<compile_context>
chip_gen: v7x
topology: tpu7x:2x2x1
jax: 0.10.0
libtpu: 0.0.40
codegen_flags: <defaults>
</compile_context>

<pallas_src>
import jax
import jax.numpy as jnp
from jax.experimental import pallas as pl
from jax.experimental.pallas import tpu as pltpu

# ---- model hyper-parameters (from the reference module) -------------------------
EMBEDDING_DIM = 128
HIDDEN_DIM = 256
VOCAB_SIZE = 100
VOCAB_PAD = 128            # lane-dense logits width (multiple of 128)
NUM_LAYERS = 2


# =================================================================================
# Generic projection kernel: (M, K) @ (K, N) + b  (bf16 operands, f32 accumulate)
# Used to hoist every x @ W_ih (encoder fwd+bwd fused along N, decoder all steps)
# and the attention q/k/v projection out of the serial recurrences.
# =================================================================================
def _proj_kernel(x_ref, w_ref, b_ref, o_ref):
    o_ref[...] = (jnp.dot(x_ref[...], w_ref[...],
                          preferred_element_type=jnp.float32) + b_ref[...])


def proj(x, w, b):
    """x: (M, K) bf16, w: (K, N) bf16, b: (1, N) f32 -> (M, N) f32."""
    M, K = x.shape
    N = w.shape[1]
    return pl.pallas_call(
        _proj_kernel,
        out_shape=jax.ShapeDtypeStruct((M, N), jnp.float32),
        grid_spec=pltpu.PrefetchScalarGridSpec(
            num_scalar_prefetch=0,
            grid=(1,),
            in_specs=[pl.BlockSpec((M, K), lambda i: (0, 0)),
                      pl.BlockSpec((K, N), lambda i: (0, 0)),
                      pl.BlockSpec((1, N), lambda i: (0, 0))],
            out_specs=pl.BlockSpec((M, N), lambda i: (0, 0))),
    )(x, w, b)


# =================================================================================
# Fused bidirectional LSTM layer: one pallas_call, grid=(T,), both directions per step.
# Input gates (x @ W_ih + b) are precomputed; only h @ W_hh remains in the recurrence.
# =================================================================================
def _bilstm_layer_kernel(xgf_ref, xgb_ref, whhf_ref, whhb_ref,
                         yf_ref, yb_ref, hT_ref, cT_ref,
                         hf_scr, cf_scr, hb_scr, cb_scr):
    t = pl.program_id(0)
    H = hf_scr.shape[-1]

    @pl.when(t == 0)
    def _():
        hf_scr[...] = jnp.zeros_like(hf_scr)
        cf_scr[...] = jnp.zeros_like(cf_scr)
        hb_scr[...] = jnp.zeros_like(hb_scr)
        cb_scr[...] = jnp.zeros_like(cb_scr)

    def lstm_step(xg, h_scr, c_scr, whh_ref):
        # gates in f32; only the recurrent matmul uses bf16 operands.
        gates = xg + jnp.dot(h_scr[...].astype(jnp.bfloat16), whh_ref[...],
                             preferred_element_type=jnp.float32)      # (B, 4H)
        i = jax.nn.sigmoid(gates[:, 0 * H:1 * H])
        f = jax.nn.sigmoid(gates[:, 1 * H:2 * H])
        g = jnp.tanh(gates[:, 2 * H:3 * H])
        o = jax.nn.sigmoid(gates[:, 3 * H:4 * H])
        c_new = f * c_scr[...] + i * g
        h_new = o * jnp.tanh(c_new)
        h_scr[...] = h_new
        c_scr[...] = c_new
        return h_new, c_new

    hf, cf = lstm_step(xgf_ref[0], hf_scr, cf_scr, whhf_ref)   # forward: time t
    hb, cb = lstm_step(xgb_ref[0], hb_scr, cb_scr, whhb_ref)   # backward: time T-1-t

    yf_ref[0] = hf
    yb_ref[0] = hb

    @pl.when(t == pl.num_programs(0) - 1)
    def _():
        hT_ref[0] = hf
        hT_ref[1] = hb
        cT_ref[0] = cf
        cT_ref[1] = cb


def bilstm_layer(xg_f, xg_b, w_hh_f, w_hh_b):
    """xg_*: (T, B, 4H) precomputed input gates (f32, original time order).
    Returns y_f (T,B,H), y_b (T,B,H), h_T (2,B,H), c_T (2,B,H)."""
    T, B, G = xg_f.shape
    H = G // 4
    fmap = lambda t: (t, 0, 0)
    rmap = lambda t: (T - 1 - t, 0, 0)
    c2 = lambda t: (0, 0)
    c3 = lambda t: (0, 0, 0)
    return pl.pallas_call(
        _bilstm_layer_kernel,
        out_shape=(jax.ShapeDtypeStruct((T, B, H), jnp.float32),
                   jax.ShapeDtypeStruct((T, B, H), jnp.float32),
                   jax.ShapeDtypeStruct((2, B, H), jnp.float32),
                   jax.ShapeDtypeStruct((2, B, H), jnp.float32)),
        grid_spec=pltpu.PrefetchScalarGridSpec(
            num_scalar_prefetch=0,
            grid=(T,),
            in_specs=[pl.BlockSpec((1, B, G), fmap),
                      pl.BlockSpec((1, B, G), rmap),
                      pl.BlockSpec((H, G), c2),
                      pl.BlockSpec((H, G), c2)],
            out_specs=(pl.BlockSpec((1, B, H), fmap),
                       pl.BlockSpec((1, B, H), rmap),
                       pl.BlockSpec((2, B, H), c3),
                       pl.BlockSpec((2, B, H), c3)),
            scratch_shapes=[pltpu.VMEM((B, H), jnp.float32) for _ in range(4)]),
        compiler_params=pltpu.CompilerParams(
            dimension_semantics=("arbitrary",)),   # sequential carry over time
    )(xg_f, xg_b, w_hh_f, w_hh_b)


# =================================================================================
# Attention context -> precomputed logit contribution (ctx @ W_ctx + fc_b), one call.
# q/k/v projections are done by proj() beforehand as a single (B*T, 2H) matmul.
# =================================================================================
def _attn_ctx_kernel(qkv_ref, wctx_ref, fcb_ref, out_ref):
    H = wctx_ref.shape[0]
    qkv = qkv_ref[...]                                  # (B, T, 3H) f32
    q = qkv[..., 0 * H:1 * H].astype(jnp.bfloat16)
    k = qkv[..., 1 * H:2 * H].astype(jnp.bfloat16)
    v = qkv[..., 2 * H:3 * H].astype(jnp.bfloat16)
    # TODO(synk): the reference defines Softmax(dim=1) but never applies it in forward();
    # matched that behaviour exactly (raw scaled scores).
    scores = jnp.einsum("btd,bsd->bts", q, k,
                        preferred_element_type=jnp.float32) / (H ** 0.5)
    ctx = jnp.einsum("bts,bsd->btd", scores.astype(jnp.bfloat16), v,
                     preferred_element_type=jnp.float32)            # (B, T, H)
    # TODO(synk): reference cats (B,1,H) decoder output with (B,T,H) context along dim=2
    # (shape-inconsistent); pool the context over encoder time to (B, H) as before.
    ctx_mean = jnp.mean(ctx, axis=1)                                # (B, H)
    out_ref[...] = (jnp.dot(ctx_mean.astype(jnp.bfloat16), wctx_ref[...],
                            preferred_element_type=jnp.float32) + fcb_ref[...])


def attn_ctx(qkv, w_ctx, fc_b):
    """qkv: (B, T, 3H) f32 -> ctx_logits (B, Vp) f32 (= ctx @ W_ctx + fc_b, lane-padded)."""
    B, T, G3 = qkv.shape
    H, Vp = w_ctx.shape
    return pl.pallas_call(
        _attn_ctx_kernel,
        out_shape=jax.ShapeDtypeStruct((B, Vp), jnp.float32),
        grid_spec=pltpu.PrefetchScalarGridSpec(
            num_scalar_prefetch=0,
            grid=(1,),
            in_specs=[pl.BlockSpec((B, T, G3), lambda i: (0, 0, 0)),
                      pl.BlockSpec((H, Vp), lambda i: (0, 0)),
                      pl.BlockSpec((1, Vp), lambda i: (0, 0))],
            out_specs=pl.BlockSpec((B, Vp), lambda i: (0, 0))),
    )(qkv, w_ctx, fc_b)


# =================================================================================
# Fused decoder: T_dec LSTM steps + fc projection in ONE pallas_call, grid=(T_dec,).
# Weights resident in VMEM; (h, c) carried in scratch; ctx contribution precomputed.
# =================================================================================
def _decoder_kernel(xg_ref, h0_ref, c0_ref, whh_ref, wh_ref, ctxl_ref,
                    logits_ref, h_scr, c_scr):
    t = pl.program_id(0)
    H = h_scr.shape[-1]

    @pl.when(t == 0)
    def _():
        h_scr[...] = h0_ref[...]
        c_scr[...] = c0_ref[...]

    gates = xg_ref[0] + jnp.dot(h_scr[...].astype(jnp.bfloat16), whh_ref[...],
                                preferred_element_type=jnp.float32)   # (B, 4H)
    i = jax.nn.sigmoid(gates[:, 0 * H:1 * H])
    f = jax.nn.sigmoid(gates[:, 1 * H:2 * H])
    g = jnp.tanh(gates[:, 2 * H:3 * H])
    o = jax.nn.sigmoid(gates[:, 3 * H:4 * H])
    c_new = f * c_scr[...] + i * g
    h_new = o * jnp.tanh(c_new)
    h_scr[...] = h_new
    c_scr[...] = c_new

    # logits = h_t @ W_h + (ctx @ W_ctx + fc_b)  (ctx part precomputed, lane-padded)
    logits_ref[0] = (jnp.dot(h_new.astype(jnp.bfloat16), wh_ref[...],
                             preferred_element_type=jnp.float32) + ctxl_ref[...])


def decoder_fused(xg, h0, c0, w_hh, w_h, ctx_logits):
    """xg: (T_dec, B, 4H) precomputed input gates.  Returns logits (T_dec, B, Vp)."""
    T, B, G = xg.shape
    H = h0.shape[-1]
    Vp = w_h.shape[1]
    tmap = lambda t: (t, 0, 0)
    c2 = lambda t: (0, 0)
    return pl.pallas_call(
        _decoder_kernel,
        out_shape=jax.ShapeDtypeStruct((T, B, Vp), jnp.float32),
        grid_spec=pltpu.PrefetchScalarGridSpec(
            num_scalar_prefetch=0,
            grid=(T,),
            in_specs=[pl.BlockSpec((1, B, G), tmap),
                      pl.BlockSpec((B, H), c2),
                      pl.BlockSpec((B, H), c2),
                      pl.BlockSpec((H, G), c2),
                      pl.BlockSpec((H, Vp), c2),
                      pl.BlockSpec((B, Vp), c2)],
            out_specs=pl.BlockSpec((1, B, Vp), tmap),
            scratch_shapes=[pltpu.VMEM((B, H), jnp.float32),
                            pltpu.VMEM((B, H), jnp.float32)]),
        compiler_params=pltpu.CompilerParams(
            dimension_semantics=("arbitrary",)),   # sequential carry over time
    )(xg, h0, c0, w_hh, w_h, ctx_logits)


# =================================================================================
# Parameters (deterministic, in-script).  Matmul weights stored in bf16.
# =================================================================================
def init_params(key):
    H, E, V, Vp, L = HIDDEN_DIM, EMBEDDING_DIM, VOCAB_SIZE, VOCAB_PAD, NUM_LAYERS
    keys = iter(jax.random.split(key, 64))
    scale = 1.0 / (H ** 0.5)

    def u(shape):
        return jax.random.uniform(next(keys), shape, jnp.float32, -scale, scale)

    params = {}
    params["enc_emb"] = (jax.random.normal(next(keys), (V, E), jnp.float32) * 0.1
                         ).astype(jnp.bfloat16)

    enc = []
    for l in range(L):
        in_dim = E if l == 0 else 2 * H
        # fwd/bwd input weights concatenated along N so x@W_ih is one batched matmul.
        # (single bias per gate set, as before; PyTorch's b_ih + b_hh would be summed.)
        w_f, w_b = u((in_dim, 4 * H)), u((in_dim, 4 * H))
        b_f, b_b = u((1, 4 * H)), u((1, 4 * H))
        enc.append(dict(
            w_ih=jnp.concatenate([w_f, w_b], axis=1).astype(jnp.bfloat16),  # (Ein, 8H)
            b=jnp.concatenate([b_f, b_b], axis=1),                           # (1, 8H) f32
            w_hh_f=u((H, 4 * H)).astype(jnp.bfloat16),
            w_hh_b=u((H, 4 * H)).astype(jnp.bfloat16)))
    params["enc_lstm"] = enc

    params["dec_emb"] = (jax.random.normal(next(keys), (V, E), jnp.float32) * 0.1
                         ).astype(jnp.bfloat16)
    params["dec_w_ih"] = u((E, 4 * H)).astype(jnp.bfloat16)
    params["dec_b"] = u((1, 4 * H))
    params["dec_w_hh"] = u((H, 4 * H)).astype(jnp.bfloat16)

    # TODO(synk): reference self_atttention uses Linear(hidden_dim, hidden_dim) and has
    # the `self.quert`/`self.query` typo plus `value = self.value` (the module object);
    # here the q/k/v projections take the 2*H bidirectional encoder features -> H.
    wq, wk, wv = u((2 * H, H)), u((2 * H, H)), u((2 * H, H))
    bq, bk, bv = u((1, H)), u((1, H)), u((1, H))
    params["attn_wqkv"] = jnp.concatenate([wq, wk, wv], axis=1).astype(jnp.bfloat16)
    params["attn_bqkv"] = jnp.concatenate([bq, bk, bv], axis=1)

    # fc split: combined = [out, ctx] @ fc_w + fc_b  ==  out @ W_h + ctx @ W_ctx + fc_b.
    # Lane-padded V=100 -> 128 (padded columns are all-zero; sliced off outside).
    fc_w = u((2 * H, V))
    fc_b = u((1, V))
    pad = ((0, 0), (0, Vp - V))
    params["fc_w_h"] = jnp.pad(fc_w[:H], pad).astype(jnp.bfloat16)     # (H, Vp)
    params["fc_w_ctx"] = jnp.pad(fc_w[H:], pad).astype(jnp.bfloat16)   # (H, Vp)
    params["fc_b"] = jnp.pad(fc_b, pad)                                 # (1, Vp) f32
    return params


# =================================================================================
# Forward pass (gathers / reshapes in plain JAX glue, hot paths in Pallas)
# =================================================================================
def seq2seq_forward(params, article, summary):
    H, E, L, Vp = HIDDEN_DIM, EMBEDDING_DIM, NUM_LAYERS, VOCAB_PAD
    B, T_enc = article.shape
    T_dec = summary.shape[1]

    # ---------------- encoder: embedding + 2-layer bidirectional LSTM ------------
    emb = params["enc_emb"][article]                       # (B, T, E) bf16 gather glue
    x = jnp.transpose(emb, (1, 0, 2))                      # (T, B, E) time-major bf16

    hT = cT = None
    for l in range(L):
        layer = params["enc_lstm"][l]
        Ein = x.shape[-1]
        # hoisted input projection: both directions in one (T*B, Ein) @ (Ein, 8H) matmul
        xg = proj(x.reshape(T_enc * B, Ein), layer["w_ih"], layer["b"])
        xg = xg.reshape(T_enc, B, 8 * H)
        y_f, y_b, hT, cT = bilstm_layer(xg[..., :4 * H], xg[..., 4 * H:],
                                        layer["w_hh_f"], layer["w_hh_b"])
        x = jnp.concatenate([y_f, y_b], axis=-1).astype(jnp.bfloat16)   # (T, B, 2H)

    encoder_outputs = jnp.transpose(x, (1, 0, 2))          # (B, T, 2H) bf16

    # TODO(synk): reference feeds the (L*2, B, H) encoder state into a single-layer
    # unidirectional decoder LSTM (shape error in PyTorch); use the final layer's
    # forward-direction state instead.
    h0_dec = hT[0]                                         # (B, H) f32
    c0_dec = cT[0]

    # ---------------- attention context (constant across decoder steps) ----------
    qkv = proj(encoder_outputs.reshape(B * T_enc, 2 * H),
               params["attn_wqkv"], params["attn_bqkv"])   # (B*T, 3H) f32
    qkv = qkv.reshape(B, T_enc, 3 * H)
    ctx_logits = attn_ctx(qkv, params["fc_w_ctx"], params["fc_b"])      # (B, Vp)

    # ---------------- decoder: all steps fused into one pallas_call --------------
    dec_emb = params["dec_emb"][summary]                   # (B, T_dec, E) bf16 gather
    dec_x = jnp.transpose(dec_emb, (1, 0, 2)).reshape(T_dec * B, E)
    dec_xg = proj(dec_x, params["dec_w_ih"], params["dec_b"])           # (T_dec*B, 4H)
    dec_xg = dec_xg.reshape(T_dec, B, 4 * H)

    logits = decoder_fused(dec_xg, h0_dec, c0_dec, params["dec_w_hh"],
                           params["fc_w_h"], ctx_logits)   # (T_dec, B, Vp)

    preds = jnp.transpose(logits[..., :VOCAB_SIZE], (1, 0, 2))          # (B, T_dec, V)
    # torch.stack(decoder_outputs, dim=1) of (B,1,V) tensors -> (B, T_dec, 1, V)
    return preds[:, :, None, :]


# =================================================================================
if __name__ == "__main__":
    key = jax.random.PRNGKey(0)
    pkey, akey, skey = jax.random.split(key, 3)

    params = init_params(pkey)

    B, T_ENC, T_DEC = 2, 8, 4
    article = jax.random.randint(akey, (B, T_ENC), 0, VOCAB_SIZE, dtype=jnp.int32)
    summary = jax.random.randint(skey, (B, T_DEC), 0, VOCAB_SIZE, dtype=jnp.int32)

    fwd = jax.jit(seq2seq_forward)
    out = fwd(params, article, summary)
    out = jax.block_until_ready(out)

    assert out.shape == (B, T_DEC, 1, VOCAB_SIZE), out.shape
    assert bool(jnp.all(jnp.isfinite(out)))
    print("KERNEL_OK")
</pallas_src>

<mosaic_0001>
module attributes {stable_mosaic.version = 11 : i64} {
  func.func @_proj_kernel(%arg0: i32, %arg1: memref<16x128xbf16, #tpu.memory_space<vmem>>, %arg2: memref<128x2048xbf16, #tpu.memory_space<vmem>>, %arg3: memref<1x2048xf32, #tpu.memory_space<vmem>>, %arg4: memref<16x2048xf32, #tpu.memory_space<vmem>>) attributes {dimension_semantics = [#tpu.dimension_semantics<arbitrary>], iteration_bounds = array<i64: 1>, scalar_prefetch = 0 : i64, scratch_operands = 0 : i64, tpu.core_type = #tpu.core_type<tc>, window_params = [{pipeline_mode = #tpu.pipeline_mode<synchronous>, transform_indices = @transform_0, window_bounds = array<i64: 16, 128>}, {pipeline_mode = #tpu.pipeline_mode<synchronous>, transform_indices = @transform_1, window_bounds = array<i64: 128, 2048>}, {pipeline_mode = #tpu.pipeline_mode<synchronous>, transform_indices = @transform_2, window_bounds = array<i64: 1, 2048>}, {pipeline_mode = #tpu.pipeline_mode<synchronous>, transform_indices = @transform_3, window_bounds = array<i64: 16, 2048>}]} {
    %c0 = arith.constant 0 : index
    %c0_0 = arith.constant 0 : index
    %0 = vector.load %arg1[%c0, %c0_0] : memref<16x128xbf16, #tpu.memory_space<vmem>>, vector<16x128xbf16>
    %c0_1 = arith.constant 0 : index
    %c0_2 = arith.constant 0 : index
    %1 = vector.load %arg2[%c0_1, %c0_2] : memref<128x2048xbf16, #tpu.memory_space<vmem>>, vector<128x2048xbf16>
    %cst = arith.constant dense<0.000000e+00> : vector<16x2048xf32>
    %2 = tpu.matmul %0, %1, %cst {dimension_numbers = #tpu.dot_dimension_numbers<[1], [0], [0], [1], [0, 0, 1, 1], [], []>} : vector<16x128xbf16>, vector<128x2048xbf16>, vector<16x2048xf32> -> vector<16x2048xf32>
    %c0_3 = arith.constant 0 : index
    %c0_4 = arith.constant 0 : index
    %3 = vector.load %arg3[%c0_3, %c0_4] : memref<1x2048xf32, #tpu.memory_space<vmem>>, vector<1x2048xf32>
    %4 = vector.broadcast %3 : vector<1x2048xf32> to vector<16x2048xf32>
    %5 = arith.addf %2, %4 : vector<16x2048xf32>
    %c0_5 = arith.constant 0 : index
    %c0_6 = arith.constant 0 : index
    %6 = vector.load %arg4[%c0_5, %c0_6] : memref<16x2048xf32, #tpu.memory_space<vmem>>, vector<16x2048xf32>
    tpu.vector_store %arg4[%c0_5, %c0_6], %5 {strides = array<i32>} : memref<16x2048xf32, #tpu.memory_space<vmem>>, vector<16x2048xf32>,
    return
  }
  func.func @transform_0(%arg0: i32) -> (i32, i32) {
    %c0_i32 = arith.constant 0 : i32
    %c0_i32_0 = arith.constant 0 : i32
    %c0_i32_1 = arith.constant 0 : i32
    return %c0_i32, %c0_i32_0 : i32, i32
  }
  func.func @transform_1(%arg0: i32) -> (i32, i32) {
    %c0_i32 = arith.constant 0 : i32
    %c0_i32_0 = arith.constant 0 : i32
    %c0_i32_1 = arith.constant 0 : i32
    return %c0_i32, %c0_i32_0 : i32, i32
  }
  func.func @transform_2(%arg0: i32) -> (i32, i32) {
    %c0_i32 = arith.constant 0 : i32
    %c0_i32_0 = arith.constant 0 : i32
    %c0_i32_1 = arith.constant 0 : i32
    return %c0_i32, %c0_i32_0 : i32, i32
  }
  func.func @transform_3(%arg0: i32) -> (i32, i32) {
    %c0_i32 = arith.constant 0 : i32
    %c0_i32_0 = arith.constant 0 : i32
    %c0_i32_1 = arith.constant 0 : i32
    return %c0_i32, %c0_i32_0 : i32, i32
  }
}

module attributes {stable_mosaic.version = 11 : i64} {
  func.func @_bilstm_layer_kernel(%arg0: i32, %arg1: memref<1x2x1024xf32, #tpu.memory_space<vmem>>, %arg2: memref<1x2x1024xf32, #tpu.memory_space<vmem>>, %arg3: memref<256x1024xbf16, #tpu.memory_space<vmem>>, %arg4: memref<256x1024xbf16, #tpu.memory_space<vmem>>, %arg5: memref<1x2x256xf32, #tpu.memory_space<vmem>>, %arg6: memref<1x2x256xf32, #tpu.memory_space<vmem>>, %arg7: memref<2x2x256xf32, #tpu.memory_space<vmem>>, %arg8: memref<2x2x256xf32, #tpu.memory_space<vmem>>, %arg9: memref<2x256xf32, #tpu.memory_space<vmem>>, %arg10: memref<2x256xf32, #tpu.memory_space<vmem>>, %arg11: memref<2x256xf32, #tpu.memory_space<vmem>>, %arg12: memref<2x256xf32, #tpu.memory_space<vmem>>) attributes {dimension_semantics = [#tpu.dimension_semantics<arbitrary>], iteration_bounds = array<i64: 8>, scalar_prefetch = 0 : i64, scratch_operands = 4 : i64, tpu.core_type = #tpu.core_type<tc>, window_params = [{transform_indices = @transform_0, window_bounds = array<i64: 1, 2, 1024>}, {transform_indices = @transform_1, window_bounds = array<i64: 1, 2, 1024>}, {pipeline_mode = #tpu.pipeline_mode<synchronous>, transform_indices = @transform_2, window_bounds = array<i64: 256, 1024>}, {pipeline_mode = #tpu.pipeline_mode<synchronous>, transform_indices = @transform_3, window_bounds = array<i64: 256, 1024>}, {transform_indices = @transform_4, window_bounds = array<i64: 1, 2, 256>}, {transform_indices = @transform_5, window_bounds = array<i64: 1, 2, 256>}, {pipeline_mode = #tpu.pipeline_mode<synchronous>, transform_indices = @transform_6, window_bounds = array<i64: 2, 2, 256>}, {pipeline_mode = #tpu.pipeline_mode<synchronous>, transform_indices = @transform_7, window_bounds = array<i64: 2, 2, 256>}]} {
    %c0_i32 = arith.constant 0 : i32
    %0 = arith.cmpi eq, %arg0, %c0_i32 : i32
    %1 = arith.extui %0 : i1 to i32
    %c0_i32_0 = arith.constant 0 : i32
    %2 = arith.cmpi ne, %1, %c0_i32_0 : i32
    scf.if %2 {
      %cst_40 = arith.constant 0.000000e+00 : f32
      %82 = vector.broadcast %cst_40 : f32 to vector<2x256xf32>
      %c0_41 = arith.constant 0 : index
      %c0_42 = arith.constant 0 : index
      %83 = vector.load %arg9[%c0_41, %c0_42] : memref<2x256xf32, #tpu.memory_space<vmem>>, vector<2x256xf32>
      tpu.vector_store %arg9[%c0_41, %c0_42], %82 {strides = array<i32>} : memref<2x256xf32, #tpu.memory_space<vmem>>, vector<2x256xf32>,
      %cst_43 = arith.constant 0.000000e+00 : f32
      %84 = vector.broadcast %cst_43 : f32 to vector<2x256xf32>
      %c0_44 = arith.constant 0 : index
      %c0_45 = arith.constant 0 : index
      %85 = vector.load %arg10[%c0_44, %c0_45] : memref<2x256xf32, #tpu.memory_space<vmem>>, vector<2x256xf32>
      tpu.vector_store %arg10[%c0_44, %c0_45], %84 {strides = array<i32>} : memref<2x256xf32, #tpu.memory_space<vmem>>, vector<2x256xf32>,
      %cst_46 = arith.constant 0.000000e+00 : f32
      %86 = vector.broadcast %cst_46 : f32 to vector<2x256xf32>
      %c0_47 = arith.constant 0 : index
      %c0_48 = arith.constant 0 : index
      %87 = vector.load %arg11[%c0_47, %c0_48] : memref<2x256xf32, #tpu.memory_space<vmem>>, vector<2x256xf32>
      tpu.vector_store %arg11[%c0_47, %c0_48], %86 {strides = array<i32>} : memref<2x256xf32, #tpu.memory_space<vmem>>, vector<2x256xf32>,
      %cst_49 = arith.constant 0.000000e+00 : f32
      %88 = vector.broadcast %cst_49 : f32 to vector<2x256xf32>
      %c0_50 = arith.constant 0 : index
      %c0_51 = arith.constant 0 : index
      %89 = vector.load %arg12[%c0_50, %c0_51] : memref<2x256xf32, #tpu.memory_space<vmem>>, vector<2x256xf32>
      tpu.vector_store %arg12[%c0_50, %c0_51], %88 {strides = array<i32>} : memref<2x256xf32, #tpu.memory_space<vmem>>, vector<2x256xf32>,
    } else {
    }
    %c0 = arith.constant 0 : index
    %c0_1 = arith.constant 0 : index
    %c0_2 = arith.constant 0 : index
    %3 = vector.load %arg1[%c0, %c0_1, %c0_2] : memref<1x2x1024xf32, #tpu.memory_space<vmem>>, vector<1x2x1024xf32>
    %4 = vector.shape_cast %3 : vector<1x2x1024xf32> to vector<2x1024xf32>
    %c0_3 = arith.constant 0 : index
    %c0_4 = arith.constant 0 : index
    %5 = vector.load %arg9[%c0_3, %c0_4] : memref<2x256xf32, #tpu.memory_space<vmem>>, vector<2x256xf32>
    %6 = arith.truncf %5 : vector<2x256xf32> to vector<2x256xbf16>
    %c0_5 = arith.constant 0 : index
    %c0_6 = arith.constant 0 : index
    %7 = vector.load %arg3[%c0_5, %c0_6] : memref<256x1024xbf16, #tpu.memory_space<vmem>>, vector<256x1024xbf16>
    %cst = arith.constant dense<0.000000e+00> : vector<2x1024xf32>
    %8 = tpu.matmul %6, %7, %cst {dimension_numbers = #tpu.dot_dimension_numbers<[1], [0], [0], [1], [0, 0, 1, 1], [], []>} : vector<2x256xbf16>, vector<256x1024xbf16>, vector<2x1024xf32> -> vector<2x1024xf32>
    %9 = arith.addf %4, %8 : vector<2x1024xf32>
    %10 = vector.extract_strided_slice %9 {offsets = [0, 0], sizes = [2, 256], strides = [1, 1]} : vector<2x1024xf32> to vector<2x256xf32>
    %11 = arith.negf %10 : vector<2x256xf32>
    %12 = math.exp %11 : vector<2x256xf32>
    %cst_7 = arith.constant 1.000000e+00 : f32
    %13 = vector.broadcast %cst_7 : f32 to vector<2x256xf32>
    %14 = arith.addf %13, %12 : vector<2x256xf32>
    %15 = arith.divf %13, %14 : vector<2x256xf32>
    %16 = vector.extract_strided_slice %9 {offsets = [0, 256], sizes = [2, 256], strides = [1, 1]} : vector<2x1024xf32> to vector<2x256xf32>
    %17 = arith.negf %16 : vector<2x256xf32>
    %18 = math.exp %17 : vector<2x256xf32>
    %cst_8 = arith.constant 1.000000e+00 : f32
    %19 = vector.broadcast %cst_8 : f32 to vector<2x256xf32>
    %20 = arith.addf %19, %18 : vector<2x256xf32>
    %21 = arith.divf %19, %20 : vector<2x256xf32>
    %22 = vector.extract_strided_slice %9 {offsets = [0, 512], sizes = [2, 256], strides = [1, 1]} : vector<2x1024xf32> to vector<2x256xf32>
    %23 = math.tanh %22 : vector<2x256xf32>
    %24 = vector.extract_strided_slice %9 {offsets = [0, 768], sizes = [2, 256], strides = [1, 1]} : vector<2x1024xf32> to vector<2x256xf32>
    %25 = arith.negf %24 : vector<2x256xf32>
    %26 = math.exp %25 : vector<2x256xf32>
    %cst_9 = arith.constant 1.000000e+00 : f32
    %27 = vector.broadcast %cst_9 : f32 to vector<2x256xf32>
    %28 = arith.addf %27, %26 : vector<2x256xf32>
    %29 = arith.divf %27, %28 : vector<2x256xf32>
    %c0_10 = arith.constant 0 : index
    %c0_11 = arith.constant 0 : index
    %30 = vector.load %arg10[%c0_10, %c0_11] : memref<2x256xf32, #tpu.memory_space<vmem>>, vector<2x256xf32>
    %31 = arith.mulf %21, %30 : vector<2x256xf32>
    %32 = arith.mulf %15, %23 : vector<2x256xf32>
    %33 = arith.addf %31, %32 : vector<2x256xf32>
    %34 = math.tanh %33 : vector<2x256xf32>
    %35 = arith.mulf %29, %34 : vector<2x256xf32>
    %c0_12 = arith.constant 0 : index
    %c0_13 = arith.constant 0 : index
    %36 = vector.load %arg9[%c0_12, %c0_13] : memref<2x256xf32, #tpu.memory_space<vmem>>, vector<2x256xf32>
    tpu.vector_store %arg9[%c0_12, %c0_13], %35 {strides = array<i32>} : memref<2x256xf32, #tpu.memory_space<vmem>>, vector<2x256xf32>,
    %c0_14 = arith.constant 0 : index
    %c0_15 = arith.constant 0 : index
    %37 = vector.load %arg10[%c0_14, %c0_15] : memref<2x256xf32, #tpu.memory_space<vmem>>, vector<2x256xf32>
    tpu.vector_store %arg10[%c0_14, %c0_15], %33 {strides = array<i32>} : memref<2x256xf32, #tpu.memory_space<vmem>>, vector<2x256xf32>,
    %c0_16 = arith.constant 0 : index
    %c0_17 = arith.constant 0 : index
    %c0_18 = arith.constant 0 : index
    %38 = vector.load %arg2[%c0_16, %c0_17, %c0_18] : memref<1x2x1024xf32, #tpu.memory_space<vmem>>, vector<1x2x1024xf32>
    %39 = vector.shape_cast %38 : vector<1x2x1024xf32> to vector<2x1024xf32>
    %c0_19 = arith.constant 0 : index
    %c0_20 = arith.constant 0 : index
    %40 = vector.load %arg11[%c0_19, %c0_20] : memref<2x256xf32, #tpu.memory_space<vmem>>, vector<2x256xf32>
    %41 = arith.truncf %40 : vector<2x256xf32> to vector<2x256xbf16>
    %c0_21 = arith.constant 0 : index
    %c0_22 = arith.constant 0 : index
    %42 = vector.load %arg4[%c0_21, %c0_22] : memref<256x1024xbf16, #tpu.memory_space<vmem>>, vector<256x1024xbf16>
    %cst_23 = arith.constant dense<0.000000e+00> : vector<2x1024xf32>
    %43 = tpu.matmul %41, %42, %cst_23 {dimension_numbers = #tpu.dot_dimension_numbers<[1], [0], [0], [1], [0, 0, 1, 1], [], []>} : vector<2x256xbf16>, vector<256x1024xbf16>, vector<2x1024xf32> -> vector<2x1024xf32>
    %44 = arith.addf %39, %43 : vector<2x1024xf32>
    %45 = vector.extract_strided_slice %44 {offsets = [0, 0], sizes = [2, 256], strides = [1, 1]} : vector<2x1024xf32> to vector<2x256xf32>
    %46 = arith.negf %45 : vector<2x256xf32>
    %47 = math.exp %46 : vector<2x256xf32>
    %cst_24 = arith.constant 1.000000e+00 : f32
    %48 = vector.broadcast %cst_24 : f32 to vector<2x256xf32>
    %49 = arith.addf %48, %47 : vector<2x256xf32>
    %50 = arith.divf %48, %49 : vector<2x256xf32>
    %51 = vector.extract_strided_slice %44 {offsets = [0, 256], sizes = [2, 256], strides = [1, 1]} : vector<2x1024xf32> to vector<2x256xf32>
    %52 = arith.negf %51 : vector<2x256xf32>
    %53 = math.exp %52 : vector<2x256xf32>
    %cst_25 = arith.constant 1.000000e+00 : f32
    %54 = vector.broadcast %cst_25 : f32 to vector<2x256xf32>
    %55 = arith.addf %54, %53 : vector<2x256xf32>
    %56 = arith.divf %54, %55 : vector<2x256xf32>
    %57 = vector.extract_strided_slice %44 {offsets = [0, 512], sizes = [2, 256], strides = [1, 1]} : vector<2x1024xf32> to vector<2x256xf32>
    %58 = math.tanh %57 : vector<2x256xf32>
    %59 = vector.extract_strided_slice %44 {offsets = [0, 768], sizes = [2, 256], strides = [1, 1]} : vector<2x1024xf32> to vector<2x256xf32>
    %60 = arith.negf %59 : vector<2x256xf32>
    %61 = math.exp %60 : vector<2x256xf32>
    %cst_26 = arith.constant 1.000000e+00 : f32
    %62 = vector.broadcast %cst_26 : f32 to vector<2x256xf32>
    %63 = arith.addf %62, %61 : vector<2x256xf32>
    %64 = arith.divf %62, %63 : vector<2x256xf32>
    %c0_27 = arith.constant 0 : index
    %c0_28 = arith.constant 0 : index
    %65 = vector.load %arg12[%c0_27, %c0_28] : memref<2x256xf32, #tpu.memory_space<vmem>>, vector<2x256xf32>
    %66 = arith.mulf %56, %65 : vector<2x256xf32>
    %67 = arith.mulf %50, %58 : vector<2x256xf32>
    %68 = arith.addf %66, %67 : vector<2x256xf32>
    %69 = math.tanh %68 : vector<2x256xf32>
    %70 = arith.mulf %64, %69 : vector<2x256xf32>
    %c0_29 = arith.constant 0 : index
    %c0_30 = arith.constant 0 : index
    %71 = vector.load %arg11[%c0_29, %c0_30] : memref<2x256xf32, #tpu.memory_space<vmem>>, vector<2x256xf32>
    tpu.vector_store %arg11[%c0_29, %c0_30], %70 {strides = array<i32>} : memref<2x256xf32, #tpu.memory_space<vmem>>, vector<2x256xf32>,
    %c0_31 = arith.constant 0 : index
    %c0_32 = arith.constant 0 : index
    %72 = vector.load %arg12[%c0_31, %c0_32] : memref<2x256xf32, #tpu.memory_space<vmem>>, vector<2x256xf32>
    tpu.vector_store %arg12[%c0_31, %c0_32], %68 {strides = array<i32>} : memref<2x256xf32, #tpu.memory_space<vmem>>, vector<2x256xf32>,
    %c0_33 = arith.constant 0 : index
    %c0_34 = arith.constant 0 : index
    %c0_35 = arith.constant 0 : index
    %73 = vector.load %arg5[%c0_33, %c0_34, %c0_35] : memref<1x2x256xf32, #tpu.memory_space<vmem>>, vector<1x2x256xf32>
    %74 = vector.shape_cast %73 : vector<1x2x256xf32> to vector<2x256xf32>
    %75 = vector.shape_cast %35 : vector<2x256xf32> to vector<1x2x256xf32>
    tpu.vector_store %arg5[%c0_33, %c0_34, %c0_35], %75 {strides = array<i32>} : memref<1x2x256xf32, #tpu.memory_space<vmem>>, vector<1x2x256xf32>,
    %c0_36 = arith.constant 0 : index
    %c0_37 = arith.constant 0 : index
    %c0_38 = arith.constant 0 : index
    %76 = vector.load %arg6[%c0_36, %c0_37, %c0_38] : memref<1x2x256xf32, #tpu.memory_space<vmem>>, vector<1x2x256xf32>
    %77 = vector.shape_cast %76 : vector<1x2x256xf32> to vector<2x256xf32>
    %78 = vector.shape_cast %70 : vector<2x256xf32> to vector<1x2x256xf32>
    tpu.vector_store %arg6[%c0_36, %c0_37, %c0_38], %78 {strides = array<i32>} : memref<1x2x256xf32, #tpu.memory_space<vmem>>, vector<1x2x256xf32>,
    %c7_i32 = arith.constant 7 : i32
    %79 = arith.cmpi eq, %arg0, %c7_i32 : i32
    %80 = arith.extui %79 : i1 to i32
    %c0_i32_39 = arith.constant 0 : i32
    %81 = arith.cmpi ne, %80, %c0_i32_39 : i32
    scf.if %81 {
      %c0_40 = arith.constant 0 : index
      %c0_41 = arith.constant 0 : index
      %c0_42 = arith.constant 0 : index
      %82 = vector.load %arg7[%c0_40, %c0_41, %c0_42] : memref<2x2x256xf32, #tpu.memory_space<vmem>>, vector<1x2x256xf32>
      %83 = vector.shape_cast %82 : vector<1x2x256xf32> to vector<2x256xf32>
      %84 = vector.shape_cast %35 : vector<2x256xf32> to vector<1x2x256xf32>
      tpu.vector_store %arg7[%c0_40, %c0_41, %c0_42], %84 {strides = array<i32>} : memref<2x2x256xf32, #tpu.memory_space<vmem>>, vector<1x2x256xf32>,
      %c1 = arith.constant 1 : index
      %c0_43 = arith.constant 0 : index
      %c0_44 = arith.constant 0 : index
      %85 = vector.load %arg7[%c1, %c0_43, %c0_44] : memref<2x2x256xf32, #tpu.memory_space<vmem>>, vector<1x2x256xf32>
      %86 = vector.shape_cast %85 : vector<1x2x256xf32> to vector<2x256xf32>
      %87 = vector.shape_cast %70 : vector<2x256xf32> to vector<1x2x256xf32>
      tpu.vector_store %arg7[%c1, %c0_43, %c0_44], %87 {strides = array<i32>} : memref<2x2x256xf32, #tpu.memory_space<vmem>>, vector<1x2x256xf32>,
      %c0_45 = arith.constant 0 : index
      %c0_46 = arith.constant 0 : index
      %c0_47 = arith.constant 0 : index
      %88 = vector.load %arg8[%c0_45, %c0_46, %c0_47] : memref<2x2x256xf32, #tpu.memory_space<vmem>>, vector<1x2x256xf32>
      %89 = vector.shape_cast %88 : vector<1x2x256xf32> to vector<2x256xf32>
      %90 = vector.shape_cast %33 : vector<2x256xf32> to vector<1x2x256xf32>
      tpu.vector_store %arg8[%c0_45, %c0_46, %c0_47], %90 {strides = array<i32>} : memref<2x2x256xf32, #tpu.memory_space<vmem>>, vector<1x2x256xf32>,
      %c1_48 = arith.constant 1 : index
      %c0_49 = arith.constant 0 : index
      %c0_50 = arith.constant 0 : index
      %91 = vector.load %arg8[%c1_48, %c0_49, %c0_50] : memref<2x2x256xf32, #tpu.memory_space<vmem>>, vector<1x2x256xf32>
      %92 = vector.shape_cast %91 : vector<1x2x256xf32> to vector<2x256xf32>
      %93 = vector.shape_cast %68 : vector<2x256xf32> to vector<1x2x256xf32>
      tpu.vector_store %arg8[%c1_48, %c0_49, %c0_50], %93 {strides = array<i32>} : memref<2x2x256xf32, #tpu.memory_space<vmem>>, vector<1x2x256xf32>,
    } else {
    }
    return
  }
  func.func @transform_0(%arg0: i32) -> (i32, i32, i32) {
    %c0_i32 = arith.constant 0 : i32
    %c0_i32_0 = arith.constant 0 : i32
    %c0_i32_1 = arith.constant 0 : i32
    return %arg0, %c0_i32, %c0_i32_0 : i32, i32, i32
  }
  func.func @transform_1(%arg0: i32) -> (i32, i32, i32) {
    %c7_i32 = arith.constant 7 : i32
    %0 = arith.subi %c7_i32, %arg0 : i32
    %c0_i32 = arith.constant 0 : i32
    %c0_i32_0 = arith.constant 0 : i32
    %c0_i32_1 = arith.constant 0 : i32
    return %0, %c0_i32, %c0_i32_0 : i32, i32, i32
  }
  func.func @transform_2(%arg0: i32) -> (i32, i32) {
    %c0_i32 = arith.constant 0 : i32
    %c0_i32_0 = arith.constant 0 : i32
    %c0_i32_1 = arith.constant 0 : i32
    return %c0_i32, %c0_i32_0 : i32, i32
  }
  func.func @transform_3(%arg0: i32) -> (i32, i32) {
    %c0_i32 = arith.constant 0 : i32
    %c0_i32_0 = arith.constant 0 : i32
    %c0_i32_1 = arith.constant 0 : i32
    return %c0_i32, %c0_i32_0 : i32, i32
  }
  func.func @transform_4(%arg0: i32) -> (i32, i32, i32) {
    %c0_i32 = arith.constant 0 : i32
    %c0_i32_0 = arith.constant 0 : i32
    %c0_i32_1 = arith.constant 0 : i32
    return %arg0, %c0_i32, %c0_i32_0 : i32, i32, i32
  }
  func.func @transform_5(%arg0: i32) -> (i32, i32, i32) {
    %c7_i32 = arith.constant 7 : i32
    %0 = arith.subi %c7_i32, %arg0 : i32
    %c0_i32 = arith.constant 0 : i32
    %c0_i32_0 = arith.constant 0 : i32
    %c0_i32_1 = arith.constant 0 : i32
    return %0, %c0_i32, %c0_i32_0 : i32, i32, i32
  }
  func.func @transform_6(%arg0: i32) -> (i32, i32, i32) {
    %c0_i32 = arith.constant 0 : i32
    %c0_i32_0 = arith.constant 0 : i32
    %c0_i32_1 = arith.constant 0 : i32
    %c0_i32_2 = arith.constant 0 : i32
    return %c0_i32, %c0_i32_0, %c0_i32_1 : i32, i32, i32
  }
  func.func @transform_7(%arg0: i32) -> (i32, i32, i32) {
    %c0_i32 = arith.constant 0 : i32
    %c0_i32_0 = arith.constant 0 : i32
    %c0_i32_1 = arith.constant 0 : i32
    %c0_i32_2 = arith.constant 0 : i32
    return %c0_i32, %c0_i32_0, %c0_i32_1 : i32, i32, i32
  }
}

module attributes {stable_mosaic.version = 11 : i64} {
  func.func @_proj_kernel(%arg0: i32, %arg1: memref<16x512xbf16, #tpu.memory_space<vmem>>, %arg2: memref<512x2048xbf16, #tpu.memory_space<vmem>>, %arg3: memref<1x2048xf32, #tpu.memory_space<vmem>>, %arg4: memref<16x2048xf32, #tpu.memory_space<vmem>>) attributes {dimension_semantics = [#tpu.dimension_semantics<arbitrary>], iteration_bounds = array<i64: 1>, scalar_prefetch = 0 : i64, scratch_operands = 0 : i64, tpu.core_type = #tpu.core_type<tc>, window_params = [{pipeline_mode = #tpu.pipeline_mode<synchronous>, transform_indices = @transform_0, window_bounds = array<i64: 16, 512>}, {pipeline_mode = #tpu.pipeline_mode<synchronous>, transform_indices = @transform_1, window_bounds = array<i64: 512, 2048>}, {pipeline_mode = #tpu.pipeline_mode<synchronous>, transform_indices = @transform_2, window_bounds = array<i64: 1, 2048>}, {pipeline_mode = #tpu.pipeline_mode<synchronous>, transform_indices = @transform_3, window_bounds = array<i64: 16, 2048>}]} {
    %c0 = arith.constant 0 : index
    %c0_0 = arith.constant 0 : index
    %0 = vector.load %arg1[%c0, %c0_0] : memref<16x512xbf16, #tpu.memory_space<vmem>>, vector<16x512xbf16>
    %c0_1 = arith.constant 0 : index
    %c0_2 = arith.constant 0 : index
    %1 = vector.load %arg2[%c0_1, %c0_2] : memref<512x2048xbf16, #tpu.memory_space<vmem>>, vector<512x2048xbf16>
    %cst = arith.constant dense<0.000000e+00> : vector<16x2048xf32>
    %2 = tpu.matmul %0, %1, %cst {dimension_numbers = #tpu.dot_dimension_numbers<[1], [0], [0], [1], [0, 0, 1, 1], [], []>} : vector<16x512xbf16>, vector<512x2048xbf16>, vector<16x2048xf32> -> vector<16x2048xf32>
    %c0_3 = arith.constant 0 : index
    %c0_4 = arith.constant 0 : index
    %3 = vector.load %arg3[%c0_3, %c0_4] : memref<1x2048xf32, #tpu.memory_space<vmem>>, vector<1x2048xf32>
    %4 = vector.broadcast %3 : vector<1x2048xf32> to vector<16x2048xf32>
    %5 = arith.addf %2, %4 : vector<16x2048xf32>
    %c0_5 = arith.constant 0 : index
    %c0_6 = arith.constant 0 : index
    %6 = vector.load %arg4[%c0_5, %c0_6] : memref<16x2048xf32, #tpu.memory_space<vmem>>, vector<16x2048xf32>
    tpu.vector_store %arg4[%c0_5, %c0_6], %5 {strides = array<i32>} : memref<16x2048xf32, #tpu.memory_space<vmem>>, vector<16x2048xf32>,
    return
  }
  func.func @transform_0(%arg0: i32) -> (i32, i32) {
    %c0_i32 = arith.constant 0 : i32
    %c0_i32_0 = arith.constant 0 : i32
    %c0_i32_1 = arith.constant 0 : i32
    return %c0_i32, %c0_i32_0 : i32, i32
  }
  func.func @transform_1(%arg0: i32) -> (i32, i32) {
    %c0_i32 = arith.constant 0 : i32
    %c0_i32_0 = arith.constant 0 : i32
    %c0_i32_1 = arith.constant 0 : i32
    return %c0_i32, %c0_i32_0 : i32, i32
  }
  func.func @transform_2(%arg0: i32) -> (i32, i32) {
    %c0_i32 = arith.constant 0 : i32
    %c0_i32_0 = arith.constant 0 : i32
    %c0_i32_1 = arith.constant 0 : i32
    return %c0_i32, %c0_i32_0 : i32, i32
  }
  func.func @transform_3(%arg0: i32) -> (i32, i32) {
    %c0_i32 = arith.constant 0 : i32
    %c0_i32_0 = arith.constant 0 : i32
    %c0_i32_1 = arith.constant 0 : i32
    return %c0_i32, %c0_i32_0 : i32, i32
  }
}

module attributes {stable_mosaic.version = 11 : i64} {
  func.func @_bilstm_layer_kernel(%arg0: i32, %arg1: memref<1x2x1024xf32, #tpu.memory_space<vmem>>, %arg2: memref<1x2x1024xf32, #tpu.memory_space<vmem>>, %arg3: memref<256x1024xbf16, #tpu.memory_space<vmem>>, %arg4: memref<256x1024xbf16, #tpu.memory_space<vmem>>, %arg5: memref<1x2x256xf32, #tpu.memory_space<vmem>>, %arg6: memref<1x2x256xf32, #tpu.memory_space<vmem>>, %arg7: memref<2x2x256xf32, #tpu.memory_space<vmem>>, %arg8: memref<2x2x256xf32, #tpu.memory_space<vmem>>, %arg9: memref<2x256xf32, #tpu.memory_space<vmem>>, %arg10: memref<2x256xf32, #tpu.memory_space<vmem>>, %arg11: memref<2x256xf32, #tpu.memory_space<vmem>>, %arg12: memref<2x256xf32, #tpu.memory_space<vmem>>) attributes {dimension_semantics = [#tpu.dimension_semantics<arbitrary>], iteration_bounds = array<i64: 8>, scalar_prefetch = 0 : i64, scratch_operands = 4 : i64, tpu.core_type = #tpu.core_type<tc>, window_params = [{transform_indices = @transform_0, window_bounds = array<i64: 1, 2, 1024>}, {transform_indices = @transform_1, window_bounds = array<i64: 1, 2, 1024>}, {pipeline_mode = #tpu.pipeline_mode<synchronous>, transform_indices = @transform_2, window_bounds = array<i64: 256, 1024>}, {pipeline_mode = #tpu.pipeline_mode<synchronous>, transform_indices = @transform_3, window_bounds = array<i64: 256, 1024>}, {transform_indices = @transform_4, window_bounds = array<i64: 1, 2, 256>}, {transform_indices = @transform_5, window_bounds = array<i64: 1, 2, 256>}, {pipeline_mode = #tpu.pipeline_mode<synchronous>, transform_indices = @transform_6, window_bounds = array<i64: 2, 2, 256>}, {pipeline_mode = #tpu.pipeline_mode<synchronous>, transform_indices = @transform_7, window_bounds = array<i64: 2, 2, 256>}]} {
    %c0_i32 = arith.constant 0 : i32
    %0 = arith.cmpi eq, %arg0, %c0_i32 : i32
    %1 = arith.extui %0 : i1 to i32
    %c0_i32_0 = arith.constant 0 : i32
    %2 = arith.cmpi ne, %1, %c0_i32_0 : i32
    scf.if %2 {
      %cst_40 = arith.constant 0.000000e+00 : f32
      %82 = vector.broadcast %cst_40 : f32 to vector<2x256xf32>
      %c0_41 = arith.constant 0 : index
      %c0_42 = arith.constant 0 : index
      %83 = vector.load %arg9[%c0_41, %c0_42] : memref<2x256xf32, #tpu.memory_space<vmem>>, vector<2x256xf32>
      tpu.vector_store %arg9[%c0_41, %c0_42], %82 {strides = array<i32>} : memref<2x256xf32, #tpu.memory_space<vmem>>, vector<2x256xf32>,
      %cst_43 = arith.constant 0.000000e+00 : f32
      %84 = vector.broadcast %cst_43 : f32 to vector<2x256xf32>
      %c0_44 = arith.constant 0 : index
      %c0_45 = arith.constant 0 : index
      %85 = vector.load %arg10[%c0_44, %c0_45] : memref<2x256xf32, #tpu.memory_space<vmem>>, vector<2x256xf32>
      tpu.vector_store %arg10[%c0_44, %c0_45], %84 {strides = array<i32>} : memref<2x256xf32, #tpu.memory_space<vmem>>, vector<2x256xf32>,
      %cst_46 = arith.constant 0.000000e+00 : f32
      %86 = vector.broadcast %cst_46 : f32 to vector<2x256xf32>
      %c0_47 = arith.constant 0 : index
      %c0_48 = arith.constant 0 : index
      %87 = vector.load %arg11[%c0_47, %c0_48] : memref<2x256xf32, #tpu.memory_space<vmem>>, vector<2x256xf32>
      tpu.vector_store %arg11[%c0_47, %c0_48], %86 {strides = array<i32>} : memref<2x256xf32, #tpu.memory_space<vmem>>, vector<2x256xf32>,
      %cst_49 = arith.constant 0.000000e+00 : f32
      %88 = vector.broadcast %cst_49 : f32 to vector<2x256xf32>
      %c0_50 = arith.constant 0 : index
      %c0_51 = arith.constant 0 : index
      %89 = vector.load %arg12[%c0_50, %c0_51] : memref<2x256xf32, #tpu.memory_space<vmem>>, vector<2x256xf32>
      tpu.vector_store %arg12[%c0_50, %c0_51], %88 {strides = array<i32>} : memref<2x256xf32, #tpu.memory_space<vmem>>, vector<2x256xf32>,
    } else {
    }
    %c0 = arith.constant 0 : index
    %c0_1 = arith.constant 0 : index
    %c0_2 = arith.constant 0 : index
    %3 = vector.load %arg1[%c0, %c0_1, %c0_2] : memref<1x2x1024xf32, #tpu.memory_space<vmem>>, vector<1x2x1024xf32>
    %4 = vector.shape_cast %3 : vector<1x2x1024xf32> to vector<2x1024xf32>
    %c0_3 = arith.constant 0 : index
    %c0_4 = arith.constant 0 : index
    %5 = vector.load %arg9[%c0_3, %c0_4] : memref<2x256xf32, #tpu.memory_space<vmem>>, vector<2x256xf32>
    %6 = arith.truncf %5 : vector<2x256xf32> to vector<2x256xbf16>
    %c0_5 = arith.constant 0 : index
    %c0_6 = arith.constant 0 : index
    %7 = vector.load %arg3[%c0_5, %c0_6] : memref<256x1024xbf16, #tpu.memory_space<vmem>>, vector<256x1024xbf16>
    %cst = arith.constant dense<0.000000e+00> : vector<2x1024xf32>
    %8 = tpu.matmul %6, %7, %cst {dimension_numbers = #tpu.dot_dimension_numbers<[1], [0], [0], [1], [0, 0, 1, 1], [], []>} : vector<2x256xbf16>, vector<256x1024xbf16>, vector<2x1024xf32> -> vector<2x1024xf32>
    %9 = arith.addf %4, %8 : vector<2x1024xf32>
    %10 = vector.extract_strided_slice %9 {offsets = [0, 0], sizes = [2, 256], strides = [1, 1]} : vector<2x1024xf32> to vector<2x256xf32>
    %11 = arith.negf %10 : vector<2x256xf32>
    %12 = math.exp %11 : vector<2x256xf32>
    %cst_7 = arith.constant 1.000000e+00 : f32
    %13 = vector.broadcast %cst_7 : f32 to vector<2x256xf32>
    %14 = arith.addf %13, %12 : vector<2x256xf32>
    %15 = arith.divf %13, %14 : vector<2x256xf32>
    %16 = vector.extract_strided_slice %9 {offsets = [0, 256], sizes = [2, 256], strides = [1, 1]} : vector<2x1024xf32> to vector<2x256xf32>
    %17 = arith.negf %16 : vector<2x256xf32>
    %18 = math.exp %17 : vector<2x256xf32>
    %cst_8 = arith.constant 1.000000e+00 : f32
    %19 = vector.broadcast %cst_8 : f32 to vector<2x256xf32>
    %20 = arith.addf %19, %18 : vector<2x256xf32>
    %21 = arith.divf %19, %20 : vector<2x256xf32>
    %22 = vector.extract_strided_slice %9 {offsets = [0, 512], sizes = [2, 256], strides = [1, 1]} : vector<2x1024xf32> to vector<2x256xf32>
    %23 = math.tanh %22 : vector<2x256xf32>
    %24 = vector.extract_strided_slice %9 {offsets = [0, 768], sizes = [2, 256], strides = [1, 1]} : vector<2x1024xf32> to vector<2x256xf32>
    %25 = arith.negf %24 : vector<2x256xf32>
    %26 = math.exp %25 : vector<2x256xf32>
    %cst_9 = arith.constant 1.000000e+00 : f32
    %27 = vector.broadcast %cst_9 : f32 to vector<2x256xf32>
    %28 = arith.addf %27, %26 : vector<2x256xf32>
    %29 = arith.divf %27, %28 : vector<2x256xf32>
    %c0_10 = arith.constant 0 : index
    %c0_11 = arith.constant 0 : index
    %30 = vector.load %arg10[%c0_10, %c0_11] : memref<2x256xf32, #tpu.memory_space<vmem>>, vector<2x256xf32>
    %31 = arith.mulf %21, %30 : vector<2x256xf32>
    %32 = arith.mulf %15, %23 : vector<2x256xf32>
    %33 = arith.addf %31, %32 : vector<2x256xf32>
    %34 = math.tanh %33 : vector<2x256xf32>
    %35 = arith.mulf %29, %34 : vector<2x256xf32>
    %c0_12 = arith.constant 0 : index
    %c0_13 = arith.constant 0 : index
    %36 = vector.load %arg9[%c0_12, %c0_13] : memref<2x256xf32, #tpu.memory_space<vmem>>, vector<2x256xf32>
    tpu.vector_store %arg9[%c0_12, %c0_13], %35 {strides = array<i32>} : memref<2x256xf32, #tpu.memory_space<vmem>>, vector<2x256xf32>,
    %c0_14 = arith.constant 0 : index
    %c0_15 = arith.constant 0 : index
    %37 = vector.load %arg10[%c0_14, %c0_15] : memref<2x256xf32, #tpu.memory_space<vmem>>, vector<2x256xf32>
    tpu.vector_store %arg10[%c0_14, %c0_15], %33 {strides = array<i32>} : memref<2x256xf32, #tpu.memory_space<vmem>>, vector<2x256xf32>,
    %c0_16 = arith.constant 0 : index
    %c0_17 = arith.constant 0 : index
    %c0_18 = arith.constant 0 : index
    %38 = vector.load %arg2[%c0_16, %c0_17, %c0_18] : memref<1x2x1024xf32, #tpu.memory_space<vmem>>, vector<1x2x1024xf32>
    %39 = vector.shape_cast %38 : vector<1x2x1024xf32> to vector<2x1024xf32>
    %c0_19 = arith.constant 0 : index
    %c0_20 = arith.constant 0 : index
    %40 = vector.load %arg11[%c0_19, %c0_20] : memref<2x256xf32, #tpu.memory_space<vmem>>, vector<2x256xf32>
    %41 = arith.truncf %40 : vector<2x256xf32> to vector<2x256xbf16>
    %c0_21 = arith.constant 0 : index
    %c0_22 = arith.constant 0 : index
    %42 = vector.load %arg4[%c0_21, %c0_22] : memref<256x1024xbf16, #tpu.memory_space<vmem>>, vector<256x1024xbf16>
    %cst_23 = arith.constant dense<0.000000e+00> : vector<2x1024xf32>
    %43 = tpu.matmul %41, %42, %cst_23 {dimension_numbers = #tpu.dot_dimension_numbers<[1], [0], [0], [1], [0, 0, 1, 1], [], []>} : vector<2x256xbf16>, vector<256x1024xbf16>, vector<2x1024xf32> -> vector<2x1024xf32>
    %44 = arith.addf %39, %43 : vector<2x1024xf32>
    %45 = vector.extract_strided_slice %44 {offsets = [0, 0], sizes = [2, 256], strides = [1, 1]} : vector<2x1024xf32> to vector<2x256xf32>
    %46 = arith.negf %45 : vector<2x256xf32>
    %47 = math.exp %46 : vector<2x256xf32>
    %cst_24 = arith.constant 1.000000e+00 : f32
    %48 = vector.broadcast %cst_24 : f32 to vector<2x256xf32>
    %49 = arith.addf %48, %47 : vector<2x256xf32>
    %50 = arith.divf %48, %49 : vector<2x256xf32>
    %51 = vector.extract_strided_slice %44 {offsets = [0, 256], sizes = [2, 256], strides = [1, 1]} : vector<2x1024xf32> to vector<2x256xf32>
    %52 = arith.negf %51 : vector<2x256xf32>
    %53 = math.exp %52 : vector<2x256xf32>
    %cst_25 = arith.constant 1.000000e+00 : f32
    %54 = vector.broadcast %cst_25 : f32 to vector<2x256xf32>
    %55 = arith.addf %54, %53 : vector<2x256xf32>
    %56 = arith.divf %54, %55 : vector<2x256xf32>
    %57 = vector.extract_strided_slice %44 {offsets = [0, 512], sizes = [2, 256], strides = [1, 1]} : vector<2x1024xf32> to vector<2x256xf32>
    %58 = math.tanh %57 : vector<2x256xf32>
    %59 = vector.extract_strided_slice %44 {offsets = [0, 768], sizes = [2, 256], strides = [1, 1]} : vector<2x1024xf32> to vector<2x256xf32>
    %60 = arith.negf %59 : vector<2x256xf32>
    %61 = math.exp %60 : vector<2x256xf32>
    %cst_26 = arith.constant 1.000000e+00 : f32
    %62 = vector.broadcast %cst_26 : f32 to vector<2x256xf32>
    %63 = arith.addf %62, %61 : vector<2x256xf32>
    %64 = arith.divf %62, %63 : vector<2x256xf32>
    %c0_27 = arith.constant 0 : index
    %c0_28 = arith.constant 0 : index
    %65 = vector.load %arg12[%c0_27, %c0_28] : memref<2x256xf32, #tpu.memory_space<vmem>>, vector<2x256xf32>
    %66 = arith.mulf %56, %65 : vector<2x256xf32>
    %67 = arith.mulf %50, %58 : vector<2x256xf32>
    %68 = arith.addf %66, %67 : vector<2x256xf32>
    %69 = math.tanh %68 : vector<2x256xf32>
    %70 = arith.mulf %64, %69 : vector<2x256xf32>
    %c0_29 = arith.constant 0 : index
    %c0_30 = arith.constant 0 : index
    %71 = vector.load %arg11[%c0_29, %c0_30] : memref<2x256xf32, #tpu.memory_space<vmem>>, vector<2x256xf32>
    tpu.vector_store %arg11[%c0_29, %c0_30], %70 {strides = array<i32>} : memref<2x256xf32, #tpu.memory_space<vmem>>, vector<2x256xf32>,
    %c0_31 = arith.constant 0 : index
    %c0_32 = arith.constant 0 : index
    %72 = vector.load %arg12[%c0_31, %c0_32] : memref<2x256xf32, #tpu.memory_space<vmem>>, vector<2x256xf32>
    tpu.vector_store %arg12[%c0_31, %c0_32], %68 {strides = array<i32>} : memref<2x256xf32, #tpu.memory_space<vmem>>, vector<2x256xf32>,
    %c0_33 = arith.constant 0 : index
    %c0_34 = arith.constant 0 : index
    %c0_35 = arith.constant 0 : index
    %73 = vector.load %arg5[%c0_33, %c0_34, %c0_35] : memref<1x2x256xf32, #tpu.memory_space<vmem>>, vector<1x2x256xf32>
    %74 = vector.shape_cast %73 : vector<1x2x256xf32> to vector<2x256xf32>
    %75 = vector.shape_cast %35 : vector<2x256xf32> to vector<1x2x256xf32>
    tpu.vector_store %arg5[%c0_33, %c0_34, %c0_35], %75 {strides = array<i32>} : memref<1x2x256xf32, #tpu.memory_space<vmem>>, vector<1x2x256xf32>,
    %c0_36 = arith.constant 0 : index
    %c0_37 = arith.constant 0 : index
    %c0_38 = arith.constant 0 : index
    %76 = vector.load %arg6[%c0_36, %c0_37, %c0_38] : memref<1x2x256xf32, #tpu.memory_space<vmem>>, vector<1x2x256xf32>
    %77 = vector.shape_cast %76 : vector<1x2x256xf32> to vector<2x256xf32>
    %78 = vector.shape_cast %70 : vector<2x256xf32> to vector<1x2x256xf32>
    tpu.vector_store %arg6[%c0_36, %c0_37, %c0_38], %78 {strides = array<i32>} : memref<1x2x256xf32, #tpu.memory_space<vmem>>, vector<1x2x256xf32>,
    %c7_i32 = arith.constant 7 : i32
    %79 = arith.cmpi eq, %arg0, %c7_i32 : i32
    %80 = arith.extui %79 : i1 to i32
    %c0_i32_39 = arith.constant 0 : i32
    %81 = arith.cmpi ne, %80, %c0_i32_39 : i32
    scf.if %81 {
      %c0_40 = arith.constant 0 : index
      %c0_41 = arith.constant 0 : index
      %c0_42 = arith.constant 0 : index
      %82 = vector.load %arg7[%c0_40, %c0_41, %c0_42] : memref<2x2x256xf32, #tpu.memory_space<vmem>>, vector<1x2x256xf32>
      %83 = vector.shape_cast %82 : vector<1x2x256xf32> to vector<2x256xf32>
      %84 = vector.shape_cast %35 : vector<2x256xf32> to vector<1x2x256xf32>
      tpu.vector_store %arg7[%c0_40, %c0_41, %c0_42], %84 {strides = array<i32>} : memref<2x2x256xf32, #tpu.memory_space<vmem>>, vector<1x2x256xf32>,
      %c1 = arith.constant 1 : index
      %c0_43 = arith.constant 0 : index
      %c0_44 = arith.constant 0 : index
      %85 = vector.load %arg7[%c1, %c0_43, %c0_44] : memref<2x2x256xf32, #tpu.memory_space<vmem>>, vector<1x2x256xf32>
      %86 = vector.shape_cast %85 : vector<1x2x256xf32> to vector<2x256xf32>
      %87 = vector.shape_cast %70 : vector<2x256xf32> to vector<1x2x256xf32>
      tpu.vector_store %arg7[%c1, %c0_43, %c0_44], %87 {strides = array<i32>} : memref<2x2x256xf32, #tpu.memory_space<vmem>>, vector<1x2x256xf32>,
      %c0_45 = arith.constant 0 : index
      %c0_46 = arith.constant 0 : index
      %c0_47 = arith.constant 0 : index
      %88 = vector.load %arg8[%c0_45, %c0_46, %c0_47] : memref<2x2x256xf32, #tpu.memory_space<vmem>>, vector<1x2x256xf32>
      %89 = vector.shape_cast %88 : vector<1x2x256xf32> to vector<2x256xf32>
      %90 = vector.shape_cast %33 : vector<2x256xf32> to vector<1x2x256xf32>
      tpu.vector_store %arg8[%c0_45, %c0_46, %c0_47], %90 {strides = array<i32>} : memref<2x2x256xf32, #tpu.memory_space<vmem>>, vector<1x2x256xf32>,
      %c1_48 = arith.constant 1 : index
      %c0_49 = arith.constant 0 : index
      %c0_50 = arith.constant 0 : index
      %91 = vector.load %arg8[%c1_48, %c0_49, %c0_50] : memref<2x2x256xf32, #tpu.memory_space<vmem>>, vector<1x2x256xf32>
      %92 = vector.shape_cast %91 : vector<1x2x256xf32> to vector<2x256xf32>
      %93 = vector.shape_cast %68 : vector<2x256xf32> to vector<1x2x256xf32>
      tpu.vector_store %arg8[%c1_48, %c0_49, %c0_50], %93 {strides = array<i32>} : memref<2x2x256xf32, #tpu.memory_space<vmem>>, vector<1x2x256xf32>,
    } else {
    }
    return
  }
  func.func @transform_0(%arg0: i32) -> (i32, i32, i32) {
    %c0_i32 = arith.constant 0 : i32
    %c0_i32_0 = arith.constant 0 : i32
    %c0_i32_1 = arith.constant 0 : i32
    return %arg0, %c0_i32, %c0_i32_0 : i32, i32, i32
  }
  func.func @transform_1(%arg0: i32) -> (i32, i32, i32) {
    %c7_i32 = arith.constant 7 : i32
    %0 = arith.subi %c7_i32, %arg0 : i32
    %c0_i32 = arith.constant 0 : i32
    %c0_i32_0 = arith.constant 0 : i32
    %c0_i32_1 = arith.constant 0 : i32
    return %0, %c0_i32, %c0_i32_0 : i32, i32, i32
  }
  func.func @transform_2(%arg0: i32) -> (i32, i32) {
    %c0_i32 = arith.constant 0 : i32
    %c0_i32_0 = arith.constant 0 : i32
    %c0_i32_1 = arith.constant 0 : i32
    return %c0_i32, %c0_i32_0 : i32, i32
  }
  func.func @transform_3(%arg0: i32) -> (i32, i32) {
    %c0_i32 = arith.constant 0 : i32
    %c0_i32_0 = arith.constant 0 : i32
    %c0_i32_1 = arith.constant 0 : i32
    return %c0_i32, %c0_i32_0 : i32, i32
  }
  func.func @transform_4(%arg0: i32) -> (i32, i32, i32) {
    %c0_i32 = arith.constant 0 : i32
    %c0_i32_0 = arith.constant 0 : i32
    %c0_i32_1 = arith.constant 0 : i32
    return %arg0, %c0_i32, %c0_i32_0 : i32, i32, i32
  }
  func.func @transform_5(%arg0: i32) -> (i32, i32, i32) {
    %c7_i32 = arith.constant 7 : i32
    %0 = arith.subi %c7_i32, %arg0 : i32
    %c0_i32 = arith.constant 0 : i32
    %c0_i32_0 = arith.constant 0 : i32
    %c0_i32_1 = arith.constant 0 : i32
    return %0, %c0_i32, %c0_i32_0 : i32, i32, i32
  }
  func.func @transform_6(%arg0: i32) -> (i32, i32, i32) {
    %c0_i32 = arith.constant 0 : i32
    %c0_i32_0 = arith.constant 0 : i32
    %c0_i32_1 = arith.constant 0 : i32
    %c0_i32_2 = arith.constant 0 : i32
    return %c0_i32, %c0_i32_0, %c0_i32_1 : i32, i32, i32
  }
  func.func @transform_7(%arg0: i32) -> (i32, i32, i32) {
    %c0_i32 = arith.constant 0 : i32
    %c0_i32_0 = arith.constant 0 : i32
    %c0_i32_1 = arith.constant 0 : i32
    %c0_i32_2 = arith.constant 0 : i32
    return %c0_i32, %c0_i32_0, %c0_i32_1 : i32, i32, i32
  }
}

module attributes {stable_mosaic.version = 11 : i64} {
  func.func @_proj_kernel(%arg0: i32, %arg1: memref<16x512xbf16, #tpu.memory_space<vmem>>, %arg2: memref<512x768xbf16, #tpu.memory_space<vmem>>, %arg3: memref<1x768xf32, #tpu.memory_space<vmem>>, %arg4: memref<16x768xf32, #tpu.memory_space<vmem>>) attributes {dimension_semantics = [#tpu.dimension_semantics<arbitrary>], iteration_bounds = array<i64: 1>, scalar_prefetch = 0 : i64, scratch_operands = 0 : i64, tpu.core_type = #tpu.core_type<tc>, window_params = [{pipeline_mode = #tpu.pipeline_mode<synchronous>, transform_indices = @transform_0, window_bounds = array<i64: 16, 512>}, {pipeline_mode = #tpu.pipeline_mode<synchronous>, transform_indices = @transform_1, window_bounds = array<i64: 512, 768>}, {pipeline_mode = #tpu.pipeline_mode<synchronous>, transform_indices = @transform_2, window_bounds = array<i64: 1, 768>}, {pipeline_mode = #tpu.pipeline_mode<synchronous>, transform_indices = @transform_3, window_bounds = array<i64: 16, 768>}]} {
    %c0 = arith.constant 0 : index
    %c0_0 = arith.constant 0 : index
    %0 = vector.load %arg1[%c0, %c0_0] : memref<16x512xbf16, #tpu.memory_space<vmem>>, vector<16x512xbf16>
    %c0_1 = arith.constant 0 : index
    %c0_2 = arith.constant 0 : index
    %1 = vector.load %arg2[%c0_1, %c0_2] : memref<512x768xbf16, #tpu.memory_space<vmem>>, vector<512x768xbf16>
    %cst = arith.constant dense<0.000000e+00> : vector<16x768xf32>
    %2 = tpu.matmul %0, %1, %cst {dimension_numbers = #tpu.dot_dimension_numbers<[1], [0], [0], [1], [0, 0, 1, 1], [], []>} : vector<16x512xbf16>, vector<512x768xbf16>, vector<16x768xf32> -> vector<16x768xf32>
    %c0_3 = arith.constant 0 : index
    %c0_4 = arith.constant 0 : index
    %3 = vector.load %arg3[%c0_3, %c0_4] : memref<1x768xf32, #tpu.memory_space<vmem>>, vector<1x768xf32>
    %4 = vector.broadcast %3 : vector<1x768xf32> to vector<16x768xf32>
    %5 = arith.addf %2, %4 : vector<16x768xf32>
    %c0_5 = arith.constant 0 : index
    %c0_6 = arith.constant 0 : index
    %6 = vector.load %arg4[%c0_5, %c0_6] : memref<16x768xf32, #tpu.memory_space<vmem>>, vector<16x768xf32>
    tpu.vector_store %arg4[%c0_5, %c0_6], %5 {strides = array<i32>} : memref<16x768xf32, #tpu.memory_space<vmem>>, vector<16x768xf32>,
    return
  }
  func.func @transform_0(%arg0: i32) -> (i32, i32) {
    %c0_i32 = arith.constant 0 : i32
    %c0_i32_0 = arith.constant 0 : i32
    %c0_i32_1 = arith.constant 0 : i32
    return %c0_i32, %c0_i32_0 : i32, i32
  }
  func.func @transform_1(%arg0: i32) -> (i32, i32) {
    %c0_i32 = arith.constant 0 : i32
    %c0_i32_0 = arith.constant 0 : i32
    %c0_i32_1 = arith.constant 0 : i32
    return %c0_i32, %c0_i32_0 : i32, i32
  }
  func.func @transform_2(%arg0: i32) -> (i32, i32) {
    %c0_i32 = arith.constant 0 : i32
    %c0_i32_0 = arith.constant 0 : i32
    %c0_i32_1 = arith.constant 0 : i32
    return %c0_i32, %c0_i32_0 : i32, i32
  }
  func.func @transform_3(%arg0: i32) -> (i32, i32) {
    %c0_i32 = arith.constant 0 : i32
    %c0_i32_0 = arith.constant 0 : i32
    %c0_i32_1 = arith.constant 0 : i32
    return %c0_i32, %c0_i32_0 : i32, i32
  }
}

module attributes {stable_mosaic.version = 11 : i64} {
  func.func @_proj_kernel(%arg0: i32, %arg1: memref<8x128xbf16, #tpu.memory_space<vmem>>, %arg2: memref<128x1024xbf16, #tpu.memory_space<vmem>>, %arg3: memref<1x1024xf32, #tpu.memory_space<vmem>>, %arg4: memref<8x1024xf32, #tpu.memory_space<vmem>>) attributes {dimension_semantics = [#tpu.dimension_semantics<arbitrary>], iteration_bounds = array<i64: 1>, scalar_prefetch = 0 : i64, scratch_operands = 0 : i64, tpu.core_type = #tpu.core_type<tc>, window_params = [{pipeline_mode = #tpu.pipeline_mode<synchronous>, transform_indices = @transform_0, window_bounds = array<i64: 8, 128>}, {pipeline_mode = #tpu.pipeline_mode<synchronous>, transform_indices = @transform_1, window_bounds = array<i64: 128, 1024>}, {pipeline_mode = #tpu.pipeline_mode<synchronous>, transform_indices = @transform_2, window_bounds = array<i64: 1, 1024>}, {pipeline_mode = #tpu.pipeline_mode<synchronous>, transform_indices = @transform_3, window_bounds = array<i64: 8, 1024>}]} {
    %c0 = arith.constant 0 : index
    %c0_0 = arith.constant 0 : index
    %0 = vector.load %arg1[%c0, %c0_0] : memref<8x128xbf16, #tpu.memory_space<vmem>>, vector<8x128xbf16>
    %c0_1 = arith.constant 0 : index
    %c0_2 = arith.constant 0 : index
    %1 = vector.load %arg2[%c0_1, %c0_2] : memref<128x1024xbf16, #tpu.memory_space<vmem>>, vector<128x1024xbf16>
    %cst = arith.constant dense<0.000000e+00> : vector<8x1024xf32>
    %2 = tpu.matmul %0, %1, %cst {dimension_numbers = #tpu.dot_dimension_numbers<[1], [0], [0], [1], [0, 0, 1, 1], [], []>} : vector<8x128xbf16>, vector<128x1024xbf16>, vector<8x1024xf32> -> vector<8x1024xf32>
    %c0_3 = arith.constant 0 : index
    %c0_4 = arith.constant 0 : index
    %3 = vector.load %arg3[%c0_3, %c0_4] : memref<1x1024xf32, #tpu.memory_space<vmem>>, vector<1x1024xf32>
    %4 = vector.broadcast %3 : vector<1x1024xf32> to vector<8x1024xf32>
    %5 = arith.addf %2, %4 : vector<8x1024xf32>
    %c0_5 = arith.constant 0 : index
    %c0_6 = arith.constant 0 : index
    %6 = vector.load %arg4[%c0_5, %c0_6] : memref<8x1024xf32, #tpu.memory_space<vmem>>, vector<8x1024xf32>
    tpu.vector_store %arg4[%c0_5, %c0_6], %5 {strides = array<i32>} : memref<8x1024xf32, #tpu.memory_space<vmem>>, vector<8x1024xf32>,
    return
  }
  func.func @transform_0(%arg0: i32) -> (i32, i32) {
    %c0_i32 = arith.constant 0 : i32
    %c0_i32_0 = arith.constant 0 : i32
    %c0_i32_1 = arith.constant 0 : i32
    return %c0_i32, %c0_i32_0 : i32, i32
  }
  func.func @transform_1(%arg0: i32) -> (i32, i32) {
    %c0_i32 = arith.constant 0 : i32
    %c0_i32_0 = arith.constant 0 : i32
    %c0_i32_1 = arith.constant 0 : i32
    return %c0_i32, %c0_i32_0 : i32, i32
  }
  func.func @transform_2(%arg0: i32) -> (i32, i32) {
    %c0_i32 = arith.constant 0 : i32
    %c0_i32_0 = arith.constant 0 : i32
    %c0_i32_1 = arith.constant 0 : i32
    return %c0_i32, %c0_i32_0 : i32, i32
  }
  func.func @transform_3(%arg0: i32) -> (i32, i32) {
    %c0_i32 = arith.constant 0 : i32
    %c0_i32_0 = arith.constant 0 : i32
    %c0_i32_1 = arith.constant 0 : i32
    return %c0_i32, %c0_i32_0 : i32, i32
  }
}

module attributes {stable_mosaic.version = 11 : i64} {
  func.func @_attn_ctx_kernel(%arg0: i32, %arg1: memref<2x8x768xf32, #tpu.memory_space<vmem>>, %arg2: memref<256x128xbf16, #tpu.memory_space<vmem>>, %arg3: memref<1x128xf32, #tpu.memory_space<vmem>>, %arg4: memref<2x128xf32, #tpu.memory_space<vmem>>) attributes {dimension_semantics = [#tpu.dimension_semantics<arbitrary>], iteration_bounds = array<i64: 1>, scalar_prefetch = 0 : i64, scratch_operands = 0 : i64, tpu.core_type = #tpu.core_type<tc>, window_params = [{pipeline_mode = #tpu.pipeline_mode<synchronous>, transform_indices = @transform_0, window_bounds = array<i64: 2, 8, 768>}, {pipeline_mode = #tpu.pipeline_mode<synchronous>, transform_indices = @transform_1, window_bounds = array<i64: 256, 128>}, {pipeline_mode = #tpu.pipeline_mode<synchronous>, transform_indices = @transform_2, window_bounds = array<i64: 1, 128>}, {pipeline_mode = #tpu.pipeline_mode<synchronous>, transform_indices = @transform_3, window_bounds = array<i64: 2, 128>}]} {
    %c0 = arith.constant 0 : index
    %c0_0 = arith.constant 0 : index
    %c0_1 = arith.constant 0 : index
    %0 = vector.load %arg1[%c0, %c0_0, %c0_1] : memref<2x8x768xf32, #tpu.memory_space<vmem>>, vector<2x8x768xf32>
    %1 = vector.extract_strided_slice %0 {offsets = [0, 0, 0], sizes = [2, 8, 256], strides = [1, 1, 1]} : vector<2x8x768xf32> to vector<2x8x256xf32>
    %2 = arith.truncf %1 : vector<2x8x256xf32> to vector<2x8x256xbf16>
    %3 = vector.extract_strided_slice %0 {offsets = [0, 0, 256], sizes = [2, 8, 256], strides = [1, 1, 1]} : vector<2x8x768xf32> to vector<2x8x256xf32>
    %4 = arith.truncf %3 : vector<2x8x256xf32> to vector<2x8x256xbf16>
    %5 = vector.extract_strided_slice %0 {offsets = [0, 0, 512], sizes = [2, 8, 256], strides = [1, 1, 1]} : vector<2x8x768xf32> to vector<2x8x256xf32>
    %6 = arith.truncf %5 : vector<2x8x256xf32> to vector<2x8x256xbf16>
    "tpu.trace_start"() <{level = 10 : i32, message = "btd,bsd->bts"}> : () -> ()
    %cst = arith.constant dense<0.000000e+00> : vector<2x8x8xf32>
    %7 = tpu.matmul %2, %4, %cst {dimension_numbers = #tpu.dot_dimension_numbers<[2], [2], [1], [1], [0, 0, 0, 1, 1, 1], [0], [0]>} : vector<2x8x256xbf16>, vector<2x8x256xbf16>, vector<2x8x8xf32> -> vector<2x8x8xf32>
    "tpu.trace_stop"() : () -> ()
    %cst_2 = arith.constant 1.600000e+01 : f32
    %8 = vector.broadcast %cst_2 : f32 to vector<2x8x8xf32>
    %9 = arith.divf %7, %8 : vector<2x8x8xf32>
    %10 = arith.truncf %9 : vector<2x8x8xf32> to vector<2x8x8xbf16>
    "tpu.trace_start"() <{level = 10 : i32, message = "bts,bsd->btd"}> : () -> ()
    %cst_3 = arith.constant dense<0.000000e+00> : vector<2x8x256xf32>
    %11 = tpu.matmul %10, %6, %cst_3 {dimension_numbers = #tpu.dot_dimension_numbers<[2], [1], [1], [2], [0, 0, 0, 1, 1, 2], [0], [0]>} : vector<2x8x8xbf16>, vector<2x8x256xbf16>, vector<2x8x256xf32> -> vector<2x8x256xf32>
    "tpu.trace_stop"() : () -> ()
    %cst_4 = arith.constant dense<0.000000e+00> : vector<2x256xf32>
    %12 = vector.multi_reduction <add>, %11, %cst_4 [1] : vector<2x8x256xf32> to vector<2x256xf32>
    %cst_5 = arith.constant 8.000000e+00 : f32
    %13 = vector.broadcast %cst_5 : f32 to vector<2x256xf32>
    %14 = arith.divf %12, %13 : vector<2x256xf32>
    %15 = arith.truncf %14 : vector<2x256xf32> to vector<2x256xbf16>
    %c0_6 = arith.constant 0 : index
    %c0_7 = arith.constant 0 : index
    %16 = vector.load %arg2[%c0_6, %c0_7] : memref<256x128xbf16, #tpu.memory_space<vmem>>, vector<256x128xbf16>
    %cst_8 = arith.constant dense<0.000000e+00> : vector<2x128xf32>
    %17 = tpu.matmul %15, %16, %cst_8 {dimension_numbers = #tpu.dot_dimension_numbers<[1], [0], [0], [1], [0, 0, 1, 1], [], []>} : vector<2x256xbf16>, vector<256x128xbf16>, vector<2x128xf32> -> vector<2x128xf32>
    %c0_9 = arith.constant 0 : index
    %c0_10 = arith.constant 0 : index
    %18 = vector.load %arg3[%c0_9, %c0_10] : memref<1x128xf32, #tpu.memory_space<vmem>>, vector<1x128xf32>
    %19 = vector.broadcast %18 : vector<1x128xf32> to vector<2x128xf32>
    %20 = arith.addf %17, %19 : vector<2x128xf32>
    %c0_11 = arith.constant 0 : index
    %c0_12 = arith.constant 0 : index
    %21 = vector.load %arg4[%c0_11, %c0_12] : memref<2x128xf32, #tpu.memory_space<vmem>>, vector<2x128xf32>
    tpu.vector_store %arg4[%c0_11, %c0_12], %20 {strides = array<i32>} : memref<2x128xf32, #tpu.memory_space<vmem>>, vector<2x128xf32>,
    return
  }
  func.func @transform_0(%arg0: i32) -> (i32, i32, i32) {
    %c0_i32 = arith.constant 0 : i32
    %c0_i32_0 = arith.constant 0 : i32
    %c0_i32_1 = arith.constant 0 : i32
    %c0_i32_2 = arith.constant 0 : i32
    return %c0_i32, %c0_i32_0, %c0_i32_1 : i32, i32, i32
  }
  func.func @transform_1(%arg0: i32) -> (i32, i32) {
    %c0_i32 = arith.constant 0 : i32
    %c0_i32_0 = arith.constant 0 : i32
    %c0_i32_1 = arith.constant 0 : i32
    return %c0_i32, %c0_i32_0 : i32, i32
  }
  func.func @transform_2(%arg0: i32) -> (i32, i32) {
    %c0_i32 = arith.constant 0 : i32
    %c0_i32_0 = arith.constant 0 : i32
    %c0_i32_1 = arith.constant 0 : i32
    return %c0_i32, %c0_i32_0 : i32, i32
  }
  func.func @transform_3(%arg0: i32) -> (i32, i32) {
    %c0_i32 = arith.constant 0 : i32
    %c0_i32_0 = arith.constant 0 : i32
    %c0_i32_1 = arith.constant 0 : i32
    return %c0_i32, %c0_i32_0 : i32, i32
  }
}

module attributes {stable_mosaic.version = 11 : i64} {
  func.func @_decoder_kernel(%arg0: i32, %arg1: memref<1x2x1024xf32, #tpu.memory_space<vmem>>, %arg2: memref<2x256xf32, #tpu.memory_space<vmem>>, %arg3: memref<2x256xf32, #tpu.memory_space<vmem>>, %arg4: memref<256x1024xbf16, #tpu.memory_space<vmem>>, %arg5: memref<256x128xbf16, #tpu.memory_space<vmem>>, %arg6: memref<2x128xf32, #tpu.memory_space<vmem>>, %arg7: memref<1x2x128xf32, #tpu.memory_space<vmem>>, %arg8: memref<2x256xf32, #tpu.memory_space<vmem>>, %arg9: memref<2x256xf32, #tpu.memory_space<vmem>>) attributes {dimension_semantics = [#tpu.dimension_semantics<arbitrary>], iteration_bounds = array<i64: 4>, scalar_prefetch = 0 : i64, scratch_operands = 2 : i64, tpu.core_type = #tpu.core_type<tc>, window_params = [{transform_indices = @transform_0, window_bounds = array<i64: 1, 2, 1024>}, {pipeline_mode = #tpu.pipeline_mode<synchronous>, transform_indices = @transform_1, window_bounds = array<i64: 2, 256>}, {pipeline_mode = #tpu.pipeline_mode<synchronous>, transform_indices = @transform_2, window_bounds = array<i64: 2, 256>}, {pipeline_mode = #tpu.pipeline_mode<synchronous>, transform_indices = @transform_3, window_bounds = array<i64: 256, 1024>}, {pipeline_mode = #tpu.pipeline_mode<synchronous>, transform_indices = @transform_4, window_bounds = array<i64: 256, 128>}, {pipeline_mode = #tpu.pipeline_mode<synchronous>, transform_indices = @transform_5, window_bounds = array<i64: 2, 128>}, {transform_indices = @transform_6, window_bounds = array<i64: 1, 2, 128>}]} {
    %c0_i32 = arith.constant 0 : i32
    %0 = arith.cmpi eq, %arg0, %c0_i32 : i32
    %1 = arith.extui %0 : i1 to i32
    %c0_i32_0 = arith.constant 0 : i32
    %2 = arith.cmpi ne, %1, %c0_i32_0 : i32
    scf.if %2 {
      %c0_24 = arith.constant 0 : index
      %c0_25 = arith.constant 0 : index
      %46 = vector.load %arg2[%c0_24, %c0_25] : memref<2x256xf32, #tpu.memory_space<vmem>>, vector<2x256xf32>
      %c0_26 = arith.constant 0 : index
      %c0_27 = arith.constant 0 : index
      %47 = vector.load %arg8[%c0_26, %c0_27] : memref<2x256xf32, #tpu.memory_space<vmem>>, vector<2x256xf32>
      tpu.vector_store %arg8[%c0_26, %c0_27], %46 {strides = array<i32>} : memref<2x256xf32, #tpu.memory_space<vmem>>, vector<2x256xf32>,
      %c0_28 = arith.constant 0 : index
      %c0_29 = arith.constant 0 : index
      %48 = vector.load %arg3[%c0_28, %c0_29] : memref<2x256xf32, #tpu.memory_space<vmem>>, vector<2x256xf32>
      %c0_30 = arith.constant 0 : index
      %c0_31 = arith.constant 0 : index
      %49 = vector.load %arg9[%c0_30, %c0_31] : memref<2x256xf32, #tpu.memory_space<vmem>>, vector<2x256xf32>
      tpu.vector_store %arg9[%c0_30, %c0_31], %48 {strides = array<i32>} : memref<2x256xf32, #tpu.memory_space<vmem>>, vector<2x256xf32>,
    } else {
    }
    %c0 = arith.constant 0 : index
    %c0_1 = arith.constant 0 : index
    %c0_2 = arith.constant 0 : index
    %3 = vector.load %arg1[%c0, %c0_1, %c0_2] : memref<1x2x1024xf32, #tpu.memory_space<vmem>>, vector<1x2x1024xf32>
    %4 = vector.shape_cast %3 : vector<1x2x1024xf32> to vector<2x1024xf32>
    %c0_3 = arith.constant 0 : index
    %c0_4 = arith.constant 0 : index
    %5 = vector.load %arg8[%c0_3, %c0_4] : memref<2x256xf32, #tpu.memory_space<vmem>>, vector<2x256xf32>
    %6 = arith.truncf %5 : vector<2x256xf32> to vector<2x256xbf16>
    %c0_5 = arith.constant 0 : index
    %c0_6 = arith.constant 0 : index
    %7 = vector.load %arg4[%c0_5, %c0_6] : memref<256x1024xbf16, #tpu.memory_space<vmem>>, vector<256x1024xbf16>
    %cst = arith.constant dense<0.000000e+00> : vector<2x1024xf32>
    %8 = tpu.matmul %6, %7, %cst {dimension_numbers = #tpu.dot_dimension_numbers<[1], [0], [0], [1], [0, 0, 1, 1], [], []>} : vector<2x256xbf16>, vector<256x1024xbf16>, vector<2x1024xf32> -> vector<2x1024xf32>
    %9 = arith.addf %4, %8 : vector<2x1024xf32>
    %10 = vector.extract_strided_slice %9 {offsets = [0, 0], sizes = [2, 256], strides = [1, 1]} : vector<2x1024xf32> to vector<2x256xf32>
    %11 = arith.negf %10 : vector<2x256xf32>
    %12 = math.exp %11 : vector<2x256xf32>
    %cst_7 = arith.constant 1.000000e+00 : f32
    %13 = vector.broadcast %cst_7 : f32 to vector<2x256xf32>
    %14 = arith.addf %13, %12 : vector<2x256xf32>
    %15 = arith.divf %13, %14 : vector<2x256xf32>
    %16 = vector.extract_strided_slice %9 {offsets = [0, 256], sizes = [2, 256], strides = [1, 1]} : vector<2x1024xf32> to vector<2x256xf32>
    %17 = arith.negf %16 : vector<2x256xf32>
    %18 = math.exp %17 : vector<2x256xf32>
    %cst_8 = arith.constant 1.000000e+00 : f32
    %19 = vector.broadcast %cst_8 : f32 to vector<2x256xf32>
    %20 = arith.addf %19, %18 : vector<2x256xf32>
    %21 = arith.divf %19, %20 : vector<2x256xf32>
    %22 = vector.extract_strided_slice %9 {offsets = [0, 512], sizes = [2, 256], strides = [1, 1]} : vector<2x1024xf32> to vector<2x256xf32>
    %23 = math.tanh %22 : vector<2x256xf32>
    %24 = vector.extract_strided_slice %9 {offsets = [0, 768], sizes = [2, 256], strides = [1, 1]} : vector<2x1024xf32> to vector<2x256xf32>
    %25 = arith.negf %24 : vector<2x256xf32>
    %26 = math.exp %25 : vector<2x256xf32>
    %cst_9 = arith.constant 1.000000e+00 : f32
    %27 = vector.broadcast %cst_9 : f32 to vector<2x256xf32>
    %28 = arith.addf %27, %26 : vector<2x256xf32>
    %29 = arith.divf %27, %28 : vector<2x256xf32>
    %c0_10 = arith.constant 0 : index
    %c0_11 = arith.constant 0 : index
    %30 = vector.load %arg9[%c0_10, %c0_11] : memref<2x256xf32, #tpu.memory_space<vmem>>, vector<2x256xf32>
    %31 = arith.mulf %21, %30 : vector<2x256xf32>
    %32 = arith.mulf %15, %23 : vector<2x256xf32>
    %33 = arith.addf %31, %32 : vector<2x256xf32>
    %34 = math.tanh %33 : vector<2x256xf32>
    %35 = arith.mulf %29, %34 : vector<2x256xf32>
    %c0_12 = arith.constant 0 : index
    %c0_13 = arith.constant 0 : index
    %36 = vector.load %arg8[%c0_12, %c0_13] : memref<2x256xf32, #tpu.memory_space<vmem>>, vector<2x256xf32>
    tpu.vector_store %arg8[%c0_12, %c0_13], %35 {strides = array<i32>} : memref<2x256xf32, #tpu.memory_space<vmem>>, vector<2x256xf32>,
    %c0_14 = arith.constant 0 : index
    %c0_15 = arith.constant 0 : index
    %37 = vector.load %arg9[%c0_14, %c0_15] : memref<2x256xf32, #tpu.memory_space<vmem>>, vector<2x256xf32>
    tpu.vector_store %arg9[%c0_14, %c0_15], %33 {strides = array<i32>} : memref<2x256xf32, #tpu.memory_space<vmem>>, vector<2x256xf32>,
    %38 = arith.truncf %35 : vector<2x256xf32> to vector<2x256xbf16>
    %c0_16 = arith.constant 0 : index
    %c0_17 = arith.constant 0 : index
    %39 = vector.load %arg5[%c0_16, %c0_17] : memref<256x128xbf16, #tpu.memory_space<vmem>>, vector<256x128xbf16>
    %cst_18 = arith.constant dense<0.000000e+00> : vector<2x128xf32>
    %40 = tpu.matmul %38, %39, %cst_18 {dimension_numbers = #tpu.dot_dimension_numbers<[1], [0], [0], [1], [0, 0, 1, 1], [], []>} : vector<2x256xbf16>, vector<256x128xbf16>, vector<2x128xf32> -> vector<2x128xf32>
    %c0_19 = arith.constant 0 : index
    %c0_20 = arith.constant 0 : index
    %41 = vector.load %arg6[%c0_19, %c0_20] : memref<2x128xf32, #tpu.memory_space<vmem>>, vector<2x128xf32>
    %42 = arith.addf %40, %41 : vector<2x128xf32>
    %c0_21 = arith.constant 0 : index
    %c0_22 = arith.constant 0 : index
    %c0_23 = arith.constant 0 : index
    %43 = vector.load %arg7[%c0_21, %c0_22, %c0_23] : memref<1x2x128xf32, #tpu.memory_space<vmem>>, vector<1x2x128xf32>
    %44 = vector.shape_cast %43 : vector<1x2x128xf32> to vector<2x128xf32>
    %45 = vector.shape_cast %42 : vector<2x128xf32> to vector<1x2x128xf32>
    tpu.vector_store %arg7[%c0_21, %c0_22, %c0_23], %45 {strides = array<i32>} : memref<1x2x128xf32, #tpu.memory_space<vmem>>, vector<1x2x128xf32>,
    return
  }
  func.func @transform_0(%arg0: i32) -> (i32, i32, i32) {
    %c0_i32 = arith.constant 0 : i32
    %c0_i32_0 = arith.constant 0 : i32
    %c0_i32_1 = arith.constant 0 : i32
    return %arg0, %c0_i32, %c0_i32_0 : i32, i32, i32
  }
  func.func @transform_1(%arg0: i32) -> (i32, i32) {
    %c0_i32 = arith.constant 0 : i32
    %c0_i32_0 = arith.constant 0 : i32
    %c0_i32_1 = arith.constant 0 : i32
    return %c0_i32, %c0_i32_0 : i32, i32
  }
  func.func @transform_2(%arg0: i32) -> (i32, i32) {
    %c0_i32 = arith.constant 0 : i32
    %c0_i32_0 = arith.constant 0 : i32
    %c0_i32_1 = arith.constant 0 : i32
    return %c0_i32, %c0_i32_0 : i32, i32
  }
  func.func @transform_3(%arg0: i32) -> (i32, i32) {
    %c0_i32 = arith.constant 0 : i32
    %c0_i32_0 = arith.constant 0 : i32
    %c0_i32_1 = arith.constant 0 : i32
    return %c0_i32, %c0_i32_0 : i32, i32
  }
  func.func @transform_4(%arg0: i32) -> (i32, i32) {
    %c0_i32 = arith.constant 0 : i32
    %c0_i32_0 = arith.constant 0 : i32
    %c0_i32_1 = arith.constant 0 : i32
    return %c0_i32, %c0_i32_0 : i32, i32
  }
  func.func @transform_5(%arg0: i32) -> (i32, i32) {
    %c0_i32 = arith.constant 0 : i32
    %c0_i32_0 = arith.constant 0 : i32
    %c0_i32_1 = arith.constant 0 : i32
    return %c0_i32, %c0_i32_0 : i32, i32
  }
  func.func @transform_6(%arg0: i32) -> (i32, i32, i32) {
    %c0_i32 = arith.constant 0 : i32
    %c0_i32_0 = arith.constant 0 : i32
    %c0_i32_1 = arith.constant 0 : i32
    return %arg0, %c0_i32, %c0_i32_0 : i32, i32, i32
  }
}

</mosaic_0001>

<bundles_post_ra>
// kernel: seq2seq_forward.8
= control target key start
LH: loop header
LB: loop body
LE: loop exit
PB: predicated region body
PF: predicated region fallthrough
CT: control target
= control target key end

     0   :  { %8 = vsyncpa [#allocation3], 0  ;;  %s1658_s0 = inlined_call_operand.vmem [shape: bf16[16,128], index: 0, kind: input, shape index: {}]   ;;  %s1659_s1 = inlined_call_operand.hbm [shape: bf16[128,2048], index: 1, kind: input, shape index: {}]   ;;  %s1660_s2 = inlined_call_operand.hbm [shape: f32[1,2048], index: 2, kind: input, shape index: {}]   ;;  %s1661_s3 = inlined_call_operand.vmem [shape: f32[16,2048], index: 3, kind: output, shape index: {}]  }
   0x1   :  { %9 = vsyncpa [#allocation5], 0  ;;  %s1466_s12 = smov [#allocation2]   ;;  %s1418_s16 = scalar_lea.hbm %s1659_s1, 16384 }
   0x2   :  { %s17_s13 = sshll.u32 %s1466_s12, 4  ;;  %p1419_p0 = scmp.ne.s32.totalorder %s1659_s1, %s1418_s16  ;;  %s18_s13 = int_to_ptr.vmem [resolvable:$true] %s17_s13 }
   0x3   :  { %p1422_p1 = scmp.lt.u32.totalorder %s1418_s16, %s1659_s1 }
   0x5   :  { %p1424_p2 = pnand %p1422_p1, %p1419_p0 }
   0x7   :  { %1427 = shalt.err (!%p1424_p2)
}
   0x8   :  { %s1428_s21 = scalar_lea.vmem %s18_s13, 16384  ;;  %p1433_p4 = scmp.lt.s32.totalorder %s18_s13, %s18_s13 }
   0x9   :  { %p1429_p3 = scmp.ne.s32.totalorder %s18_s13, %s1428_s21  ;;  %p1434_p5 = scmp.lt.s32.totalorder %s1428_s21, %s1428_s21 }
   0xb   :  { %p1435_p6 = por %p1434_p5, %p1433_p4 }
   0xd   :  { %p1436_p7 = pnand %p1435_p6, %p1429_p3 }
   0xf   :  { %1439 = shalt.err (!%p1436_p7)
}
  0x10   :  { %s1467_s22 = smov 1024   ;;  %s1468_s23 = smov 64  }
  0x11   :  { %23 = dma.hbm_to_vmem [thread:$0]  %s1659_s1, 16384, %s18_s13, [#allocation3], %s1467_s22, %s1467_s22, %s1468_s23  }
  0x12   :  { %s1469_s26 = smov [#allocation4]   ;;  %s1440_s30 = scalar_lea.hbm %s1660_s2, 256 }
  0x13   :  { %s30_s27 = sshll.u32 %s1469_s26, 4  ;;  %p1441_p8 = scmp.ne.s32.totalorder %s1660_s2, %s1440_s30  ;;  %s31_s27 = int_to_ptr.vmem [resolvable:$true] %s30_s27 }
  0x14   :  { %p1444_p9 = scmp.lt.u32.totalorder %s1440_s30, %s1660_s2 }
  0x16   :  { %p1446_p10 = pnand %p1444_p9, %p1441_p8 }
  0x18   :  { %1449 = shalt.err (!%p1446_p10)
}
  0x19   :  { %s1450_s8 = scalar_lea.vmem %s31_s27, 256  ;;  %p1455_p12 = scmp.lt.s32.totalorder %s31_s27, %s31_s27 }
  0x1a   :  { %p1451_p11 = scmp.ne.s32.totalorder %s31_s27, %s1450_s8  ;;  %p1456_p13 = scmp.lt.s32.totalorder %s1450_s8, %s1450_s8 }
  0x1c   :  { %p1457_p0 = por %p1456_p13, %p1455_p12 }
  0x1e   :  { %p1458_p1 = pnand %p1457_p0, %p1451_p11 }
  0x20   :  { %1461 = shalt.err (!%p1458_p1)
}
  0x21   :  { %33 = dma.hbm_to_vmem [thread:$0]  %s1660_s2, 256, %s31_s27, [#allocation5]  }
  0x22   :  { %1462 = dma.done.wait [#allocation3], 16384  }
  0x23   :  { %1463 = vsyncadd [#allocation3], 4294950912 }
  0x24   :  { %1464 = dma.done.wait [#allocation5], 256  }
  0x25   :  { %1465 = vsyncadd [#allocation5], 4294967040  ;;  %v1470_v0 = vmov 0   ;;  %v43_v1 = vld [vmem:[#allocation2] sm:$0xff]  ;;  %v44_v3 = vld [vmem:[#allocation2 + $0x8] sm:$0xff] }
  0x26   :  { %933 = vmatprep.mubr.bf16.mxu0 %v1470_v0  ;;  %976 = vmatprep.mubr.bf16.mxu1 %v1470_v0  ;;  %v51_v2 = vld [vmem:[#allocation2 + $0x40] sm:$0xff]  ;;  %v52_v5 = vld [vmem:[#allocation2 + $0x48] sm:$0xff]  ;;  %v45_v63 = vld [vmem:[#allocation2 + $0x10] sm:$0xff] }
  0x27   :  { %v1285_v4 = vcombine.high %v43_v1, %v51_v2  ;;  %v1284_v6 = vcombine.low %v43_v1, %v51_v2  ;;  %v59_v7 = vld [vmem:[#allocation2 + $0x80] sm:$0xff]  ;;  %v1287_v9 = vcombine.high %v44_v3, %v52_v5  ;;  %v1286_v10 = vcombine.low %v44_v3, %v52_v5  ;;  %v60_v12 = vld [vmem:[#allocation2 + $0x88] sm:$0xff]  ;;  %v53_v1 = vld [vmem:[#allocation2 + $0x50] sm:$0xff] }
  0x28   :  { %v67_v8 = vld [vmem:[#allocation2 + $0xc0] sm:$0xff]  ;;  %v68_v13 = vld [vmem:[#allocation2 + $0xc8] sm:$0xff]  ;;  %v46_v2 = vld [vmem:[#allocation2 + $0x18] sm:$0xff] }
  0x29   :  { %v1301_v11 = vcombine.high %v59_v7, %v67_v8  ;;  %v75_v14 = vld [vmem:[#allocation2 + $0x100] sm:$0xff]  ;;  %901 = vmatprep.subr.bf16.mxu0 %v1285_v4  ;;  %v1303_v15 = vcombine.high %v60_v12, %v68_v13  ;;  %v76_v17 = vld [vmem:[#allocation2 + $0x108] sm:$0xff]  ;;  %944 = vmatprep.subr.bf16.mxu1 %v1287_v9  ;;  %v1300_v19 = vcombine.low %v59_v7, %v67_v8  ;;  %v54_v3 = vld [vmem:[#allocation2 + $0x58] sm:$0xff] }
  0x2a   :  { %v83_v16 = vld [vmem:[#allocation2 + $0x140] sm:$0xff]  ;;  %v84_v18 = vld [vmem:[#allocation2 + $0x148] sm:$0xff]  ;;  %902 = vmatpush1.bf16.msra.mxu0 %v1284_v6  ;;  %945 = vmatpush1.bf16.msra.mxu1 %v1286_v10  ;;  %v1302_v20 = vcombine.low %v60_v12, %v68_v13  ;;  %v1289_v6 = vcombine.high %v45_v63, %v53_v1  ;;  %v1291_v7 = vcombine.high %v46_v2, %v54_v3  ;;  %v61_v8 = vld [vmem:[#allocation2 + $0x90] sm:$0xff] }
  0x2b   :  { %903 = vmatprep.subr.bf16.mxu0 %v1301_v11  ;;  %v1317_v21 = vcombine.high %v75_v14, %v83_v16  ;;  %946 = vmatprep.subr.bf16.mxu1 %v1303_v15  ;;  %v1319_v22 = vcombine.high %v76_v17, %v84_v18  ;;  %v91_v23 = vld [vmem:[#allocation2 + $0x180] sm:$0xff]  ;;  %v92_v25 = vld [vmem:[#allocation2 + $0x188] sm:$0xff]  ;;  %v1316_v27 = vcombine.low %v75_v14, %v83_v16  ;;  %v69_v9 = vld [vmem:[#allocation2 + $0xd0] sm:$0xff] }
  0x2c   :  { %v99_v24 = vld [vmem:[#allocation2 + $0x1c0] sm:$0xff]  ;;  %v100_v26 = vld [vmem:[#allocation2 + $0x1c8] sm:$0xff]  ;;  %v1318_v28 = vcombine.low %v76_v17, %v84_v18  ;;  %v62_v11 = vld [vmem:[#allocation2 + $0x98] sm:$0xff]  ;;  %v1288_v13 = vcombine.low %v45_v63, %v53_v1  ;;  %v1290_v14 = vcombine.low %v46_v2, %v54_v3  ;;  %v1305_v15 = vcombine.high %v61_v8, %v69_v9 }
  0x2d   :  { %v1333_v29 = vcombine.high %v91_v23, %v99_v24  ;;  %v1335_v30 = vcombine.high %v92_v25, %v100_v26  ;;  %v107_v31 = vld [vmem:[#allocation2 + $0x200] sm:$0xff]  ;;  %v108_v33 = vld [vmem:[#allocation2 + $0x208] sm:$0xff]  ;;  %v1332_v35 = vcombine.low %v91_v23, %v99_v24  ;;  %v1334_v36 = vcombine.low %v92_v25, %v100_v26  ;;  %v70_v12 = vld [vmem:[#allocation2 + $0xd8] sm:$0xff] }
  0x2e   :  { %904 = vmatpush1.bf16.msra.mxu0 %v1300_v19  ;;  %947 = vmatpush1.bf16.msra.mxu1 %v1302_v20  ;;  %v115_v32 = vld [vmem:[#allocation2 + $0x240] sm:$0xff]  ;;  %v116_v34 = vld [vmem:[#allocation2 + $0x248] sm:$0xff]  ;;  %v1307_v16 = vcombine.high %v62_v11, %v70_v12  ;;  %v77_v17 = vld [vmem:[#allocation2 + $0x110] sm:$0xff] }
  0x2f   :  { %905 = vmatprep.subr.bf16.mxu0 %v1317_v21  ;;  %948 = vmatprep.subr.bf16.mxu1 %v1319_v22  ;;  %v1349_v37 = vcombine.high %v107_v31, %v115_v32  ;;  %v1351_v38 = vcombine.high %v108_v33, %v116_v34  ;;  %v123_v39 = vld [vmem:[#allocation2 + $0x280] sm:$0xff]  ;;  %v124_v41 = vld [vmem:[#allocation2 + $0x288] sm:$0xff]  ;;  %v1348_v43 = vcombine.low %v107_v31, %v115_v32  ;;  %v85_v18 = vld [vmem:[#allocation2 + $0x150] sm:$0xff] }
  0x30   :  { %v131_v40 = vld [vmem:[#allocation2 + $0x2c0] sm:$0xff]  ;;  %v132_v42 = vld [vmem:[#allocation2 + $0x2c8] sm:$0xff]  ;;  %v1350_v44 = vcombine.low %v108_v33, %v116_v34  ;;  %v78_v19 = vld [vmem:[#allocation2 + $0x118] sm:$0xff]  ;;  %v1304_v21 = vcombine.low %v61_v8, %v69_v9  ;;  %v1306_v22 = vcombine.low %v62_v11, %v70_v12  ;;  %v1321_v23 = vcombine.high %v77_v17, %v85_v18 }
  0x31   :  { %v1365_v45 = vcombine.high %v123_v39, %v131_v40  ;;  %v1367_v46 = vcombine.high %v124_v41, %v132_v42  ;;  %v139_v47 = vld [vmem:[#allocation2 + $0x300] sm:$0xff]  ;;  %v140_v49 = vld [vmem:[#allocation2 + $0x308] sm:$0xff]  ;;  %v1364_v51 = vcombine.low %v123_v39, %v131_v40  ;;  %v1366_v52 = vcombine.low %v124_v41, %v132_v42  ;;  %v86_v20 = vld [vmem:[#allocation2 + $0x158] sm:$0xff] }
  0x32   :  { %906 = vmatpush1.bf16.msra.mxu0 %v1316_v27  ;;  %949 = vmatpush1.bf16.msra.mxu1 %v1318_v28  ;;  %v147_v48 = vld [vmem:[#allocation2 + $0x340] sm:$0xff]  ;;  %v148_v50 = vld [vmem:[#allocation2 + $0x348] sm:$0xff]  ;;  %v1323_v24 = vcombine.high %v78_v19, %v86_v20  ;;  %v93_v25 = vld [vmem:[#allocation2 + $0x190] sm:$0xff] }
  0x33   :  { %907 = vmatprep.subr.bf16.mxu0 %v1333_v29  ;;  %950 = vmatprep.subr.bf16.mxu1 %v1335_v30  ;;  %v1381_v53 = vcombine.high %v139_v47, %v147_v48  ;;  %v1383_v54 = vcombine.high %v140_v49, %v148_v50  ;;  %v155_v55 = vld [vmem:[#allocation2 + $0x380] sm:$0xff]  ;;  %v156_v57 = vld [vmem:[#allocation2 + $0x388] sm:$0xff]  ;;  %v1380_v59 = vcombine.low %v139_v47, %v147_v48  ;;  %v101_v26 = vld [vmem:[#allocation2 + $0x1d0] sm:$0xff] }
  0x34   :  { %v163_v56 = vld [vmem:[#allocation2 + $0x3c0] sm:$0xff]  ;;  %v164_v58 = vld [vmem:[#allocation2 + $0x3c8] sm:$0xff]  ;;  %v1382_v60 = vcombine.low %v140_v49, %v148_v50  ;;  %v94_v27 = vld [vmem:[#allocation2 + $0x198] sm:$0xff]  ;;  %v1320_v29 = vcombine.low %v77_v17, %v85_v18  ;;  %v1322_v30 = vcombine.low %v78_v19, %v86_v20  ;;  %v1337_v31 = vcombine.high %v93_v25, %v101_v26 }
  0x35   :  { %v1397_v61 = vcombine.high %v155_v55, %v163_v56  ;;  %v1399_v62 = vcombine.high %v156_v57, %v164_v58  ;;  %v1396_v4 = vcombine.low %v155_v55, %v163_v56  ;;  %v1398_v5 = vcombine.low %v156_v57, %v164_v58  ;;  %v1520_v10 = vld [vmem:[%s1658_s0] sm:$0xff]   ;;  %v102_v28 = vld [vmem:[#allocation2 + $0x1d8] sm:$0xff]  ;;  %v109_v33 = vld [vmem:[#allocation2 + $0x210] sm:$0xff] }
  0x36   :  { %908 = vmatpush1.bf16.msra.mxu0 %v1332_v35  ;;  %951 = vmatpush1.bf16.msra.mxu1 %v1334_v36  ;;  %v1339_v32 = vcombine.high %v94_v27, %v102_v28  ;;  %v117_v34 = vld [vmem:[#allocation2 + $0x250] sm:$0xff]  ;;  %v110_v35 = vld [vmem:[#allocation2 + $0x218] sm:$0xff]  ;;  %v47_v2 = vld [vmem:[#allocation2 + $0x20] sm:$0xff] }
  0x37   :  { %909 = vmatprep.subr.bf16.mxu0 %v1349_v37  ;;  %952 = vmatprep.subr.bf16.mxu1 %v1351_v38  ;;  %v118_v36 = vld [vmem:[#allocation2 + $0x258] sm:$0xff]  ;;  %v1336_v37 = vcombine.low %v93_v25, %v101_v26  ;;  %v1338_v38 = vcombine.low %v94_v27, %v102_v28  ;;  %v1353_v39 = vcombine.high %v109_v33, %v117_v34  ;;  %v125_v41 = vld [vmem:[#allocation2 + $0x290] sm:$0xff]  ;;  %v55_v3 = vld [vmem:[#allocation2 + $0x60] sm:$0xff] }
  0x38   :  { %v1355_v40 = vcombine.high %v110_v35, %v118_v36  ;;  %v133_v42 = vld [vmem:[#allocation2 + $0x2d0] sm:$0xff]  ;;  %v1293_v8 = vcombine.high %v47_v2, %v55_v3  ;;  %v63_v11 = vld [vmem:[#allocation2 + $0xa0] sm:$0xff] }
  0x39   :  { %v1369_v47 = vcombine.high %v125_v41, %v133_v42  ;;  %v141_v49 = vld [vmem:[#allocation2 + $0x310] sm:$0xff]  ;;  %v71_v12 = vld [vmem:[#allocation2 + $0xe0] sm:$0xff] }
  0x3a   :  { %910 = vmatpush1.bf16.msra.mxu0 %v1348_v43  ;;  %953 = vmatpush1.bf16.msra.mxu1 %v1350_v44  ;;  %v126_v43 = vld [vmem:[#allocation2 + $0x298] sm:$0xff]  ;;  %v149_v50 = vld [vmem:[#allocation2 + $0x350] sm:$0xff]  ;;  %v1309_v17 = vcombine.high %v63_v11, %v71_v12  ;;  %v79_v19 = vld [vmem:[#allocation2 + $0x120] sm:$0xff] }
  0x3b   :  { %911 = vmatprep.subr.bf16.mxu0 %v1365_v45  ;;  %954 = vmatprep.subr.bf16.mxu1 %v1367_v46  ;;  %v134_v44 = vld [vmem:[#allocation2 + $0x2d8] sm:$0xff]  ;;  %v1352_v45 = vcombine.low %v109_v33, %v117_v34  ;;  %v1354_v46 = vcombine.low %v110_v35, %v118_v36  ;;  %v1385_v55 = vcombine.high %v141_v49, %v149_v50  ;;  %v157_v57 = vld [vmem:[#allocation2 + $0x390] sm:$0xff]  ;;  %v87_v20 = vld [vmem:[#allocation2 + $0x160] sm:$0xff] }
  0x3c   :  { %v1371_v48 = vcombine.high %v126_v43, %v134_v44  ;;  %v165_v58 = vld [vmem:[#allocation2 + $0x3d0] sm:$0xff]  ;;  %v1325_v25 = vcombine.high %v79_v19, %v87_v20  ;;  %v95_v27 = vld [vmem:[#allocation2 + $0x1a0] sm:$0xff] }
  0x3d   :  { %v1401_v63 = vcombine.high %v157_v57, %v165_v58  ;;  %v103_v28 = vld [vmem:[#allocation2 + $0x1e0] sm:$0xff] }
  0x3e   :  { %912 = vmatpush1.bf16.msra.mxu0 %v1364_v51  ;;  %955 = vmatpush1.bf16.msra.mxu1 %v1366_v52  ;;  %v142_v51 = vld [vmem:[#allocation2 + $0x318] sm:$0xff]  ;;  %v1341_v33 = vcombine.high %v95_v27, %v103_v28  ;;  %v111_v35 = vld [vmem:[#allocation2 + $0x220] sm:$0xff] }
  0x3f   :  { %913 = vmatprep.subr.bf16.mxu0 %v1381_v53  ;;  %956 = vmatprep.subr.bf16.mxu1 %v1383_v54  ;;  %v150_v52 = vld [vmem:[#allocation2 + $0x358] sm:$0xff]  ;;  %v1368_v53 = vcombine.low %v125_v41, %v133_v42  ;;  %v1370_v54 = vcombine.low %v126_v43, %v134_v44  ;;  %v119_v36 = vld [vmem:[#allocation2 + $0x260] sm:$0xff] }
  0x40   :  { %v1387_v56 = vcombine.high %v142_v51, %v150_v52  ;;  %v1357_v41 = vcombine.high %v111_v35, %v119_v36  ;;  %v127_v43 = vld [vmem:[#allocation2 + $0x2a0] sm:$0xff] }
  0x41   :  { %v135_v44 = vld [vmem:[#allocation2 + $0x2e0] sm:$0xff] }
  0x42   :  { %914 = vmatpush1.bf16.msra.mxu0 %v1380_v59  ;;  %957 = vmatpush1.bf16.msra.mxu1 %v1382_v60  ;;  %v158_v59 = vld [vmem:[#allocation2 + $0x398] sm:$0xff] }
  0x43   :  { %915 = vmatprep.subr.bf16.mxu0 %v1397_v61  ;;  %958 = vmatprep.subr.bf16.mxu1 %v1399_v62  ;;  %v166_v60 = vld [vmem:[#allocation2 + $0x3d8] sm:$0xff]  ;;  %v1384_v61 = vcombine.low %v141_v49, %v149_v50  ;;  %v1386_v62 = vcombine.low %v142_v51, %v150_v52  ;;  %v1373_v49 = vcombine.high %v127_v43, %v135_v44  ;;  %v143_v51 = vld [vmem:[#allocation2 + $0x320] sm:$0xff] }
  0x44   :  { %v1403_v1 = vcombine.high %v158_v59, %v166_v60  ;;  %v151_v52 = vld [vmem:[#allocation2 + $0x360] sm:$0xff] }
  0x46   :  { %916 = vmatpush1.bf16.msra.mxu0 %v1396_v4  ;;  %959 = vmatpush1.bf16.msra.mxu1 %v1398_v5  ;;  %v48_v4 = vld [vmem:[#allocation2 + $0x28] sm:$0xff] }
  0x47   :  { %987 = vmatprep.subr.bf16.mxu0 %v1289_v6  ;;  %1030 = vmatprep.subr.bf16.mxu1 %v1291_v7  ;;  %v56_v5 = vld [vmem:[#allocation2 + $0x68] sm:$0xff]  ;;  %v1400_v6 = vcombine.low %v157_v57, %v165_v58  ;;  %v1402_v7 = vcombine.low %v158_v59, %v166_v60  ;;  %v1389_v57 = vcombine.high %v143_v51, %v151_v52  ;;  %v159_v59 = vld [vmem:[#allocation2 + $0x3a0] sm:$0xff] }
  0x48   :  { %v1295_v9 = vcombine.high %v48_v4, %v56_v5  ;;  %v167_v60 = vld [vmem:[#allocation2 + $0x3e0] sm:$0xff] }
  0x49   :  { %934 = vmatmul.mubr.bf16.vlgmr.msra.gmra.mrb[0].mxu0 %v1520_v10  ;;  %977 = vmatmul.mubr.bf16.vlgmr.msra.gmra.mrb[0].mxu1 %v1520_v10 }
  0x4a   :  { %988 = vmatpush1.bf16.msra.mxu0 %v1288_v13  ;;  %1031 = vmatpush1.bf16.msra.mxu1 %v1290_v14  ;;  %v64_v13 = vld [vmem:[#allocation2 + $0xa8] sm:$0xff] }
  0x4b   :  { %989 = vmatprep.subr.bf16.mxu0 %v1305_v15  ;;  %1032 = vmatprep.subr.bf16.mxu1 %v1307_v16  ;;  %v72_v14 = vld [vmem:[#allocation2 + $0xe8] sm:$0xff]  ;;  %v1292_v15 = vcombine.low %v47_v2, %v55_v3  ;;  %v1294_v16 = vcombine.low %v48_v4, %v56_v5  ;;  %v1405_v2 = vcombine.high %v159_v59, %v167_v60  ;;  %v49_v4 = vld [vmem:[#allocation2 + $0x30] sm:$0xff] }
  0x4c   :  { %1019 = vmatprep.mubr.bf16.mxu0 %v1470_v0  ;;  %1062 = vmatprep.mubr.bf16.mxu1 %v1470_v0  ;;  %v1311_v18 = vcombine.high %v64_v13, %v72_v14  ;;  %v57_v5 = vld [vmem:[#allocation2 + $0x70] sm:$0xff] }
  0x4e   :  { %990 = vmatpush1.bf16.msra.mxu0 %v1304_v21  ;;  %1033 = vmatpush1.bf16.msra.mxu1 %v1306_v22  ;;  %v80_v21 = vld [vmem:[#allocation2 + $0x128] sm:$0xff] }
  0x4f   :  { %991 = vmatprep.subr.bf16.mxu0 %v1321_v23  ;;  %1034 = vmatprep.subr.bf16.mxu1 %v1323_v24  ;;  %v88_v22 = vld [vmem:[#allocation2 + $0x168] sm:$0xff]  ;;  %v1308_v23 = vcombine.low %v63_v11, %v71_v12  ;;  %v1310_v24 = vcombine.low %v64_v13, %v72_v14  ;;  %v1297_v11 = vcombine.high %v49_v4, %v57_v5  ;;  %v65_v13 = vld [vmem:[#allocation2 + $0xb0] sm:$0xff] }
  0x50   :  { %v1327_v26 = vcombine.high %v80_v21, %v88_v22  ;;  %v73_v14 = vld [vmem:[#allocation2 + $0xf0] sm:$0xff] }
  0x52   :  { %992 = vmatpush1.bf16.msra.mxu0 %v1320_v29  ;;  %1035 = vmatpush1.bf16.msra.mxu1 %v1322_v30  ;;  %v96_v29 = vld [vmem:[#allocation2 + $0x1a8] sm:$0xff] }
  0x53   :  { %993 = vmatprep.subr.bf16.mxu0 %v1337_v31  ;;  %1036 = vmatprep.subr.bf16.mxu1 %v1339_v32  ;;  %v104_v30 = vld [vmem:[#allocation2 + $0x1e8] sm:$0xff]  ;;  %v1324_v31 = vcombine.low %v79_v19, %v87_v20  ;;  %v1326_v32 = vcombine.low %v80_v21, %v88_v22  ;;  %v1313_v19 = vcombine.high %v65_v13, %v73_v14  ;;  %v81_v21 = vld [vmem:[#allocation2 + $0x130] sm:$0xff] }
  0x54   :  { %v1343_v34 = vcombine.high %v96_v29, %v104_v30  ;;  %v89_v22 = vld [vmem:[#allocation2 + $0x170] sm:$0xff] }
  0x56   :  { %994 = vmatpush1.bf16.msra.mxu0 %v1336_v37  ;;  %1037 = vmatpush1.bf16.msra.mxu1 %v1338_v38  ;;  %v112_v37 = vld [vmem:[#allocation2 + $0x228] sm:$0xff] }
  0x57   :  { %995 = vmatprep.subr.bf16.mxu0 %v1353_v39  ;;  %1038 = vmatprep.subr.bf16.mxu1 %v1355_v40  ;;  %v120_v38 = vld [vmem:[#allocation2 + $0x268] sm:$0xff]  ;;  %v1340_v39 = vcombine.low %v95_v27, %v103_v28  ;;  %v1342_v40 = vcombine.low %v96_v29, %v104_v30  ;;  %v1329_v27 = vcombine.high %v81_v21, %v89_v22  ;;  %v97_v29 = vld [vmem:[#allocation2 + $0x1b0] sm:$0xff] }
  0x58   :  { %v1359_v42 = vcombine.high %v112_v37, %v120_v38  ;;  %v105_v30 = vld [vmem:[#allocation2 + $0x1f0] sm:$0xff] }
  0x5a   :  { %996 = vmatpush1.bf16.msra.mxu0 %v1352_v45  ;;  %1039 = vmatpush1.bf16.msra.mxu1 %v1354_v46  ;;  %v128_v45 = vld [vmem:[#allocation2 + $0x2a8] sm:$0xff] }
  0x5b   :  { %997 = vmatprep.subr.bf16.mxu0 %v1369_v47  ;;  %1040 = vmatprep.subr.bf16.mxu1 %v1371_v48  ;;  %v136_v46 = vld [vmem:[#allocation2 + $0x2e8] sm:$0xff]  ;;  %v1356_v47 = vcombine.low %v111_v35, %v119_v36  ;;  %v1358_v48 = vcombine.low %v112_v37, %v120_v38  ;;  %v1345_v35 = vcombine.high %v97_v29, %v105_v30  ;;  %v113_v37 = vld [vmem:[#allocation2 + $0x230] sm:$0xff] }
  0x5c   :  { %v1375_v50 = vcombine.high %v128_v45, %v136_v46  ;;  %v121_v38 = vld [vmem:[#allocation2 + $0x270] sm:$0xff] }
  0x5e   :  { %998 = vmatpush1.bf16.msra.mxu0 %v1368_v53  ;;  %1041 = vmatpush1.bf16.msra.mxu1 %v1370_v54  ;;  %v144_v53 = vld [vmem:[#allocation2 + $0x328] sm:$0xff] }
  0x5f   :  { %999 = vmatprep.subr.bf16.mxu0 %v1385_v55  ;;  %1042 = vmatprep.subr.bf16.mxu1 %v1387_v56  ;;  %v152_v54 = vld [vmem:[#allocation2 + $0x368] sm:$0xff]  ;;  %v1372_v55 = vcombine.low %v127_v43, %v135_v44  ;;  %v1374_v56 = vcombine.low %v128_v45, %v136_v46  ;;  %v1361_v43 = vcombine.high %v113_v37, %v121_v38  ;;  %v129_v44 = vld [vmem:[#allocation2 + $0x2b0] sm:$0xff]  ;;  %v130_v46 = vld [vmem:[#allocation2 + $0x2b8] sm:$0xff] }
  0x60   :  { %v1391_v58 = vcombine.high %v144_v53, %v152_v54  ;;  %v137_v45 = vld [vmem:[#allocation2 + $0x2f0] sm:$0xff] }
  0x62   :  { %1000 = vmatpush1.bf16.msra.mxu0 %v1384_v61  ;;  %1043 = vmatpush1.bf16.msra.mxu1 %v1386_v62  ;;  %v160_v61 = vld [vmem:[#allocation2 + $0x3a8] sm:$0xff] }
  0x63   :  { %1001 = vmatprep.subr.bf16.mxu0 %v1401_v63  ;;  %1044 = vmatprep.subr.bf16.mxu1 %v1403_v1  ;;  %v168_v62 = vld [vmem:[#allocation2 + $0x3e8] sm:$0xff]  ;;  %v1388_v63 = vcombine.low %v143_v51, %v151_v52  ;;  %v1390_v1 = vcombine.low %v144_v53, %v152_v54  ;;  %v145_v52 = vld [vmem:[#allocation2 + $0x330] sm:$0xff]  ;;  %v146_v54 = vld [vmem:[#allocation2 + $0x338] sm:$0xff] }
  0x64   :  { %v1407_v3 = vcombine.high %v160_v61, %v168_v62  ;;  %v153_v53 = vld [vmem:[#allocation2 + $0x370] sm:$0xff] }
  0x66   :  { %1002 = vmatpush1.bf16.msra.mxu0 %v1400_v6  ;;  %1045 = vmatpush1.bf16.msra.mxu1 %v1402_v7  ;;  %v50_v6 = vld [vmem:[#allocation2 + $0x38] sm:$0xff] }
  0x67   :  { %1073 = vmatprep.subr.bf16.mxu0 %v1293_v8  ;;  %1116 = vmatprep.subr.bf16.mxu1 %v1295_v9  ;;  %v58_v7 = vld [vmem:[#allocation2 + $0x78] sm:$0xff]  ;;  %v1404_v8 = vcombine.low %v159_v59, %v167_v60  ;;  %v1406_v9 = vcombine.low %v160_v61, %v168_v62  ;;  %v161_v60 = vld [vmem:[#allocation2 + $0x3b0] sm:$0xff] }
  0x68   :  { %v1299_v12 = vcombine.high %v50_v6, %v58_v7  ;;  %v169_v61 = vld [vmem:[#allocation2 + $0x3f0] sm:$0xff]  ;;  %v162_v62 = vld [vmem:[#allocation2 + $0x3b8] sm:$0xff] }
  0x69   :  { %1020 = vmatmul.mubr.bf16.vlgmr.msra.gmra.mrb[4].mxu0 %v1520_v10  ;;  %1063 = vmatmul.mubr.bf16.vlgmr.msra.gmra.mrb[4].mxu1 %v1520_v10 }
  0x6a   :  { %1074 = vmatpush1.bf16.msra.mxu0 %v1292_v15  ;;  %1117 = vmatpush1.bf16.msra.mxu1 %v1294_v16  ;;  %v66_v15 = vld [vmem:[#allocation2 + $0xb8] sm:$0xff] }
  0x6b   :  { %1075 = vmatprep.subr.bf16.mxu0 %v1309_v17  ;;  %1118 = vmatprep.subr.bf16.mxu1 %v1311_v18  ;;  %v74_v16 = vld [vmem:[#allocation2 + $0xf8] sm:$0xff]  ;;  %v1296_v17 = vcombine.low %v49_v4, %v57_v5  ;;  %v1298_v18 = vcombine.low %v50_v6, %v58_v7  ;;  %v1408_v5 = vcombine.low %v161_v60, %v169_v61  ;;  %v175_v7 = vlaneseq }
  0x6c   :  { %1105 = vmatprep.mubr.bf16.mxu0 %v1470_v0  ;;  %1148 = vmatprep.mubr.bf16.mxu1 %v1470_v0  ;;  %v1315_v20 = vcombine.high %v66_v15, %v74_v16 }
  0x6e   :  { %1076 = vmatpush1.bf16.msra.mxu0 %v1308_v23  ;;  %1119 = vmatpush1.bf16.msra.mxu1 %v1310_v24  ;;  %v82_v23 = vld [vmem:[#allocation2 + $0x138] sm:$0xff] }
  0x6f   :  { %1077 = vmatprep.subr.bf16.mxu0 %v1325_v25  ;;  %1120 = vmatprep.subr.bf16.mxu1 %v1327_v26  ;;  %v90_v24 = vld [vmem:[#allocation2 + $0x178] sm:$0xff]  ;;  %v1312_v25 = vcombine.low %v65_v13, %v73_v14  ;;  %v1314_v26 = vcombine.low %v66_v15, %v74_v16 }
  0x70   :  { %v1331_v28 = vcombine.high %v82_v23, %v90_v24 }
  0x72   :  { %1078 = vmatpush1.bf16.msra.mxu0 %v1324_v31  ;;  %1121 = vmatpush1.bf16.msra.mxu1 %v1326_v32  ;;  %v98_v31 = vld [vmem:[#allocation2 + $0x1b8] sm:$0xff] }
  0x73   :  { %1079 = vmatprep.subr.bf16.mxu0 %v1341_v33  ;;  %1122 = vmatprep.subr.bf16.mxu1 %v1343_v34  ;;  %v106_v32 = vld [vmem:[#allocation2 + $0x1f8] sm:$0xff]  ;;  %v1328_v33 = vcombine.low %v81_v21, %v89_v22  ;;  %v1330_v34 = vcombine.low %v82_v23, %v90_v24 }
  0x74   :  { %v1347_v36 = vcombine.high %v98_v31, %v106_v32 }
  0x76   :  { %1080 = vmatpush1.bf16.msra.mxu0 %v1340_v39  ;;  %1123 = vmatpush1.bf16.msra.mxu1 %v1342_v40  ;;  %v114_v39 = vld [vmem:[#allocation2 + $0x238] sm:$0xff] }
  0x77   :  { %1081 = vmatprep.subr.bf16.mxu0 %v1357_v41  ;;  %1124 = vmatprep.subr.bf16.mxu1 %v1359_v42  ;;  %v122_v40 = vld [vmem:[#allocation2 + $0x278] sm:$0xff]  ;;  %v1344_v41 = vcombine.low %v97_v29, %v105_v30  ;;  %v1346_v42 = vcombine.low %v98_v31, %v106_v32 }
  0x7a   :  { %1082 = vmatpush1.bf16.msra.mxu0 %v1356_v47  ;;  %1125 = vmatpush1.bf16.msra.mxu1 %v1358_v48  ;;  %v138_v47 = vld [vmem:[#allocation2 + $0x2f8] sm:$0xff]  ;;  %v1360_v48 = vcombine.low %v113_v37, %v121_v38 }
  0x7b   :  { %1083 = vmatprep.subr.bf16.mxu0 %v1373_v49  ;;  %1126 = vmatprep.subr.bf16.mxu1 %v1375_v50  ;;  %v1362_v49 = vcombine.low %v114_v39, %v122_v40  ;;  %v1377_v50 = vcombine.high %v129_v44, %v137_v45  ;;  %v1379_v51 = vcombine.high %v130_v46, %v138_v47 }
  0x7e   :  { %1084 = vmatpush1.bf16.msra.mxu0 %v1372_v55  ;;  %1127 = vmatpush1.bf16.msra.mxu1 %v1374_v56  ;;  %v154_v55 = vld [vmem:[#allocation2 + $0x378] sm:$0xff]  ;;  %v1376_v56 = vcombine.low %v129_v44, %v137_v45 }
  0x7f   :  { %1085 = vmatprep.subr.bf16.mxu0 %v1389_v57  ;;  %1128 = vmatprep.subr.bf16.mxu1 %v1391_v58  ;;  %v1378_v57 = vcombine.low %v130_v46, %v138_v47  ;;  %v1393_v58 = vcombine.high %v145_v52, %v153_v53  ;;  %v1395_v59 = vcombine.high %v146_v54, %v154_v55 }
  0x82   :  { %1086 = vmatpush1.bf16.msra.mxu0 %v1388_v63  ;;  %1129 = vmatpush1.bf16.msra.mxu1 %v1390_v1  ;;  %v170_v63 = vld [vmem:[#allocation2 + $0x3f8] sm:$0xff]  ;;  %v1392_v1 = vcombine.low %v145_v52, %v153_v53 }
  0x83   :  { %1087 = vmatprep.subr.bf16.mxu0 %v1405_v2  ;;  %1130 = vmatprep.subr.bf16.mxu1 %v1407_v3  ;;  %v1394_v2 = vcombine.low %v146_v54, %v154_v55  ;;  %v1409_v3 = vcombine.high %v161_v60, %v169_v61  ;;  %v1411_v4 = vcombine.high %v162_v62, %v170_v63 }
  0x84   :  { %v1410_v6 = vcombine.low %v162_v62, %v170_v63 }
  0x86   :  { %1088 = vmatpush1.bf16.msra.mxu0 %v1404_v8  ;;  %1131 = vmatpush1.bf16.msra.mxu1 %v1406_v9  ;;  %v1536_v8 = vshrl.u32 %v175_v7, 7 }
  0x87   :  { %1159 = vmatprep.subr.bf16.mxu0 %v1297_v11  ;;  %1202 = vmatprep.subr.bf16.mxu1 %v1299_v12  ;;  %v171_v11 = vld [vmem:[#allocation4] sm:$0xff] }
  0x88   :  { %v177_v9 = vsub.s32 0, %v1536_v8  ;;  %v185_v12 = vsub.s32 2, %v1536_v8  ;;  %v181_v13 = vsub.s32 1, %v1536_v8  ;;  %v189_v14 = vsub.s32 3, %v1536_v8 }
  0x89   :  { %1106 = vmatmul.mubr.bf16.vlgmr.msra.gmra.mrb[8].mxu0 %v1520_v10  ;;  %1149 = vmatmul.mubr.bf16.vlgmr.msra.gmra.mrb[8].mxu1 %v1520_v10  ;;  %v205_v37 = vsub.s32 7, %v1536_v8 }
  0x8a   :  { %1160 = vmatpush1.bf16.msra.mxu0 %v1296_v17  ;;  %1203 = vmatpush1.bf16.msra.mxu1 %v1298_v18  ;;  %v178_v15 = vrot.slane %v171_v11, %v177_v9  ;;  %v186_v16 = vrot.slane %v171_v11, %v185_v12  ;;  %v190_v17 = vrot.slane %v171_v11, %v189_v14 }
  0x8b   :  { %1161 = vmatprep.subr.bf16.mxu0 %v1313_v19  ;;  %1204 = vmatprep.subr.bf16.mxu1 %v1315_v20 }
  0x8c   :  { %1191 = vmatprep.mubr.bf16.mxu0 %v1470_v0  ;;  %1234 = vmatprep.mubr.bf16.mxu1 %v1470_v0  ;;  %v1363_v0 = vcombine.high %v114_v39, %v122_v40 }
  0x8e   :  { %1162 = vmatpush1.bf16.msra.mxu0 %v1312_v25  ;;  %1205 = vmatpush1.bf16.msra.mxu1 %v1314_v26 }
  0x8f   :  { %1163 = vmatprep.subr.bf16.mxu0 %v1329_v27  ;;  %1206 = vmatprep.subr.bf16.mxu1 %v1331_v28 }
  0x92   :  { %1164 = vmatpush1.bf16.msra.mxu0 %v1328_v33  ;;  %1207 = vmatpush1.bf16.msra.mxu1 %v1330_v34  ;;  %v193_v34 = vsub.s32 4, %v1536_v8 }
  0x93   :  { %1165 = vmatprep.subr.bf16.mxu0 %v1345_v35  ;;  %1208 = vmatprep.subr.bf16.mxu1 %v1347_v36  ;;  %v201_v35 = vsub.s32 6, %v1536_v8  ;;  %v197_v36 = vsub.s32 5, %v1536_v8 }
  0x94   :  { %v194_v38 = vrot.slane %v171_v11, %v193_v34 }
  0x95   :  { %v202_v39 = vrot.slane %v171_v11, %v201_v35  ;;  %v198_v40 = vrot.slane %v171_v11, %v197_v36 }
  0x96   :  { %1166 = vmatpush1.bf16.msra.mxu0 %v1344_v41  ;;  %1209 = vmatpush1.bf16.msra.mxu1 %v1346_v42  ;;  %v206_v41 = vrot.slane %v171_v11, %v205_v37 }
  0x97   :  { %1167 = vmatprep.subr.bf16.mxu0 %v1361_v43  ;;  %1210 = vmatprep.subr.bf16.mxu1 %v1363_v0 }
  0x9a   :  { %1168 = vmatpush1.bf16.msra.mxu0 %v1360_v48  ;;  %1211 = vmatpush1.bf16.msra.mxu1 %v1362_v49 }
  0x9b   :  { %1169 = vmatprep.subr.bf16.mxu0 %v1377_v50  ;;  %1212 = vmatprep.subr.bf16.mxu1 %v1379_v51 }
  0x9e   :  { %1170 = vmatpush1.bf16.msra.mxu0 %v1376_v56  ;;  %1213 = vmatpush1.bf16.msra.mxu1 %v1378_v57  ;;  %v172_v57 = vld [vmem:[#allocation4 + $0x8] sm:$0xff] }
  0x9f   :  { %1171 = vmatprep.subr.bf16.mxu0 %v1393_v58  ;;  %1214 = vmatprep.subr.bf16.mxu1 %v1395_v59  ;;  %v210_v58 = vrot.slane %v172_v57, %v177_v9  ;;  %v218_v59 = vrot.slane %v172_v57, %v185_v12  ;;  %v214_v60 = vrot.slane %v172_v57, %v181_v13 }
  0xa0   :  { %v222_v61 = vrot.slane %v172_v57, %v189_v14 }
  0xa2   :  { %1172 = vmatpush1.bf16.msra.mxu0 %v1392_v1  ;;  %1215 = vmatpush1.bf16.msra.mxu1 %v1394_v2 }
  0xa3   :  { %1173 = vmatprep.subr.bf16.mxu0 %v1409_v3  ;;  %1216 = vmatprep.subr.bf16.mxu1 %v1411_v4 }
  0xa6   :  { %1174 = vmatpush1.bf16.msra.mxu0 %v1408_v5  ;;  %1217 = vmatpush1.bf16.msra.mxu1 %v1410_v6 }
  0xa9   :  { %1192 = vmatmul.mubr.bf16.vlgmr.msra.gmra.mrb[12].mxu0 %v1520_v10  ;;  %1235 = vmatmul.mubr.bf16.vlgmr.msra.gmra.mrb[12].mxu1 %v1520_v10  ;;  %v182_v10 = vrot.slane %v171_v11, %v181_v13 }
 0x11c   :  { %v935_v18 = vpop.f32.mrb[0].mxu0  ;;  %v978_v20 = vpop.f32.mrb[0].mxu1 }
 0x11d   :  { %v936_v19 = vadd.f32 %v935_v18, %v178_v15  ;;  %v937_v21 = vpop.f32.mrb[1].mxu0  ;;  %v979_v22 = vadd.f32 %v978_v20, %v186_v16  ;;  %v980_v24 = vpop.f32.mrb[1].mxu1  ;;  %v238_v18 = vrot.slane %v172_v57, %v205_v37 }
 0x11e   :  { %v938_v23 = vadd.f32 %v937_v21, %v182_v10  ;;  %v939_v25 = vpop.f32.mrb[2].mxu0  ;;  %v981_v26 = vadd.f32 %v980_v24, %v190_v17  ;;  %v982_v28 = vpop.f32.mrb[2].mxu1 }
 0x11f   :  { %1245 = vst [vmem:[%s1661_s3] sm:$0xff] %v936_v19  ;;  %v940_v27 = vadd.f32 %v939_v25, %v178_v15  ;;  %v941_v29 = vpop.f32.mrb[3].mxu0  ;;  %1247 = vst [vmem:[%s1661_s3 + $0x10] sm:$0xff] %v979_v22  ;;  %v983_v30 = vadd.f32 %v982_v28, %v186_v16  ;;  %v984_v32 = vpop.f32.mrb[3].mxu1  ;;  %v226_v16 = vrot.slane %v172_v57, %v193_v34 }
 0x120   :  { %1246 = vst [vmem:[%s1661_s3 + $0x8] sm:$0xff] %v938_v23  ;;  %v942_v31 = vadd.f32 %v941_v29, %v182_v10  ;;  %1248 = vst [vmem:[%s1661_s3 + $0x18] sm:$0xff] %v981_v26  ;;  %v985_v33 = vadd.f32 %v984_v32, %v190_v17  ;;  %v234_v10 = vrot.slane %v172_v57, %v201_v35 }
 0x121   :  { %1261 = vst [vmem:[%s1661_s3 + $0x80] sm:$0xff] %v940_v27  ;;  %1263 = vst [vmem:[%s1661_s3 + $0x90] sm:$0xff] %v983_v30  ;;  %v230_v17 = vrot.slane %v172_v57, %v197_v36 }
 0x122   :  { %1262 = vst [vmem:[%s1661_s3 + $0x88] sm:$0xff] %v942_v31  ;;  %1264 = vst [vmem:[%s1661_s3 + $0x98] sm:$0xff] %v985_v33 }
 0x13c   :  { %v1021_v42 = vpop.f32.mrb[4].mxu0  ;;  %v1064_v0 = vpop.f32.mrb[4].mxu1 }
 0x13d   :  { %v1022_v43 = vadd.f32 %v1021_v42, %v194_v38  ;;  %v1023_v44 = vpop.f32.mrb[5].mxu0  ;;  %v1065_v45 = vadd.f32 %v1064_v0, %v202_v39  ;;  %v1066_v47 = vpop.f32.mrb[5].mxu1 }
 0x13e   :  { %v1024_v46 = vadd.f32 %v1023_v44, %v198_v40  ;;  %v1025_v48 = vpop.f32.mrb[6].mxu0  ;;  %v1067_v49 = vadd.f32 %v1066_v47, %v206_v41  ;;  %v1068_v51 = vpop.f32.mrb[6].mxu1 }
 0x13f   :  { %1249 = vst [vmem:[%s1661_s3 + $0x20] sm:$0xff] %v1022_v43  ;;  %v1026_v50 = vadd.f32 %v1025_v48, %v194_v38  ;;  %v1027_v52 = vpop.f32.mrb[7].mxu0  ;;  %1251 = vst [vmem:[%s1661_s3 + $0x30] sm:$0xff] %v1065_v45  ;;  %v1069_v53 = vadd.f32 %v1068_v51, %v202_v39  ;;  %v1070_v55 = vpop.f32.mrb[7].mxu1 }
 0x140   :  { %1250 = vst [vmem:[%s1661_s3 + $0x28] sm:$0xff] %v1024_v46  ;;  %v1028_v54 = vadd.f32 %v1027_v52, %v198_v40  ;;  %1252 = vst [vmem:[%s1661_s3 + $0x38] sm:$0xff] %v1067_v49  ;;  %v1071_v56 = vadd.f32 %v1070_v55, %v206_v41 }
 0x141   :  { %1265 = vst [vmem:[%s1661_s3 + $0xa0] sm:$0xff] %v1026_v50  ;;  %1267 = vst [vmem:[%s1661_s3 + $0xb0] sm:$0xff] %v1069_v53 }
 0x142   :  { %1266 = vst [vmem:[%s1661_s3 + $0xa8] sm:$0xff] %v1028_v54  ;;  %1268 = vst [vmem:[%s1661_s3 + $0xb8] sm:$0xff] %v1071_v56 }
 0x15c   :  { %v1107_v62 = vpop.f32.mrb[8].mxu0  ;;  %v1150_v1 = vpop.f32.mrb[8].mxu1 }
 0x15d   :  { %v1108_v63 = vadd.f32 %v1107_v62, %v210_v58  ;;  %v1109_v2 = vpop.f32.mrb[9].mxu0  ;;  %v1151_v3 = vadd.f32 %v1150_v1, %v218_v59  ;;  %v1152_v5 = vpop.f32.mrb[9].mxu1 }
 0x15e   :  { %v1110_v4 = vadd.f32 %v1109_v2, %v214_v60  ;;  %v1111_v6 = vpop.f32.mrb[10].mxu0  ;;  %v1153_v7 = vadd.f32 %v1152_v5, %v222_v61  ;;  %v1154_v11 = vpop.f32.mrb[10].mxu1 }
 0x15f   :  { %1253 = vst [vmem:[%s1661_s3 + $0x40] sm:$0xff] %v1108_v63  ;;  %v1112_v9 = vadd.f32 %v1111_v6, %v210_v58  ;;  %v1113_v12 = vpop.f32.mrb[11].mxu0  ;;  %1255 = vst [vmem:[%s1661_s3 + $0x50] sm:$0xff] %v1151_v3  ;;  %v1155_v8 = vadd.f32 %v1154_v11, %v218_v59  ;;  %v1156_v14 = vpop.f32.mrb[11].mxu1 }
 0x160   :  { %1254 = vst [vmem:[%s1661_s3 + $0x48] sm:$0xff] %v1110_v4  ;;  %v1114_v13 = vadd.f32 %v1113_v12, %v214_v60  ;;  %1256 = vst [vmem:[%s1661_s3 + $0x58] sm:$0xff] %v1153_v7  ;;  %v1157_v15 = vadd.f32 %v1156_v14, %v222_v61 }
 0x161   :  { %1269 = vst [vmem:[%s1661_s3 + $0xc0] sm:$0xff] %v1112_v9  ;;  %1271 = vst [vmem:[%s1661_s3 + $0xd0] sm:$0xff] %v1155_v8 }
 0x162   :  { %1270 = vst [vmem:[%s1661_s3 + $0xc8] sm:$0xff] %v1114_v13  ;;  %1272 = vst [vmem:[%s1661_s3 + $0xd8] sm:$0xff] %v1157_v15 }
 0x17c   :  { %v1193_v19 = vpop.f32.mrb[12].mxu0  ;;  %v1236_v21 = vpop.f32.mrb[12].mxu1 }
 0x17d   :  { %v1194_v20 = vadd.f32 %v1193_v19, %v226_v16  ;;  %v1195_v22 = vpop.f32.mrb[13].mxu0  ;;  %v1237_v23 = vadd.f32 %v1236_v21, %v234_v10  ;;  %v1238_v25 = vpop.f32.mrb[13].mxu1 }
 0x17e   :  { %v1196_v24 = vadd.f32 %v1195_v22, %v230_v17  ;;  %v1197_v26 = vpop.f32.mrb[14].mxu0  ;;  %v1239_v27 = vadd.f32 %v1238_v25, %v238_v18  ;;  %v1240_v29 = vpop.f32.mrb[14].mxu1 }
 0x17f   :  { %1257 = vst [vmem:[%s1661_s3 + $0x60] sm:$0xff] %v1194_v20  ;;  %v1198_v28 = vadd.f32 %v1197_v26, %v226_v16  ;;  %v1199_v30 = vpop.f32.mrb[15].mxu0  ;;  %1259 = vst [vmem:[%s1661_s3 + $0x70] sm:$0xff] %v1237_v23  ;;  %v1241_v31 = vadd.f32 %v1240_v29, %v234_v10  ;;  %v1242_v33 = vpop.f32.mrb[15].mxu1 }
 0x180   :  { %1258 = vst [vmem:[%s1661_s3 + $0x68] sm:$0xff] %v1196_v24  ;;  %v1200_v32 = vadd.f32 %v1199_v30, %v230_v17  ;;  %1260 = vst [vmem:[%s1661_s3 + $0x78] sm:$0xff] %v1239_v27  ;;  %v1243_v34 = vadd.f32 %v1242_v33, %v238_v18 }
 0x181   :  { %1273 = vst [vmem:[%s1661_s3 + $0xe0] sm:$0xff] %v1198_v28  ;;  %1275 = vst [vmem:[%s1661_s3 + $0xf0] sm:$0xff] %v1241_v31 }
 0x182   :  { %1274 = vst [vmem:[%s1661_s3 + $0xe8] sm:$0xff] %v1200_v32  ;;  %1276 = vst [vmem:[%s1661_s3 + $0xf8] sm:$0xff] %v1243_v34 }
 0x183   :  { %1281 = vsyncpa [#allocation3], 1 }
 0x184   :  { %1282 = vsyncpa [#allocation5], 1 }

// kernel: seq2seq_forward.9
= control target key start
LH: loop header
LB: loop body
LE: loop exit
PB: predicated region body
PF: predicated region fallthrough
CT: control target
= control target key end

     0   :  { %13 = vsyncpa [#allocation7], 0  ;;  %s3374_s0 = inlined_call_operand.vmem [shape: f32[8,2,1024], index: 0, kind: input, shape index: {}]   ;;  %s3375_s1 = inlined_call_operand.vmem [shape: f32[8,2,1024], index: 1, kind: input, shape index: {}]   ;;  %s3376_s2 = inlined_call_operand.hbm [shape: bf16[256,1024], index: 2, kind: input, shape index: {}]   ;;  %s3377_s3 = inlined_call_operand.hbm [shape: bf16[256,1024], index: 3, kind: input, shape index: {}]   ;;  %s3378_s4 = inlined_call_operand.vmem [shape: f32[8,2,256], index: 4, kind: output, shape index: {0}]   ;;  %s3379_s5 = inlined_call_operand.vmem [shape: f32[8,2,256], index: 5, kind: output, shape index: {1}]   ;;  %s3380_s6 = inlined_call_operand.hbm [shape: f32[2,2,256], index: 6, kind: output, shape index: {2}]   ;;  %s3381_s7 = inlined_call_operand.hbm [shape: f32[2,2,256], index: 7, kind: output, shape index: {3}]  }
   0x1   :  { %14 = vsyncpa [#allocation10], 0 }
   0x2   :  { %15 = vsyncpa [#allocation8], 0 }
   0x3   :  { %16 = vsyncpa [#allocation13], 0  ;;  %s3155_s24 = smov 0  }
   0x4 LB: > { %s3161_s25 = sadd.s32 4294967295, %s3103_s24   ;;  %p2601_p0 = scmp.ge.s32.totalorder %s3103_s24, 1  ;;  %s3103_s24 = sphi %s3155_s24, %s22_s24  }
   0x5   : > { %p219_p1 = scmp.lt.s32.totalorder %s3103_s24, 9  ;;  %s3105_s26 = smov [#allocation6]  }
   0x6   : > { %s231_s27 = sshll.u32 %s3105_s26, 4  ;;  %p3382_p4 = scmp.eq.s32.totalorder %s3161_s25, 0  ;;  %s232_s27 = int_to_ptr.vmem [resolvable:$true] %s231_s27 }
   0x7   : > { %p3166_p3 = pnand %p2601_p0, %p219_p1  ;;  %s3106_s29 = smov [#allocation9]  }
   0x8   : > { %s244_s30 = sshll.u32 %s3106_s29, 4  ;;  %s2973_s11 = scalar_lea.hbm %s3376_s2, 16384  ;;  %s3179_s30 = int_to_ptr.vmem [resolvable:$true] %s244_s30 }
   0x9   : > { %s3384_s28 = scalar_select %p3166_p3, 1, 0 }
   0xa   : > { %p2908_p5 = pneg %p3166_p3  ;;  %p2974_p7 = scmp.ne.s32.totalorder %s3376_s2, %s2973_s11 }
   0xb   : > { %p2980_p11 = scmp.lt.u32.totalorder %s2973_s11, %s3376_s2 }
   0xc   : > { %p3175_p6 = pnand %p3382_p4, %p2908_p5 }
   0xe   : > { %p2975_p8 = pneg %p3175_p6 }
  0x10   : > { %p2976_p9 = pnand %p2975_p8, %p2974_p7 }
  0x12   : > { %p2977_p10 = pneg %p2976_p9 }
  0x14   : > { %p2982_p12 = pnand %p2980_p11, %p2977_p10 }
  0x16   : > { %2985 = shalt.err (!%p2982_p12)
}
  0x17   : > { %s2986_s16 = scalar_lea.vmem %s232_s27, 16384  ;;  %p2994_p5 = scmp.lt.s32.totalorder %s232_s27, %s232_s27 }
  0x18   : > { %p2987_p13 = scmp.ne.s32.totalorder %s232_s27, %s2986_s16  ;;  %p2995_p2 = scmp.lt.s32.totalorder %s2986_s16, %s2986_s16 }
  0x1a   : > { %p2989_p0 = pnand %p2987_p13, %p2975_p8  ;;  %p2996_p4 = por %p2995_p2, %p2994_p5 }
  0x1c   : > { %p2990_p1 = pneg %p2989_p0 }
  0x1e   : > { %p2997_p3 = pnand %p2996_p4, %p2990_p1 }
  0x20   : > { %3000 = shalt.err (!%p2997_p3)
}
  0x21   : > { %s3107_s17 = smov 512   ;;  %s3108_s18 = smov 32  }
  0x22   : > { %2911 = dma.hbm_to_vmem [thread:$0]  (!%p3175_p6), %s3376_s2, 16384, %s232_s27, [#allocation7], %s3107_s17, %s3107_s17, %s3108_s18  }
  0x23   : > { %s3001_s23 = scalar_lea.hbm %s3377_s3, 16384 }
  0x24   : > { %p3002_p7 = scmp.ne.s32.totalorder %s3377_s3, %s3001_s23  ;;  %p3008_p4 = scmp.lt.u32.totalorder %s3001_s23, %s3377_s3 }
  0x26   : > { %p3004_p2 = pnand %p3002_p7, %p2975_p8 }
  0x28   : > { %p3005_p3 = pneg %p3004_p2 }
  0x2a   : > { %p3010_p9 = pnand %p3008_p4, %p3005_p3 }
  0x2c   : > { %3013 = shalt.err (!%p3010_p9)
}
  0x2d   : > { %s3014_s27 = scalar_lea.vmem %s3179_s30, 16384  ;;  %p3022_p13 = scmp.lt.s32.totalorder %s3179_s30, %s3179_s30 }
  0x2e   : > { %p3015_p10 = scmp.ne.s32.totalorder %s3179_s30, %s3014_s27  ;;  %p3023_p0 = scmp.lt.s32.totalorder %s3014_s27, %s3014_s27 }
  0x30   : > { %p3017_p11 = pnand %p3015_p10, %p2975_p8  ;;  %p3024_p1 = por %p3023_p0, %p3022_p13 }
  0x32   : > { %p3018_p12 = pneg %p3017_p11 }
  0x34   : > { %p3025_p5 = pnand %p3024_p1, %p3018_p12 }
  0x36   : > { %3028 = shalt.err (!%p3025_p5)
}
  0x37   : > { %2914 = dma.hbm_to_vmem [thread:$0]  (!%p3175_p6), %s3377_s3, 16384, %s3179_s30, [#allocation10], %s3107_s17, %s3107_s17, %s3108_s18  }
  0x38   : > { %p3386_p7 = scmp.ne.s32.totalorder %s3384_s28, 0 }
  0x39   : > { %p3387_p2 = scmp.eq.s32.totalorder (!%p3386_p7), %s3161_s25, 0 }
  0x3a   : > { %278 = sbr.rel (%p3386_p7) target bundleno = 643 (0x283), region = 36 }
  0x41   : > { %3086 = dma.done.wait (%p3387_p2), [#allocation7], 16384   ;;  %p3388_p8 = pmov %p3387_p2 }
  0x42   : > { %p3389_p3 = pmov %p3387_p2 }
  0x43   : > { %3088 = vsyncadd (%p3388_p8), [#allocation7], 4294950912 }
  0x44   : > { %3090 = dma.done.wait (%p3389_p3), [#allocation10], 16384   ;;  %p3390_p4 = pmov %p3387_p2 }
  0x45   : > { %p326_p9 = scmp.lt.s32.totalorder %s3161_s25, 7  ;;  %s331_s30 = ssub.s32 7, %s3161_s25 }
  0x46   : > { %3092 = vsyncadd (%p3390_p4), [#allocation10], 4294950912  ;;  %p332_p6 = scmp.lt.s32.totalorder %s331_s30, 7  ;;  %p3391_p10 = scmp.ne.s32.totalorder %s3161_s25, 0 }
  0x47   : > { %s327_s28 = scalar_select %p326_p9, %s3161_s25, 7 }
  0x48   : > { %s3393_s30 = smov (!%p332_p6, %s331_s30), 7  ;;  %353 = sbr.rel (%p3391_p10) target bundleno = 79 (0x4f), region = 48 }
  0x49   : > { %s2888_s8 = sshll.u32 %s327_s28, 4  ;;  %s2890_s13 = sshll.u32 %s327_s28, 2  ;;  %v3109_v0 = vmov (!%p3391_p10), 0.0  }
  0x4a   : > { %s3244_s16 = scalar_lea.vmem %s3374_s0, %s2888_s8  ;;  %s2889_s17 = sshll.u32 %s3393_s30, 4  ;;  %354 = vst [vmem:[#allocation2] sm:$0xf] (!%p3391_p10), %v3109_v0  ;;  %355 = vst [vmem:[#allocation3] sm:$0xf] (!%p3391_p10), %v3109_v0 }
  0x4b   : > { %s3249_s20 = scalar_lea.vmem %s3375_s1, %s2889_s17  ;;  %s3254_s23 = scalar_lea.vmem %s3378_s4, %s2890_s13  ;;  %356 = vst [vmem:[#allocation4] sm:$0xf] (!%p3391_p10), %v3109_v0  ;;  %357 = vst [vmem:[#allocation5] sm:$0xf] (!%p3391_p10), %v3109_v0 }
  0x4c   : > { %s2891_s26 = sshll.u32 %s3393_s30, 2 }
  0x4d   : > { %s3259_s10 = scalar_lea.vmem %s3379_s5, %s2891_s26 }
  0x4f PF: > { %v374_v1 = vld [vmem:[#allocation6] sm:$0xff]  ;;  %v375_v3 = vld [vmem:[#allocation6 + $0x8] sm:$0xff]  ;;  %p2881_p11 = scmp.ne.s32.totalorder %s3161_s25, 7 }
  0x50   : > { %v378_v2 = vld [vmem:[#allocation6 + $0x20] sm:$0xff]  ;;  %v379_v5 = vld [vmem:[#allocation6 + $0x28] sm:$0xff] }
  0x51   : > { %v2619_v4 = vcombine.high %v374_v1, %v378_v2  ;;  %v2618_v6 = vcombine.low %v374_v1, %v378_v2  ;;  %v382_v7 = vld [vmem:[#allocation6 + $0x40] sm:$0xff]  ;;  %v2621_v9 = vcombine.high %v375_v3, %v379_v5  ;;  %v2620_v10 = vcombine.low %v375_v3, %v379_v5  ;;  %v383_v12 = vld [vmem:[#allocation6 + $0x48] sm:$0xff]  ;;  %v3263_v54 = vld.sshfl [vmem:[#allocation2] sm:$0x33 pattern:$0x76325410] }
  0x52   : > { %v386_v8 = vld [vmem:[#allocation6 + $0x60] sm:$0xff]  ;;  %v387_v13 = vld [vmem:[#allocation6 + $0x68] sm:$0xff]  ;;  %v369_v58 = vcombine.high %v3263_v54, %v3263_v54 }
  0x53   : > { %v2627_v11 = vcombine.high %v382_v7, %v386_v8  ;;  %v390_v14 = vld [vmem:[#allocation6 + $0x80] sm:$0xff]  ;;  %1142 = vmatprep.subr.bf16.mxu0 %v2619_v4  ;;  %v2629_v15 = vcombine.high %v383_v12, %v387_v13  ;;  %v391_v17 = vld [vmem:[#allocation6 + $0x88] sm:$0xff]  ;;  %1183 = vmatprep.subr.bf16.mxu1 %v2621_v9  ;;  %v2626_v19 = vcombine.low %v382_v7, %v386_v8 }
  0x54   : > { %v394_v16 = vld [vmem:[#allocation6 + $0xa0] sm:$0xff]  ;;  %v395_v18 = vld [vmem:[#allocation6 + $0xa8] sm:$0xff]  ;;  %1143 = vmatpush1.bf16.msra.mxu0 %v2618_v6  ;;  %1184 = vmatpush1.bf16.msra.mxu1 %v2620_v10  ;;  %v2628_v20 = vcombine.low %v383_v12, %v387_v13  ;;  %v3267_v62 = vpack.c.bf16 %v369_v58, %v369_v58 }
  0x55   : > { %1144 = vmatprep.subr.bf16.mxu0 %v2627_v11  ;;  %v2635_v21 = vcombine.high %v390_v14, %v394_v16  ;;  %1185 = vmatprep.subr.bf16.mxu1 %v2629_v15  ;;  %v2637_v22 = vcombine.high %v391_v17, %v395_v18  ;;  %v398_v23 = vld [vmem:[#allocation6 + $0xc0] sm:$0xff]  ;;  %v399_v25 = vld [vmem:[#allocation6 + $0xc8] sm:$0xff]  ;;  %v2634_v27 = vcombine.low %v390_v14, %v394_v16 }
  0x56   : > { %v402_v24 = vld [vmem:[#allocation6 + $0xe0] sm:$0xff]  ;;  %v403_v26 = vld [vmem:[#allocation6 + $0xe8] sm:$0xff]  ;;  %v2636_v28 = vcombine.low %v391_v17, %v395_v18  ;;  %1174 = vmatprep.mubr.bf16.mxu0 %v3267_v62  ;;  %1215 = vmatprep.mubr.bf16.mxu1 %v3267_v62 }
  0x57   : > { %v2643_v29 = vcombine.high %v398_v23, %v402_v24  ;;  %v2645_v30 = vcombine.high %v399_v25, %v403_v26  ;;  %v406_v31 = vld [vmem:[#allocation6 + $0x100] sm:$0xff]  ;;  %v407_v33 = vld [vmem:[#allocation6 + $0x108] sm:$0xff]  ;;  %v2642_v35 = vcombine.low %v398_v23, %v402_v24  ;;  %v2644_v36 = vcombine.low %v399_v25, %v403_v26 }
  0x58   : > { %1145 = vmatpush1.bf16.msra.mxu0 %v2626_v19  ;;  %1186 = vmatpush1.bf16.msra.mxu1 %v2628_v20  ;;  %v410_v32 = vld [vmem:[#allocation6 + $0x120] sm:$0xff]  ;;  %v411_v34 = vld [vmem:[#allocation6 + $0x128] sm:$0xff] }
  0x59   : > { %1146 = vmatprep.subr.bf16.mxu0 %v2635_v21  ;;  %1187 = vmatprep.subr.bf16.mxu1 %v2637_v22  ;;  %v2651_v37 = vcombine.high %v406_v31, %v410_v32  ;;  %v2653_v38 = vcombine.high %v407_v33, %v411_v34  ;;  %v414_v39 = vld [vmem:[#allocation6 + $0x140] sm:$0xff]  ;;  %v415_v41 = vld [vmem:[#allocation6 + $0x148] sm:$0xff]  ;;  %v2650_v43 = vcombine.low %v406_v31, %v410_v32 }
  0x5a   : > { %v418_v40 = vld [vmem:[#allocation6 + $0x160] sm:$0xff]  ;;  %v419_v42 = vld [vmem:[#allocation6 + $0x168] sm:$0xff]  ;;  %v2652_v44 = vcombine.low %v407_v33, %v411_v34 }
  0x5b   : > { %v2659_v45 = vcombine.high %v414_v39, %v418_v40  ;;  %v2661_v46 = vcombine.high %v415_v41, %v419_v42  ;;  %v422_v47 = vld [vmem:[#allocation6 + $0x180] sm:$0xff]  ;;  %v423_v49 = vld [vmem:[#allocation6 + $0x188] sm:$0xff]  ;;  %v2658_v51 = vcombine.low %v414_v39, %v418_v40  ;;  %v2660_v52 = vcombine.low %v415_v41, %v419_v42 }
  0x5c   : > { %1147 = vmatpush1.bf16.msra.mxu0 %v2634_v27  ;;  %1188 = vmatpush1.bf16.msra.mxu1 %v2636_v28  ;;  %v426_v48 = vld [vmem:[#allocation6 + $0x1a0] sm:$0xff]  ;;  %v427_v50 = vld [vmem:[#allocation6 + $0x1a8] sm:$0xff] }
  0x5d   : > { %1148 = vmatprep.subr.bf16.mxu0 %v2643_v29  ;;  %1189 = vmatprep.subr.bf16.mxu1 %v2645_v30  ;;  %v2667_v53 = vcombine.high %v422_v47, %v426_v48  ;;  %v2669_v55 = vcombine.high %v423_v49, %v427_v50  ;;  %v430_v56 = vld [vmem:[#allocation6 + $0x1c0] sm:$0xff]  ;;  %v431_v59 = vld [vmem:[#allocation6 + $0x1c8] sm:$0xff]  ;;  %v2666_v61 = vcombine.low %v422_v47, %v426_v48 }
  0x5e   : > { %v434_v57 = vld [vmem:[#allocation6 + $0x1e0] sm:$0xff]  ;;  %v435_v60 = vld [vmem:[#allocation6 + $0x1e8] sm:$0xff]  ;;  %v2668_v63 = vcombine.low %v423_v49, %v427_v50 }
  0x5f   : > { %v2675_v0 = vcombine.high %v430_v56, %v434_v57  ;;  %v2677_v1 = vcombine.high %v431_v59, %v435_v60  ;;  %v438_v2 = vld [vmem:[#allocation6 + $0x200] sm:$0xff]  ;;  %v439_v4 = vld [vmem:[#allocation6 + $0x208] sm:$0xff]  ;;  %v2674_v6 = vcombine.low %v430_v56, %v434_v57  ;;  %v2676_v7 = vcombine.low %v431_v59, %v435_v60 }
  0x60   : > { %1149 = vmatpush1.bf16.msra.mxu0 %v2642_v35  ;;  %1190 = vmatpush1.bf16.msra.mxu1 %v2644_v36  ;;  %v442_v3 = vld [vmem:[#allocation6 + $0x220] sm:$0xff]  ;;  %v443_v5 = vld [vmem:[#allocation6 + $0x228] sm:$0xff] }
  0x61   : > { %1150 = vmatprep.subr.bf16.mxu0 %v2651_v37  ;;  %1191 = vmatprep.subr.bf16.mxu1 %v2653_v38  ;;  %v2683_v8 = vcombine.high %v438_v2, %v442_v3  ;;  %v2685_v9 = vcombine.high %v439_v4, %v443_v5  ;;  %v446_v10 = vld [vmem:[#allocation6 + $0x240] sm:$0xff]  ;;  %v447_v12 = vld [vmem:[#allocation6 + $0x248] sm:$0xff]  ;;  %v2682_v14 = vcombine.low %v438_v2, %v442_v3 }
  0x62   : > { %v450_v11 = vld [vmem:[#allocation6 + $0x260] sm:$0xff]  ;;  %v451_v13 = vld [vmem:[#allocation6 + $0x268] sm:$0xff]  ;;  %v2684_v15 = vcombine.low %v439_v4, %v443_v5  ;;  %v376_v4 = vld [vmem:[#allocation6 + $0x10] sm:$0xff] }
  0x63   : > { %v2691_v16 = vcombine.high %v446_v10, %v450_v11  ;;  %v2693_v17 = vcombine.high %v447_v12, %v451_v13  ;;  %v454_v18 = vld [vmem:[#allocation6 + $0x280] sm:$0xff]  ;;  %v455_v20 = vld [vmem:[#allocation6 + $0x288] sm:$0xff]  ;;  %v2690_v22 = vcombine.low %v446_v10, %v450_v11  ;;  %v2692_v23 = vcombine.low %v447_v12, %v451_v13  ;;  %v380_v5 = vld [vmem:[#allocation6 + $0x30] sm:$0xff] }
  0x64   : > { %1151 = vmatpush1.bf16.msra.mxu0 %v2650_v43  ;;  %1192 = vmatpush1.bf16.msra.mxu1 %v2652_v44  ;;  %v458_v19 = vld [vmem:[#allocation6 + $0x2a0] sm:$0xff]  ;;  %v459_v21 = vld [vmem:[#allocation6 + $0x2a8] sm:$0xff]  ;;  %v2623_v10 = vcombine.high %v376_v4, %v380_v5  ;;  %v384_v12 = vld [vmem:[#allocation6 + $0x50] sm:$0xff] }
  0x65   : > { %1152 = vmatprep.subr.bf16.mxu0 %v2659_v45  ;;  %1193 = vmatprep.subr.bf16.mxu1 %v2661_v46  ;;  %v2699_v24 = vcombine.high %v454_v18, %v458_v19  ;;  %v2701_v25 = vcombine.high %v455_v20, %v459_v21  ;;  %v462_v26 = vld [vmem:[#allocation6 + $0x2c0] sm:$0xff]  ;;  %v463_v28 = vld [vmem:[#allocation6 + $0x2c8] sm:$0xff]  ;;  %v2698_v30 = vcombine.low %v454_v18, %v458_v19  ;;  %v388_v13 = vld [vmem:[#allocation6 + $0x70] sm:$0xff] }
  0x66   : > { %v466_v27 = vld [vmem:[#allocation6 + $0x2e0] sm:$0xff]  ;;  %v467_v29 = vld [vmem:[#allocation6 + $0x2e8] sm:$0xff]  ;;  %v2700_v31 = vcombine.low %v455_v20, %v459_v21  ;;  %v2631_v19 = vcombine.high %v384_v12, %v388_v13  ;;  %v392_v21 = vld [vmem:[#allocation6 + $0x90] sm:$0xff] }
  0x67   : > { %v2707_v32 = vcombine.high %v462_v26, %v466_v27  ;;  %v2709_v33 = vcombine.high %v463_v28, %v467_v29  ;;  %v470_v34 = vld [vmem:[#allocation6 + $0x300] sm:$0xff]  ;;  %v471_v36 = vld [vmem:[#allocation6 + $0x308] sm:$0xff]  ;;  %v2706_v38 = vcombine.low %v462_v26, %v466_v27  ;;  %v2708_v39 = vcombine.low %v463_v28, %v467_v29  ;;  %v400_v28 = vld [vmem:[#allocation6 + $0xd0] sm:$0xff] }
  0x68   : > { %1153 = vmatpush1.bf16.msra.mxu0 %v2658_v51  ;;  %1194 = vmatpush1.bf16.msra.mxu1 %v2660_v52  ;;  %v474_v35 = vld [vmem:[#allocation6 + $0x320] sm:$0xff]  ;;  %v475_v37 = vld [vmem:[#allocation6 + $0x328] sm:$0xff]  ;;  %v404_v29 = vld [vmem:[#allocation6 + $0xf0] sm:$0xff] }
  0x69   : > { %1154 = vmatprep.subr.bf16.mxu0 %v2667_v53  ;;  %1195 = vmatprep.subr.bf16.mxu1 %v2669_v55  ;;  %v2715_v40 = vcombine.high %v470_v34, %v474_v35  ;;  %v2717_v41 = vcombine.high %v471_v36, %v475_v37  ;;  %v478_v42 = vld [vmem:[#allocation6 + $0x340] sm:$0xff]  ;;  %v479_v44 = vld [vmem:[#allocation6 + $0x348] sm:$0xff]  ;;  %v2714_v46 = vcombine.low %v470_v34, %v474_v35 }
  0x6a   : > { %v482_v43 = vld [vmem:[#allocation6 + $0x360] sm:$0xff]  ;;  %v483_v45 = vld [vmem:[#allocation6 + $0x368] sm:$0xff]  ;;  %v2716_v47 = vcombine.low %v471_v36, %v475_v37  ;;  %v2647_v34 = vcombine.high %v400_v28, %v404_v29  ;;  %v408_v36 = vld [vmem:[#allocation6 + $0x110] sm:$0xff] }
  0x6b   : > { %v2723_v48 = vcombine.high %v478_v42, %v482_v43  ;;  %v2725_v49 = vcombine.high %v479_v44, %v483_v45  ;;  %v486_v50 = vld [vmem:[#allocation6 + $0x380] sm:$0xff]  ;;  %v487_v52 = vld [vmem:[#allocation6 + $0x388] sm:$0xff]  ;;  %v2722_v55 = vcombine.low %v478_v42, %v482_v43  ;;  %v2724_v56 = vcombine.low %v479_v44, %v483_v45  ;;  %v412_v37 = vld [vmem:[#allocation6 + $0x130] sm:$0xff] }
  0x6c   : > { %1155 = vmatpush1.bf16.msra.mxu0 %v2666_v61  ;;  %1196 = vmatpush1.bf16.msra.mxu1 %v2668_v63  ;;  %v490_v51 = vld [vmem:[#allocation6 + $0x3a0] sm:$0xff]  ;;  %v491_v53 = vld [vmem:[#allocation6 + $0x3a8] sm:$0xff]  ;;  %v2655_v42 = vcombine.high %v408_v36, %v412_v37  ;;  %v416_v43 = vld [vmem:[#allocation6 + $0x150] sm:$0xff] }
  0x6d   : > { %1156 = vmatprep.subr.bf16.mxu0 %v2675_v0  ;;  %1197 = vmatprep.subr.bf16.mxu1 %v2677_v1  ;;  %v2731_v57 = vcombine.high %v486_v50, %v490_v51  ;;  %v2733_v58 = vcombine.high %v487_v52, %v491_v53  ;;  %v494_v59 = vld [vmem:[#allocation6 + $0x3c0] sm:$0xff]  ;;  %v495_v61 = vld [vmem:[#allocation6 + $0x3c8] sm:$0xff]  ;;  %v2730_v0 = vcombine.low %v486_v50, %v490_v51  ;;  %v420_v44 = vld [vmem:[#allocation6 + $0x170] sm:$0xff] }
  0x6e   : > { %v498_v60 = vld [vmem:[#allocation6 + $0x3e0] sm:$0xff]  ;;  %v499_v63 = vld [vmem:[#allocation6 + $0x3e8] sm:$0xff]  ;;  %v2732_v1 = vcombine.low %v487_v52, %v491_v53  ;;  %v417_v45 = vld [vmem:[#allocation6 + $0x158] sm:$0xff] }
  0x6f   : > { %v2739_v2 = vcombine.high %v494_v59, %v498_v60  ;;  %v2741_v3 = vcombine.high %v495_v61, %v499_v63  ;;  %v424_v51 = vld [vmem:[#allocation6 + $0x190] sm:$0xff]  ;;  %v425_v53 = vld [vmem:[#allocation6 + $0x198] sm:$0xff] }
  0x70   : > { %1157 = vmatpush1.bf16.msra.mxu0 %v2674_v6  ;;  %1198 = vmatpush1.bf16.msra.mxu1 %v2676_v7  ;;  %v377_v6 = vld [vmem:[#allocation6 + $0x18] sm:$0xff]  ;;  %v428_v52 = vld [vmem:[#allocation6 + $0x1b0] sm:$0xff] }
  0x71   : > { %1158 = vmatprep.subr.bf16.mxu0 %v2683_v8  ;;  %1199 = vmatprep.subr.bf16.mxu1 %v2685_v9  ;;  %v381_v7 = vld [vmem:[#allocation6 + $0x38] sm:$0xff]  ;;  %v2738_v8 = vcombine.low %v494_v59, %v498_v60  ;;  %v2740_v9 = vcombine.low %v495_v61, %v499_v63  ;;  %v432_v60 = vld [vmem:[#allocation6 + $0x1d0] sm:$0xff] }
  0x72   : > { %v2625_v11 = vcombine.high %v377_v6, %v381_v7  ;;  %v2624_v18 = vcombine.low %v377_v6, %v381_v7  ;;  %v436_v61 = vld [vmem:[#allocation6 + $0x1f0] sm:$0xff]  ;;  %v433_v63 = vld [vmem:[#allocation6 + $0x1d8] sm:$0xff] }
  0x73   : > { %v444_v6 = vld [vmem:[#allocation6 + $0x230] sm:$0xff]  ;;  %v441_v7 = vld [vmem:[#allocation6 + $0x218] sm:$0xff] }
  0x74   : > { %1159 = vmatpush1.bf16.msra.mxu0 %v2682_v14  ;;  %1200 = vmatpush1.bf16.msra.mxu1 %v2684_v15  ;;  %v3273_v14 = vpack.c.bf16 %v3263_v54, %v3263_v54  ;;  %v385_v15 = vld [vmem:[#allocation6 + $0x58] sm:$0xff]  ;;  %v2630_v54 = vcombine.low %v384_v12, %v388_v13  ;;  %v448_v13 = vld [vmem:[#allocation6 + $0x250] sm:$0xff] }
  0x75   : > { %1160 = vmatprep.subr.bf16.mxu0 %v2691_v16  ;;  %1201 = vmatprep.subr.bf16.mxu1 %v2693_v17  ;;  %v389_v16 = vld [vmem:[#allocation6 + $0x78] sm:$0xff]  ;;  %v2622_v17 = vcombine.low %v376_v4, %v380_v5  ;;  %v440_v5 = vld [vmem:[#allocation6 + $0x210] sm:$0xff] }
  0x76   : > { %v2633_v20 = vcombine.high %v385_v15, %v389_v16 }
  0x78   : > { %1161 = vmatpush1.bf16.msra.mxu0 %v2690_v22  ;;  %1202 = vmatpush1.bf16.msra.mxu1 %v2692_v23  ;;  %v396_v22 = vld [vmem:[#allocation6 + $0xb0] sm:$0xff]  ;;  %v393_v23 = vld [vmem:[#allocation6 + $0x98] sm:$0xff] }
  0x79   : > { %1162 = vmatprep.subr.bf16.mxu0 %v2699_v24  ;;  %1203 = vmatprep.subr.bf16.mxu1 %v2701_v25  ;;  %v397_v24 = vld [vmem:[#allocation6 + $0xb8] sm:$0xff]  ;;  %v2632_v25 = vcombine.low %v385_v15, %v389_v16  ;;  %v2639_v26 = vcombine.high %v392_v21, %v396_v22  ;;  %v452_v15 = vld [vmem:[#allocation6 + $0x270] sm:$0xff] }
  0x7a   : > { %v2641_v27 = vcombine.high %v393_v23, %v397_v24  ;;  %v449_v16 = vld [vmem:[#allocation6 + $0x258] sm:$0xff] }
  0x7c   : > { %1163 = vmatpush1.bf16.msra.mxu0 %v2698_v30  ;;  %1204 = vmatpush1.bf16.msra.mxu1 %v2700_v31  ;;  %v401_v30 = vld [vmem:[#allocation6 + $0xd8] sm:$0xff] }
  0x7d   : > { %1164 = vmatprep.subr.bf16.mxu0 %v2707_v32  ;;  %1205 = vmatprep.subr.bf16.mxu1 %v2709_v33  ;;  %v405_v31 = vld [vmem:[#allocation6 + $0xf8] sm:$0xff]  ;;  %v2638_v32 = vcombine.low %v392_v21, %v396_v22  ;;  %v2640_v33 = vcombine.low %v393_v23, %v397_v24  ;;  %v456_v22 = vld [vmem:[#allocation6 + $0x290] sm:$0xff] }
  0x7e   : > { %v2649_v35 = vcombine.high %v401_v30, %v405_v31  ;;  %v460_v23 = vld [vmem:[#allocation6 + $0x2b0] sm:$0xff]  ;;  %v457_v24 = vld [vmem:[#allocation6 + $0x298] sm:$0xff] }
  0x80   : > { %1165 = vmatpush1.bf16.msra.mxu0 %v2706_v38  ;;  %1206 = vmatpush1.bf16.msra.mxu1 %v2708_v39  ;;  %v409_v38 = vld [vmem:[#allocation6 + $0x118] sm:$0xff] }
  0x81   : > { %1166 = vmatprep.subr.bf16.mxu0 %v2715_v40  ;;  %1207 = vmatprep.subr.bf16.mxu1 %v2717_v41  ;;  %v413_v39 = vld [vmem:[#allocation6 + $0x138] sm:$0xff]  ;;  %v2646_v40 = vcombine.low %v400_v28, %v404_v29  ;;  %v2648_v41 = vcombine.low %v401_v30, %v405_v31  ;;  %v464_v29 = vld [vmem:[#allocation6 + $0x2d0] sm:$0xff] }
  0x82   : > { %v468_v30 = vld [vmem:[#allocation6 + $0x2f0] sm:$0xff]  ;;  %v465_v31 = vld [vmem:[#allocation6 + $0x2d8] sm:$0xff] }
  0x84   : > { %1167 = vmatpush1.bf16.msra.mxu0 %v2714_v46  ;;  %1208 = vmatpush1.bf16.msra.mxu1 %v2716_v47  ;;  %v421_v46 = vld [vmem:[#allocation6 + $0x178] sm:$0xff]  ;;  %v2654_v47 = vcombine.low %v408_v36, %v412_v37  ;;  %v472_v37 = vld [vmem:[#allocation6 + $0x310] sm:$0xff] }
  0x85   : > { %1168 = vmatprep.subr.bf16.mxu0 %v2723_v48  ;;  %1209 = vmatprep.subr.bf16.mxu1 %v2725_v49  ;;  %v2656_v48 = vcombine.low %v409_v38, %v413_v39  ;;  %v2663_v49 = vcombine.high %v416_v43, %v420_v44  ;;  %v2665_v50 = vcombine.high %v417_v45, %v421_v46 }
  0x88   : > { %1169 = vmatpush1.bf16.msra.mxu0 %v2722_v55  ;;  %1210 = vmatpush1.bf16.msra.mxu1 %v2724_v56  ;;  %v429_v55 = vld [vmem:[#allocation6 + $0x1b8] sm:$0xff]  ;;  %v2662_v56 = vcombine.low %v416_v43, %v420_v44  ;;  %v480_v44 = vld [vmem:[#allocation6 + $0x350] sm:$0xff] }
  0x89   : > { %1170 = vmatprep.subr.bf16.mxu0 %v2731_v57  ;;  %1211 = vmatprep.subr.bf16.mxu1 %v2733_v58  ;;  %v2664_v57 = vcombine.low %v417_v45, %v421_v46  ;;  %v2671_v58 = vcombine.high %v424_v51, %v428_v52  ;;  %v2673_v59 = vcombine.high %v425_v53, %v429_v55  ;;  %v484_v45 = vld [vmem:[#allocation6 + $0x370] sm:$0xff]  ;;  %v481_v46 = vld [vmem:[#allocation6 + $0x358] sm:$0xff] }
  0x8c   : > { %1171 = vmatpush1.bf16.msra.mxu0 %v2730_v0  ;;  %1212 = vmatpush1.bf16.msra.mxu1 %v2732_v1  ;;  %v437_v0 = vld [vmem:[#allocation6 + $0x1f8] sm:$0xff]  ;;  %v2670_v1 = vcombine.low %v424_v51, %v428_v52  ;;  %v488_v52 = vld [vmem:[#allocation6 + $0x390] sm:$0xff] }
  0x8d   : > { %1172 = vmatprep.subr.bf16.mxu0 %v2739_v2  ;;  %1213 = vmatprep.subr.bf16.mxu1 %v2741_v3  ;;  %v2672_v2 = vcombine.low %v425_v53, %v429_v55  ;;  %v2679_v3 = vcombine.high %v432_v60, %v436_v61  ;;  %v2681_v4 = vcombine.high %v433_v63, %v437_v0  ;;  %v492_v53 = vld [vmem:[#allocation6 + $0x3b0] sm:$0xff]  ;;  %v489_v55 = vld [vmem:[#allocation6 + $0x398] sm:$0xff] }
  0x90   : > { %1173 = vmatpush1.bf16.msra.mxu0 %v2738_v8  ;;  %1214 = vmatpush1.bf16.msra.mxu1 %v2740_v9  ;;  %v445_v8 = vld [vmem:[#allocation6 + $0x238] sm:$0xff]  ;;  %v2678_v9 = vcombine.low %v432_v60, %v436_v61  ;;  %v496_v61 = vld [vmem:[#allocation6 + $0x3d0] sm:$0xff] }
  0x91   : > { %1224 = vmatprep.subr.bf16.mxu0 %v2623_v10  ;;  %1265 = vmatprep.subr.bf16.mxu1 %v2625_v11  ;;  %v2680_v10 = vcombine.low %v433_v63, %v437_v0  ;;  %v2687_v11 = vcombine.high %v440_v5, %v444_v6  ;;  %v2689_v12 = vcombine.high %v441_v7, %v445_v8  ;;  %v500_v63 = vld [vmem:[#allocation6 + $0x3f0] sm:$0xff]  ;;  %v497_v0 = vld [vmem:[#allocation6 + $0x3d8] sm:$0xff] }
  0x93   : > { %1175 = vmatmul.mubr.bf16.vlgmr.msra.gmra.mrb[0].mxu0 %v3273_v14  ;;  %1216 = vmatmul.mubr.bf16.vlgmr.msra.gmra.mrb[0].mxu1 %v3273_v14 }
  0x94   : > { %1225 = vmatpush1.bf16.msra.mxu0 %v2622_v17  ;;  %1266 = vmatpush1.bf16.msra.mxu1 %v2624_v18  ;;  %v453_v17 = vld [vmem:[#allocation6 + $0x278] sm:$0xff]  ;;  %v2686_v18 = vcombine.low %v440_v5, %v444_v6  ;;  %v1401_v6 = vld [vmem:[#allocation9] sm:$0xff] }
  0x95   : > { %1226 = vmatprep.subr.bf16.mxu0 %v2631_v19  ;;  %1267 = vmatprep.subr.bf16.mxu1 %v2633_v20  ;;  %v2688_v19 = vcombine.low %v441_v7, %v445_v8  ;;  %v2695_v20 = vcombine.high %v448_v13, %v452_v15  ;;  %v2697_v21 = vcombine.high %v449_v16, %v453_v17  ;;  %v1405_v7 = vld [vmem:[#allocation9 + $0x20] sm:$0xff]  ;;  %v1402_v8 = vld [vmem:[#allocation9 + $0x8] sm:$0xff] }
  0x96   : > { %1256 = vmatprep.mubr.bf16.mxu0 %v3267_v62  ;;  %1297 = vmatprep.mubr.bf16.mxu1 %v3267_v62  ;;  %v2657_v62 = vcombine.high %v409_v38, %v413_v39  ;;  %v476_v38 = vld [vmem:[#allocation6 + $0x330] sm:$0xff]  ;;  %v473_v39 = vld [vmem:[#allocation6 + $0x318] sm:$0xff] }
  0x98   : > { %1227 = vmatpush1.bf16.msra.mxu0 %v2630_v54  ;;  %1268 = vmatpush1.bf16.msra.mxu1 %v2632_v25  ;;  %v461_v54 = vld [vmem:[#allocation6 + $0x2b8] sm:$0xff]  ;;  %v2694_v25 = vcombine.low %v448_v13, %v452_v15  ;;  %v2751_v13 = vcombine.high %v1401_v6, %v1405_v7 }
  0x99   : > { %1228 = vmatprep.subr.bf16.mxu0 %v2639_v26  ;;  %1269 = vmatprep.subr.bf16.mxu1 %v2641_v27  ;;  %v2696_v26 = vcombine.low %v449_v16, %v453_v17  ;;  %v2703_v27 = vcombine.high %v456_v22, %v460_v23  ;;  %v2705_v28 = vcombine.high %v457_v24, %v461_v54  ;;  %v1409_v16 = vld [vmem:[#allocation9 + $0x40] sm:$0xff] }
  0x9a   : > { %v1413_v17 = vld [vmem:[#allocation9 + $0x60] sm:$0xff] }
  0x9c   : > { %1229 = vmatpush1.bf16.msra.mxu0 %v2638_v32  ;;  %1270 = vmatpush1.bf16.msra.mxu1 %v2640_v33  ;;  %v469_v32 = vld [vmem:[#allocation6 + $0x2f8] sm:$0xff]  ;;  %v2702_v33 = vcombine.low %v456_v22, %v460_v23  ;;  %v2759_v23 = vcombine.high %v1409_v16, %v1413_v17 }
  0x9d   : > { %1230 = vmatprep.subr.bf16.mxu0 %v2647_v34  ;;  %1271 = vmatprep.subr.bf16.mxu1 %v2649_v35  ;;  %v2704_v34 = vcombine.low %v457_v24, %v461_v54  ;;  %v2711_v35 = vcombine.high %v464_v29, %v468_v30  ;;  %v2713_v36 = vcombine.high %v465_v31, %v469_v32  ;;  %v1417_v54 = vld [vmem:[#allocation9 + $0x80] sm:$0xff] }
  0xa0   : > { %1231 = vmatpush1.bf16.msra.mxu0 %v2646_v40  ;;  %1272 = vmatpush1.bf16.msra.mxu1 %v2648_v41  ;;  %v477_v40 = vld [vmem:[#allocation6 + $0x338] sm:$0xff]  ;;  %v2710_v41 = vcombine.low %v464_v29, %v468_v30  ;;  %v2758_v29 = vcombine.low %v1409_v16, %v1413_v17 }
  0xa1   : > { %1232 = vmatprep.subr.bf16.mxu0 %v2655_v42  ;;  %1273 = vmatprep.subr.bf16.mxu1 %v2657_v62  ;;  %v2712_v42 = vcombine.low %v465_v31, %v469_v32  ;;  %v2719_v62 = vcombine.high %v472_v37, %v476_v38  ;;  %v2721_v43 = vcombine.high %v473_v39, %v477_v40 }
  0xa4   : > { %1233 = vmatpush1.bf16.msra.mxu0 %v2654_v47  ;;  %1274 = vmatpush1.bf16.msra.mxu1 %v2656_v48  ;;  %v485_v47 = vld [vmem:[#allocation6 + $0x378] sm:$0xff]  ;;  %v2718_v48 = vcombine.low %v472_v37, %v476_v38 }
  0xa5   : > { %1234 = vmatprep.subr.bf16.mxu0 %v2663_v49  ;;  %1275 = vmatprep.subr.bf16.mxu1 %v2665_v50  ;;  %v2720_v49 = vcombine.low %v473_v39, %v477_v40  ;;  %v2727_v50 = vcombine.high %v480_v44, %v484_v45  ;;  %v2729_v51 = vcombine.high %v481_v46, %v485_v47  ;;  %v1433_v40 = vld [vmem:[#allocation9 + $0x100] sm:$0xff] }
  0xa8   : > { %1235 = vmatpush1.bf16.msra.mxu0 %v2662_v56  ;;  %1276 = vmatpush1.bf16.msra.mxu1 %v2664_v57  ;;  %v493_v56 = vld [vmem:[#allocation6 + $0x3b8] sm:$0xff]  ;;  %v2726_v57 = vcombine.low %v480_v44, %v484_v45 }
  0xa9   : > { %1236 = vmatprep.subr.bf16.mxu0 %v2671_v58  ;;  %1277 = vmatprep.subr.bf16.mxu1 %v2673_v59  ;;  %v2728_v58 = vcombine.low %v481_v46, %v485_v47  ;;  %v2735_v59 = vcombine.high %v488_v52, %v492_v53  ;;  %v2737_v60 = vcombine.high %v489_v55, %v493_v56  ;;  %v1441_v47 = vld [vmem:[#allocation9 + $0x140] sm:$0xff] }
  0xac   : > { %1237 = vmatpush1.bf16.msra.mxu0 %v2670_v1  ;;  %1278 = vmatpush1.bf16.msra.mxu1 %v2672_v2  ;;  %v501_v1 = vld [vmem:[#allocation6 + $0x3f8] sm:$0xff]  ;;  %v2734_v2 = vcombine.low %v488_v52, %v492_v53 }
  0xad   : > { %1238 = vmatprep.subr.bf16.mxu0 %v2679_v3  ;;  %1279 = vmatprep.subr.bf16.mxu1 %v2681_v4  ;;  %v2736_v3 = vcombine.low %v489_v55, %v493_v56  ;;  %v2743_v4 = vcombine.high %v496_v61, %v500_v63  ;;  %v2745_v5 = vcombine.high %v497_v0, %v501_v1  ;;  %v1449_v56 = vld [vmem:[#allocation9 + $0x180] sm:$0xff] }
  0xb0   : > { %1239 = vmatpush1.bf16.msra.mxu0 %v2678_v9  ;;  %1280 = vmatpush1.bf16.msra.mxu1 %v2680_v10  ;;  %v1406_v9 = vld [vmem:[#allocation9 + $0x28] sm:$0xff]  ;;  %v3279_v10 = vld.sshfl [vmem:[#allocation4] sm:$0x33 pattern:$0x76325410] }
  0xb1   : > { %1240 = vmatprep.subr.bf16.mxu0 %v2687_v11  ;;  %1281 = vmatprep.subr.bf16.mxu1 %v2689_v12  ;;  %v2742_v11 = vcombine.low %v496_v61, %v500_v63  ;;  %v2744_v12 = vcombine.low %v497_v0, %v501_v1  ;;  %v2753_v15 = vcombine.high %v1402_v8, %v1406_v9  ;;  %v1457_v1 = vld [vmem:[#allocation9 + $0x1c0] sm:$0xff] }
  0xb2   : > { %v2752_v22 = vcombine.low %v1402_v8, %v1406_v9  ;;  %v1465_v9 = vld [vmem:[#allocation9 + $0x200] sm:$0xff] }
  0xb4   : > { %1241 = vmatpush1.bf16.msra.mxu0 %v2686_v18  ;;  %1282 = vmatpush1.bf16.msra.mxu1 %v2688_v19  ;;  %v1396_v18 = vcombine.high %v3279_v10, %v3279_v10  ;;  %v1410_v19 = vld [vmem:[#allocation9 + $0x48] sm:$0xff] }
  0xb5   : > { %1242 = vmatprep.subr.bf16.mxu0 %v2695_v20  ;;  %1283 = vmatprep.subr.bf16.mxu1 %v2697_v21  ;;  %v1414_v20 = vld [vmem:[#allocation9 + $0x68] sm:$0xff]  ;;  %v2750_v21 = vcombine.low %v1401_v6, %v1405_v7 }
  0xb6   : > { %v2761_v24 = vcombine.high %v1410_v19, %v1414_v20  ;;  %v2760_v30 = vcombine.low %v1410_v19, %v1414_v20  ;;  %v1473_v19 = vld [vmem:[#allocation9 + $0x240] sm:$0xff] }
  0xb7   : > { %v1477_v20 = vld [vmem:[#allocation9 + $0x260] sm:$0xff] }
  0xb8   : > { %1243 = vmatpush1.bf16.msra.mxu0 %v2694_v25  ;;  %1284 = vmatpush1.bf16.msra.mxu1 %v2696_v26  ;;  %v1421_v25 = vld [vmem:[#allocation9 + $0xa0] sm:$0xff]  ;;  %v3283_v26 = vpack.c.bf16 %v1396_v18, %v1396_v18 }
  0xb9   : > { %1244 = vmatprep.subr.bf16.mxu0 %v2703_v27  ;;  %1285 = vmatprep.subr.bf16.mxu1 %v2705_v28  ;;  %v1418_v27 = vld [vmem:[#allocation9 + $0x88] sm:$0xff]  ;;  %v2767_v31 = vcombine.high %v1417_v54, %v1421_v25  ;;  %v2766_v37 = vcombine.low %v1417_v54, %v1421_v25  ;;  %v2823_v54 = vcombine.high %v1473_v19, %v1477_v20 }
  0xba   : > { %v1422_v28 = vld [vmem:[#allocation9 + $0xa8] sm:$0xff] }
  0xbb   : > { %v2769_v32 = vcombine.high %v1418_v27, %v1422_v28 }
  0xbc   : > { %1245 = vmatpush1.bf16.msra.mxu0 %v2702_v33  ;;  %1286 = vmatpush1.bf16.msra.mxu1 %v2704_v34  ;;  %v1425_v33 = vld [vmem:[#allocation9 + $0xc0] sm:$0xff] }
  0xbd   : > { %1246 = vmatprep.subr.bf16.mxu0 %v2711_v35  ;;  %1287 = vmatprep.subr.bf16.mxu1 %v2713_v36  ;;  %v1429_v34 = vld [vmem:[#allocation9 + $0xe0] sm:$0xff]  ;;  %v1426_v35 = vld [vmem:[#allocation9 + $0xc8] sm:$0xff] }
  0xbe   : > { %v1430_v36 = vld [vmem:[#allocation9 + $0xe8] sm:$0xff]  ;;  %v2775_v38 = vcombine.high %v1425_v33, %v1429_v34 }
  0xbf   : > { %v2777_v39 = vcombine.high %v1426_v35, %v1430_v36  ;;  %v2776_v44 = vcombine.low %v1426_v35, %v1430_v36  ;;  %v1489_v35 = vld [vmem:[#allocation9 + $0x2c0] sm:$0xff] }
  0xc0   : > { %1247 = vmatpush1.bf16.msra.mxu0 %v2710_v41  ;;  %1288 = vmatpush1.bf16.msra.mxu1 %v2712_v42  ;;  %v1437_v41 = vld [vmem:[#allocation9 + $0x120] sm:$0xff]  ;;  %v1434_v42 = vld [vmem:[#allocation9 + $0x108] sm:$0xff] }
  0xc1   : > { %1248 = vmatprep.subr.bf16.mxu0 %v2719_v62  ;;  %1289 = vmatprep.subr.bf16.mxu1 %v2721_v43  ;;  %v1438_v62 = vld [vmem:[#allocation9 + $0x128] sm:$0xff]  ;;  %v2774_v43 = vcombine.low %v1425_v33, %v1429_v34  ;;  %v2783_v45 = vcombine.high %v1433_v40, %v1437_v41  ;;  %v1493_v36 = vld [vmem:[#allocation9 + $0x2e0] sm:$0xff] }
  0xc2   : > { %v2785_v46 = vcombine.high %v1434_v42, %v1438_v62  ;;  %v2784_v52 = vcombine.low %v1434_v42, %v1438_v62  ;;  %v1497_v42 = vld [vmem:[#allocation9 + $0x300] sm:$0xff] }
  0xc3   : > { %v1501_v62 = vld [vmem:[#allocation9 + $0x320] sm:$0xff] }
  0xc4   : > { %1249 = vmatpush1.bf16.msra.mxu0 %v2718_v48  ;;  %1290 = vmatpush1.bf16.msra.mxu1 %v2720_v49  ;;  %v1445_v48 = vld [vmem:[#allocation9 + $0x160] sm:$0xff]  ;;  %v1442_v49 = vld [vmem:[#allocation9 + $0x148] sm:$0xff] }
  0xc5   : > { %1250 = vmatprep.subr.bf16.mxu0 %v2727_v50  ;;  %1291 = vmatprep.subr.bf16.mxu1 %v2729_v51  ;;  %v1446_v50 = vld [vmem:[#allocation9 + $0x168] sm:$0xff]  ;;  %v2782_v51 = vcombine.low %v1433_v40, %v1437_v41  ;;  %v2791_v53 = vcombine.high %v1441_v47, %v1445_v48  ;;  %v2839_v40 = vcombine.high %v1489_v35, %v1493_v36 }
  0xc6   : > { %v2793_v55 = vcombine.high %v1442_v49, %v1446_v50  ;;  %v2792_v61 = vcombine.low %v1442_v49, %v1446_v50  ;;  %v1505_v49 = vld [vmem:[#allocation9 + $0x340] sm:$0xff] }
  0xc7   : > { %v1509_v50 = vld [vmem:[#allocation9 + $0x360] sm:$0xff] }
  0xc8   : > { %1251 = vmatpush1.bf16.msra.mxu0 %v2726_v57  ;;  %1292 = vmatpush1.bf16.msra.mxu1 %v2728_v58  ;;  %v1453_v57 = vld [vmem:[#allocation9 + $0x1a0] sm:$0xff]  ;;  %v1450_v58 = vld [vmem:[#allocation9 + $0x188] sm:$0xff] }
  0xc9   : > { %1252 = vmatprep.subr.bf16.mxu0 %v2735_v59  ;;  %1293 = vmatprep.subr.bf16.mxu1 %v2737_v60  ;;  %v1454_v59 = vld [vmem:[#allocation9 + $0x1a8] sm:$0xff]  ;;  %v2790_v60 = vcombine.low %v1441_v47, %v1445_v48  ;;  %v2799_v63 = vcombine.high %v1449_v56, %v1453_v57  ;;  %v2847_v47 = vcombine.high %v1497_v42, %v1501_v62 }
  0xca   : > { %v2801_v0 = vcombine.high %v1450_v58, %v1454_v59  ;;  %v2800_v6 = vcombine.low %v1450_v58, %v1454_v59  ;;  %v1513_v58 = vld [vmem:[#allocation9 + $0x380] sm:$0xff] }
  0xcb   : > { %v1517_v59 = vld [vmem:[#allocation9 + $0x3a0] sm:$0xff] }
  0xcc   : > { %1253 = vmatpush1.bf16.msra.mxu0 %v2734_v2  ;;  %1294 = vmatpush1.bf16.msra.mxu1 %v2736_v3  ;;  %v1461_v2 = vld [vmem:[#allocation9 + $0x1e0] sm:$0xff]  ;;  %v1458_v3 = vld [vmem:[#allocation9 + $0x1c8] sm:$0xff] }
  0xcd   : > { %1254 = vmatprep.subr.bf16.mxu0 %v2743_v4  ;;  %1295 = vmatprep.subr.bf16.mxu1 %v2745_v5  ;;  %v1462_v4 = vld [vmem:[#allocation9 + $0x1e8] sm:$0xff]  ;;  %v2798_v5 = vcombine.low %v1449_v56, %v1453_v57  ;;  %v2807_v7 = vcombine.high %v1457_v1, %v1461_v2  ;;  %v2855_v56 = vcombine.high %v1505_v49, %v1509_v50 }
  0xce   : > { %v2809_v8 = vcombine.high %v1458_v3, %v1462_v4  ;;  %v2808_v16 = vcombine.low %v1458_v3, %v1462_v4  ;;  %v1521_v3 = vld [vmem:[#allocation9 + $0x3c0] sm:$0xff] }
  0xcf   : > { %v1525_v4 = vld [vmem:[#allocation9 + $0x3e0] sm:$0xff] }
  0xd0   : > { %1255 = vmatpush1.bf16.msra.mxu0 %v2742_v11  ;;  %1296 = vmatpush1.bf16.msra.mxu1 %v2744_v12  ;;  %v1469_v11 = vld [vmem:[#allocation9 + $0x220] sm:$0xff]  ;;  %v1466_v12 = vld [vmem:[#allocation9 + $0x208] sm:$0xff] }
  0xd1   : > { %2169 = vmatprep.subr.bf16.mxu0 %v2751_v13  ;;  %2210 = vmatprep.subr.bf16.mxu1 %v2753_v15  ;;  %v1470_v13 = vld [vmem:[#allocation9 + $0x228] sm:$0xff]  ;;  %v2806_v15 = vcombine.low %v1457_v1, %v1461_v2  ;;  %v2815_v17 = vcombine.high %v1465_v9, %v1469_v11  ;;  %v2863_v1 = vcombine.high %v1513_v58, %v1517_v59 }
  0xd2   : > { %v2817_v18 = vcombine.high %v1466_v12, %v1470_v13 }
  0xd3   : > { %1257 = vmatmul.mubr.bf16.vlgmr.msra.gmra.mrb[4].mxu0 %v3273_v14  ;;  %1298 = vmatmul.mubr.bf16.vlgmr.msra.gmra.mrb[4].mxu1 %v3273_v14  ;;  %v2768_v14 = vcombine.low %v1418_v27, %v1422_v28  ;;  %v1481_v27 = vld [vmem:[#allocation9 + $0x280] sm:$0xff] }
  0xd4   : > { %2170 = vmatpush1.bf16.msra.mxu0 %v2750_v21  ;;  %2211 = vmatpush1.bf16.msra.mxu1 %v2752_v22  ;;  %v1474_v21 = vld [vmem:[#allocation9 + $0x248] sm:$0xff]  ;;  %v1485_v28 = vld [vmem:[#allocation9 + $0x2a0] sm:$0xff] }
  0xd5   : > { %2171 = vmatprep.subr.bf16.mxu0 %v2759_v23  ;;  %2212 = vmatprep.subr.bf16.mxu1 %v2761_v24  ;;  %v1478_v22 = vld [vmem:[#allocation9 + $0x268] sm:$0xff]  ;;  %v2814_v23 = vcombine.low %v1465_v9, %v1469_v11  ;;  %v2816_v24 = vcombine.low %v1466_v12, %v1470_v13  ;;  %v2831_v33 = vcombine.high %v1481_v27, %v1485_v28  ;;  %v1403_v12 = vld [vmem:[#allocation9 + $0x10] sm:$0xff] }
  0xd6   : > { %2201 = vmatprep.mubr.bf16.mxu0 %v3283_v26  ;;  %2242 = vmatprep.mubr.bf16.mxu1 %v3283_v26  ;;  %v2825_v25 = vcombine.high %v1474_v21, %v1478_v22  ;;  %v2871_v9 = vcombine.high %v1521_v3, %v1525_v4  ;;  %v1407_v13 = vld [vmem:[#allocation9 + $0x30] sm:$0xff] }
  0xd8   : > { %2172 = vmatpush1.bf16.msra.mxu0 %v2758_v29  ;;  %2213 = vmatpush1.bf16.msra.mxu1 %v2760_v30  ;;  %v1482_v29 = vld [vmem:[#allocation9 + $0x288] sm:$0xff] }
  0xd9   : > { %2173 = vmatprep.subr.bf16.mxu0 %v2767_v31  ;;  %2214 = vmatprep.subr.bf16.mxu1 %v2769_v32  ;;  %v1486_v30 = vld [vmem:[#allocation9 + $0x2a8] sm:$0xff]  ;;  %v2822_v31 = vcombine.low %v1473_v19, %v1477_v20  ;;  %v2824_v32 = vcombine.low %v1474_v21, %v1478_v22  ;;  %v2755_v19 = vcombine.high %v1403_v12, %v1407_v13  ;;  %v1411_v21 = vld [vmem:[#allocation9 + $0x50] sm:$0xff] }
  0xda   : > { %v2833_v34 = vcombine.high %v1482_v29, %v1486_v30  ;;  %v1415_v22 = vld [vmem:[#allocation9 + $0x70] sm:$0xff] }
  0xdc   : > { %2174 = vmatpush1.bf16.msra.mxu0 %v2766_v37  ;;  %2215 = vmatpush1.bf16.msra.mxu1 %v2768_v14  ;;  %v1490_v37 = vld [vmem:[#allocation9 + $0x2c8] sm:$0xff] }
  0xdd   : > { %2175 = vmatprep.subr.bf16.mxu0 %v2775_v38  ;;  %2216 = vmatprep.subr.bf16.mxu1 %v2777_v39  ;;  %v1494_v14 = vld [vmem:[#allocation9 + $0x2e8] sm:$0xff]  ;;  %v2830_v38 = vcombine.low %v1481_v27, %v1485_v28  ;;  %v2832_v39 = vcombine.low %v1482_v29, %v1486_v30  ;;  %v2763_v28 = vcombine.high %v1411_v21, %v1415_v22  ;;  %v1419_v30 = vld [vmem:[#allocation9 + $0x90] sm:$0xff] }
  0xde   : > { %v2841_v41 = vcombine.high %v1490_v37, %v1494_v14 }
  0xe0   : > { %2176 = vmatpush1.bf16.msra.mxu0 %v2774_v43  ;;  %2217 = vmatpush1.bf16.msra.mxu1 %v2776_v44  ;;  %v1498_v43 = vld [vmem:[#allocation9 + $0x308] sm:$0xff] }
  0xe1   : > { %2177 = vmatprep.subr.bf16.mxu0 %v2783_v45  ;;  %2218 = vmatprep.subr.bf16.mxu1 %v2785_v46  ;;  %v1502_v44 = vld [vmem:[#allocation9 + $0x328] sm:$0xff]  ;;  %v2838_v45 = vcombine.low %v1489_v35, %v1493_v36  ;;  %v2840_v46 = vcombine.low %v1490_v37, %v1494_v14  ;;  %v1427_v37 = vld [vmem:[#allocation9 + $0xd0] sm:$0xff] }
  0xe2   : > { %v2849_v48 = vcombine.high %v1498_v43, %v1502_v44  ;;  %v1431_v14 = vld [vmem:[#allocation9 + $0xf0] sm:$0xff] }
  0xe4   : > { %2178 = vmatpush1.bf16.msra.mxu0 %v2782_v51  ;;  %2219 = vmatpush1.bf16.msra.mxu1 %v2784_v52  ;;  %v1506_v51 = vld [vmem:[#allocation9 + $0x348] sm:$0xff] }
  0xe5   : > { %2179 = vmatprep.subr.bf16.mxu0 %v2791_v53  ;;  %2220 = vmatprep.subr.bf16.mxu1 %v2793_v55  ;;  %v1510_v52 = vld [vmem:[#allocation9 + $0x368] sm:$0xff]  ;;  %v2846_v53 = vcombine.low %v1497_v42, %v1501_v62  ;;  %v2848_v55 = vcombine.low %v1498_v43, %v1502_v44  ;;  %v2779_v42 = vcombine.high %v1427_v37, %v1431_v14  ;;  %v1435_v43 = vld [vmem:[#allocation9 + $0x110] sm:$0xff] }
  0xe6   : > { %v2857_v57 = vcombine.high %v1506_v51, %v1510_v52  ;;  %v1439_v44 = vld [vmem:[#allocation9 + $0x130] sm:$0xff] }
  0xe8   : > { %2180 = vmatpush1.bf16.msra.mxu0 %v2790_v60  ;;  %2221 = vmatpush1.bf16.msra.mxu1 %v2792_v61  ;;  %v1514_v60 = vld [vmem:[#allocation9 + $0x388] sm:$0xff] }
  0xe9   : > { %2181 = vmatprep.subr.bf16.mxu0 %v2799_v63  ;;  %2222 = vmatprep.subr.bf16.mxu1 %v2801_v0  ;;  %v1518_v61 = vld [vmem:[#allocation9 + $0x3a8] sm:$0xff]  ;;  %v2854_v63 = vcombine.low %v1505_v49, %v1509_v50  ;;  %v2856_v0 = vcombine.low %v1506_v51, %v1510_v52  ;;  %v2787_v49 = vcombine.high %v1435_v43, %v1439_v44  ;;  %v1443_v50 = vld [vmem:[#allocation9 + $0x150] sm:$0xff]  ;;  %v1444_v52 = vld [vmem:[#allocation9 + $0x158] sm:$0xff] }
  0xea   : > { %v2865_v2 = vcombine.high %v1514_v60, %v1518_v61  ;;  %v1447_v51 = vld [vmem:[#allocation9 + $0x170] sm:$0xff] }
  0xec   : > { %2182 = vmatpush1.bf16.msra.mxu0 %v2798_v5  ;;  %2223 = vmatpush1.bf16.msra.mxu1 %v2800_v6  ;;  %v1522_v5 = vld [vmem:[#allocation9 + $0x3c8] sm:$0xff] }
  0xed   : > { %2183 = vmatprep.subr.bf16.mxu0 %v2807_v7  ;;  %2224 = vmatprep.subr.bf16.mxu1 %v2809_v8  ;;  %v1526_v6 = vld [vmem:[#allocation9 + $0x3e8] sm:$0xff]  ;;  %v2862_v7 = vcombine.low %v1513_v58, %v1517_v59  ;;  %v2864_v8 = vcombine.low %v1514_v60, %v1518_v61  ;;  %v1451_v59 = vld [vmem:[#allocation9 + $0x190] sm:$0xff]  ;;  %v1452_v61 = vld [vmem:[#allocation9 + $0x198] sm:$0xff] }
  0xee   : > { %v2873_v11 = vcombine.high %v1522_v5, %v1526_v6  ;;  %v1455_v60 = vld [vmem:[#allocation9 + $0x1b0] sm:$0xff] }
  0xf0   : > { %2184 = vmatpush1.bf16.msra.mxu0 %v2806_v15  ;;  %2225 = vmatpush1.bf16.msra.mxu1 %v2808_v16  ;;  %v1404_v15 = vld [vmem:[#allocation9 + $0x18] sm:$0xff] }
  0xf1   : > { %2185 = vmatprep.subr.bf16.mxu0 %v2815_v17  ;;  %2226 = vmatprep.subr.bf16.mxu1 %v2817_v18  ;;  %v1408_v16 = vld [vmem:[#allocation9 + $0x38] sm:$0xff]  ;;  %v2870_v17 = vcombine.low %v1521_v3, %v1525_v4  ;;  %v2872_v18 = vcombine.low %v1522_v5, %v1526_v6  ;;  %v1459_v4 = vld [vmem:[#allocation9 + $0x1d0] sm:$0xff] }
  0xf2   : > { %v2757_v20 = vcombine.high %v1404_v15, %v1408_v16  ;;  %v2756_v27 = vcombine.low %v1404_v15, %v1408_v16  ;;  %v1463_v5 = vld [vmem:[#allocation9 + $0x1f0] sm:$0xff]  ;;  %v1460_v6 = vld [vmem:[#allocation9 + $0x1d8] sm:$0xff] }
  0xf3   : > { %v1471_v15 = vld [vmem:[#allocation9 + $0x230] sm:$0xff]  ;;  %v1468_v16 = vld [vmem:[#allocation9 + $0x218] sm:$0xff] }
  0xf4   : > { %2186 = vmatpush1.bf16.msra.mxu0 %v2814_v23  ;;  %2227 = vmatpush1.bf16.msra.mxu1 %v2816_v24  ;;  %v3291_v23 = vpack.c.bf16 %v3279_v10, %v3279_v10  ;;  %v1412_v24 = vld [vmem:[#allocation9 + $0x58] sm:$0xff]  ;;  %v2762_v10 = vcombine.low %v1411_v21, %v1415_v22  ;;  %v1475_v22 = vld [vmem:[#allocation9 + $0x250] sm:$0xff] }
  0xf5   : > { %2187 = vmatprep.subr.bf16.mxu0 %v2823_v54  ;;  %2228 = vmatprep.subr.bf16.mxu1 %v2825_v25  ;;  %v1416_v54 = vld [vmem:[#allocation9 + $0x78] sm:$0xff]  ;;  %v2754_v25 = vcombine.low %v1403_v12, %v1407_v13  ;;  %v1467_v13 = vld [vmem:[#allocation9 + $0x210] sm:$0xff] }
  0xf6   : > { %v2765_v29 = vcombine.high %v1412_v24, %v1416_v54 }
  0xf8   : > { %2188 = vmatpush1.bf16.msra.mxu0 %v2822_v31  ;;  %2229 = vmatpush1.bf16.msra.mxu1 %v2824_v32  ;;  %v1423_v31 = vld [vmem:[#allocation9 + $0xb0] sm:$0xff]  ;;  %v1420_v32 = vld [vmem:[#allocation9 + $0x98] sm:$0xff] }
  0xf9   : > { %2189 = vmatprep.subr.bf16.mxu0 %v2831_v33  ;;  %2230 = vmatprep.subr.bf16.mxu1 %v2833_v34  ;;  %v1424_v33 = vld [vmem:[#allocation9 + $0xb8] sm:$0xff]  ;;  %v2764_v34 = vcombine.low %v1412_v24, %v1416_v54  ;;  %v2771_v35 = vcombine.high %v1419_v30, %v1423_v31  ;;  %v1479_v24 = vld [vmem:[#allocation9 + $0x270] sm:$0xff] }
  0xfa   : > { %v2773_v36 = vcombine.high %v1420_v32, %v1424_v33  ;;  %v1476_v54 = vld [vmem:[#allocation9 + $0x258] sm:$0xff] }
  0xfc   : > { %2190 = vmatpush1.bf16.msra.mxu0 %v2830_v38  ;;  %2231 = vmatpush1.bf16.msra.mxu1 %v2832_v39  ;;  %v1428_v38 = vld [vmem:[#allocation9 + $0xd8] sm:$0xff] }
  0xfd   : > { %2191 = vmatprep.subr.bf16.mxu0 %v2839_v40  ;;  %2232 = vmatprep.subr.bf16.mxu1 %v2841_v41  ;;  %v1432_v39 = vld [vmem:[#allocation9 + $0xf8] sm:$0xff]  ;;  %v2770_v40 = vcombine.low %v1419_v30, %v1423_v31  ;;  %v2772_v41 = vcombine.low %v1420_v32, %v1424_v33  ;;  %v1483_v31 = vld [vmem:[#allocation9 + $0x290] sm:$0xff] }
  0xfe   : > { %v2781_v62 = vcombine.high %v1428_v38, %v1432_v39  ;;  %v1487_v32 = vld [vmem:[#allocation9 + $0x2b0] sm:$0xff]  ;;  %v1484_v33 = vld [vmem:[#allocation9 + $0x298] sm:$0xff] }
 0x100   : > { %2192 = vmatpush1.bf16.msra.mxu0 %v2838_v45  ;;  %2233 = vmatpush1.bf16.msra.mxu1 %v2840_v46  ;;  %v1436_v45 = vld [vmem:[#allocation9 + $0x118] sm:$0xff] }
 0x101   : > { %2193 = vmatprep.subr.bf16.mxu0 %v2847_v47  ;;  %2234 = vmatprep.subr.bf16.mxu1 %v2849_v48  ;;  %v1440_v46 = vld [vmem:[#allocation9 + $0x138] sm:$0xff]  ;;  %v2778_v47 = vcombine.low %v1427_v37, %v1431_v14  ;;  %v2780_v48 = vcombine.low %v1428_v38, %v1432_v39  ;;  %v1491_v14 = vld [vmem:[#allocation9 + $0x2d0] sm:$0xff] }
 0x102   : > { %v1495_v38 = vld [vmem:[#allocation9 + $0x2f0] sm:$0xff]  ;;  %v1492_v39 = vld [vmem:[#allocation9 + $0x2d8] sm:$0xff] }
 0x104   : > { %2194 = vmatpush1.bf16.msra.mxu0 %v2846_v53  ;;  %2235 = vmatpush1.bf16.msra.mxu1 %v2848_v55  ;;  %v1448_v53 = vld [vmem:[#allocation9 + $0x178] sm:$0xff]  ;;  %v2786_v55 = vcombine.low %v1435_v43, %v1439_v44  ;;  %v1499_v44 = vld [vmem:[#allocation9 + $0x310] sm:$0xff] }
 0x105   : > { %2195 = vmatprep.subr.bf16.mxu0 %v2855_v56  ;;  %2236 = vmatprep.subr.bf16.mxu1 %v2857_v57  ;;  %v2788_v56 = vcombine.low %v1436_v45, %v1440_v46  ;;  %v2795_v57 = vcombine.high %v1443_v50, %v1447_v51  ;;  %v2797_v58 = vcombine.high %v1444_v52, %v1448_v53 }
 0x108   : > { %2196 = vmatpush1.bf16.msra.mxu0 %v2854_v63  ;;  %2237 = vmatpush1.bf16.msra.mxu1 %v2856_v0  ;;  %v1456_v63 = vld [vmem:[#allocation9 + $0x1b8] sm:$0xff]  ;;  %v2794_v0 = vcombine.low %v1443_v50, %v1447_v51  ;;  %v1507_v51 = vld [vmem:[#allocation9 + $0x350] sm:$0xff] }
 0x109   : > { %2197 = vmatprep.subr.bf16.mxu0 %v2863_v1  ;;  %2238 = vmatprep.subr.bf16.mxu1 %v2865_v2  ;;  %v2796_v1 = vcombine.low %v1444_v52, %v1448_v53  ;;  %v2803_v2 = vcombine.high %v1451_v59, %v1455_v60  ;;  %v2805_v3 = vcombine.high %v1452_v61, %v1456_v63  ;;  %v1511_v52 = vld [vmem:[#allocation9 + $0x370] sm:$0xff]  ;;  %v1508_v53 = vld [vmem:[#allocation9 + $0x358] sm:$0xff] }
 0x10c   : > { %2198 = vmatpush1.bf16.msra.mxu0 %v2862_v7  ;;  %2239 = vmatpush1.bf16.msra.mxu1 %v2864_v8  ;;  %v1464_v7 = vld [vmem:[#allocation9 + $0x1f8] sm:$0xff]  ;;  %v2802_v8 = vcombine.low %v1451_v59, %v1455_v60  ;;  %v1515_v60 = vld [vmem:[#allocation9 + $0x390] sm:$0xff] }
 0x10d   : > { %2199 = vmatprep.subr.bf16.mxu0 %v2871_v9  ;;  %2240 = vmatprep.subr.bf16.mxu1 %v2873_v11  ;;  %v2804_v9 = vcombine.low %v1452_v61, %v1456_v63  ;;  %v2811_v11 = vcombine.high %v1459_v4, %v1463_v5  ;;  %v2813_v12 = vcombine.high %v1460_v6, %v1464_v7  ;;  %v1519_v61 = vld [vmem:[#allocation9 + $0x3b0] sm:$0xff]  ;;  %v1516_v63 = vld [vmem:[#allocation9 + $0x398] sm:$0xff] }
 0x110   : > { %2200 = vmatpush1.bf16.msra.mxu0 %v2870_v17  ;;  %2241 = vmatpush1.bf16.msra.mxu1 %v2872_v18  ;;  %v1472_v17 = vld [vmem:[#allocation9 + $0x238] sm:$0xff]  ;;  %v2810_v18 = vcombine.low %v1459_v4, %v1463_v5  ;;  %v1523_v5 = vld [vmem:[#allocation9 + $0x3d0] sm:$0xff] }
 0x111   : > { %2251 = vmatprep.subr.bf16.mxu0 %v2755_v19  ;;  %2292 = vmatprep.subr.bf16.mxu1 %v2757_v20  ;;  %v2812_v19 = vcombine.low %v1460_v6, %v1464_v7  ;;  %v2819_v20 = vcombine.high %v1467_v13, %v1471_v15  ;;  %v2821_v21 = vcombine.high %v1468_v16, %v1472_v17  ;;  %v1527_v6 = vld [vmem:[#allocation9 + $0x3f0] sm:$0xff]  ;;  %v1524_v7 = vld [vmem:[#allocation9 + $0x3d8] sm:$0xff] }
 0x113   : > { %2202 = vmatmul.mubr.bf16.vlgmr.msra.gmra.mrb[8].mxu0 %v3291_v23  ;;  %2243 = vmatmul.mubr.bf16.vlgmr.msra.gmra.mrb[8].mxu1 %v3291_v23 }
 0x114   : > { %2252 = vmatpush1.bf16.msra.mxu0 %v2754_v25  ;;  %2293 = vmatpush1.bf16.msra.mxu1 %v2756_v27  ;;  %v1480_v25 = vld [vmem:[#allocation9 + $0x278] sm:$0xff]  ;;  %v2818_v27 = vcombine.low %v1467_v13, %v1471_v15  ;;  %v2874_v15 = vcombine.low %v1523_v5, %v1527_v6 }
 0x115   : > { %2253 = vmatprep.subr.bf16.mxu0 %v2763_v28  ;;  %2294 = vmatprep.subr.bf16.mxu1 %v2765_v29  ;;  %v2820_v28 = vcombine.low %v1468_v16, %v1472_v17  ;;  %v2827_v29 = vcombine.high %v1475_v22, %v1479_v24  ;;  %v2829_v30 = vcombine.high %v1476_v54, %v1480_v25  ;;  %v3110_v17 = vmov 1983009808  }
 0x116   : > { %2283 = vmatprep.mubr.bf16.mxu0 %v3283_v26  ;;  %2324 = vmatprep.mubr.bf16.mxu1 %v3283_v26  ;;  %v2789_v26 = vcombine.high %v1436_v45, %v1440_v46  ;;  %v1503_v45 = vld [vmem:[#allocation9 + $0x330] sm:$0xff]  ;;  %v1500_v46 = vld [vmem:[#allocation9 + $0x318] sm:$0xff] }
 0x118   : > { %2254 = vmatpush1.bf16.msra.mxu0 %v2762_v10  ;;  %2295 = vmatpush1.bf16.msra.mxu1 %v2764_v34  ;;  %v1488_v10 = vld [vmem:[#allocation9 + $0x2b8] sm:$0xff]  ;;  %v2826_v34 = vcombine.low %v1475_v22, %v1479_v24 }
 0x119   : > { %2255 = vmatprep.subr.bf16.mxu0 %v2771_v35  ;;  %2296 = vmatprep.subr.bf16.mxu1 %v2773_v36  ;;  %v2828_v35 = vcombine.low %v1476_v54, %v1480_v25  ;;  %v2835_v36 = vcombine.high %v1483_v31, %v1487_v32  ;;  %v2837_v37 = vcombine.high %v1484_v33, %v1488_v10 }
 0x11c   : > { %2256 = vmatpush1.bf16.msra.mxu0 %v2770_v40  ;;  %2297 = vmatpush1.bf16.msra.mxu1 %v2772_v41  ;;  %v1496_v40 = vld [vmem:[#allocation9 + $0x2f8] sm:$0xff]  ;;  %v2834_v41 = vcombine.low %v1483_v31, %v1487_v32 }
 0x11d   : > { %2257 = vmatprep.subr.bf16.mxu0 %v2779_v42  ;;  %2298 = vmatprep.subr.bf16.mxu1 %v2781_v62  ;;  %v2836_v42 = vcombine.low %v1484_v33, %v1488_v10  ;;  %v2843_v62 = vcombine.high %v1491_v14, %v1495_v38  ;;  %v2845_v43 = vcombine.high %v1492_v39, %v1496_v40 }
 0x120   : > { %2258 = vmatpush1.bf16.msra.mxu0 %v2778_v47  ;;  %2299 = vmatpush1.bf16.msra.mxu1 %v2780_v48  ;;  %v1504_v47 = vld [vmem:[#allocation9 + $0x338] sm:$0xff]  ;;  %v2842_v48 = vcombine.low %v1491_v14, %v1495_v38 }
 0x121   : > { %2259 = vmatprep.subr.bf16.mxu0 %v2787_v49  ;;  %2300 = vmatprep.subr.bf16.mxu1 %v2789_v26  ;;  %v2844_v49 = vcombine.low %v1492_v39, %v1496_v40  ;;  %v2851_v26 = vcombine.high %v1499_v44, %v1503_v45  ;;  %v2853_v50 = vcombine.high %v1500_v46, %v1504_v47 }
 0x124   : > { %2260 = vmatpush1.bf16.msra.mxu0 %v2786_v55  ;;  %2301 = vmatpush1.bf16.msra.mxu1 %v2788_v56  ;;  %v1512_v55 = vld [vmem:[#allocation9 + $0x378] sm:$0xff]  ;;  %v2850_v56 = vcombine.low %v1499_v44, %v1503_v45 }
 0x125   : > { %2261 = vmatprep.subr.bf16.mxu0 %v2795_v57  ;;  %2302 = vmatprep.subr.bf16.mxu1 %v2797_v58  ;;  %v2852_v57 = vcombine.low %v1500_v46, %v1504_v47  ;;  %v2859_v58 = vcombine.high %v1507_v51, %v1511_v52  ;;  %v2861_v59 = vcombine.high %v1508_v53, %v1512_v55 }
 0x128   : > { %2262 = vmatpush1.bf16.msra.mxu0 %v2794_v0  ;;  %2303 = vmatpush1.bf16.msra.mxu1 %v2796_v1  ;;  %v1520_v0 = vld [vmem:[#allocation9 + $0x3b8] sm:$0xff]  ;;  %v2858_v1 = vcombine.low %v1507_v51, %v1511_v52 }
 0x129   : > { %2263 = vmatprep.subr.bf16.mxu0 %v2803_v2  ;;  %2304 = vmatprep.subr.bf16.mxu1 %v2805_v3  ;;  %v2860_v2 = vcombine.low %v1508_v53, %v1512_v55  ;;  %v2867_v3 = vcombine.high %v1515_v60, %v1519_v61  ;;  %v2869_v4 = vcombine.high %v1516_v63, %v1520_v0  ;;  %v359_v53 = vld [vmem:[%s3244_s16 + $0x8] sm:$0xff] }
 0x12c   : > { %2264 = vmatpush1.bf16.msra.mxu0 %v2802_v8  ;;  %2305 = vmatpush1.bf16.msra.mxu1 %v2804_v9  ;;  %v1528_v8 = vld [vmem:[#allocation9 + $0x3f8] sm:$0xff]  ;;  %v2866_v9 = vcombine.low %v1515_v60, %v1519_v61  ;;  %v1377_v60 = vld [vmem:[#allocation3] sm:$0xf] }
 0x12d   : > { %2265 = vmatprep.subr.bf16.mxu0 %v2811_v11  ;;  %2306 = vmatprep.subr.bf16.mxu1 %v2813_v12  ;;  %v2868_v11 = vcombine.low %v1516_v63, %v1520_v0  ;;  %v2875_v12 = vcombine.high %v1523_v5, %v1527_v6  ;;  %v2877_v13 = vcombine.high %v1524_v7, %v1528_v8 }
 0x12e   : > { %v2876_v16 = vcombine.low %v1524_v7, %v1528_v8 }
 0x130   : > { %2266 = vmatpush1.bf16.msra.mxu0 %v2810_v18  ;;  %2307 = vmatpush1.bf16.msra.mxu1 %v2812_v19  ;;  %v1317_v18 = vunpack.c.l.s4 %v3110_v17  ;;  %v1319_v19 = vlaneseq }
 0x131   : > { %2267 = vmatprep.subr.bf16.mxu0 %v2819_v20  ;;  %2308 = vmatprep.subr.bf16.mxu1 %v2821_v21 }
 0x132   : > { %v1318_v20 = vunpack.c.0.s8 %v1317_v18  ;;  %v1320_v21 = vshrl.u32 %v1319_v19, 7 }
 0x134   : > { %2268 = vmatpush1.bf16.msra.mxu0 %v2818_v27  ;;  %2309 = vmatpush1.bf16.msra.mxu1 %v2820_v28  ;;  %v3299_v24 = vsub.s32 %v1318_v20, %v1320_v21 }
 0x135   : > { %2269 = vmatprep.subr.bf16.mxu0 %v2827_v29  ;;  %2310 = vmatprep.subr.bf16.mxu1 %v2829_v30 }
 0x138   : > { %2270 = vmatpush1.bf16.msra.mxu0 %v2826_v34  ;;  %2311 = vmatpush1.bf16.msra.mxu1 %v2828_v35  ;;  %v358_v35 = vld [vmem:[%s3244_s16] sm:$0xff] }
 0x139   : > { %2271 = vmatprep.subr.bf16.mxu0 %v2835_v36  ;;  %2312 = vmatprep.subr.bf16.mxu1 %v2837_v37 }
 0x13c   : > { %2272 = vmatpush1.bf16.msra.mxu0 %v2834_v41  ;;  %2313 = vmatpush1.bf16.msra.mxu1 %v2836_v42 }
 0x13d   : > { %2273 = vmatprep.subr.bf16.mxu0 %v2843_v62  ;;  %2314 = vmatprep.subr.bf16.mxu1 %v2845_v43 }
 0x140   : > { %2274 = vmatpush1.bf16.msra.mxu0 %v2842_v48  ;;  %2315 = vmatpush1.bf16.msra.mxu1 %v2844_v49 }
 0x141   : > { %2275 = vmatprep.subr.bf16.mxu0 %v2851_v26  ;;  %2316 = vmatprep.subr.bf16.mxu1 %v2853_v50 }
 0x144   : > { %2276 = vmatpush1.bf16.msra.mxu0 %v2850_v56  ;;  %2317 = vmatpush1.bf16.msra.mxu1 %v2852_v57 }
 0x145   : > { %2277 = vmatprep.subr.bf16.mxu0 %v2859_v58  ;;  %2318 = vmatprep.subr.bf16.mxu1 %v2861_v59 }
 0x148   : > { %2278 = vmatpush1.bf16.msra.mxu0 %v2858_v1  ;;  %2319 = vmatpush1.bf16.msra.mxu1 %v2860_v2 }
 0x149   : > { %2279 = vmatprep.subr.bf16.mxu0 %v2867_v3  ;;  %2320 = vmatprep.subr.bf16.mxu1 %v2869_v4 }
 0x14c   : > { %2280 = vmatpush1.bf16.msra.mxu0 %v2866_v9  ;;  %2321 = vmatpush1.bf16.msra.mxu1 %v2868_v11 }
 0x14d   : > { %2281 = vmatprep.subr.bf16.mxu0 %v2875_v12  ;;  %2322 = vmatprep.subr.bf16.mxu1 %v2877_v13 }
 0x150   : > { %2282 = vmatpush1.bf16.msra.mxu0 %v2874_v15  ;;  %2323 = vmatpush1.bf16.msra.mxu1 %v2876_v16 }
 0x153   : > { %2284 = vmatmul.mubr.bf16.vlgmr.msra.gmra.mrb[12].mxu0 %v3291_v23  ;;  %2325 = vmatmul.mubr.bf16.vlgmr.msra.gmra.mrb[12].mxu1 %v3291_v23 }
 0x166   : > { %v1176_v22 = vpop.f32.mrb[0].mxu0  ;;  %v1217_v54 = vpop.f32.mrb[0].mxu1 }
 0x167   : > { %v1178_v25 = vpop.f32.mrb[1].mxu0  ;;  %v1219_v28 = vpop.f32.mrb[1].mxu1 }
 0x168   : > { %v1314_v27 = vcombine.low %v1176_v22, %v1178_v25  ;;  %v1180_v29 = vpop.f32.mrb[2].mxu0  ;;  %v1315_v30 = vcombine.low %v1217_v54, %v1219_v28  ;;  %v1221_v31 = vpop.f32.mrb[2].mxu1  ;;  %v1385_v54 = vld [vmem:[%s3249_s20] sm:$0xff] }
 0x169   : > { %v1181_v32 = vpop.f32.mrb[3].mxu0  ;;  %v1222_v23 = vpop.f32.mrb[3].mxu1 }
 0x16a   : > { %v1322_v33 = vrot.slane %v1314_v27, %v3299_v24  ;;  %v1329_v10 = vrot.slane %v1315_v30, %v3299_v24 }
 0x16c   : > { %v1330_v34 = vcombine.low %v1322_v33, %v1329_v10 }
 0x16e   : > { %v1350_v36 = vadd.f32 %v1330_v34, %v358_v35 }
 0x170   : > { %v1359_v37 = vrot.slane %v1350_v36, 4  ;;  %v2746_v38 = vmul.f32 -1.442695, %v1350_v36 }
 0x172   : > { %v2747_v14 = vmul.f32 -1.442695, %v1359_v37 }
 0x174   : > { %2941 = vpow2.f32 %v2747_v14 }
 0x175   : > { %2943 = vpow2.f32 %v2746_v38 }
 0x17e   : > { %v2942_v42 = vpop.eup %2941 }
 0x17f   : > { %v2944_v45 = vpop.eup %2943  ;;  %v1364_v50 = vadd.f32 1.0, %v2942_v42 }
 0x180   : > { %v1355_v52 = vadd.f32 1.0, %v2944_v45 }
 0x181   : > { %2945 = vrcp.f32 %v1364_v50 }
 0x182   : > { %2947 = vrcp.f32 %v1355_v52 }
 0x18b   : > { %v2946_v59 = vpop.eup %2945 }
 0x18c   : > { %v2948_v61 = vpop.eup %2947  ;;  %v1378_v0 = vmul.f32 %v2946_v59, %v1377_v60 }
 0x1a6   : > { %v1258_v39 = vpop.f32.mrb[4].mxu0  ;;  %v1299_v40 = vpop.f32.mrb[4].mxu1 }
 0x1a7   : > { %v1260_v41 = vpop.f32.mrb[5].mxu0  ;;  %v1301_v43 = vpop.f32.mrb[5].mxu1 }
 0x1a8   : > { %v1331_v62 = vcombine.low %v1258_v39, %v1260_v41  ;;  %v1262_v44 = vpop.f32.mrb[6].mxu0  ;;  %v1332_v46 = vcombine.low %v1299_v40, %v1301_v43  ;;  %v1303_v47 = vpop.f32.mrb[6].mxu1 }
 0x1a9   : > { %v1263_v48 = vpop.f32.mrb[7].mxu0  ;;  %v1304_v26 = vpop.f32.mrb[7].mxu1 }
 0x1aa   : > { %v1339_v49 = vrot.slane %v1331_v62, %v3299_v24  ;;  %v1346_v51 = vrot.slane %v1332_v46, %v3299_v24  ;;  %v1386_v62 = vld [vmem:[%s3249_s20 + $0x8] sm:$0xff] }
 0x1ab   : > { %v2404_v48 = vld [vmem:[#allocation5] sm:$0xf] }
 0x1ac   : > { %v1347_v55 = vcombine.low %v1339_v49, %v1346_v51 }
 0x1ae   : > { %v1351_v56 = vadd.f32 %v1347_v55, %v359_v53 }
 0x1b0   : > { %2949 = vtanh.f32 %v1351_v56  ;;  %v1369_v57 = vrot.slane %v1351_v56, 4 }
 0x1b2   : > { %v2748_v58 = vmul.f32 -1.442695, %v1369_v57 }
 0x1b4   : > { %2951 = vpow2.f32 %v2748_v58 }
 0x1ba   : > { %v2950_v63 = vpop.eup %2949 }
 0x1bb   : > { %v1379_v1 = vmul.f32 %v2950_v63, %v2948_v61 }
 0x1bd   : > { %v3307_v2 = vadd.f32 %v1379_v1, %v1378_v0 }
 0x1be   : > { %v2952_v3 = vpop.eup %2951 }
 0x1bf   : > { %v1374_v4 = vadd.f32 1.0, %v2952_v3  ;;  %1384 = vst [vmem:[#allocation3] sm:$0xf] %v3307_v2  ;;  %2953 = vtanh.f32 %v3307_v2  ;;  %2421 = vst [vmem:[#allocation12] sm:$0xf] (!%p2881_p11), %v3307_v2 }
 0x1c1   : > { %2955 = vrcp.f32 %v1374_v4 }
 0x1c9   : > { %v2954_v5 = vpop.eup %2953 }
 0x1cb   : > { %v2956_v6 = vpop.eup %2955 }
 0x1cc   : > { %v3311_v7 = vmul.f32 %v2956_v6, %v2954_v5 }
 0x1ce   : > { %1383 = vst [vmem:[#allocation2] sm:$0xf] %v3311_v7  ;;  %2412 = vst [vmem:[%s3254_s23] sm:$0xf] %v3311_v7 }
 0x1cf   : > { %2418 = vst [vmem:[#allocation11] sm:$0xf] (!%p2881_p11), %v3311_v7 }
 0x1e6   : > { %v2203_v8 = vpop.f32.mrb[8].mxu0  ;;  %v2244_v9 = vpop.f32.mrb[8].mxu1 }
 0x1e7   : > { %v2205_v11 = vpop.f32.mrb[9].mxu0  ;;  %v2246_v13 = vpop.f32.mrb[9].mxu1 }
 0x1e8   : > { %v2341_v12 = vcombine.low %v2203_v8, %v2205_v11  ;;  %v2207_v15 = vpop.f32.mrb[10].mxu0  ;;  %v2342_v16 = vcombine.low %v2244_v9, %v2246_v13  ;;  %v2248_v17 = vpop.f32.mrb[10].mxu1 }
 0x1e9   : > { %v2208_v18 = vpop.f32.mrb[11].mxu0  ;;  %v2249_v20 = vpop.f32.mrb[11].mxu1 }
 0x1ea   : > { %v2349_v19 = vrot.slane %v2341_v12, %v3299_v24  ;;  %v2356_v21 = vrot.slane %v2342_v16, %v3299_v24 }
 0x1ec   : > { %v2357_v22 = vcombine.low %v2349_v19, %v2356_v21 }
 0x1ee   : > { %v2377_v25 = vadd.f32 %v2357_v22, %v1385_v54 }
 0x1f0   : > { %v2386_v27 = vrot.slane %v2377_v25, 4  ;;  %v2878_v29 = vmul.f32 -1.442695, %v2377_v25 }
 0x1f2   : > { %v2879_v28 = vmul.f32 -1.442695, %v2386_v27 }
 0x1f4   : > { %2957 = vpow2.f32 %v2879_v28 }
 0x1f5   : > { %2959 = vpow2.f32 %v2878_v29 }
 0x1fe   : > { %v2958_v33 = vpop.eup %2957 }
 0x1ff   : > { %v2960_v35 = vpop.eup %2959  ;;  %v2391_v40 = vadd.f32 1.0, %v2958_v33 }
 0x200   : > { %v2382_v42 = vadd.f32 1.0, %v2960_v35 }
 0x201   : > { %2961 = vrcp.f32 %v2391_v40 }
 0x202   : > { %2963 = vrcp.f32 %v2382_v42 }
 0x20b   : > { %v2962_v47 = vpop.eup %2961 }
 0x20c   : > { %v2964_v49 = vpop.eup %2963  ;;  %v2405_v50 = vmul.f32 %v2962_v47, %v2404_v48 }
 0x226   : > { %v2285_v30 = vpop.f32.mrb[12].mxu0  ;;  %v2326_v31 = vpop.f32.mrb[12].mxu1 }
 0x227   : > { %v2287_v32 = vpop.f32.mrb[13].mxu0  ;;  %v2328_v10 = vpop.f32.mrb[13].mxu1 }
 0x228   : > { %v2358_v23 = vcombine.low %v2285_v30, %v2287_v32  ;;  %v2289_v34 = vpop.f32.mrb[14].mxu0  ;;  %v2359_v36 = vcombine.low %v2326_v31, %v2328_v10  ;;  %v2330_v37 = vpop.f32.mrb[14].mxu1 }
 0x229   : > { %v2290_v14 = vpop.f32.mrb[15].mxu0  ;;  %v2331_v39 = vpop.f32.mrb[15].mxu1 }
 0x22a   : > { %v2366_v38 = vrot.slane %v2358_v23, %v3299_v24  ;;  %v2373_v41 = vrot.slane %v2359_v36, %v3299_v24 }
 0x22c   : > { %v2374_v43 = vcombine.low %v2366_v38, %v2373_v41 }
 0x22e   : > { %v2378_v44 = vadd.f32 %v2374_v43, %v1386_v62 }
 0x230   : > { %2965 = vtanh.f32 %v2378_v44  ;;  %v2396_v45 = vrot.slane %v2378_v44, 4 }
 0x232   : > { %v2880_v46 = vmul.f32 -1.442695, %v2396_v45 }
 0x234   : > { %2967 = vpow2.f32 %v2880_v46 }
 0x23a   : > { %v2966_v26 = vpop.eup %2965 }
 0x23b   : > { %v2406_v51 = vmul.f32 %v2966_v26, %v2964_v49 }
 0x23d   : > { %v2407_v52 = vadd.f32 %v2406_v51, %v2405_v50 }
 0x23e   : > { %v2968_v53 = vpop.eup %2967 }
 0x23f   : > { %v2401_v24 = vadd.f32 1.0, %v2968_v53  ;;  %2411 = vst [vmem:[#allocation5] sm:$0xf] %v2407_v52  ;;  %2969 = vtanh.f32 %v2407_v52  ;;  %2423 = vst [vmem:[#allocation12 + $0x4] sm:$0xf] (!%p2881_p11), %v2407_v52 }
 0x241   : > { %2971 = vrcp.f32 %v2401_v24 }
 0x248   : > { %2417 = sbr.rel (%p2881_p11) target bundleno = 592 (0x250), region = 52 }
 0x249   : > { %v2970_v55 = vpop.eup %2969 }
 0x24b   : > { %v2972_v56 = vpop.eup %2971 }
 0x24c   : > { %v2409_v57 = vmul.f32 %v2972_v56, %v2970_v55 }
 0x24e   : > { %2410 = vst [vmem:[#allocation4] sm:$0xf] %v2409_v57  ;;  %2413 = vst [vmem:[%s3259_s10] sm:$0xf] %v2409_v57 }
 0x24f   : > { %2420 = vst [vmem:[#allocation11 + $0x4] sm:$0xf] %v2409_v57 }
 0x250 PF: > { %p2919_p12 = scmp.eq.s32.totalorder %s3161_s25, 7  ;;  %s3111_s27 = smov [#allocation11]  }
 0x251   : > { %s2448_s11 = sshll.u32 %s3111_s27, 4  ;;  %s2449_s11 = int_to_ptr.vmem [resolvable:$true] %s2448_s11 }
 0x252   : > { %s3029_s12 = scalar_lea.vmem %s2449_s11, 128  ;;  %p3036_p5 = scmp.lt.s32.totalorder %s2449_s11, %s2449_s11 }
 0x253   : > { %p3030_p13 = scmp.ne.s32.totalorder %s2449_s11, %s3029_s12  ;;  %p3037_p7 = scmp.lt.s32.totalorder %s3029_s12, %s3029_s12 }
 0x255   : > { %p3031_p0 = pnand %p3030_p13, %p2919_p12  ;;  %p3038_p2 = por %p3037_p7, %p3036_p5 }
 0x257   : > { %p3032_p1 = pneg %p3031_p0 }
 0x259   : > { %p3039_p8 = pnand %p3038_p2, %p3032_p1 }
 0x25b   : > { %3042 = shalt.err (!%p3039_p8)
}
 0x25c   : > { %s3043_s8 = scalar_lea.hbm %s3380_s6, 128 }
 0x25d   : > { %p3044_p3 = scmp.ne.s32.totalorder %s3380_s6, %s3043_s8  ;;  %p3049_p6 = scmp.lt.u32.totalorder %s3043_s8, %s3380_s6 }
 0x25f   : > { %p3045_p4 = pnand %p3044_p3, %p2919_p12 }
 0x261   : > { %p3046_p9 = pneg %p3045_p4 }
 0x263   : > { %p3051_p10 = pnand %p3049_p6, %p3046_p9 }
 0x265   : > { %3054 = shalt.err (!%p3051_p10)
}
 0x266   : > { %s3112_s17 = smov 64   ;;  %s3113_s18 = smov 4  }
 0x267   : > { %2901 = dma.vmem_to_hbm [thread:$0]  (%p2919_p12), %s2449_s11, 128, %s3380_s6, [#allocation8], %s3112_s17, %s3112_s17, %s3113_s18  }
 0x268   : > { %s3114_s21 = smov [#allocation12]  }
 0x269   : > { %s2461_s22 = sshll.u32 %s3114_s21, 4  ;;  %s2462_s22 = int_to_ptr.vmem [resolvable:$true] %s2461_s22 }
 0x26a   : > { %s3055_s23 = scalar_lea.vmem %s2462_s22, 128  ;;  %p3062_p1 = scmp.lt.s32.totalorder %s2462_s22, %s2462_s22 }
 0x26b   : > { %p3056_p11 = scmp.ne.s32.totalorder %s2462_s22, %s3055_s23  ;;  %p3063_p5 = scmp.lt.s32.totalorder %s3055_s23, %s3055_s23 }
 0x26d   : > { %p3057_p13 = pnand %p3056_p11, %p2919_p12  ;;  %p3064_p7 = por %p3063_p5, %p3062_p1 }
 0x26f   : > { %p3058_p0 = pneg %p3057_p13 }
 0x271   : > { %p3065_p2 = pnand %p3064_p7, %p3058_p0 }
 0x273   : > { %3068 = shalt.err (!%p3065_p2)
}
 0x274   : > { %s3069_s9 = scalar_lea.hbm %s3381_s7, 128 }
 0x275   : > { %p3070_p8 = scmp.ne.s32.totalorder %s3381_s7, %s3069_s9  ;;  %p3075_p9 = scmp.lt.u32.totalorder %s3069_s9, %s3381_s7 }
 0x277   : > { %p3071_p3 = pnand %p3070_p8, %p2919_p12 }
 0x279   : > { %p3072_p4 = pneg %p3071_p3 }
 0x27b   : > { %p3077_p6 = pnand %p3075_p9, %p3072_p4 }
 0x27d   : > { %3080 = shalt.err (!%p3077_p6)
}
 0x27e   : > { %2903 = dma.vmem_to_hbm [thread:$0]  (%p2919_p12), %s2462_s22, 128, %s3381_s7, [#allocation13], %s3112_s17, %s3112_s17, %s3113_s18  }
 0x27f   : > { %3094 = dma.done.wait (%p2919_p12), [#allocation8], 128  }
 0x280   : > { %3096 = vsyncadd (%p2919_p12), [#allocation8], 4294967168 }
 0x281   : > { %3098 = dma.done.wait (%p2919_p12), [#allocation13], 128  }
 0x282   : > { %3100 = vsyncadd (%p2919_p12), [#allocation13], 4294967168 }
 0x283 PF: > { %s22_s24 = sadd.s32 1, %s3103_s24  }
 0x284   : > { %p19_p10 = scmp.ge.s32.totalorder %s22_s24, 10  }
 0x286   :  { %21 = sbr.rel (!%p19_p10) target bundleno = 4 (0x4), region = 117 }
 0x28d   :  { %2498 = vsyncpa [#allocation7], 1 }
 0x28e   :  { %2500 = vsyncpa [#allocation7 + $0x1], 1 }
 0x28f   :  { %2501 = vsyncpa [#allocation10], 1 }
 0x290   :  { %2502 = vsyncpa [#allocation8], 1 }
 0x291   :  { %2504 = vsyncpa [#allocation8 + $0x1], 1 }
 0x292   :  { %2505 = vsyncpa [#allocation13], 1 }

// kernel: seq2seq_forward.11
= control target key start
LH: loop header
LB: loop body
LE: loop exit
PB: predicated region body
PF: predicated region fallthrough
CT: control target
= control target key end

     0   :  { %s2886_s24 = smov 0   ;;  %s3766_s0 = inlined_call_operand.vmem [shape: f32[8,2,1024], index: 0, kind: input, shape index: {}]   ;;  %s3767_s1 = inlined_call_operand.vmem [shape: f32[8,2,1024], index: 1, kind: input, shape index: {}]   ;;  %s3768_s2 = inlined_call_operand.vmem [shape: bf16[256,1024], index: 2, kind: input, shape index: {}]   ;;  %s3769_s3 = inlined_call_operand.vmem [shape: bf16[256,1024], index: 3, kind: input, shape index: {}]   ;;  %s3770_s4 = inlined_call_operand.vmem [shape: f32[8,2,256], index: 4, kind: output, shape index: {0}]   ;;  %s3771_s5 = inlined_call_operand.vmem [shape: f32[8,2,256], index: 5, kind: output, shape index: {1}]   ;;  %s3772_s6 = inlined_call_operand.vmem [shape: f32[2,2,256], index: 6, kind: output, shape index: {2}]   ;;  %s3773_s7 = inlined_call_operand.vmem [shape: f32[2,2,256], index: 7, kind: output, shape index: {3}]  }
   0x1 LB: > { %s2892_s25 = sadd.s32 4294967295, %s2842_s24   ;;  %p2511_p0 = scmp.ge.s32.totalorder %s2842_s24, 1  ;;  %s2842_s24 = sphi %s2886_s24, %s18_s24  }
   0x2   : > { %p250_p1 = scmp.lt.s32.totalorder %s2842_s24, 9 }
   0x4   : > { %p251_p2 = pnand %p2511_p0, %p250_p1 }
   0x5   : > { %p294_p3 = scmp.lt.s32.totalorder (!%p251_p2), %s2892_s25, 7  ;;  %s299_s26 = ssub.s32 (!%p251_p2), 7, %s2892_s25 }
   0x6   : > { %254 = sbr.rel (%p251_p2) target bundleno = 534 (0x216), region = 36  ;;  %p300_p4 = scmp.lt.s32.totalorder (!%p251_p2), %s299_s26, 7 }
   0x7   : > { %p2520_p5 = scmp.ne.s32.totalorder (!%p251_p2), %s2892_s25, 0 }
   0xd   : > { %s295_s27 = scalar_select %p294_p3, %s2892_s25, 7 }
   0xe   : > { %s3775_s26 = smov (!%p300_p4, %s299_s26), 7  ;;  %321 = sbr.rel (%p2520_p5) target bundleno = 21 (0x15), region = 40 }
   0xf   : > { %s2790_s28 = sshll.u32 %s295_s27, 4  ;;  %s2792_s29 = sshll.u32 %s295_s27, 2  ;;  %v2844_v0 = vmov (!%p2520_p5), 0.0  }
  0x10   : > { %s2902_s9 = scalar_lea.vmem %s3766_s0, %s2790_s28  ;;  %s2791_s10 = sshll.u32 %s3775_s26, 4  ;;  %322 = vst [vmem:[#allocation2] sm:$0xf] (!%p2520_p5), %v2844_v0  ;;  %323 = vst [vmem:[#allocation3] sm:$0xf] (!%p2520_p5), %v2844_v0 }
  0x11   : > { %s2907_s13 = scalar_lea.vmem %s3767_s1, %s2791_s10  ;;  %s2912_s16 = scalar_lea.vmem %s3770_s4, %s2792_s29  ;;  %324 = vst [vmem:[#allocation4] sm:$0xf] (!%p2520_p5), %v2844_v0  ;;  %325 = vst [vmem:[#allocation5] sm:$0xf] (!%p2520_p5), %v2844_v0 }
  0x12   : > { %s2793_s17 = sshll.u32 %s3775_s26, 2 }
  0x13   : > { %s2917_s20 = scalar_lea.vmem %s3771_s5, %s2793_s17 }
  0x15 PF: > { %v342_v1 = vld [vmem:[%s3768_s2] sm:$0xff]  ;;  %v343_v3 = vld [vmem:[%s3768_s2 + $0x8] sm:$0xff]  ;;  %p2785_p6 = scmp.ne.s32.totalorder %s2892_s25, 7 }
  0x16   : > { %v346_v2 = vld [vmem:[%s3768_s2 + $0x20] sm:$0xff]  ;;  %v347_v5 = vld [vmem:[%s3768_s2 + $0x28] sm:$0xff] }
  0x17   : > { %v2523_v4 = vcombine.high %v342_v1, %v346_v2  ;;  %v2522_v6 = vcombine.low %v342_v1, %v346_v2  ;;  %v350_v7 = vld [vmem:[%s3768_s2 + $0x40] sm:$0xff]  ;;  %v2525_v9 = vcombine.high %v343_v3, %v347_v5  ;;  %v2524_v10 = vcombine.low %v343_v3, %v347_v5  ;;  %v351_v12 = vld [vmem:[%s3768_s2 + $0x48] sm:$0xff] }
  0x18   : > { %v354_v8 = vld [vmem:[%s3768_s2 + $0x60] sm:$0xff]  ;;  %v355_v13 = vld [vmem:[%s3768_s2 + $0x68] sm:$0xff] }
  0x19   : > { %v2531_v11 = vcombine.high %v350_v7, %v354_v8  ;;  %v358_v14 = vld [vmem:[%s3768_s2 + $0x80] sm:$0xff]  ;;  %1110 = vmatprep.subr.bf16.mxu0 %v2523_v4  ;;  %v2533_v15 = vcombine.high %v351_v12, %v355_v13  ;;  %v359_v17 = vld [vmem:[%s3768_s2 + $0x88] sm:$0xff]  ;;  %1151 = vmatprep.subr.bf16.mxu1 %v2525_v9  ;;  %v2530_v19 = vcombine.low %v350_v7, %v354_v8 }
  0x1a   : > { %v362_v16 = vld [vmem:[%s3768_s2 + $0xa0] sm:$0xff]  ;;  %v363_v18 = vld [vmem:[%s3768_s2 + $0xa8] sm:$0xff]  ;;  %1111 = vmatpush1.bf16.msra.mxu0 %v2522_v6  ;;  %1152 = vmatpush1.bf16.msra.mxu1 %v2524_v10  ;;  %v2532_v20 = vcombine.low %v351_v12, %v355_v13 }
  0x1b   : > { %1112 = vmatprep.subr.bf16.mxu0 %v2531_v11  ;;  %v2539_v21 = vcombine.high %v358_v14, %v362_v16  ;;  %1153 = vmatprep.subr.bf16.mxu1 %v2533_v15  ;;  %v2541_v22 = vcombine.high %v359_v17, %v363_v18  ;;  %v366_v23 = vld [vmem:[%s3768_s2 + $0xc0] sm:$0xff]  ;;  %v367_v25 = vld [vmem:[%s3768_s2 + $0xc8] sm:$0xff]  ;;  %v2538_v27 = vcombine.low %v358_v14, %v362_v16 }
  0x1c   : > { %v370_v24 = vld [vmem:[%s3768_s2 + $0xe0] sm:$0xff]  ;;  %v371_v26 = vld [vmem:[%s3768_s2 + $0xe8] sm:$0xff]  ;;  %v2540_v28 = vcombine.low %v359_v17, %v363_v18 }
  0x1d   : > { %v2547_v29 = vcombine.high %v366_v23, %v370_v24  ;;  %v2549_v30 = vcombine.high %v367_v25, %v371_v26  ;;  %v374_v31 = vld [vmem:[%s3768_s2 + $0x100] sm:$0xff]  ;;  %v375_v33 = vld [vmem:[%s3768_s2 + $0x108] sm:$0xff]  ;;  %v2546_v35 = vcombine.low %v366_v23, %v370_v24  ;;  %v2548_v36 = vcombine.low %v367_v25, %v371_v26 }
  0x1e   : > { %1113 = vmatpush1.bf16.msra.mxu0 %v2530_v19  ;;  %1154 = vmatpush1.bf16.msra.mxu1 %v2532_v20  ;;  %v378_v32 = vld [vmem:[%s3768_s2 + $0x120] sm:$0xff]  ;;  %v379_v34 = vld [vmem:[%s3768_s2 + $0x128] sm:$0xff] }
  0x1f   : > { %1114 = vmatprep.subr.bf16.mxu0 %v2539_v21  ;;  %1155 = vmatprep.subr.bf16.mxu1 %v2541_v22  ;;  %v2555_v37 = vcombine.high %v374_v31, %v378_v32  ;;  %v2557_v38 = vcombine.high %v375_v33, %v379_v34  ;;  %v382_v39 = vld [vmem:[%s3768_s2 + $0x140] sm:$0xff]  ;;  %v383_v41 = vld [vmem:[%s3768_s2 + $0x148] sm:$0xff]  ;;  %v2554_v43 = vcombine.low %v374_v31, %v378_v32 }
  0x20   : > { %v386_v40 = vld [vmem:[%s3768_s2 + $0x160] sm:$0xff]  ;;  %v387_v42 = vld [vmem:[%s3768_s2 + $0x168] sm:$0xff]  ;;  %v2556_v44 = vcombine.low %v375_v33, %v379_v34 }
  0x21   : > { %v2563_v45 = vcombine.high %v382_v39, %v386_v40  ;;  %v2565_v46 = vcombine.high %v383_v41, %v387_v42  ;;  %v390_v47 = vld [vmem:[%s3768_s2 + $0x180] sm:$0xff]  ;;  %v391_v49 = vld [vmem:[%s3768_s2 + $0x188] sm:$0xff]  ;;  %v2562_v51 = vcombine.low %v382_v39, %v386_v40  ;;  %v2564_v52 = vcombine.low %v383_v41, %v387_v42 }
  0x22   : > { %1115 = vmatpush1.bf16.msra.mxu0 %v2538_v27  ;;  %1156 = vmatpush1.bf16.msra.mxu1 %v2540_v28  ;;  %v394_v48 = vld [vmem:[%s3768_s2 + $0x1a0] sm:$0xff]  ;;  %v395_v50 = vld [vmem:[%s3768_s2 + $0x1a8] sm:$0xff] }
  0x23   : > { %1116 = vmatprep.subr.bf16.mxu0 %v2547_v29  ;;  %1157 = vmatprep.subr.bf16.mxu1 %v2549_v30  ;;  %v2571_v53 = vcombine.high %v390_v47, %v394_v48  ;;  %v3004_v54 = vld.sshfl [vmem:[#allocation2] sm:$0x33 pattern:$0x76325410]  ;;  %v2573_v55 = vcombine.high %v391_v49, %v395_v50  ;;  %v399_v59 = vld [vmem:[%s3768_s2 + $0x1c8] sm:$0xff]  ;;  %v2570_v61 = vcombine.low %v390_v47, %v394_v48 }
  0x24   : > { %v398_v56 = vld [vmem:[%s3768_s2 + $0x1c0] sm:$0xff]  ;;  %v337_v58 = vcombine.high %v3004_v54, %v3004_v54  ;;  %v403_v60 = vld [vmem:[%s3768_s2 + $0x1e8] sm:$0xff]  ;;  %v2572_v63 = vcombine.low %v391_v49, %v395_v50 }
  0x25   : > { %v402_v57 = vld [vmem:[%s3768_s2 + $0x1e0] sm:$0xff]  ;;  %v2581_v1 = vcombine.high %v399_v59, %v403_v60  ;;  %v407_v4 = vld [vmem:[%s3768_s2 + $0x208] sm:$0xff]  ;;  %v2580_v7 = vcombine.low %v399_v59, %v403_v60 }
  0x26   : > { %1117 = vmatpush1.bf16.msra.mxu0 %v2546_v35  ;;  %1158 = vmatpush1.bf16.msra.mxu1 %v2548_v36  ;;  %v3020_v62 = vpack.c.bf16 %v337_v58, %v337_v58  ;;  %v2579_v0 = vcombine.high %v398_v56, %v402_v57  ;;  %v406_v2 = vld [vmem:[%s3768_s2 + $0x200] sm:$0xff]  ;;  %v411_v5 = vld [vmem:[%s3768_s2 + $0x228] sm:$0xff]  ;;  %v2578_v6 = vcombine.low %v398_v56, %v402_v57 }
  0x27   : > { %1118 = vmatprep.subr.bf16.mxu0 %v2555_v37  ;;  %1159 = vmatprep.subr.bf16.mxu1 %v2557_v38  ;;  %v410_v3 = vld [vmem:[%s3768_s2 + $0x220] sm:$0xff]  ;;  %v2589_v9 = vcombine.high %v407_v4, %v411_v5  ;;  %v415_v12 = vld [vmem:[%s3768_s2 + $0x248] sm:$0xff]  ;;  %v2588_v15 = vcombine.low %v407_v4, %v411_v5  ;;  %v344_v4 = vld [vmem:[%s3768_s2 + $0x10] sm:$0xff] }
  0x28   : > { %1142 = vmatprep.mubr.bf16.mxu0 %v3020_v62  ;;  %1183 = vmatprep.mubr.bf16.mxu1 %v3020_v62  ;;  %v2587_v8 = vcombine.high %v406_v2, %v410_v3  ;;  %v414_v10 = vld [vmem:[%s3768_s2 + $0x240] sm:$0xff]  ;;  %v419_v13 = vld [vmem:[%s3768_s2 + $0x268] sm:$0xff]  ;;  %v2586_v14 = vcombine.low %v406_v2, %v410_v3  ;;  %v348_v5 = vld [vmem:[%s3768_s2 + $0x30] sm:$0xff] }
  0x29   : > { %v418_v11 = vld [vmem:[%s3768_s2 + $0x260] sm:$0xff]  ;;  %v2597_v17 = vcombine.high %v415_v12, %v419_v13  ;;  %v423_v20 = vld [vmem:[%s3768_s2 + $0x288] sm:$0xff]  ;;  %v2596_v23 = vcombine.low %v415_v12, %v419_v13  ;;  %v352_v12 = vld [vmem:[%s3768_s2 + $0x50] sm:$0xff] }
  0x2a   : > { %1119 = vmatpush1.bf16.msra.mxu0 %v2554_v43  ;;  %1160 = vmatpush1.bf16.msra.mxu1 %v2556_v44  ;;  %v2595_v16 = vcombine.high %v414_v10, %v418_v11  ;;  %v422_v18 = vld [vmem:[%s3768_s2 + $0x280] sm:$0xff]  ;;  %v427_v21 = vld [vmem:[%s3768_s2 + $0x2a8] sm:$0xff]  ;;  %v2594_v22 = vcombine.low %v414_v10, %v418_v11  ;;  %v2527_v10 = vcombine.high %v344_v4, %v348_v5  ;;  %v356_v13 = vld [vmem:[%s3768_s2 + $0x70] sm:$0xff] }
  0x2b   : > { %1120 = vmatprep.subr.bf16.mxu0 %v2563_v45  ;;  %1161 = vmatprep.subr.bf16.mxu1 %v2565_v46  ;;  %v426_v19 = vld [vmem:[%s3768_s2 + $0x2a0] sm:$0xff]  ;;  %v2605_v25 = vcombine.high %v423_v20, %v427_v21  ;;  %v431_v28 = vld [vmem:[%s3768_s2 + $0x2c8] sm:$0xff]  ;;  %v2604_v31 = vcombine.low %v423_v20, %v427_v21  ;;  %v364_v21 = vld [vmem:[%s3768_s2 + $0xb0] sm:$0xff] }
  0x2c   : > { %v2603_v24 = vcombine.high %v422_v18, %v426_v19  ;;  %v430_v26 = vld [vmem:[%s3768_s2 + $0x2c0] sm:$0xff]  ;;  %v435_v29 = vld [vmem:[%s3768_s2 + $0x2e8] sm:$0xff]  ;;  %v2602_v30 = vcombine.low %v422_v18, %v426_v19  ;;  %v2535_v19 = vcombine.high %v352_v12, %v356_v13 }
  0x2d   : > { %v434_v27 = vld [vmem:[%s3768_s2 + $0x2e0] sm:$0xff]  ;;  %v2613_v33 = vcombine.high %v431_v28, %v435_v29  ;;  %v439_v36 = vld [vmem:[%s3768_s2 + $0x308] sm:$0xff]  ;;  %v2612_v39 = vcombine.low %v431_v28, %v435_v29  ;;  %v368_v28 = vld [vmem:[%s3768_s2 + $0xd0] sm:$0xff] }
  0x2e   : > { %1121 = vmatpush1.bf16.msra.mxu0 %v2562_v51  ;;  %1162 = vmatpush1.bf16.msra.mxu1 %v2564_v52  ;;  %v2611_v32 = vcombine.high %v430_v26, %v434_v27  ;;  %v438_v34 = vld [vmem:[%s3768_s2 + $0x300] sm:$0xff]  ;;  %v443_v37 = vld [vmem:[%s3768_s2 + $0x328] sm:$0xff]  ;;  %v2610_v38 = vcombine.low %v430_v26, %v434_v27  ;;  %v372_v29 = vld [vmem:[%s3768_s2 + $0xf0] sm:$0xff] }
  0x2f   : > { %1122 = vmatprep.subr.bf16.mxu0 %v2571_v53  ;;  %1163 = vmatprep.subr.bf16.mxu1 %v2573_v55  ;;  %v442_v35 = vld [vmem:[%s3768_s2 + $0x320] sm:$0xff]  ;;  %v2621_v41 = vcombine.high %v439_v36, %v443_v37  ;;  %v447_v44 = vld [vmem:[%s3768_s2 + $0x348] sm:$0xff]  ;;  %v2620_v47 = vcombine.low %v439_v36, %v443_v37  ;;  %v376_v36 = vld [vmem:[%s3768_s2 + $0x110] sm:$0xff] }
  0x30   : > { %v2619_v40 = vcombine.high %v438_v34, %v442_v35  ;;  %v446_v42 = vld [vmem:[%s3768_s2 + $0x340] sm:$0xff]  ;;  %v451_v45 = vld [vmem:[%s3768_s2 + $0x368] sm:$0xff]  ;;  %v2618_v46 = vcombine.low %v438_v34, %v442_v35  ;;  %v2551_v34 = vcombine.high %v368_v28, %v372_v29  ;;  %v380_v37 = vld [vmem:[%s3768_s2 + $0x130] sm:$0xff] }
  0x31   : > { %v450_v43 = vld [vmem:[%s3768_s2 + $0x360] sm:$0xff]  ;;  %v2629_v49 = vcombine.high %v447_v44, %v451_v45  ;;  %v455_v52 = vld [vmem:[%s3768_s2 + $0x388] sm:$0xff]  ;;  %v2628_v56 = vcombine.low %v447_v44, %v451_v45  ;;  %v388_v44 = vld [vmem:[%s3768_s2 + $0x170] sm:$0xff] }
  0x32   : > { %1123 = vmatpush1.bf16.msra.mxu0 %v2570_v61  ;;  %1164 = vmatpush1.bf16.msra.mxu1 %v2572_v63  ;;  %v2627_v48 = vcombine.high %v446_v42, %v450_v43  ;;  %v454_v50 = vld [vmem:[%s3768_s2 + $0x380] sm:$0xff]  ;;  %v459_v53 = vld [vmem:[%s3768_s2 + $0x3a8] sm:$0xff]  ;;  %v2626_v55 = vcombine.low %v446_v42, %v450_v43  ;;  %v384_v43 = vld [vmem:[%s3768_s2 + $0x150] sm:$0xff] }
  0x33   : > { %1124 = vmatprep.subr.bf16.mxu0 %v2579_v0  ;;  %1165 = vmatprep.subr.bf16.mxu1 %v2581_v1  ;;  %v458_v51 = vld [vmem:[%s3768_s2 + $0x3a0] sm:$0xff]  ;;  %v2637_v58 = vcombine.high %v455_v52, %v459_v53  ;;  %v463_v61 = vld [vmem:[%s3768_s2 + $0x3c8] sm:$0xff]  ;;  %v2636_v1 = vcombine.low %v455_v52, %v459_v53  ;;  %v385_v45 = vld [vmem:[%s3768_s2 + $0x158] sm:$0xff] }
  0x34   : > { %v2635_v57 = vcombine.high %v454_v50, %v458_v51  ;;  %v462_v59 = vld [vmem:[%s3768_s2 + $0x3c0] sm:$0xff]  ;;  %v467_v63 = vld [vmem:[%s3768_s2 + $0x3e8] sm:$0xff]  ;;  %v2634_v0 = vcombine.low %v454_v50, %v458_v51  ;;  %v392_v51 = vld [vmem:[%s3768_s2 + $0x190] sm:$0xff] }
  0x35   : > { %v466_v60 = vld [vmem:[%s3768_s2 + $0x3e0] sm:$0xff]  ;;  %v2645_v3 = vcombine.high %v463_v61, %v467_v63  ;;  %v396_v52 = vld [vmem:[%s3768_s2 + $0x1b0] sm:$0xff]  ;;  %v393_v53 = vld [vmem:[%s3768_s2 + $0x198] sm:$0xff] }
  0x36   : > { %1125 = vmatpush1.bf16.msra.mxu0 %v2578_v6  ;;  %1166 = vmatpush1.bf16.msra.mxu1 %v2580_v7  ;;  %v2643_v2 = vcombine.high %v462_v59, %v466_v60  ;;  %v345_v6 = vld [vmem:[%s3768_s2 + $0x18] sm:$0xff] }
  0x37   : > { %1126 = vmatprep.subr.bf16.mxu0 %v2587_v8  ;;  %1167 = vmatprep.subr.bf16.mxu1 %v2589_v9  ;;  %v349_v7 = vld [vmem:[%s3768_s2 + $0x38] sm:$0xff]  ;;  %v2642_v8 = vcombine.low %v462_v59, %v466_v60  ;;  %v2644_v9 = vcombine.low %v463_v61, %v467_v63  ;;  %v400_v60 = vld [vmem:[%s3768_s2 + $0x1d0] sm:$0xff] }
  0x38   : > { %v2529_v11 = vcombine.high %v345_v6, %v349_v7  ;;  %v2528_v18 = vcombine.low %v345_v6, %v349_v7  ;;  %v404_v61 = vld [vmem:[%s3768_s2 + $0x1f0] sm:$0xff]  ;;  %v401_v63 = vld [vmem:[%s3768_s2 + $0x1d8] sm:$0xff] }
  0x39   : > { %v412_v6 = vld [vmem:[%s3768_s2 + $0x230] sm:$0xff]  ;;  %v409_v7 = vld [vmem:[%s3768_s2 + $0x218] sm:$0xff] }
  0x3a   : > { %1127 = vmatpush1.bf16.msra.mxu0 %v2586_v14  ;;  %1168 = vmatpush1.bf16.msra.mxu1 %v2588_v15  ;;  %v3140_v14 = vpack.c.bf16 %v3004_v54, %v3004_v54  ;;  %v353_v15 = vld [vmem:[%s3768_s2 + $0x58] sm:$0xff]  ;;  %v360_v54 = vld [vmem:[%s3768_s2 + $0x90] sm:$0xff] }
  0x3b   : > { %1128 = vmatprep.subr.bf16.mxu0 %v2595_v16  ;;  %1169 = vmatprep.subr.bf16.mxu1 %v2597_v17  ;;  %v357_v16 = vld [vmem:[%s3768_s2 + $0x78] sm:$0xff]  ;;  %v2526_v17 = vcombine.low %v344_v4, %v348_v5  ;;  %v2543_v26 = vcombine.high %v360_v54, %v364_v21  ;;  %v408_v5 = vld [vmem:[%s3768_s2 + $0x210] sm:$0xff] }
  0x3c   : > { %v2537_v20 = vcombine.high %v353_v15, %v357_v16 }
  0x3e   : > { %1129 = vmatpush1.bf16.msra.mxu0 %v2594_v22  ;;  %1170 = vmatpush1.bf16.msra.mxu1 %v2596_v23  ;;  %v361_v22 = vld [vmem:[%s3768_s2 + $0x98] sm:$0xff] }
  0x3f   : > { %1130 = vmatprep.subr.bf16.mxu0 %v2603_v24  ;;  %1171 = vmatprep.subr.bf16.mxu1 %v2605_v25  ;;  %v365_v23 = vld [vmem:[%s3768_s2 + $0xb8] sm:$0xff]  ;;  %v2534_v24 = vcombine.low %v352_v12, %v356_v13  ;;  %v2536_v25 = vcombine.low %v353_v15, %v357_v16  ;;  %v416_v13 = vld [vmem:[%s3768_s2 + $0x250] sm:$0xff] }
  0x40   : > { %v2545_v27 = vcombine.high %v361_v22, %v365_v23  ;;  %v420_v15 = vld [vmem:[%s3768_s2 + $0x270] sm:$0xff]  ;;  %v417_v16 = vld [vmem:[%s3768_s2 + $0x258] sm:$0xff] }
  0x42   : > { %1131 = vmatpush1.bf16.msra.mxu0 %v2602_v30  ;;  %1172 = vmatpush1.bf16.msra.mxu1 %v2604_v31  ;;  %v369_v30 = vld [vmem:[%s3768_s2 + $0xd8] sm:$0xff] }
  0x43   : > { %1132 = vmatprep.subr.bf16.mxu0 %v2611_v32  ;;  %1173 = vmatprep.subr.bf16.mxu1 %v2613_v33  ;;  %v373_v31 = vld [vmem:[%s3768_s2 + $0xf8] sm:$0xff]  ;;  %v2542_v32 = vcombine.low %v360_v54, %v364_v21  ;;  %v2544_v33 = vcombine.low %v361_v22, %v365_v23  ;;  %v424_v21 = vld [vmem:[%s3768_s2 + $0x290] sm:$0xff] }
  0x44   : > { %v2553_v35 = vcombine.high %v369_v30, %v373_v31  ;;  %v428_v22 = vld [vmem:[%s3768_s2 + $0x2b0] sm:$0xff]  ;;  %v425_v23 = vld [vmem:[%s3768_s2 + $0x298] sm:$0xff] }
  0x46   : > { %1133 = vmatpush1.bf16.msra.mxu0 %v2610_v38  ;;  %1174 = vmatpush1.bf16.msra.mxu1 %v2612_v39  ;;  %v381_v38 = vld [vmem:[%s3768_s2 + $0x138] sm:$0xff]  ;;  %v2550_v39 = vcombine.low %v368_v28, %v372_v29  ;;  %v432_v29 = vld [vmem:[%s3768_s2 + $0x2d0] sm:$0xff] }
  0x47   : > { %1134 = vmatprep.subr.bf16.mxu0 %v2619_v40  ;;  %1175 = vmatprep.subr.bf16.mxu1 %v2621_v41  ;;  %v2552_v40 = vcombine.low %v369_v30, %v373_v31  ;;  %v2559_v41 = vcombine.high %v376_v36, %v380_v37  ;;  %v436_v30 = vld [vmem:[%s3768_s2 + $0x2f0] sm:$0xff]  ;;  %v433_v31 = vld [vmem:[%s3768_s2 + $0x2d8] sm:$0xff] }
  0x4a   : > { %1135 = vmatpush1.bf16.msra.mxu0 %v2618_v46  ;;  %1176 = vmatpush1.bf16.msra.mxu1 %v2620_v47  ;;  %v389_v46 = vld [vmem:[%s3768_s2 + $0x178] sm:$0xff]  ;;  %v2558_v47 = vcombine.low %v376_v36, %v380_v37  ;;  %v440_v37 = vld [vmem:[%s3768_s2 + $0x310] sm:$0xff] }
  0x4b   : > { %1136 = vmatprep.subr.bf16.mxu0 %v2627_v48  ;;  %1177 = vmatprep.subr.bf16.mxu1 %v2629_v49  ;;  %v2567_v49 = vcombine.high %v384_v43, %v388_v44  ;;  %v2569_v50 = vcombine.high %v385_v45, %v389_v46 }
  0x4e   : > { %1137 = vmatpush1.bf16.msra.mxu0 %v2626_v55  ;;  %1178 = vmatpush1.bf16.msra.mxu1 %v2628_v56  ;;  %v397_v55 = vld [vmem:[%s3768_s2 + $0x1b8] sm:$0xff]  ;;  %v2566_v56 = vcombine.low %v384_v43, %v388_v44  ;;  %v448_v44 = vld [vmem:[%s3768_s2 + $0x350] sm:$0xff] }
  0x4f   : > { %1138 = vmatprep.subr.bf16.mxu0 %v2635_v57  ;;  %1179 = vmatprep.subr.bf16.mxu1 %v2637_v58  ;;  %v2568_v57 = vcombine.low %v385_v45, %v389_v46  ;;  %v2575_v58 = vcombine.high %v392_v51, %v396_v52  ;;  %v2577_v59 = vcombine.high %v393_v53, %v397_v55  ;;  %v452_v45 = vld [vmem:[%s3768_s2 + $0x370] sm:$0xff]  ;;  %v449_v46 = vld [vmem:[%s3768_s2 + $0x358] sm:$0xff] }
  0x52   : > { %1139 = vmatpush1.bf16.msra.mxu0 %v2634_v0  ;;  %1180 = vmatpush1.bf16.msra.mxu1 %v2636_v1  ;;  %v405_v0 = vld [vmem:[%s3768_s2 + $0x1f8] sm:$0xff]  ;;  %v2574_v1 = vcombine.low %v392_v51, %v396_v52  ;;  %v456_v52 = vld [vmem:[%s3768_s2 + $0x390] sm:$0xff] }
  0x53   : > { %1140 = vmatprep.subr.bf16.mxu0 %v2643_v2  ;;  %1181 = vmatprep.subr.bf16.mxu1 %v2645_v3  ;;  %v2576_v2 = vcombine.low %v393_v53, %v397_v55  ;;  %v2583_v3 = vcombine.high %v400_v60, %v404_v61  ;;  %v2585_v4 = vcombine.high %v401_v63, %v405_v0  ;;  %v460_v53 = vld [vmem:[%s3768_s2 + $0x3b0] sm:$0xff]  ;;  %v457_v55 = vld [vmem:[%s3768_s2 + $0x398] sm:$0xff] }
  0x56   : > { %1141 = vmatpush1.bf16.msra.mxu0 %v2642_v8  ;;  %1182 = vmatpush1.bf16.msra.mxu1 %v2644_v9  ;;  %v413_v8 = vld [vmem:[%s3768_s2 + $0x238] sm:$0xff]  ;;  %v2582_v9 = vcombine.low %v400_v60, %v404_v61  ;;  %v464_v61 = vld [vmem:[%s3768_s2 + $0x3d0] sm:$0xff] }
  0x57   : > { %1192 = vmatprep.subr.bf16.mxu0 %v2527_v10  ;;  %1233 = vmatprep.subr.bf16.mxu1 %v2529_v11  ;;  %v2584_v10 = vcombine.low %v401_v63, %v405_v0  ;;  %v2591_v11 = vcombine.high %v408_v5, %v412_v6  ;;  %v2593_v12 = vcombine.high %v409_v7, %v413_v8  ;;  %v468_v63 = vld [vmem:[%s3768_s2 + $0x3f0] sm:$0xff]  ;;  %v465_v0 = vld [vmem:[%s3768_s2 + $0x3d8] sm:$0xff] }
  0x59   : > { %1143 = vmatmul.mubr.bf16.vlgmr.msra.gmra.mrb[0].mxu0 %v3140_v14  ;;  %1184 = vmatmul.mubr.bf16.vlgmr.msra.gmra.mrb[0].mxu1 %v3140_v14 }
  0x5a   : > { %1193 = vmatpush1.bf16.msra.mxu0 %v2526_v17  ;;  %1234 = vmatpush1.bf16.msra.mxu1 %v2528_v18  ;;  %v421_v17 = vld [vmem:[%s3768_s2 + $0x278] sm:$0xff]  ;;  %v2590_v18 = vcombine.low %v408_v5, %v412_v6  ;;  %v1369_v6 = vld [vmem:[%s3769_s3] sm:$0xff] }
  0x5b   : > { %1194 = vmatprep.subr.bf16.mxu0 %v2535_v19  ;;  %1235 = vmatprep.subr.bf16.mxu1 %v2537_v20  ;;  %v2592_v19 = vcombine.low %v409_v7, %v413_v8  ;;  %v2599_v20 = vcombine.high %v416_v13, %v420_v15  ;;  %v2601_v54 = vcombine.high %v417_v16, %v421_v17  ;;  %v1373_v7 = vld [vmem:[%s3769_s3 + $0x20] sm:$0xff]  ;;  %v1370_v8 = vld [vmem:[%s3769_s3 + $0x8] sm:$0xff] }
  0x5c   : > { %1224 = vmatprep.mubr.bf16.mxu0 %v3020_v62  ;;  %1265 = vmatprep.mubr.bf16.mxu1 %v3020_v62  ;;  %v377_v62 = vld [vmem:[%s3768_s2 + $0x118] sm:$0xff] }
  0x5d   : > { %v2561_v42 = vcombine.high %v377_v62, %v381_v38  ;;  %v2560_v48 = vcombine.low %v377_v62, %v381_v38  ;;  %v444_v62 = vld [vmem:[%s3768_s2 + $0x330] sm:$0xff]  ;;  %v441_v38 = vld [vmem:[%s3768_s2 + $0x318] sm:$0xff] }
  0x5e   : > { %1195 = vmatpush1.bf16.msra.mxu0 %v2534_v24  ;;  %1236 = vmatpush1.bf16.msra.mxu1 %v2536_v25  ;;  %v429_v24 = vld [vmem:[%s3768_s2 + $0x2b8] sm:$0xff]  ;;  %v2598_v25 = vcombine.low %v416_v13, %v420_v15  ;;  %v2655_v13 = vcombine.high %v1369_v6, %v1373_v7 }
  0x5f   : > { %1196 = vmatprep.subr.bf16.mxu0 %v2543_v26  ;;  %1237 = vmatprep.subr.bf16.mxu1 %v2545_v27  ;;  %v2600_v26 = vcombine.low %v417_v16, %v421_v17  ;;  %v2607_v27 = vcombine.high %v424_v21, %v428_v22  ;;  %v2609_v28 = vcombine.high %v425_v23, %v429_v24  ;;  %v1377_v16 = vld [vmem:[%s3769_s3 + $0x40] sm:$0xff] }
  0x60   : > { %v1381_v17 = vld [vmem:[%s3769_s3 + $0x60] sm:$0xff] }
  0x62   : > { %1197 = vmatpush1.bf16.msra.mxu0 %v2542_v32  ;;  %1238 = vmatpush1.bf16.msra.mxu1 %v2544_v33  ;;  %v437_v32 = vld [vmem:[%s3768_s2 + $0x2f8] sm:$0xff]  ;;  %v2606_v33 = vcombine.low %v424_v21, %v428_v22  ;;  %v2663_v22 = vcombine.high %v1377_v16, %v1381_v17 }
  0x63   : > { %1198 = vmatprep.subr.bf16.mxu0 %v2551_v34  ;;  %1239 = vmatprep.subr.bf16.mxu1 %v2553_v35  ;;  %v2608_v34 = vcombine.low %v425_v23, %v429_v24  ;;  %v2615_v35 = vcombine.high %v432_v29, %v436_v30  ;;  %v2617_v36 = vcombine.high %v433_v31, %v437_v32  ;;  %v1385_v24 = vld [vmem:[%s3769_s3 + $0x80] sm:$0xff] }
  0x66   : > { %1199 = vmatpush1.bf16.msra.mxu0 %v2550_v39  ;;  %1240 = vmatpush1.bf16.msra.mxu1 %v2552_v40  ;;  %v445_v39 = vld [vmem:[%s3768_s2 + $0x338] sm:$0xff]  ;;  %v2614_v40 = vcombine.low %v432_v29, %v436_v30  ;;  %v2662_v29 = vcombine.low %v1377_v16, %v1381_v17 }
  0x67   : > { %1200 = vmatprep.subr.bf16.mxu0 %v2559_v41  ;;  %1241 = vmatprep.subr.bf16.mxu1 %v2561_v42  ;;  %v2616_v41 = vcombine.low %v433_v31, %v437_v32  ;;  %v2623_v42 = vcombine.high %v440_v37, %v444_v62  ;;  %v2625_v43 = vcombine.high %v441_v38, %v445_v39 }
  0x6a   : > { %1201 = vmatpush1.bf16.msra.mxu0 %v2558_v47  ;;  %1242 = vmatpush1.bf16.msra.mxu1 %v2560_v48  ;;  %v453_v47 = vld [vmem:[%s3768_s2 + $0x378] sm:$0xff]  ;;  %v2622_v48 = vcombine.low %v440_v37, %v444_v62 }
  0x6b   : > { %1202 = vmatprep.subr.bf16.mxu0 %v2567_v49  ;;  %1243 = vmatprep.subr.bf16.mxu1 %v2569_v50  ;;  %v2624_v49 = vcombine.low %v441_v38, %v445_v39  ;;  %v2631_v50 = vcombine.high %v448_v44, %v452_v45  ;;  %v2633_v51 = vcombine.high %v449_v46, %v453_v47  ;;  %v1401_v39 = vld [vmem:[%s3769_s3 + $0x100] sm:$0xff] }
  0x6e   : > { %1203 = vmatpush1.bf16.msra.mxu0 %v2566_v56  ;;  %1244 = vmatpush1.bf16.msra.mxu1 %v2568_v57  ;;  %v461_v56 = vld [vmem:[%s3768_s2 + $0x3b8] sm:$0xff]  ;;  %v2630_v57 = vcombine.low %v448_v44, %v452_v45 }
  0x6f   : > { %1204 = vmatprep.subr.bf16.mxu0 %v2575_v58  ;;  %1245 = vmatprep.subr.bf16.mxu1 %v2577_v59  ;;  %v2632_v58 = vcombine.low %v449_v46, %v453_v47  ;;  %v2639_v59 = vcombine.high %v456_v52, %v460_v53  ;;  %v2641_v60 = vcombine.high %v457_v55, %v461_v56  ;;  %v1409_v47 = vld [vmem:[%s3769_s3 + $0x140] sm:$0xff] }
  0x72   : > { %1205 = vmatpush1.bf16.msra.mxu0 %v2574_v1  ;;  %1246 = vmatpush1.bf16.msra.mxu1 %v2576_v2  ;;  %v469_v1 = vld [vmem:[%s3768_s2 + $0x3f8] sm:$0xff]  ;;  %v2638_v2 = vcombine.low %v456_v52, %v460_v53 }
  0x73   : > { %1206 = vmatprep.subr.bf16.mxu0 %v2583_v3  ;;  %1247 = vmatprep.subr.bf16.mxu1 %v2585_v4  ;;  %v2640_v3 = vcombine.low %v457_v55, %v461_v56  ;;  %v2647_v4 = vcombine.high %v464_v61, %v468_v63  ;;  %v2649_v5 = vcombine.high %v465_v0, %v469_v1  ;;  %v1417_v56 = vld [vmem:[%s3769_s3 + $0x180] sm:$0xff] }
  0x76   : > { %1207 = vmatpush1.bf16.msra.mxu0 %v2582_v9  ;;  %1248 = vmatpush1.bf16.msra.mxu1 %v2584_v10  ;;  %v1374_v9 = vld [vmem:[%s3769_s3 + $0x28] sm:$0xff] }
  0x77   : > { %1208 = vmatprep.subr.bf16.mxu0 %v2591_v11  ;;  %1249 = vmatprep.subr.bf16.mxu1 %v2593_v12  ;;  %v3332_v10 = vld.sshfl [vmem:[#allocation4] sm:$0x33 pattern:$0x76325410]  ;;  %v2646_v11 = vcombine.low %v464_v61, %v468_v63  ;;  %v2648_v12 = vcombine.low %v465_v0, %v469_v1  ;;  %v2657_v15 = vcombine.high %v1370_v8, %v1374_v9  ;;  %v1425_v1 = vld [vmem:[%s3769_s3 + $0x1c0] sm:$0xff] }
  0x78   : > { %v2656_v21 = vcombine.low %v1370_v8, %v1374_v9  ;;  %v1433_v9 = vld [vmem:[%s3769_s3 + $0x200] sm:$0xff] }
  0x7a   : > { %1209 = vmatpush1.bf16.msra.mxu0 %v2590_v18  ;;  %1250 = vmatpush1.bf16.msra.mxu1 %v2592_v19  ;;  %v1364_v18 = vcombine.high %v3332_v10, %v3332_v10  ;;  %v1378_v19 = vld [vmem:[%s3769_s3 + $0x48] sm:$0xff] }
  0x7b   : > { %1210 = vmatprep.subr.bf16.mxu0 %v2599_v20  ;;  %1251 = vmatprep.subr.bf16.mxu1 %v2601_v54  ;;  %v1382_v20 = vld [vmem:[%s3769_s3 + $0x68] sm:$0xff]  ;;  %v2654_v54 = vcombine.low %v1369_v6, %v1373_v7 }
  0x7c   : > { %v2665_v23 = vcombine.high %v1378_v19, %v1382_v20  ;;  %v2664_v30 = vcombine.low %v1378_v19, %v1382_v20  ;;  %v1441_v19 = vld [vmem:[%s3769_s3 + $0x240] sm:$0xff] }
  0x7d   : > { %v1445_v20 = vld [vmem:[%s3769_s3 + $0x260] sm:$0xff] }
  0x7e   : > { %1211 = vmatpush1.bf16.msra.mxu0 %v2598_v25  ;;  %1252 = vmatpush1.bf16.msra.mxu1 %v2600_v26  ;;  %v1389_v25 = vld [vmem:[%s3769_s3 + $0xa0] sm:$0xff]  ;;  %v3354_v26 = vpack.c.bf16 %v1364_v18, %v1364_v18 }
  0x7f   : > { %1212 = vmatprep.subr.bf16.mxu0 %v2607_v27  ;;  %1253 = vmatprep.subr.bf16.mxu1 %v2609_v28  ;;  %v1386_v27 = vld [vmem:[%s3769_s3 + $0x88] sm:$0xff]  ;;  %v2671_v31 = vcombine.high %v1385_v24, %v1389_v25 }
  0x80   : > { %v1390_v28 = vld [vmem:[%s3769_s3 + $0xa8] sm:$0xff] }
  0x81   : > { %v2673_v32 = vcombine.high %v1386_v27, %v1390_v28  ;;  %v2672_v37 = vcombine.low %v1386_v27, %v1390_v28  ;;  %v1449_v27 = vld [vmem:[%s3769_s3 + $0x280] sm:$0xff] }
  0x82   : > { %1213 = vmatpush1.bf16.msra.mxu0 %v2606_v33  ;;  %1254 = vmatpush1.bf16.msra.mxu1 %v2608_v34  ;;  %v1393_v33 = vld [vmem:[%s3769_s3 + $0xc0] sm:$0xff] }
  0x83   : > { %1214 = vmatprep.subr.bf16.mxu0 %v2615_v35  ;;  %1255 = vmatprep.subr.bf16.mxu1 %v2617_v36  ;;  %v1397_v34 = vld [vmem:[%s3769_s3 + $0xe0] sm:$0xff]  ;;  %v1398_v35 = vld [vmem:[%s3769_s3 + $0xe8] sm:$0xff]  ;;  %v2670_v36 = vcombine.low %v1385_v24, %v1389_v25  ;;  %v2727_v24 = vcombine.high %v1441_v19, %v1445_v20 }
  0x84   : > { %v2679_v62 = vcombine.high %v1393_v33, %v1397_v34  ;;  %v1453_v28 = vld [vmem:[%s3769_s3 + $0x2a0] sm:$0xff] }
  0x86   : > { %1215 = vmatpush1.bf16.msra.mxu0 %v2614_v40  ;;  %1256 = vmatpush1.bf16.msra.mxu1 %v2616_v41  ;;  %v1405_v40 = vld [vmem:[%s3769_s3 + $0x120] sm:$0xff]  ;;  %v1402_v41 = vld [vmem:[%s3769_s3 + $0x108] sm:$0xff] }
  0x87   : > { %1216 = vmatprep.subr.bf16.mxu0 %v2623_v42  ;;  %1257 = vmatprep.subr.bf16.mxu1 %v2625_v43  ;;  %v1406_v42 = vld [vmem:[%s3769_s3 + $0x128] sm:$0xff]  ;;  %v2678_v43 = vcombine.low %v1393_v33, %v1397_v34  ;;  %v2687_v45 = vcombine.high %v1401_v39, %v1405_v40  ;;  %v2735_v33 = vcombine.high %v1449_v27, %v1453_v28 }
  0x88   : > { %v2689_v46 = vcombine.high %v1402_v41, %v1406_v42  ;;  %v2688_v52 = vcombine.low %v1402_v41, %v1406_v42  ;;  %v1465_v41 = vld [vmem:[%s3769_s3 + $0x300] sm:$0xff] }
  0x89   : > { %v1469_v42 = vld [vmem:[%s3769_s3 + $0x320] sm:$0xff] }
  0x8a   : > { %1217 = vmatpush1.bf16.msra.mxu0 %v2622_v48  ;;  %1258 = vmatpush1.bf16.msra.mxu1 %v2624_v49  ;;  %v1413_v48 = vld [vmem:[%s3769_s3 + $0x160] sm:$0xff]  ;;  %v1410_v49 = vld [vmem:[%s3769_s3 + $0x148] sm:$0xff] }
  0x8b   : > { %1218 = vmatprep.subr.bf16.mxu0 %v2631_v50  ;;  %1259 = vmatprep.subr.bf16.mxu1 %v2633_v51  ;;  %v1414_v50 = vld [vmem:[%s3769_s3 + $0x168] sm:$0xff]  ;;  %v2686_v51 = vcombine.low %v1401_v39, %v1405_v40  ;;  %v2695_v53 = vcombine.high %v1409_v47, %v1413_v48 }
  0x8c   : > { %v2697_v55 = vcombine.high %v1410_v49, %v1414_v50  ;;  %v2696_v61 = vcombine.low %v1410_v49, %v1414_v50  ;;  %v1473_v49 = vld [vmem:[%s3769_s3 + $0x340] sm:$0xff] }
  0x8d   : > { %v1477_v50 = vld [vmem:[%s3769_s3 + $0x360] sm:$0xff] }
  0x8e   : > { %1219 = vmatpush1.bf16.msra.mxu0 %v2630_v57  ;;  %1260 = vmatpush1.bf16.msra.mxu1 %v2632_v58  ;;  %v1421_v57 = vld [vmem:[%s3769_s3 + $0x1a0] sm:$0xff]  ;;  %v1418_v58 = vld [vmem:[%s3769_s3 + $0x188] sm:$0xff] }
  0x8f   : > { %1220 = vmatprep.subr.bf16.mxu0 %v2639_v59  ;;  %1261 = vmatprep.subr.bf16.mxu1 %v2641_v60  ;;  %v1422_v59 = vld [vmem:[%s3769_s3 + $0x1a8] sm:$0xff]  ;;  %v2694_v60 = vcombine.low %v1409_v47, %v1413_v48  ;;  %v2703_v63 = vcombine.high %v1417_v56, %v1421_v57  ;;  %v2751_v47 = vcombine.high %v1465_v41, %v1469_v42 }
  0x90   : > { %v2705_v0 = vcombine.high %v1418_v58, %v1422_v59  ;;  %v2704_v6 = vcombine.low %v1418_v58, %v1422_v59  ;;  %v1481_v58 = vld [vmem:[%s3769_s3 + $0x380] sm:$0xff] }
  0x91   : > { %v1485_v59 = vld [vmem:[%s3769_s3 + $0x3a0] sm:$0xff] }
  0x92   : > { %1221 = vmatpush1.bf16.msra.mxu0 %v2638_v2  ;;  %1262 = vmatpush1.bf16.msra.mxu1 %v2640_v3  ;;  %v1429_v2 = vld [vmem:[%s3769_s3 + $0x1e0] sm:$0xff]  ;;  %v1426_v3 = vld [vmem:[%s3769_s3 + $0x1c8] sm:$0xff] }
  0x93   : > { %1222 = vmatprep.subr.bf16.mxu0 %v2647_v4  ;;  %1263 = vmatprep.subr.bf16.mxu1 %v2649_v5  ;;  %v1430_v4 = vld [vmem:[%s3769_s3 + $0x1e8] sm:$0xff]  ;;  %v2702_v5 = vcombine.low %v1417_v56, %v1421_v57  ;;  %v2711_v7 = vcombine.high %v1425_v1, %v1429_v2  ;;  %v2759_v56 = vcombine.high %v1473_v49, %v1477_v50 }
  0x94   : > { %v2713_v8 = vcombine.high %v1426_v3, %v1430_v4  ;;  %v2712_v16 = vcombine.low %v1426_v3, %v1430_v4  ;;  %v1489_v3 = vld [vmem:[%s3769_s3 + $0x3c0] sm:$0xff] }
  0x95   : > { %v1493_v4 = vld [vmem:[%s3769_s3 + $0x3e0] sm:$0xff] }
  0x96   : > { %1223 = vmatpush1.bf16.msra.mxu0 %v2646_v11  ;;  %1264 = vmatpush1.bf16.msra.mxu1 %v2648_v12  ;;  %v1437_v11 = vld [vmem:[%s3769_s3 + $0x220] sm:$0xff]  ;;  %v1434_v12 = vld [vmem:[%s3769_s3 + $0x208] sm:$0xff] }
  0x97   : > { %2137 = vmatprep.subr.bf16.mxu0 %v2655_v13  ;;  %2178 = vmatprep.subr.bf16.mxu1 %v2657_v15  ;;  %v1438_v13 = vld [vmem:[%s3769_s3 + $0x228] sm:$0xff]  ;;  %v2710_v15 = vcombine.low %v1425_v1, %v1429_v2  ;;  %v2719_v17 = vcombine.high %v1433_v9, %v1437_v11  ;;  %v2767_v1 = vcombine.high %v1481_v58, %v1485_v59 }
  0x98   : > { %v2721_v18 = vcombine.high %v1434_v12, %v1438_v13 }
  0x99   : > { %1225 = vmatmul.mubr.bf16.vlgmr.msra.gmra.mrb[4].mxu0 %v3140_v14  ;;  %1266 = vmatmul.mubr.bf16.vlgmr.msra.gmra.mrb[4].mxu1 %v3140_v14  ;;  %v1394_v14 = vld [vmem:[%s3769_s3 + $0xc8] sm:$0xff] }
  0x9a   : > { %2138 = vmatpush1.bf16.msra.mxu0 %v2654_v54  ;;  %2179 = vmatpush1.bf16.msra.mxu1 %v2656_v21  ;;  %v2681_v38 = vcombine.high %v1394_v14, %v1398_v35  ;;  %v2680_v44 = vcombine.low %v1394_v14, %v1398_v35  ;;  %v1442_v54 = vld [vmem:[%s3769_s3 + $0x248] sm:$0xff]  ;;  %v1457_v14 = vld [vmem:[%s3769_s3 + $0x2c0] sm:$0xff] }
  0x9b   : > { %2139 = vmatprep.subr.bf16.mxu0 %v2663_v22  ;;  %2180 = vmatprep.subr.bf16.mxu1 %v2665_v23  ;;  %v1446_v21 = vld [vmem:[%s3769_s3 + $0x268] sm:$0xff]  ;;  %v2718_v22 = vcombine.low %v1433_v9, %v1437_v11  ;;  %v2720_v23 = vcombine.low %v1434_v12, %v1438_v13  ;;  %v1461_v35 = vld [vmem:[%s3769_s3 + $0x2e0] sm:$0xff]  ;;  %v2775_v9 = vcombine.high %v1489_v3, %v1493_v4  ;;  %v1371_v12 = vld [vmem:[%s3769_s3 + $0x10] sm:$0xff] }
  0x9c   : > { %2169 = vmatprep.mubr.bf16.mxu0 %v3354_v26  ;;  %2210 = vmatprep.mubr.bf16.mxu1 %v3354_v26  ;;  %v2729_v25 = vcombine.high %v1442_v54, %v1446_v21  ;;  %v2743_v39 = vcombine.high %v1457_v14, %v1461_v35  ;;  %v1375_v13 = vld [vmem:[%s3769_s3 + $0x30] sm:$0xff] }
  0x9e   : > { %2140 = vmatpush1.bf16.msra.mxu0 %v2662_v29  ;;  %2181 = vmatpush1.bf16.msra.mxu1 %v2664_v30  ;;  %v1450_v29 = vld [vmem:[%s3769_s3 + $0x288] sm:$0xff] }
  0x9f   : > { %2141 = vmatprep.subr.bf16.mxu0 %v2671_v31  ;;  %2182 = vmatprep.subr.bf16.mxu1 %v2673_v32  ;;  %v1454_v30 = vld [vmem:[%s3769_s3 + $0x2a8] sm:$0xff]  ;;  %v2726_v31 = vcombine.low %v1441_v19, %v1445_v20  ;;  %v2728_v32 = vcombine.low %v1442_v54, %v1446_v21  ;;  %v2659_v19 = vcombine.high %v1371_v12, %v1375_v13  ;;  %v1379_v54 = vld [vmem:[%s3769_s3 + $0x50] sm:$0xff] }
  0xa0   : > { %v2737_v34 = vcombine.high %v1450_v29, %v1454_v30  ;;  %v1383_v21 = vld [vmem:[%s3769_s3 + $0x70] sm:$0xff] }
  0xa2   : > { %2142 = vmatpush1.bf16.msra.mxu0 %v2670_v36  ;;  %2183 = vmatpush1.bf16.msra.mxu1 %v2672_v37  ;;  %v1458_v36 = vld [vmem:[%s3769_s3 + $0x2c8] sm:$0xff] }
  0xa3   : > { %2143 = vmatprep.subr.bf16.mxu0 %v2679_v62  ;;  %2184 = vmatprep.subr.bf16.mxu1 %v2681_v38  ;;  %v1462_v37 = vld [vmem:[%s3769_s3 + $0x2e8] sm:$0xff]  ;;  %v2734_v62 = vcombine.low %v1449_v27, %v1453_v28  ;;  %v2736_v38 = vcombine.low %v1450_v29, %v1454_v30  ;;  %v2667_v28 = vcombine.high %v1379_v54, %v1383_v21  ;;  %v1391_v30 = vld [vmem:[%s3769_s3 + $0xb0] sm:$0xff] }
  0xa4   : > { %v2745_v40 = vcombine.high %v1458_v36, %v1462_v37 }
  0xa6   : > { %2144 = vmatpush1.bf16.msra.mxu0 %v2678_v43  ;;  %2185 = vmatpush1.bf16.msra.mxu1 %v2680_v44  ;;  %v1466_v43 = vld [vmem:[%s3769_s3 + $0x308] sm:$0xff] }
  0xa7   : > { %2145 = vmatprep.subr.bf16.mxu0 %v2687_v45  ;;  %2186 = vmatprep.subr.bf16.mxu1 %v2689_v46  ;;  %v1470_v44 = vld [vmem:[%s3769_s3 + $0x328] sm:$0xff]  ;;  %v2742_v45 = vcombine.low %v1457_v14, %v1461_v35  ;;  %v2744_v46 = vcombine.low %v1458_v36, %v1462_v37  ;;  %v1395_v36 = vld [vmem:[%s3769_s3 + $0xd0] sm:$0xff] }
  0xa8   : > { %v2753_v48 = vcombine.high %v1466_v43, %v1470_v44  ;;  %v1399_v37 = vld [vmem:[%s3769_s3 + $0xf0] sm:$0xff] }
  0xaa   : > { %2146 = vmatpush1.bf16.msra.mxu0 %v2686_v51  ;;  %2187 = vmatpush1.bf16.msra.mxu1 %v2688_v52  ;;  %v1474_v51 = vld [vmem:[%s3769_s3 + $0x348] sm:$0xff] }
  0xab   : > { %2147 = vmatprep.subr.bf16.mxu0 %v2695_v53  ;;  %2188 = vmatprep.subr.bf16.mxu1 %v2697_v55  ;;  %v1478_v52 = vld [vmem:[%s3769_s3 + $0x368] sm:$0xff]  ;;  %v2750_v53 = vcombine.low %v1465_v41, %v1469_v42  ;;  %v2752_v55 = vcombine.low %v1466_v43, %v1470_v44  ;;  %v2683_v41 = vcombine.high %v1395_v36, %v1399_v37  ;;  %v1403_v43 = vld [vmem:[%s3769_s3 + $0x110] sm:$0xff] }
  0xac   : > { %v2761_v57 = vcombine.high %v1474_v51, %v1478_v52  ;;  %v1407_v44 = vld [vmem:[%s3769_s3 + $0x130] sm:$0xff] }
  0xae   : > { %2148 = vmatpush1.bf16.msra.mxu0 %v2694_v60  ;;  %2189 = vmatpush1.bf16.msra.mxu1 %v2696_v61  ;;  %v1482_v60 = vld [vmem:[%s3769_s3 + $0x388] sm:$0xff] }
  0xaf   : > { %2149 = vmatprep.subr.bf16.mxu0 %v2703_v63  ;;  %2190 = vmatprep.subr.bf16.mxu1 %v2705_v0  ;;  %v1486_v61 = vld [vmem:[%s3769_s3 + $0x3a8] sm:$0xff]  ;;  %v2758_v63 = vcombine.low %v1473_v49, %v1477_v50  ;;  %v2760_v0 = vcombine.low %v1474_v51, %v1478_v52  ;;  %v1411_v50 = vld [vmem:[%s3769_s3 + $0x150] sm:$0xff]  ;;  %v1412_v52 = vld [vmem:[%s3769_s3 + $0x158] sm:$0xff] }
  0xb0   : > { %v2769_v2 = vcombine.high %v1482_v60, %v1486_v61  ;;  %v1415_v51 = vld [vmem:[%s3769_s3 + $0x170] sm:$0xff] }
  0xb2   : > { %2150 = vmatpush1.bf16.msra.mxu0 %v2702_v5  ;;  %2191 = vmatpush1.bf16.msra.mxu1 %v2704_v6  ;;  %v1490_v5 = vld [vmem:[%s3769_s3 + $0x3c8] sm:$0xff] }
  0xb3   : > { %2151 = vmatprep.subr.bf16.mxu0 %v2711_v7  ;;  %2192 = vmatprep.subr.bf16.mxu1 %v2713_v8  ;;  %v1494_v6 = vld [vmem:[%s3769_s3 + $0x3e8] sm:$0xff]  ;;  %v2766_v7 = vcombine.low %v1481_v58, %v1485_v59  ;;  %v2768_v8 = vcombine.low %v1482_v60, %v1486_v61  ;;  %v1419_v59 = vld [vmem:[%s3769_s3 + $0x190] sm:$0xff]  ;;  %v1420_v61 = vld [vmem:[%s3769_s3 + $0x198] sm:$0xff] }
  0xb4   : > { %v2777_v11 = vcombine.high %v1490_v5, %v1494_v6  ;;  %v1423_v60 = vld [vmem:[%s3769_s3 + $0x1b0] sm:$0xff] }
  0xb6   : > { %2152 = vmatpush1.bf16.msra.mxu0 %v2710_v15  ;;  %2193 = vmatpush1.bf16.msra.mxu1 %v2712_v16  ;;  %v1372_v15 = vld [vmem:[%s3769_s3 + $0x18] sm:$0xff] }
  0xb7   : > { %2153 = vmatprep.subr.bf16.mxu0 %v2719_v17  ;;  %2194 = vmatprep.subr.bf16.mxu1 %v2721_v18  ;;  %v1376_v16 = vld [vmem:[%s3769_s3 + $0x38] sm:$0xff]  ;;  %v2774_v17 = vcombine.low %v1489_v3, %v1493_v4  ;;  %v2776_v18 = vcombine.low %v1490_v5, %v1494_v6  ;;  %v1427_v4 = vld [vmem:[%s3769_s3 + $0x1d0] sm:$0xff] }
  0xb8   : > { %v2661_v20 = vcombine.high %v1372_v15, %v1376_v16  ;;  %v2660_v27 = vcombine.low %v1372_v15, %v1376_v16  ;;  %v1431_v5 = vld [vmem:[%s3769_s3 + $0x1f0] sm:$0xff]  ;;  %v1428_v6 = vld [vmem:[%s3769_s3 + $0x1d8] sm:$0xff] }
  0xb9   : > { %v1439_v15 = vld [vmem:[%s3769_s3 + $0x230] sm:$0xff]  ;;  %v1436_v16 = vld [vmem:[%s3769_s3 + $0x218] sm:$0xff] }
  0xba   : > { %2154 = vmatpush1.bf16.msra.mxu0 %v2718_v22  ;;  %2195 = vmatpush1.bf16.msra.mxu1 %v2720_v23  ;;  %v3542_v22 = vpack.c.bf16 %v3332_v10, %v3332_v10  ;;  %v1380_v23 = vld [vmem:[%s3769_s3 + $0x58] sm:$0xff]  ;;  %v1387_v10 = vld [vmem:[%s3769_s3 + $0x90] sm:$0xff] }
  0xbb   : > { %2155 = vmatprep.subr.bf16.mxu0 %v2727_v24  ;;  %2196 = vmatprep.subr.bf16.mxu1 %v2729_v25  ;;  %v1384_v24 = vld [vmem:[%s3769_s3 + $0x78] sm:$0xff]  ;;  %v2658_v25 = vcombine.low %v1371_v12, %v1375_v13  ;;  %v2675_v14 = vcombine.high %v1387_v10, %v1391_v30  ;;  %v1435_v13 = vld [vmem:[%s3769_s3 + $0x210] sm:$0xff] }
  0xbc   : > { %v2669_v29 = vcombine.high %v1380_v23, %v1384_v24 }
  0xbe   : > { %2156 = vmatpush1.bf16.msra.mxu0 %v2726_v31  ;;  %2197 = vmatpush1.bf16.msra.mxu1 %v2728_v32  ;;  %v1388_v31 = vld [vmem:[%s3769_s3 + $0x98] sm:$0xff] }
  0xbf   : > { %2157 = vmatprep.subr.bf16.mxu0 %v2735_v33  ;;  %2198 = vmatprep.subr.bf16.mxu1 %v2737_v34  ;;  %v1392_v32 = vld [vmem:[%s3769_s3 + $0xb8] sm:$0xff]  ;;  %v2666_v33 = vcombine.low %v1379_v54, %v1383_v21  ;;  %v2668_v34 = vcombine.low %v1380_v23, %v1384_v24  ;;  %v1443_v21 = vld [vmem:[%s3769_s3 + $0x250] sm:$0xff] }
  0xc0   : > { %v2677_v35 = vcombine.high %v1388_v31, %v1392_v32  ;;  %v1447_v23 = vld [vmem:[%s3769_s3 + $0x270] sm:$0xff]  ;;  %v1444_v24 = vld [vmem:[%s3769_s3 + $0x258] sm:$0xff] }
  0xc2   : > { %2158 = vmatpush1.bf16.msra.mxu0 %v2734_v62  ;;  %2199 = vmatpush1.bf16.msra.mxu1 %v2736_v38  ;;  %v1396_v62 = vld [vmem:[%s3769_s3 + $0xd8] sm:$0xff] }
  0xc3   : > { %2159 = vmatprep.subr.bf16.mxu0 %v2743_v39  ;;  %2200 = vmatprep.subr.bf16.mxu1 %v2745_v40  ;;  %v1400_v38 = vld [vmem:[%s3769_s3 + $0xf8] sm:$0xff]  ;;  %v2674_v39 = vcombine.low %v1387_v10, %v1391_v30  ;;  %v2676_v40 = vcombine.low %v1388_v31, %v1392_v32  ;;  %v1451_v30 = vld [vmem:[%s3769_s3 + $0x290] sm:$0xff] }
  0xc4   : > { %v2685_v42 = vcombine.high %v1396_v62, %v1400_v38  ;;  %v1455_v31 = vld [vmem:[%s3769_s3 + $0x2b0] sm:$0xff]  ;;  %v1452_v32 = vld [vmem:[%s3769_s3 + $0x298] sm:$0xff] }
  0xc6   : > { %2160 = vmatpush1.bf16.msra.mxu0 %v2742_v45  ;;  %2201 = vmatpush1.bf16.msra.mxu1 %v2744_v46  ;;  %v1408_v45 = vld [vmem:[%s3769_s3 + $0x138] sm:$0xff]  ;;  %v2682_v46 = vcombine.low %v1395_v36, %v1399_v37  ;;  %v1459_v37 = vld [vmem:[%s3769_s3 + $0x2d0] sm:$0xff] }
  0xc7   : > { %2161 = vmatprep.subr.bf16.mxu0 %v2751_v47  ;;  %2202 = vmatprep.subr.bf16.mxu1 %v2753_v48  ;;  %v2684_v47 = vcombine.low %v1396_v62, %v1400_v38  ;;  %v2691_v48 = vcombine.high %v1403_v43, %v1407_v44  ;;  %v1463_v62 = vld [vmem:[%s3769_s3 + $0x2f0] sm:$0xff]  ;;  %v1460_v38 = vld [vmem:[%s3769_s3 + $0x2d8] sm:$0xff] }
  0xca   : > { %2162 = vmatpush1.bf16.msra.mxu0 %v2750_v53  ;;  %2203 = vmatpush1.bf16.msra.mxu1 %v2752_v55  ;;  %v1416_v53 = vld [vmem:[%s3769_s3 + $0x178] sm:$0xff]  ;;  %v2690_v55 = vcombine.low %v1403_v43, %v1407_v44  ;;  %v1467_v44 = vld [vmem:[%s3769_s3 + $0x310] sm:$0xff] }
  0xcb   : > { %2163 = vmatprep.subr.bf16.mxu0 %v2759_v56  ;;  %2204 = vmatprep.subr.bf16.mxu1 %v2761_v57  ;;  %v2699_v57 = vcombine.high %v1411_v50, %v1415_v51  ;;  %v2701_v58 = vcombine.high %v1412_v52, %v1416_v53 }
  0xce   : > { %2164 = vmatpush1.bf16.msra.mxu0 %v2758_v63  ;;  %2205 = vmatpush1.bf16.msra.mxu1 %v2760_v0  ;;  %v1424_v63 = vld [vmem:[%s3769_s3 + $0x1b8] sm:$0xff]  ;;  %v2698_v0 = vcombine.low %v1411_v50, %v1415_v51  ;;  %v1475_v51 = vld [vmem:[%s3769_s3 + $0x350] sm:$0xff] }
  0xcf   : > { %2165 = vmatprep.subr.bf16.mxu0 %v2767_v1  ;;  %2206 = vmatprep.subr.bf16.mxu1 %v2769_v2  ;;  %v2700_v1 = vcombine.low %v1412_v52, %v1416_v53  ;;  %v2707_v2 = vcombine.high %v1419_v59, %v1423_v60  ;;  %v2709_v3 = vcombine.high %v1420_v61, %v1424_v63  ;;  %v1479_v52 = vld [vmem:[%s3769_s3 + $0x370] sm:$0xff]  ;;  %v1476_v53 = vld [vmem:[%s3769_s3 + $0x358] sm:$0xff] }
  0xd2   : > { %2166 = vmatpush1.bf16.msra.mxu0 %v2766_v7  ;;  %2207 = vmatpush1.bf16.msra.mxu1 %v2768_v8  ;;  %v1432_v7 = vld [vmem:[%s3769_s3 + $0x1f8] sm:$0xff]  ;;  %v2706_v8 = vcombine.low %v1419_v59, %v1423_v60  ;;  %v1483_v60 = vld [vmem:[%s3769_s3 + $0x390] sm:$0xff] }
  0xd3   : > { %2167 = vmatprep.subr.bf16.mxu0 %v2775_v9  ;;  %2208 = vmatprep.subr.bf16.mxu1 %v2777_v11  ;;  %v2708_v9 = vcombine.low %v1420_v61, %v1424_v63  ;;  %v2715_v11 = vcombine.high %v1427_v4, %v1431_v5  ;;  %v2717_v12 = vcombine.high %v1428_v6, %v1432_v7  ;;  %v1487_v61 = vld [vmem:[%s3769_s3 + $0x3b0] sm:$0xff]  ;;  %v1484_v63 = vld [vmem:[%s3769_s3 + $0x398] sm:$0xff] }
  0xd6   : > { %2168 = vmatpush1.bf16.msra.mxu0 %v2774_v17  ;;  %2209 = vmatpush1.bf16.msra.mxu1 %v2776_v18  ;;  %v1440_v17 = vld [vmem:[%s3769_s3 + $0x238] sm:$0xff]  ;;  %v2714_v18 = vcombine.low %v1427_v4, %v1431_v5  ;;  %v1491_v5 = vld [vmem:[%s3769_s3 + $0x3d0] sm:$0xff] }
  0xd7   : > { %2219 = vmatprep.subr.bf16.mxu0 %v2659_v19  ;;  %2260 = vmatprep.subr.bf16.mxu1 %v2661_v20  ;;  %v2716_v19 = vcombine.low %v1428_v6, %v1432_v7  ;;  %v2723_v20 = vcombine.high %v1435_v13, %v1439_v15  ;;  %v2725_v54 = vcombine.high %v1436_v16, %v1440_v17  ;;  %v1495_v6 = vld [vmem:[%s3769_s3 + $0x3f0] sm:$0xff]  ;;  %v1492_v7 = vld [vmem:[%s3769_s3 + $0x3d8] sm:$0xff] }
  0xd9   : > { %2170 = vmatmul.mubr.bf16.vlgmr.msra.gmra.mrb[8].mxu0 %v3542_v22  ;;  %2211 = vmatmul.mubr.bf16.vlgmr.msra.gmra.mrb[8].mxu1 %v3542_v22 }
  0xda   : > { %2220 = vmatpush1.bf16.msra.mxu0 %v2658_v25  ;;  %2261 = vmatpush1.bf16.msra.mxu1 %v2660_v27  ;;  %v1448_v25 = vld [vmem:[%s3769_s3 + $0x278] sm:$0xff]  ;;  %v2722_v27 = vcombine.low %v1435_v13, %v1439_v15  ;;  %v2778_v15 = vcombine.low %v1491_v5, %v1495_v6 }
  0xdb   : > { %2221 = vmatprep.subr.bf16.mxu0 %v2667_v28  ;;  %2262 = vmatprep.subr.bf16.mxu1 %v2669_v29  ;;  %v2724_v28 = vcombine.low %v1436_v16, %v1440_v17  ;;  %v2731_v29 = vcombine.high %v1443_v21, %v1447_v23  ;;  %v2733_v10 = vcombine.high %v1444_v24, %v1448_v25  ;;  %v2845_v17 = vmov 1983009808  }
  0xdc   : > { %2251 = vmatprep.mubr.bf16.mxu0 %v3354_v26  ;;  %2292 = vmatprep.mubr.bf16.mxu1 %v3354_v26  ;;  %v1404_v26 = vld [vmem:[%s3769_s3 + $0x118] sm:$0xff] }
  0xdd   : > { %v2693_v49 = vcombine.high %v1404_v26, %v1408_v45  ;;  %v2692_v56 = vcombine.low %v1404_v26, %v1408_v45  ;;  %v1471_v26 = vld [vmem:[%s3769_s3 + $0x330] sm:$0xff]  ;;  %v1468_v45 = vld [vmem:[%s3769_s3 + $0x318] sm:$0xff] }
  0xde   : > { %2222 = vmatpush1.bf16.msra.mxu0 %v2666_v33  ;;  %2263 = vmatpush1.bf16.msra.mxu1 %v2668_v34  ;;  %v1456_v33 = vld [vmem:[%s3769_s3 + $0x2b8] sm:$0xff]  ;;  %v2730_v34 = vcombine.low %v1443_v21, %v1447_v23 }
  0xdf   : > { %2223 = vmatprep.subr.bf16.mxu0 %v2675_v14  ;;  %2264 = vmatprep.subr.bf16.mxu1 %v2677_v35  ;;  %v2732_v14 = vcombine.low %v1444_v24, %v1448_v25  ;;  %v2739_v35 = vcombine.high %v1451_v30, %v1455_v31  ;;  %v2741_v36 = vcombine.high %v1452_v32, %v1456_v33 }
  0xe2   : > { %2224 = vmatpush1.bf16.msra.mxu0 %v2674_v39  ;;  %2265 = vmatpush1.bf16.msra.mxu1 %v2676_v40  ;;  %v1464_v39 = vld [vmem:[%s3769_s3 + $0x2f8] sm:$0xff]  ;;  %v2738_v40 = vcombine.low %v1451_v30, %v1455_v31 }
  0xe3   : > { %2225 = vmatprep.subr.bf16.mxu0 %v2683_v41  ;;  %2266 = vmatprep.subr.bf16.mxu1 %v2685_v42  ;;  %v2740_v41 = vcombine.low %v1452_v32, %v1456_v33  ;;  %v2747_v42 = vcombine.high %v1459_v37, %v1463_v62  ;;  %v2749_v43 = vcombine.high %v1460_v38, %v1464_v39 }
  0xe6   : > { %2226 = vmatpush1.bf16.msra.mxu0 %v2682_v46  ;;  %2267 = vmatpush1.bf16.msra.mxu1 %v2684_v47  ;;  %v1472_v46 = vld [vmem:[%s3769_s3 + $0x338] sm:$0xff]  ;;  %v2746_v47 = vcombine.low %v1459_v37, %v1463_v62 }
  0xe7   : > { %2227 = vmatprep.subr.bf16.mxu0 %v2691_v48  ;;  %2268 = vmatprep.subr.bf16.mxu1 %v2693_v49  ;;  %v2748_v48 = vcombine.low %v1460_v38, %v1464_v39  ;;  %v2755_v49 = vcombine.high %v1467_v44, %v1471_v26  ;;  %v2757_v50 = vcombine.high %v1468_v45, %v1472_v46 }
  0xea   : > { %2228 = vmatpush1.bf16.msra.mxu0 %v2690_v55  ;;  %2269 = vmatpush1.bf16.msra.mxu1 %v2692_v56  ;;  %v1480_v55 = vld [vmem:[%s3769_s3 + $0x378] sm:$0xff]  ;;  %v2754_v56 = vcombine.low %v1467_v44, %v1471_v26 }
  0xeb   : > { %2229 = vmatprep.subr.bf16.mxu0 %v2699_v57  ;;  %2270 = vmatprep.subr.bf16.mxu1 %v2701_v58  ;;  %v2756_v57 = vcombine.low %v1468_v45, %v1472_v46  ;;  %v2763_v58 = vcombine.high %v1475_v51, %v1479_v52  ;;  %v2765_v59 = vcombine.high %v1476_v53, %v1480_v55 }
  0xee   : > { %2230 = vmatpush1.bf16.msra.mxu0 %v2698_v0  ;;  %2271 = vmatpush1.bf16.msra.mxu1 %v2700_v1  ;;  %v1488_v0 = vld [vmem:[%s3769_s3 + $0x3b8] sm:$0xff]  ;;  %v2762_v1 = vcombine.low %v1475_v51, %v1479_v52 }
  0xef   : > { %2231 = vmatprep.subr.bf16.mxu0 %v2707_v2  ;;  %2272 = vmatprep.subr.bf16.mxu1 %v2709_v3  ;;  %v2764_v2 = vcombine.low %v1476_v53, %v1480_v55  ;;  %v2771_v3 = vcombine.high %v1483_v60, %v1487_v61  ;;  %v2773_v4 = vcombine.high %v1484_v63, %v1488_v0  ;;  %v327_v53 = vld [vmem:[%s2902_s9 + $0x8] sm:$0xff] }
  0xf2   : > { %2232 = vmatpush1.bf16.msra.mxu0 %v2706_v8  ;;  %2273 = vmatpush1.bf16.msra.mxu1 %v2708_v9  ;;  %v1496_v8 = vld [vmem:[%s3769_s3 + $0x3f8] sm:$0xff]  ;;  %v2770_v9 = vcombine.low %v1483_v60, %v1487_v61  ;;  %v1345_v60 = vld [vmem:[#allocation3] sm:$0xf] }
  0xf3   : > { %2233 = vmatprep.subr.bf16.mxu0 %v2715_v11  ;;  %2274 = vmatprep.subr.bf16.mxu1 %v2717_v12  ;;  %v2772_v11 = vcombine.low %v1484_v63, %v1488_v0  ;;  %v2779_v12 = vcombine.high %v1491_v5, %v1495_v6  ;;  %v2781_v13 = vcombine.high %v1492_v7, %v1496_v8 }
  0xf4   : > { %v2780_v16 = vcombine.low %v1492_v7, %v1496_v8 }
  0xf6   : > { %2234 = vmatpush1.bf16.msra.mxu0 %v2714_v18  ;;  %2275 = vmatpush1.bf16.msra.mxu1 %v2716_v19  ;;  %v1285_v18 = vunpack.c.l.s4 %v2845_v17  ;;  %v1287_v19 = vlaneseq }
  0xf7   : > { %2235 = vmatprep.subr.bf16.mxu0 %v2723_v20  ;;  %2276 = vmatprep.subr.bf16.mxu1 %v2725_v54 }
  0xf8   : > { %v1286_v20 = vunpack.c.0.s8 %v1285_v18  ;;  %v1288_v54 = vshrl.u32 %v1287_v19, 7 }
  0xfa   : > { %2236 = vmatpush1.bf16.msra.mxu0 %v2722_v27  ;;  %2277 = vmatpush1.bf16.msra.mxu1 %v2724_v28  ;;  %v3724_v23 = vsub.s32 %v1286_v20, %v1288_v54 }
  0xfb   : > { %2237 = vmatprep.subr.bf16.mxu0 %v2731_v29  ;;  %2278 = vmatprep.subr.bf16.mxu1 %v2733_v10 }
  0xfe   : > { %2238 = vmatpush1.bf16.msra.mxu0 %v2730_v34  ;;  %2279 = vmatpush1.bf16.msra.mxu1 %v2732_v14  ;;  %v326_v14 = vld [vmem:[%s2902_s9] sm:$0xff] }
  0xff   : > { %2239 = vmatprep.subr.bf16.mxu0 %v2739_v35  ;;  %2280 = vmatprep.subr.bf16.mxu1 %v2741_v36 }
 0x102   : > { %2240 = vmatpush1.bf16.msra.mxu0 %v2738_v40  ;;  %2281 = vmatpush1.bf16.msra.mxu1 %v2740_v41 }
 0x103   : > { %2241 = vmatprep.subr.bf16.mxu0 %v2747_v42  ;;  %2282 = vmatprep.subr.bf16.mxu1 %v2749_v43 }
 0x106   : > { %2242 = vmatpush1.bf16.msra.mxu0 %v2746_v47  ;;  %2283 = vmatpush1.bf16.msra.mxu1 %v2748_v48 }
 0x107   : > { %2243 = vmatprep.subr.bf16.mxu0 %v2755_v49  ;;  %2284 = vmatprep.subr.bf16.mxu1 %v2757_v50 }
 0x10a   : > { %2244 = vmatpush1.bf16.msra.mxu0 %v2754_v56  ;;  %2285 = vmatpush1.bf16.msra.mxu1 %v2756_v57 }
 0x10b   : > { %2245 = vmatprep.subr.bf16.mxu0 %v2763_v58  ;;  %2286 = vmatprep.subr.bf16.mxu1 %v2765_v59 }
 0x10e   : > { %2246 = vmatpush1.bf16.msra.mxu0 %v2762_v1  ;;  %2287 = vmatpush1.bf16.msra.mxu1 %v2764_v2 }
 0x10f   : > { %2247 = vmatprep.subr.bf16.mxu0 %v2771_v3  ;;  %2288 = vmatprep.subr.bf16.mxu1 %v2773_v4 }
 0x112   : > { %2248 = vmatpush1.bf16.msra.mxu0 %v2770_v9  ;;  %2289 = vmatpush1.bf16.msra.mxu1 %v2772_v11 }
 0x113   : > { %2249 = vmatprep.subr.bf16.mxu0 %v2779_v12  ;;  %2290 = vmatprep.subr.bf16.mxu1 %v2781_v13 }
 0x116   : > { %2250 = vmatpush1.bf16.msra.mxu0 %v2778_v15  ;;  %2291 = vmatpush1.bf16.msra.mxu1 %v2780_v16 }
 0x119   : > { %2252 = vmatmul.mubr.bf16.vlgmr.msra.gmra.mrb[12].mxu0 %v3542_v22  ;;  %2293 = vmatmul.mubr.bf16.vlgmr.msra.gmra.mrb[12].mxu1 %v3542_v22 }
 0x12c   : > { %v1144_v21 = vpop.f32.mrb[0].mxu0  ;;  %v1185_v24 = vpop.f32.mrb[0].mxu1 }
 0x12d   : > { %v1146_v25 = vpop.f32.mrb[1].mxu0  ;;  %v1187_v28 = vpop.f32.mrb[1].mxu1 }
 0x12e   : > { %v1282_v27 = vcombine.low %v1144_v21, %v1146_v25  ;;  %v1148_v29 = vpop.f32.mrb[2].mxu0  ;;  %v1283_v10 = vcombine.low %v1185_v24, %v1187_v28  ;;  %v1189_v30 = vpop.f32.mrb[2].mxu1  ;;  %v1353_v24 = vld [vmem:[%s2907_s13] sm:$0xff] }
 0x12f   : > { %v1149_v31 = vpop.f32.mrb[3].mxu0  ;;  %v1190_v22 = vpop.f32.mrb[3].mxu1 }
 0x130   : > { %v1290_v32 = vrot.slane %v1282_v27, %v3724_v23  ;;  %v1297_v33 = vrot.slane %v1283_v10, %v3724_v23 }
 0x132   : > { %v1298_v34 = vcombine.low %v1290_v32, %v1297_v33 }
 0x134   : > { %v1318_v35 = vadd.f32 %v1298_v34, %v326_v14 }
 0x136   : > { %v1327_v36 = vrot.slane %v1318_v35, 4  ;;  %v2650_v62 = vmul.f32 -1.442695, %v1318_v35 }
 0x138   : > { %v2651_v37 = vmul.f32 -1.442695, %v1327_v36 }
 0x13a   : > { %2804 = vpow2.f32 %v2651_v37 }
 0x13b   : > { %2806 = vpow2.f32 %v2650_v62 }
 0x144   : > { %v2805_v41 = vpop.eup %2804 }
 0x145   : > { %v2807_v26 = vpop.eup %2806  ;;  %v1332_v50 = vadd.f32 1.0, %v2805_v41 }
 0x146   : > { %v1323_v52 = vadd.f32 1.0, %v2807_v26 }
 0x147   : > { %2808 = vrcp.f32 %v1332_v50 }
 0x148   : > { %2810 = vrcp.f32 %v1323_v52 }
 0x151   : > { %v2809_v59 = vpop.eup %2808 }
 0x152   : > { %v2811_v61 = vpop.eup %2810  ;;  %v1346_v0 = vmul.f32 %v2809_v59, %v1345_v60 }
 0x16c   : > { %v1226_v38 = vpop.f32.mrb[4].mxu0  ;;  %v1267_v39 = vpop.f32.mrb[4].mxu1 }
 0x16d   : > { %v1228_v40 = vpop.f32.mrb[5].mxu0  ;;  %v1269_v43 = vpop.f32.mrb[5].mxu1 }
 0x16e   : > { %v1299_v42 = vcombine.low %v1226_v38, %v1228_v40  ;;  %v1230_v44 = vpop.f32.mrb[6].mxu0  ;;  %v1300_v45 = vcombine.low %v1267_v39, %v1269_v43  ;;  %v1271_v46 = vpop.f32.mrb[6].mxu1 }
 0x16f   : > { %v1231_v47 = vpop.f32.mrb[7].mxu0  ;;  %v1272_v49 = vpop.f32.mrb[7].mxu1 }
 0x170   : > { %v1307_v48 = vrot.slane %v1299_v42, %v3724_v23  ;;  %v1314_v51 = vrot.slane %v1300_v45, %v3724_v23  ;;  %v1354_v42 = vld [vmem:[%s2907_s13 + $0x8] sm:$0xff] }
 0x171   : > { %v2372_v47 = vld [vmem:[#allocation5] sm:$0xf] }
 0x172   : > { %v1315_v55 = vcombine.low %v1307_v48, %v1314_v51 }
 0x174   : > { %v1319_v56 = vadd.f32 %v1315_v55, %v327_v53 }
 0x176   : > { %2812 = vtanh.f32 %v1319_v56  ;;  %v1337_v57 = vrot.slane %v1319_v56, 4 }
 0x178   : > { %v2652_v58 = vmul.f32 -1.442695, %v1337_v57 }
 0x17a   : > { %2814 = vpow2.f32 %v2652_v58 }
 0x180   : > { %v2813_v63 = vpop.eup %2812 }
 0x181   : > { %v1347_v1 = vmul.f32 %v2813_v63, %v2811_v61 }
 0x183   : > { %v3732_v2 = vadd.f32 %v1347_v1, %v1346_v0 }
 0x184   : > { %v2815_v3 = vpop.eup %2814 }
 0x185   : > { %v1342_v4 = vadd.f32 1.0, %v2815_v3  ;;  %1352 = vst [vmem:[#allocation3] sm:$0xf] %v3732_v2  ;;  %2816 = vtanh.f32 %v3732_v2  ;;  %2389 = vst [vmem:[%s3773_s7] sm:$0xf] (!%p2785_p6), %v3732_v2 }
 0x187   : > { %2818 = vrcp.f32 %v1342_v4 }
 0x18f   : > { %v2817_v5 = vpop.eup %2816 }
 0x191   : > { %v2819_v6 = vpop.eup %2818 }
 0x192   : > { %v3736_v7 = vmul.f32 %v2819_v6, %v2817_v5 }
 0x194   : > { %1351 = vst [vmem:[#allocation2] sm:$0xf] %v3736_v7  ;;  %2380 = vst [vmem:[%s2912_s16] sm:$0xf] %v3736_v7 }
 0x195   : > { %2386 = vst [vmem:[%s3772_s6] sm:$0xf] (!%p2785_p6), %v3736_v7 }
 0x1ac   : > { %v2171_v8 = vpop.f32.mrb[8].mxu0  ;;  %v2212_v9 = vpop.f32.mrb[8].mxu1 }
 0x1ad   : > { %v2173_v11 = vpop.f32.mrb[9].mxu0  ;;  %v2214_v13 = vpop.f32.mrb[9].mxu1 }
 0x1ae   : > { %v2309_v12 = vcombine.low %v2171_v8, %v2173_v11  ;;  %v2175_v15 = vpop.f32.mrb[10].mxu0  ;;  %v2310_v16 = vcombine.low %v2212_v9, %v2214_v13  ;;  %v2216_v17 = vpop.f32.mrb[10].mxu1 }
 0x1af   : > { %v2176_v18 = vpop.f32.mrb[11].mxu0  ;;  %v2217_v20 = vpop.f32.mrb[11].mxu1 }
 0x1b0   : > { %v2317_v19 = vrot.slane %v2309_v12, %v3724_v23  ;;  %v2324_v54 = vrot.slane %v2310_v16, %v3724_v23 }
 0x1b2   : > { %v2325_v21 = vcombine.low %v2317_v19, %v2324_v54 }
 0x1b4   : > { %v2345_v25 = vadd.f32 %v2325_v21, %v1353_v24 }
 0x1b6   : > { %v2354_v27 = vrot.slane %v2345_v25, 4  ;;  %v2782_v29 = vmul.f32 -1.442695, %v2345_v25 }
 0x1b8   : > { %v2783_v28 = vmul.f32 -1.442695, %v2354_v27 }
 0x1ba   : > { %2820 = vpow2.f32 %v2783_v28 }
 0x1bb   : > { %2822 = vpow2.f32 %v2782_v29 }
 0x1c4   : > { %v2821_v32 = vpop.eup %2820 }
 0x1c5   : > { %v2823_v14 = vpop.eup %2822  ;;  %v2359_v39 = vadd.f32 1.0, %v2821_v32 }
 0x1c6   : > { %v2350_v41 = vadd.f32 1.0, %v2823_v14 }
 0x1c7   : > { %2824 = vrcp.f32 %v2359_v39 }
 0x1c8   : > { %2826 = vrcp.f32 %v2350_v41 }
 0x1d1   : > { %v2825_v46 = vpop.eup %2824 }
 0x1d2   : > { %v2827_v48 = vpop.eup %2826  ;;  %v2373_v50 = vmul.f32 %v2825_v46, %v2372_v47 }
 0x1ec   : > { %v2253_v10 = vpop.f32.mrb[12].mxu0  ;;  %v2294_v30 = vpop.f32.mrb[12].mxu1 }
 0x1ed   : > { %v2255_v31 = vpop.f32.mrb[13].mxu0  ;;  %v2296_v33 = vpop.f32.mrb[13].mxu1 }
 0x1ee   : > { %v2326_v22 = vcombine.low %v2253_v10, %v2255_v31  ;;  %v2257_v34 = vpop.f32.mrb[14].mxu0  ;;  %v2327_v35 = vcombine.low %v2294_v30, %v2296_v33  ;;  %v2298_v36 = vpop.f32.mrb[14].mxu1 }
 0x1ef   : > { %v2258_v37 = vpop.f32.mrb[15].mxu0  ;;  %v2299_v38 = vpop.f32.mrb[15].mxu1 }
 0x1f0   : > { %v2334_v62 = vrot.slane %v2326_v22, %v3724_v23  ;;  %v2341_v40 = vrot.slane %v2327_v35, %v3724_v23 }
 0x1f2   : > { %v2342_v43 = vcombine.low %v2334_v62, %v2341_v40 }
 0x1f4   : > { %v2346_v44 = vadd.f32 %v2342_v43, %v1354_v42 }
 0x1f6   : > { %2828 = vtanh.f32 %v2346_v44  ;;  %v2364_v26 = vrot.slane %v2346_v44, 4 }
 0x1f8   : > { %v2784_v45 = vmul.f32 -1.442695, %v2364_v26 }
 0x1fa   : > { %2830 = vpow2.f32 %v2784_v45 }
 0x200   : > { %v2829_v49 = vpop.eup %2828 }
 0x201   : > { %v2374_v51 = vmul.f32 %v2829_v49, %v2827_v48 }
 0x203   : > { %v2375_v52 = vadd.f32 %v2374_v51, %v2373_v50 }
 0x204   : > { %v2831_v53 = vpop.eup %2830 }
 0x205   : > { %v2369_v23 = vadd.f32 1.0, %v2831_v53  ;;  %2379 = vst [vmem:[#allocation5] sm:$0xf] %v2375_v52  ;;  %2832 = vtanh.f32 %v2375_v52  ;;  %2787 = vst [vmem:[%s3773_s7 + $0x4] sm:$0xf] (!%p2785_p6), %v2375_v52 }
 0x207   : > { %2834 = vrcp.f32 %v2369_v23 }
 0x20e   : > { %2385 = sbr.rel (%p2785_p6) target bundleno = 534 (0x216), region = 44 }
 0x20f   : > { %v2833_v55 = vpop.eup %2832 }
 0x211   : > { %v2835_v56 = vpop.eup %2834 }
 0x212   : > { %v2377_v57 = vmul.f32 %v2835_v56, %v2833_v55 }
 0x214   : > { %2378 = vst [vmem:[#allocation4] sm:$0xf] %v2377_v57  ;;  %2381 = vst [vmem:[%s2917_s20] sm:$0xf] %v2377_v57 }
 0x215   : > { %2786 = vst [vmem:[%s3772_s6 + $0x4] sm:$0xf] %v2377_v57 }
 0x216 PF: > { %s18_s24 = sadd.s32 1, %s2842_s24  }
 0x217   : > { %p15_p7 = scmp.ge.s32.totalorder %s18_s24, 10  }
 0x219   :  { %17 = sbr.rel (!%p15_p7) target bundleno = 1 (0x1), region = 107 }

// kernel: seq2seq_forward.12
= control target key start
LH: loop header
LB: loop body
LE: loop exit
PB: predicated region body
PF: predicated region fallthrough
CT: control target
= control target key end

     0   :  { %s2672_s1 = inlined_call_operand.vmem [shape: bf16[512,768], index: 1, kind: input, shape index: {}]   ;;  %s2673_s0 = inlined_call_operand.vmem [shape: bf16[16,512], index: 0, kind: input, shape index: {}]   ;;  %s2674_s2 = inlined_call_operand.vmem [shape: f32[1,768], index: 2, kind: input, shape index: {}]   ;;  %s2675_s3 = inlined_call_operand.vmem [shape: f32[16,768], index: 3, kind: output, shape index: {}]  }
   0x1   :  { %v1716_v0 = vld [vmem:[%s2672_s1 + $0x4] ss:$24 sps:$4 sm:$0xff]   ;;  %v1720_v2 = vld [vmem:[%s2672_s1] ss:$24 sps:$4 sm:$0xff]   ;;  %v1722_v4 = vld [vmem:[%s2672_s1 + $0x34] ss:$24 sps:$4 sm:$0xff]  }
   0x2   :  { %v1718_v1 = vld [vmem:[%s2672_s1 + $0x304] ss:$24 sps:$4 sm:$0xff]   ;;  %1222 = vmatprep.subr.bf16.mxu1 %v1716_v0  ;;  %v1721_v3 = vld [vmem:[%s2672_s1 + $0x300] ss:$24 sps:$4 sm:$0xff]   ;;  %v1724_v5 = vld [vmem:[%s2672_s1 + $0x334] ss:$24 sps:$4 sm:$0xff]  }
   0x3   :  { %1265 = vmatprep.subr.bf16.mxu0 %v1718_v1  ;;  %1223 = vmatpush1.bf16.msra.mxu1 %v1720_v2  ;;  %v1726_v6 = vld [vmem:[%s2672_s1 + $0x30] ss:$24 sps:$4 sm:$0xff]   ;;  %v1728_v8 = vld [vmem:[%s2672_s1 + $0x64] ss:$24 sps:$4 sm:$0xff]   ;;  %v1732_v10 = vld [vmem:[%s2672_s1 + $0x60] ss:$24 sps:$4 sm:$0xff]  }
   0x4   :  { %1266 = vmatpush1.bf16.msra.mxu0 %v1721_v3  ;;  %1224 = vmatprep.subr.bf16.mxu1 %v1722_v4  ;;  %v1727_v7 = vld [vmem:[%s2672_s1 + $0x330] ss:$24 sps:$4 sm:$0xff]   ;;  %v1730_v9 = vld [vmem:[%s2672_s1 + $0x364] ss:$24 sps:$4 sm:$0xff]   ;;  %v1733_v11 = vld [vmem:[%s2672_s1 + $0x360] ss:$24 sps:$4 sm:$0xff]  }
   0x5   :  { %1267 = vmatprep.subr.bf16.mxu0 %v1724_v5  ;;  %v1734_v12 = vld [vmem:[%s2672_s1 + $0x94] ss:$24 sps:$4 sm:$0xff]   ;;  %v1738_v14 = vld [vmem:[%s2672_s1 + $0x90] ss:$24 sps:$4 sm:$0xff]   ;;  %v1740_v16 = vld [vmem:[%s2672_s1 + $0xc4] ss:$24 sps:$4 sm:$0xff]  }
   0x6   :  { %v1736_v13 = vld [vmem:[%s2672_s1 + $0x394] ss:$24 sps:$4 sm:$0xff]   ;;  %v1739_v15 = vld [vmem:[%s2672_s1 + $0x390] ss:$24 sps:$4 sm:$0xff]   ;;  %v1742_v17 = vld [vmem:[%s2672_s1 + $0x3c4] ss:$24 sps:$4 sm:$0xff]  }
   0x7   :  { %1225 = vmatpush1.bf16.msra.mxu1 %v1726_v6  ;;  %v1744_v18 = vld [vmem:[%s2672_s1 + $0xc0] ss:$24 sps:$4 sm:$0xff]   ;;  %v1746_v20 = vld [vmem:[%s2672_s1 + $0xf4] ss:$24 sps:$4 sm:$0xff]   ;;  %v1750_v22 = vld [vmem:[%s2672_s1 + $0xf0] ss:$24 sps:$4 sm:$0xff]  }
   0x8   :  { %1268 = vmatpush1.bf16.msra.mxu0 %v1727_v7  ;;  %1226 = vmatprep.subr.bf16.mxu1 %v1728_v8  ;;  %v1745_v19 = vld [vmem:[%s2672_s1 + $0x3c0] ss:$24 sps:$4 sm:$0xff]   ;;  %v1748_v21 = vld [vmem:[%s2672_s1 + $0x3f4] ss:$24 sps:$4 sm:$0xff]   ;;  %v1751_v23 = vld [vmem:[%s2672_s1 + $0x3f0] ss:$24 sps:$4 sm:$0xff]  }
   0x9   :  { %1269 = vmatprep.subr.bf16.mxu0 %v1730_v9  ;;  %v1752_v24 = vld [vmem:[%s2672_s1 + $0x124] ss:$24 sps:$4 sm:$0xff]   ;;  %v1756_v26 = vld [vmem:[%s2672_s1 + $0x120] ss:$24 sps:$4 sm:$0xff]   ;;  %v1758_v28 = vld [vmem:[%s2672_s1 + $0x154] ss:$24 sps:$4 sm:$0xff]  }
   0xa   :  { %v1754_v25 = vld [vmem:[%s2672_s1 + $0x424] ss:$24 sps:$4 sm:$0xff]   ;;  %v1757_v27 = vld [vmem:[%s2672_s1 + $0x420] ss:$24 sps:$4 sm:$0xff]   ;;  %v1760_v29 = vld [vmem:[%s2672_s1 + $0x454] ss:$24 sps:$4 sm:$0xff]  }
   0xb   :  { %1227 = vmatpush1.bf16.msra.mxu1 %v1732_v10  ;;  %v1762_v30 = vld [vmem:[%s2672_s1 + $0x150] ss:$24 sps:$4 sm:$0xff]   ;;  %v1764_v32 = vld [vmem:[%s2672_s1 + $0x184] ss:$24 sps:$4 sm:$0xff]   ;;  %v1768_v34 = vld [vmem:[%s2672_s1 + $0x180] ss:$24 sps:$4 sm:$0xff]  }
   0xc   :  { %1270 = vmatpush1.bf16.msra.mxu0 %v1733_v11  ;;  %1228 = vmatprep.subr.bf16.mxu1 %v1734_v12  ;;  %v1763_v31 = vld [vmem:[%s2672_s1 + $0x450] ss:$24 sps:$4 sm:$0xff]   ;;  %v1766_v33 = vld [vmem:[%s2672_s1 + $0x484] ss:$24 sps:$4 sm:$0xff]   ;;  %v1769_v35 = vld [vmem:[%s2672_s1 + $0x480] ss:$24 sps:$4 sm:$0xff]  }
   0xd   :  { %1271 = vmatprep.subr.bf16.mxu0 %v1736_v13  ;;  %v1770_v36 = vld [vmem:[%s2672_s1 + $0x1b4] ss:$24 sps:$4 sm:$0xff]   ;;  %v1774_v38 = vld [vmem:[%s2672_s1 + $0x1b0] ss:$24 sps:$4 sm:$0xff]   ;;  %v1776_v40 = vld [vmem:[%s2672_s1 + $0x1e4] ss:$24 sps:$4 sm:$0xff]  }
   0xe   :  { %v1772_v37 = vld [vmem:[%s2672_s1 + $0x4b4] ss:$24 sps:$4 sm:$0xff]   ;;  %v1775_v39 = vld [vmem:[%s2672_s1 + $0x4b0] ss:$24 sps:$4 sm:$0xff]   ;;  %v1778_v41 = vld [vmem:[%s2672_s1 + $0x4e4] ss:$24 sps:$4 sm:$0xff]  }
   0xf   :  { %1229 = vmatpush1.bf16.msra.mxu1 %v1738_v14  ;;  %v1780_v42 = vld [vmem:[%s2672_s1 + $0x1e0] ss:$24 sps:$4 sm:$0xff]   ;;  %v1782_v44 = vld [vmem:[%s2672_s1 + $0x214] ss:$24 sps:$4 sm:$0xff]   ;;  %v1786_v46 = vld [vmem:[%s2672_s1 + $0x210] ss:$24 sps:$4 sm:$0xff]  }
  0x10   :  { %1272 = vmatpush1.bf16.msra.mxu0 %v1739_v15  ;;  %1230 = vmatprep.subr.bf16.mxu1 %v1740_v16  ;;  %v1781_v43 = vld [vmem:[%s2672_s1 + $0x4e0] ss:$24 sps:$4 sm:$0xff]   ;;  %v1784_v45 = vld [vmem:[%s2672_s1 + $0x514] ss:$24 sps:$4 sm:$0xff]   ;;  %v1787_v47 = vld [vmem:[%s2672_s1 + $0x510] ss:$24 sps:$4 sm:$0xff]  }
  0x11   :  { %1273 = vmatprep.subr.bf16.mxu0 %v1742_v17  ;;  %v1812_v48 = vld [vmem:[%s2673_s0 + $0x4] ss:$16 sps:$4 sm:$0xff]   ;;  %v2183_v50 = vld [vmem:[%s2673_s0 + $0xc] ss:$16 sps:$4 sm:$0xff]   ;;  %v1792_v52 = vld [vmem:[%s2672_s1 + $0x240] ss:$24 sps:$4 sm:$0xff]  }
  0x12   :  { %v1788_v49 = vld [vmem:[%s2672_s1 + $0x244] ss:$24 sps:$4 sm:$0xff]   ;;  %1254 = vmatprep.mubr.bf16.mxu1 %v1812_v48  ;;  %1297 = vmatprep.mubr.bf16.mxu0 %v2183_v50  ;;  %v1793_v53 = vld [vmem:[%s2672_s1 + $0x540] ss:$24 sps:$4 sm:$0xff]   ;;  %v1794_v54 = vld [vmem:[%s2672_s1 + $0x274] ss:$24 sps:$4 sm:$0xff]  }
  0x13   :  { %1231 = vmatpush1.bf16.msra.mxu1 %v1744_v18  ;;  %v1790_v51 = vld [vmem:[%s2672_s1 + $0x544] ss:$24 sps:$4 sm:$0xff]   ;;  %v1796_v55 = vld [vmem:[%s2672_s1 + $0x574] ss:$24 sps:$4 sm:$0xff]   ;;  %v1798_v56 = vld [vmem:[%s2672_s1 + $0x270] ss:$24 sps:$4 sm:$0xff]  }
  0x14   :  { %1274 = vmatpush1.bf16.msra.mxu0 %v1745_v19  ;;  %1232 = vmatprep.subr.bf16.mxu1 %v1746_v20  ;;  %v1799_v57 = vld [vmem:[%s2672_s1 + $0x570] ss:$24 sps:$4 sm:$0xff]   ;;  %v1800_v58 = vld [vmem:[%s2672_s1 + $0x2a4] ss:$24 sps:$4 sm:$0xff]   ;;  %v1804_v60 = vld [vmem:[%s2672_s1 + $0x2a0] ss:$24 sps:$4 sm:$0xff]  }
  0x15   :  { %1275 = vmatprep.subr.bf16.mxu0 %v1748_v21  ;;  %v1802_v59 = vld [vmem:[%s2672_s1 + $0x5a4] ss:$24 sps:$4 sm:$0xff]   ;;  %v1805_v61 = vld [vmem:[%s2672_s1 + $0x5a0] ss:$24 sps:$4 sm:$0xff]   ;;  %v1806_v62 = vld [vmem:[%s2672_s1 + $0x2d4] ss:$24 sps:$4 sm:$0xff]  }
  0x16   :  { %v1808_v63 = vld [vmem:[%s2672_s1 + $0x5d4] ss:$24 sps:$4 sm:$0xff]   ;;  %v1810_v0 = vld [vmem:[%s2672_s1 + $0x2d0] ss:$24 sps:$4 sm:$0xff]   ;;  %v1829_v9 = vld [vmem:[%s2672_s1 + $0x44] ss:$24 sps:$4 sm:$0xff]  }
  0x17   :  { %1233 = vmatpush1.bf16.msra.mxu1 %v1750_v22  ;;  %v1811_v1 = vld [vmem:[%s2672_s1 + $0x5d0] ss:$24 sps:$4 sm:$0xff]   ;;  %v1820_v2 = vld [vmem:[%s2672_s1 + $0xc] ss:$24 sps:$4 sm:$0xff]   ;;  %v1826_v8 = vld [vmem:[%s2672_s1 + $0x3c] ss:$24 sps:$4 sm:$0xff]  }
  0x18   :  { %1276 = vmatpush1.bf16.msra.mxu0 %v1751_v23  ;;  %1234 = vmatprep.subr.bf16.mxu1 %v1752_v24  ;;  %v1823_v3 = vld [vmem:[%s2672_s1 + $0x14] ss:$24 sps:$4 sm:$0xff]   ;;  %v2240_v4 = vld [vmem:[%s2673_s0] ss:$16 sps:$4 sm:$0xff]   ;;  %v2245_v5 = vld [vmem:[%s2673_s0 + $0x8] ss:$16 sps:$4 sm:$0xff]  }
  0x19   :  { %1277 = vmatprep.subr.bf16.mxu0 %v1754_v25  ;;  %v1818_v6 = vld [vmem:[%s2672_s1 + $0x8] ss:$24 sps:$4 sm:$0xff]   ;;  %v1824_v10 = vld [vmem:[%s2672_s1 + $0x38] ss:$24 sps:$4 sm:$0xff]   ;;  %v1832_v12 = vld [vmem:[%s2672_s1 + $0x6c] ss:$24 sps:$4 sm:$0xff]  }
  0x1a   :  { %v1821_v7 = vld [vmem:[%s2672_s1 + $0x10] ss:$24 sps:$4 sm:$0xff]   ;;  %v1827_v11 = vld [vmem:[%s2672_s1 + $0x40] ss:$24 sps:$4 sm:$0xff]   ;;  %v1835_v13 = vld [vmem:[%s2672_s1 + $0x74] ss:$24 sps:$4 sm:$0xff]  }
  0x1b   :  { %1235 = vmatpush1.bf16.msra.mxu1 %v1756_v26  ;;  %v1830_v14 = vld [vmem:[%s2672_s1 + $0x68] ss:$24 sps:$4 sm:$0xff]   ;;  %v1838_v16 = vld [vmem:[%s2672_s1 + $0x9c] ss:$24 sps:$4 sm:$0xff]   ;;  %v1836_v18 = vld [vmem:[%s2672_s1 + $0x98] ss:$24 sps:$4 sm:$0xff]  }
  0x1c   :  { %1278 = vmatpush1.bf16.msra.mxu0 %v1757_v27  ;;  %1236 = vmatprep.subr.bf16.mxu1 %v1758_v28  ;;  %v1833_v15 = vld [vmem:[%s2672_s1 + $0x70] ss:$24 sps:$4 sm:$0xff]   ;;  %v1841_v17 = vld [vmem:[%s2672_s1 + $0xa4] ss:$24 sps:$4 sm:$0xff]   ;;  %v1839_v19 = vld [vmem:[%s2672_s1 + $0xa0] ss:$24 sps:$4 sm:$0xff]  }
  0x1d   :  { %1279 = vmatprep.subr.bf16.mxu0 %v1760_v29  ;;  %v1844_v20 = vld [vmem:[%s2672_s1 + $0xcc] ss:$24 sps:$4 sm:$0xff]   ;;  %v1842_v22 = vld [vmem:[%s2672_s1 + $0xc8] ss:$24 sps:$4 sm:$0xff]   ;;  %v1850_v24 = vld [vmem:[%s2672_s1 + $0xfc] ss:$24 sps:$4 sm:$0xff]  }
  0x1e   :  { %v1847_v21 = vld [vmem:[%s2672_s1 + $0xd4] ss:$24 sps:$4 sm:$0xff]   ;;  %v1845_v23 = vld [vmem:[%s2672_s1 + $0xd0] ss:$24 sps:$4 sm:$0xff]   ;;  %v1853_v25 = vld [vmem:[%s2672_s1 + $0x104] ss:$24 sps:$4 sm:$0xff]  }
  0x1f   :  { %1237 = vmatpush1.bf16.msra.mxu1 %v1762_v30  ;;  %v1848_v26 = vld [vmem:[%s2672_s1 + $0xf8] ss:$24 sps:$4 sm:$0xff]   ;;  %v1856_v28 = vld [vmem:[%s2672_s1 + $0x12c] ss:$24 sps:$4 sm:$0xff]   ;;  %v1854_v30 = vld [vmem:[%s2672_s1 + $0x128] ss:$24 sps:$4 sm:$0xff]  }
  0x20   :  { %1280 = vmatpush1.bf16.msra.mxu0 %v1763_v31  ;;  %1238 = vmatprep.subr.bf16.mxu1 %v1764_v32  ;;  %v1851_v27 = vld [vmem:[%s2672_s1 + $0x100] ss:$24 sps:$4 sm:$0xff]   ;;  %v1859_v29 = vld [vmem:[%s2672_s1 + $0x134] ss:$24 sps:$4 sm:$0xff]   ;;  %v1857_v31 = vld [vmem:[%s2672_s1 + $0x130] ss:$24 sps:$4 sm:$0xff]  }
  0x21   :  { %1281 = vmatprep.subr.bf16.mxu0 %v1766_v33  ;;  %v1862_v32 = vld [vmem:[%s2672_s1 + $0x15c] ss:$24 sps:$4 sm:$0xff]  }
  0x22   :  { %v1865_v33 = vld [vmem:[%s2672_s1 + $0x164] ss:$24 sps:$4 sm:$0xff]  }
  0x23   :  { %1239 = vmatpush1.bf16.msra.mxu1 %v1768_v34  ;;  %v1860_v34 = vld [vmem:[%s2672_s1 + $0x158] ss:$24 sps:$4 sm:$0xff]  }
  0x24   :  { %1282 = vmatpush1.bf16.msra.mxu0 %v1769_v35  ;;  %1240 = vmatprep.subr.bf16.mxu1 %v1770_v36  ;;  %v1863_v35 = vld [vmem:[%s2672_s1 + $0x160] ss:$24 sps:$4 sm:$0xff]   ;;  %v1868_v36 = vld [vmem:[%s2672_s1 + $0x18c] ss:$24 sps:$4 sm:$0xff]  }
  0x25   :  { %1283 = vmatprep.subr.bf16.mxu0 %v1772_v37  ;;  %v1871_v37 = vld [vmem:[%s2672_s1 + $0x194] ss:$24 sps:$4 sm:$0xff]  }
  0x27   :  { %1241 = vmatpush1.bf16.msra.mxu1 %v1774_v38  ;;  %v1866_v38 = vld [vmem:[%s2672_s1 + $0x188] ss:$24 sps:$4 sm:$0xff]  }
  0x28   :  { %1284 = vmatpush1.bf16.msra.mxu0 %v1775_v39  ;;  %1242 = vmatprep.subr.bf16.mxu1 %v1776_v40  ;;  %v1869_v39 = vld [vmem:[%s2672_s1 + $0x190] ss:$24 sps:$4 sm:$0xff]   ;;  %v1874_v40 = vld [vmem:[%s2672_s1 + $0x1bc] ss:$24 sps:$4 sm:$0xff]  }
  0x29   :  { %1285 = vmatprep.subr.bf16.mxu0 %v1778_v41  ;;  %v1877_v41 = vld [vmem:[%s2672_s1 + $0x1c4] ss:$24 sps:$4 sm:$0xff]  }
  0x2b   :  { %1243 = vmatpush1.bf16.msra.mxu1 %v1780_v42  ;;  %v1872_v42 = vld [vmem:[%s2672_s1 + $0x1b8] ss:$24 sps:$4 sm:$0xff]  }
  0x2c   :  { %1286 = vmatpush1.bf16.msra.mxu0 %v1781_v43  ;;  %1244 = vmatprep.subr.bf16.mxu1 %v1782_v44  ;;  %v1875_v43 = vld [vmem:[%s2672_s1 + $0x1c0] ss:$24 sps:$4 sm:$0xff]   ;;  %v1880_v44 = vld [vmem:[%s2672_s1 + $0x1ec] ss:$24 sps:$4 sm:$0xff]  }
  0x2d   :  { %1287 = vmatprep.subr.bf16.mxu0 %v1784_v45  ;;  %v1883_v45 = vld [vmem:[%s2672_s1 + $0x1f4] ss:$24 sps:$4 sm:$0xff]  }
  0x2f   :  { %1245 = vmatpush1.bf16.msra.mxu1 %v1786_v46  ;;  %v1878_v46 = vld [vmem:[%s2672_s1 + $0x1e8] ss:$24 sps:$4 sm:$0xff]  }
  0x30   :  { %1288 = vmatpush1.bf16.msra.mxu0 %v1787_v47  ;;  %1246 = vmatprep.subr.bf16.mxu1 %v1788_v49  ;;  %v1881_v47 = vld [vmem:[%s2672_s1 + $0x1f0] ss:$24 sps:$4 sm:$0xff]   ;;  %v1889_v49 = vld [vmem:[%s2672_s1 + $0x224] ss:$24 sps:$4 sm:$0xff]  }
  0x31   :  { %1289 = vmatprep.subr.bf16.mxu0 %v1790_v51  ;;  %v1884_v51 = vld [vmem:[%s2672_s1 + $0x218] ss:$24 sps:$4 sm:$0xff]  }
  0x33   :  { %1247 = vmatpush1.bf16.msra.mxu1 %v1792_v52  ;;  %v1887_v52 = vld [vmem:[%s2672_s1 + $0x220] ss:$24 sps:$4 sm:$0xff]  }
  0x34   :  { %1290 = vmatpush1.bf16.msra.mxu0 %v1793_v53  ;;  %1248 = vmatprep.subr.bf16.mxu1 %v1794_v54  ;;  %v1892_v53 = vld [vmem:[%s2672_s1 + $0x24c] ss:$24 sps:$4 sm:$0xff]  }
  0x35   :  { %1291 = vmatprep.subr.bf16.mxu0 %v1796_v55  ;;  %v1895_v54 = vld [vmem:[%s2672_s1 + $0x254] ss:$24 sps:$4 sm:$0xff]   ;;  %v1890_v55 = vld [vmem:[%s2672_s1 + $0x248] ss:$24 sps:$4 sm:$0xff]  }
  0x37   :  { %1249 = vmatpush1.bf16.msra.mxu1 %v1798_v56  ;;  %v1893_v56 = vld [vmem:[%s2672_s1 + $0x250] ss:$24 sps:$4 sm:$0xff]  }
  0x38   :  { %1292 = vmatpush1.bf16.msra.mxu0 %v1799_v57  ;;  %1250 = vmatprep.subr.bf16.mxu1 %v1800_v58  ;;  %v1898_v57 = vld [vmem:[%s2672_s1 + $0x27c] ss:$24 sps:$4 sm:$0xff]  }
  0x39   :  { %1293 = vmatprep.subr.bf16.mxu0 %v1802_v59  ;;  %v1901_v58 = vld [vmem:[%s2672_s1 + $0x284] ss:$24 sps:$4 sm:$0xff]   ;;  %v1896_v59 = vld [vmem:[%s2672_s1 + $0x278] ss:$24 sps:$4 sm:$0xff]  }
  0x3b   :  { %1251 = vmatpush1.bf16.msra.mxu1 %v1804_v60  ;;  %v1899_v60 = vld [vmem:[%s2672_s1 + $0x280] ss:$24 sps:$4 sm:$0xff]  }
  0x3c   :  { %1294 = vmatpush1.bf16.msra.mxu0 %v1805_v61  ;;  %1252 = vmatprep.subr.bf16.mxu1 %v1806_v62  ;;  %v1904_v61 = vld [vmem:[%s2672_s1 + $0x2ac] ss:$24 sps:$4 sm:$0xff]  }
  0x3d   :  { %1295 = vmatprep.subr.bf16.mxu0 %v1808_v63  ;;  %v1907_v62 = vld [vmem:[%s2672_s1 + $0x2b4] ss:$24 sps:$4 sm:$0xff]   ;;  %v1902_v63 = vld [vmem:[%s2672_s1 + $0x2a8] ss:$24 sps:$4 sm:$0xff]  }
  0x3f   :  { %1253 = vmatpush1.bf16.msra.mxu1 %v1810_v0  ;;  %v1905_v0 = vld [vmem:[%s2672_s1 + $0x2b0] ss:$24 sps:$4 sm:$0xff]  }
  0x40   :  { %1296 = vmatpush1.bf16.msra.mxu0 %v1811_v1  ;;  %1308 = vmatprep.subr.bf16.mxu1 %v1820_v2  ;;  %v1910_v1 = vld [vmem:[%s2672_s1 + $0x2dc] ss:$24 sps:$4 sm:$0xff]  }
  0x41   :  { %1394 = vmatprep.subr.bf16.mxu0 %v1823_v3  ;;  %v1913_v2 = vld [vmem:[%s2672_s1 + $0x2e4] ss:$24 sps:$4 sm:$0xff]   ;;  %v1908_v3 = vld [vmem:[%s2672_s1 + $0x2d8] ss:$24 sps:$4 sm:$0xff]  }
  0x42   :  { %1255 = vmatmul.mubr.bf16.vlgmr.msra.gmra.mrb[0].mxu1 %v2240_v4 }
  0x43   :  { %1298 = vmatmul.mubr.bf16.vlgmr.msra.gmra.mrb[0].mxu0 %v2245_v5  ;;  %1309 = vmatpush1.bf16.msra.mxu1 %v1818_v6  ;;  %v1911_v6 = vld [vmem:[%s2672_s1 + $0x2e0] ss:$24 sps:$4 sm:$0xff]  }
  0x44   :  { %1395 = vmatpush1.bf16.msra.mxu0 %v1821_v7  ;;  %1310 = vmatprep.subr.bf16.mxu1 %v1826_v8  ;;  %v1916_v7 = vld [vmem:[%s2672_s1 + $0x30c] ss:$24 sps:$4 sm:$0xff]  }
  0x45   :  { %1396 = vmatprep.subr.bf16.mxu0 %v1829_v9  ;;  %1340 = vmatprep.mubr.bf16.mxu1 %v1812_v48  ;;  %v1919_v8 = vld [vmem:[%s2672_s1 + $0x314] ss:$24 sps:$4 sm:$0xff]   ;;  %v1914_v9 = vld [vmem:[%s2672_s1 + $0x308] ss:$24 sps:$4 sm:$0xff]  }
  0x46   :  { %1426 = vmatprep.mubr.bf16.mxu0 %v1812_v48  ;;  %v1886_v48 = vld [vmem:[%s2672_s1 + $0x21c] ss:$24 sps:$4 sm:$0xff]  }
  0x47   :  { %1311 = vmatpush1.bf16.msra.mxu1 %v1824_v10  ;;  %v1917_v10 = vld [vmem:[%s2672_s1 + $0x310] ss:$24 sps:$4 sm:$0xff]  }
  0x48   :  { %1397 = vmatpush1.bf16.msra.mxu0 %v1827_v11  ;;  %1312 = vmatprep.subr.bf16.mxu1 %v1832_v12  ;;  %v1922_v11 = vld [vmem:[%s2672_s1 + $0x33c] ss:$24 sps:$4 sm:$0xff]  }
  0x49   :  { %1398 = vmatprep.subr.bf16.mxu0 %v1835_v13  ;;  %v1925_v12 = vld [vmem:[%s2672_s1 + $0x344] ss:$24 sps:$4 sm:$0xff]   ;;  %v1920_v13 = vld [vmem:[%s2672_s1 + $0x338] ss:$24 sps:$4 sm:$0xff]  }
  0x4b   :  { %1313 = vmatpush1.bf16.msra.mxu1 %v1830_v14  ;;  %v1923_v14 = vld [vmem:[%s2672_s1 + $0x340] ss:$24 sps:$4 sm:$0xff]  }
  0x4c   :  { %1399 = vmatpush1.bf16.msra.mxu0 %v1833_v15  ;;  %1314 = vmatprep.subr.bf16.mxu1 %v1838_v16  ;;  %v1928_v15 = vld [vmem:[%s2672_s1 + $0x36c] ss:$24 sps:$4 sm:$0xff]   ;;  %v1926_v16 = vld [vmem:[%s2672_s1 + $0x368] ss:$24 sps:$4 sm:$0xff]  }
  0x4d   :  { %1400 = vmatprep.subr.bf16.mxu0 %v1841_v17  ;;  %v1929_v17 = vld [vmem:[%s2672_s1 + $0x370] ss:$24 sps:$4 sm:$0xff]  }
  0x4f   :  { %1315 = vmatpush1.bf16.msra.mxu1 %v1836_v18  ;;  %v1934_v18 = vld [vmem:[%s2672_s1 + $0x39c] ss:$24 sps:$4 sm:$0xff]  }
  0x50   :  { %1401 = vmatpush1.bf16.msra.mxu0 %v1839_v19  ;;  %1316 = vmatprep.subr.bf16.mxu1 %v1844_v20  ;;  %v1932_v19 = vld [vmem:[%s2672_s1 + $0x398] ss:$24 sps:$4 sm:$0xff]  }
  0x51   :  { %1402 = vmatprep.subr.bf16.mxu0 %v1847_v21  ;;  %v1935_v20 = vld [vmem:[%s2672_s1 + $0x3a0] ss:$24 sps:$4 sm:$0xff]   ;;  %v1940_v21 = vld [vmem:[%s2672_s1 + $0x3cc] ss:$24 sps:$4 sm:$0xff]  }
  0x53   :  { %1317 = vmatpush1.bf16.msra.mxu1 %v1842_v22  ;;  %v1943_v22 = vld [vmem:[%s2672_s1 + $0x3d4] ss:$24 sps:$4 sm:$0xff]  }
  0x54   :  { %1403 = vmatpush1.bf16.msra.mxu0 %v1845_v23  ;;  %1318 = vmatprep.subr.bf16.mxu1 %v1850_v24  ;;  %v1938_v23 = vld [vmem:[%s2672_s1 + $0x3c8] ss:$24 sps:$4 sm:$0xff]  }
  0x55   :  { %1404 = vmatprep.subr.bf16.mxu0 %v1853_v25  ;;  %v1941_v24 = vld [vmem:[%s2672_s1 + $0x3d0] ss:$24 sps:$4 sm:$0xff]   ;;  %v1946_v25 = vld [vmem:[%s2672_s1 + $0x3fc] ss:$24 sps:$4 sm:$0xff]  }
  0x57   :  { %1319 = vmatpush1.bf16.msra.mxu1 %v1848_v26  ;;  %v1949_v26 = vld [vmem:[%s2672_s1 + $0x404] ss:$24 sps:$4 sm:$0xff]  }
  0x58   :  { %1405 = vmatpush1.bf16.msra.mxu0 %v1851_v27  ;;  %1320 = vmatprep.subr.bf16.mxu1 %v1856_v28  ;;  %v1944_v27 = vld [vmem:[%s2672_s1 + $0x3f8] ss:$24 sps:$4 sm:$0xff]  }
  0x59   :  { %1406 = vmatprep.subr.bf16.mxu0 %v1859_v29  ;;  %v1947_v28 = vld [vmem:[%s2672_s1 + $0x400] ss:$24 sps:$4 sm:$0xff]   ;;  %v1952_v29 = vld [vmem:[%s2672_s1 + $0x42c] ss:$24 sps:$4 sm:$0xff]  }
  0x5b   :  { %1321 = vmatpush1.bf16.msra.mxu1 %v1854_v30  ;;  %v1955_v30 = vld [vmem:[%s2672_s1 + $0x434] ss:$24 sps:$4 sm:$0xff]  }
  0x5c   :  { %1407 = vmatpush1.bf16.msra.mxu0 %v1857_v31  ;;  %1322 = vmatprep.subr.bf16.mxu1 %v1862_v32  ;;  %v1950_v31 = vld [vmem:[%s2672_s1 + $0x428] ss:$24 sps:$4 sm:$0xff]  }
  0x5d   :  { %1408 = vmatprep.subr.bf16.mxu0 %v1865_v33  ;;  %v1953_v32 = vld [vmem:[%s2672_s1 + $0x430] ss:$24 sps:$4 sm:$0xff]   ;;  %v1958_v33 = vld [vmem:[%s2672_s1 + $0x45c] ss:$24 sps:$4 sm:$0xff]  }
  0x5f   :  { %1323 = vmatpush1.bf16.msra.mxu1 %v1860_v34  ;;  %v1961_v34 = vld [vmem:[%s2672_s1 + $0x464] ss:$24 sps:$4 sm:$0xff]  }
  0x60   :  { %1409 = vmatpush1.bf16.msra.mxu0 %v1863_v35  ;;  %1324 = vmatprep.subr.bf16.mxu1 %v1868_v36  ;;  %v1956_v35 = vld [vmem:[%s2672_s1 + $0x458] ss:$24 sps:$4 sm:$0xff]  }
  0x61   :  { %1410 = vmatprep.subr.bf16.mxu0 %v1871_v37  ;;  %v1959_v36 = vld [vmem:[%s2672_s1 + $0x460] ss:$24 sps:$4 sm:$0xff]   ;;  %v1964_v37 = vld [vmem:[%s2672_s1 + $0x48c] ss:$24 sps:$4 sm:$0xff]  }
  0x63   :  { %1325 = vmatpush1.bf16.msra.mxu1 %v1866_v38  ;;  %v1967_v38 = vld [vmem:[%s2672_s1 + $0x494] ss:$24 sps:$4 sm:$0xff]  }
  0x64   :  { %1411 = vmatpush1.bf16.msra.mxu0 %v1869_v39  ;;  %1326 = vmatprep.subr.bf16.mxu1 %v1874_v40  ;;  %v1962_v39 = vld [vmem:[%s2672_s1 + $0x488] ss:$24 sps:$4 sm:$0xff]  }
  0x65   :  { %1412 = vmatprep.subr.bf16.mxu0 %v1877_v41  ;;  %v1965_v40 = vld [vmem:[%s2672_s1 + $0x490] ss:$24 sps:$4 sm:$0xff]   ;;  %v1970_v41 = vld [vmem:[%s2672_s1 + $0x4bc] ss:$24 sps:$4 sm:$0xff]  }
  0x67   :  { %1327 = vmatpush1.bf16.msra.mxu1 %v1872_v42  ;;  %v1973_v42 = vld [vmem:[%s2672_s1 + $0x4c4] ss:$24 sps:$4 sm:$0xff]  }
  0x68   :  { %1413 = vmatpush1.bf16.msra.mxu0 %v1875_v43  ;;  %1328 = vmatprep.subr.bf16.mxu1 %v1880_v44  ;;  %v1968_v43 = vld [vmem:[%s2672_s1 + $0x4b8] ss:$24 sps:$4 sm:$0xff]  }
  0x69   :  { %1414 = vmatprep.subr.bf16.mxu0 %v1883_v45  ;;  %v1971_v44 = vld [vmem:[%s2672_s1 + $0x4c0] ss:$24 sps:$4 sm:$0xff]   ;;  %v1976_v45 = vld [vmem:[%s2672_s1 + $0x4ec] ss:$24 sps:$4 sm:$0xff]  }
  0x6b   :  { %1329 = vmatpush1.bf16.msra.mxu1 %v1878_v46  ;;  %v1979_v46 = vld [vmem:[%s2672_s1 + $0x4f4] ss:$24 sps:$4 sm:$0xff]  }
  0x6c   :  { %1415 = vmatpush1.bf16.msra.mxu0 %v1881_v47  ;;  %1330 = vmatprep.subr.bf16.mxu1 %v1886_v48  ;;  %v1974_v47 = vld [vmem:[%s2672_s1 + $0x4e8] ss:$24 sps:$4 sm:$0xff]  }
  0x6d   :  { %1416 = vmatprep.subr.bf16.mxu0 %v1889_v49  ;;  %v1977_v48 = vld [vmem:[%s2672_s1 + $0x4f0] ss:$24 sps:$4 sm:$0xff]   ;;  %v1982_v49 = vld [vmem:[%s2672_s1 + $0x51c] ss:$24 sps:$4 sm:$0xff]  }
  0x6f   :  { %1331 = vmatpush1.bf16.msra.mxu1 %v1884_v51  ;;  %v1985_v51 = vld [vmem:[%s2672_s1 + $0x524] ss:$24 sps:$4 sm:$0xff]  }
  0x70   :  { %1417 = vmatpush1.bf16.msra.mxu0 %v1887_v52  ;;  %1332 = vmatprep.subr.bf16.mxu1 %v1892_v53  ;;  %v1980_v52 = vld [vmem:[%s2672_s1 + $0x518] ss:$24 sps:$4 sm:$0xff]  }
  0x71   :  { %1418 = vmatprep.subr.bf16.mxu0 %v1895_v54  ;;  %v1983_v53 = vld [vmem:[%s2672_s1 + $0x520] ss:$24 sps:$4 sm:$0xff]   ;;  %v1988_v54 = vld [vmem:[%s2672_s1 + $0x54c] ss:$24 sps:$4 sm:$0xff]  }
  0x73   :  { %1333 = vmatpush1.bf16.msra.mxu1 %v1890_v55  ;;  %v1991_v55 = vld [vmem:[%s2672_s1 + $0x554] ss:$24 sps:$4 sm:$0xff]  }
  0x74   :  { %1419 = vmatpush1.bf16.msra.mxu0 %v1893_v56  ;;  %1334 = vmatprep.subr.bf16.mxu1 %v1898_v57  ;;  %v1986_v56 = vld [vmem:[%s2672_s1 + $0x548] ss:$24 sps:$4 sm:$0xff]  }
  0x75   :  { %1420 = vmatprep.subr.bf16.mxu0 %v1901_v58  ;;  %v1989_v57 = vld [vmem:[%s2672_s1 + $0x550] ss:$24 sps:$4 sm:$0xff]   ;;  %v1994_v58 = vld [vmem:[%s2672_s1 + $0x57c] ss:$24 sps:$4 sm:$0xff]  }
  0x77   :  { %1335 = vmatpush1.bf16.msra.mxu1 %v1896_v59  ;;  %v1997_v59 = vld [vmem:[%s2672_s1 + $0x584] ss:$24 sps:$4 sm:$0xff]  }
  0x78   :  { %1421 = vmatpush1.bf16.msra.mxu0 %v1899_v60  ;;  %1336 = vmatprep.subr.bf16.mxu1 %v1904_v61  ;;  %v1992_v60 = vld [vmem:[%s2672_s1 + $0x578] ss:$24 sps:$4 sm:$0xff]  }
  0x79   :  { %1422 = vmatprep.subr.bf16.mxu0 %v1907_v62  ;;  %v1995_v61 = vld [vmem:[%s2672_s1 + $0x580] ss:$24 sps:$4 sm:$0xff]   ;;  %v2000_v62 = vld [vmem:[%s2672_s1 + $0x5ac] ss:$24 sps:$4 sm:$0xff]  }
  0x7b   :  { %1337 = vmatpush1.bf16.msra.mxu1 %v1902_v63  ;;  %v2003_v63 = vld [vmem:[%s2672_s1 + $0x5b4] ss:$24 sps:$4 sm:$0xff]  }
  0x7c   :  { %1423 = vmatpush1.bf16.msra.mxu0 %v1905_v0  ;;  %1338 = vmatprep.subr.bf16.mxu1 %v1910_v1  ;;  %v1998_v0 = vld [vmem:[%s2672_s1 + $0x5a8] ss:$24 sps:$4 sm:$0xff]  }
  0x7d   :  { %1424 = vmatprep.subr.bf16.mxu0 %v1913_v2  ;;  %v2001_v1 = vld [vmem:[%s2672_s1 + $0x5b0] ss:$24 sps:$4 sm:$0xff]   ;;  %v2006_v2 = vld [vmem:[%s2672_s1 + $0x5dc] ss:$24 sps:$4 sm:$0xff]  }
  0x7f   :  { %1339 = vmatpush1.bf16.msra.mxu1 %v1908_v3  ;;  %v2009_v3 = vld [vmem:[%s2672_s1 + $0x5e4] ss:$24 sps:$4 sm:$0xff]  }
  0x80   :  { %1425 = vmatpush1.bf16.msra.mxu0 %v1911_v6  ;;  %1351 = vmatprep.subr.bf16.mxu1 %v1916_v7  ;;  %v2004_v6 = vld [vmem:[%s2672_s1 + $0x5d8] ss:$24 sps:$4 sm:$0xff]  }
  0x81   :  { %1437 = vmatprep.subr.bf16.mxu0 %v1919_v8  ;;  %v2007_v7 = vld [vmem:[%s2672_s1 + $0x5e0] ss:$24 sps:$4 sm:$0xff]   ;;  %v212_v8 = vlaneseq }
  0x82   :  { %1341 = vmatmul.mubr.bf16.vlgmr.msra.gmra.mrb[4].mxu1 %v2240_v4 }
  0x83   :  { %1427 = vmatmul.mubr.bf16.vlgmr.msra.gmra.mrb[4].mxu0 %v2240_v4  ;;  %1352 = vmatpush1.bf16.msra.mxu1 %v1914_v9  ;;  %v1931_v4 = vld [vmem:[%s2672_s1 + $0x374] ss:$24 sps:$4 sm:$0xff]   ;;  %v213_v9 = vshrl.u32 %v212_v8, 7 }
  0x84   :  { %1438 = vmatpush1.bf16.msra.mxu0 %v1917_v10  ;;  %1353 = vmatprep.subr.bf16.mxu1 %v1922_v11  ;;  %v210_v11 = vld [vmem:[%s2674_s2] sm:$0x3f] }
  0x85   :  { %1439 = vmatprep.subr.bf16.mxu0 %v1925_v12  ;;  %1383 = vmatprep.mubr.bf16.mxu1 %v2183_v50  ;;  %v214_v10 = vsub.s32 0, %v213_v9  ;;  %v218_v12 = vsub.s32 1, %v213_v9 }
  0x86   :  { %1469 = vmatprep.mubr.bf16.mxu0 %v2183_v50  ;;  %v1937_v50 = vld [vmem:[%s2672_s1 + $0x3a4] ss:$24 sps:$4 sm:$0xff]  }
  0x87   :  { %1354 = vmatpush1.bf16.msra.mxu1 %v1920_v13  ;;  %v215_v13 = vrot.slane %v210_v11, %v214_v10 }
  0x88   :  { %1440 = vmatpush1.bf16.msra.mxu0 %v1923_v14  ;;  %1355 = vmatprep.subr.bf16.mxu1 %v1928_v15  ;;  %v219_v14 = vrot.slane %v210_v11, %v218_v12 }
  0x89   :  { %1441 = vmatprep.subr.bf16.mxu0 %v1931_v4 }
  0x8b   :  { %1356 = vmatpush1.bf16.msra.mxu1 %v1926_v16 }
  0x8c   :  { %1442 = vmatpush1.bf16.msra.mxu0 %v1929_v17  ;;  %1357 = vmatprep.subr.bf16.mxu1 %v1934_v18 }
  0x8d   :  { %1443 = vmatprep.subr.bf16.mxu0 %v1937_v50 }
  0x8f   :  { %1358 = vmatpush1.bf16.msra.mxu1 %v1932_v19 }
  0x90   :  { %1444 = vmatpush1.bf16.msra.mxu0 %v1935_v20  ;;  %1359 = vmatprep.subr.bf16.mxu1 %v1940_v21 }
  0x91   :  { %1445 = vmatprep.subr.bf16.mxu0 %v1943_v22 }
  0x93   :  { %1360 = vmatpush1.bf16.msra.mxu1 %v1938_v23 }
  0x94   :  { %1446 = vmatpush1.bf16.msra.mxu0 %v1941_v24  ;;  %1361 = vmatprep.subr.bf16.mxu1 %v1946_v25 }
  0x95   :  { %1447 = vmatprep.subr.bf16.mxu0 %v1949_v26 }
  0x97   :  { %1362 = vmatpush1.bf16.msra.mxu1 %v1944_v27 }
  0x98   :  { %1448 = vmatpush1.bf16.msra.mxu0 %v1947_v28  ;;  %1363 = vmatprep.subr.bf16.mxu1 %v1952_v29  ;;  %v222_v28 = vsub.s32 2, %v213_v9  ;;  %v230_v29 = vsub.s32 4, %v213_v9 }
  0x99   :  { %1449 = vmatprep.subr.bf16.mxu0 %v1955_v30  ;;  %v226_v30 = vsub.s32 3, %v213_v9 }
  0x9b   :  { %1364 = vmatpush1.bf16.msra.mxu1 %v1950_v31  ;;  %v234_v31 = vsub.s32 5, %v213_v9 }
  0x9c   :  { %1450 = vmatpush1.bf16.msra.mxu0 %v1953_v32  ;;  %1365 = vmatprep.subr.bf16.mxu1 %v1958_v33  ;;  %v223_v32 = vrot.slane %v210_v11, %v222_v28  ;;  %v231_v33 = vrot.slane %v210_v11, %v230_v29 }
  0x9d   :  { %1451 = vmatprep.subr.bf16.mxu0 %v1961_v34  ;;  %v227_v34 = vrot.slane %v210_v11, %v226_v30 }
  0x9f   :  { %1366 = vmatpush1.bf16.msra.mxu1 %v1956_v35  ;;  %v235_v35 = vrot.slane %v210_v11, %v234_v31 }
  0xa0   :  { %1452 = vmatpush1.bf16.msra.mxu0 %v1959_v36  ;;  %1367 = vmatprep.subr.bf16.mxu1 %v1964_v37 }
  0xa1   :  { %1453 = vmatprep.subr.bf16.mxu0 %v1967_v38 }
  0xa3   :  { %1368 = vmatpush1.bf16.msra.mxu1 %v1962_v39 }
  0xa4   :  { %1454 = vmatpush1.bf16.msra.mxu0 %v1965_v40  ;;  %1369 = vmatprep.subr.bf16.mxu1 %v1970_v41 }
  0xa5   :  { %1455 = vmatprep.subr.bf16.mxu0 %v1973_v42 }
  0xa7   :  { %1370 = vmatpush1.bf16.msra.mxu1 %v1968_v43 }
  0xa8   :  { %1456 = vmatpush1.bf16.msra.mxu0 %v1971_v44  ;;  %1371 = vmatprep.subr.bf16.mxu1 %v1976_v45 }
  0xa9   :  { %1457 = vmatprep.subr.bf16.mxu0 %v1979_v46 }
  0xab   :  { %1372 = vmatpush1.bf16.msra.mxu1 %v1974_v47 }
  0xac   :  { %1458 = vmatpush1.bf16.msra.mxu0 %v1977_v48  ;;  %1373 = vmatprep.subr.bf16.mxu1 %v1982_v49 }
  0xad   :  { %1459 = vmatprep.subr.bf16.mxu0 %v1985_v51 }
  0xaf   :  { %1374 = vmatpush1.bf16.msra.mxu1 %v1980_v52 }
  0xb0   :  { %1460 = vmatpush1.bf16.msra.mxu0 %v1983_v53  ;;  %1375 = vmatprep.subr.bf16.mxu1 %v1988_v54 }
  0xb1   :  { %1461 = vmatprep.subr.bf16.mxu0 %v1991_v55 }
  0xb3   :  { %1376 = vmatpush1.bf16.msra.mxu1 %v1986_v56 }
  0xb4   :  { %1462 = vmatpush1.bf16.msra.mxu0 %v1989_v57  ;;  %1377 = vmatprep.subr.bf16.mxu1 %v1994_v58 }
  0xb5   :  { %1463 = vmatprep.subr.bf16.mxu0 %v1997_v59 }
  0xb7   :  { %1378 = vmatpush1.bf16.msra.mxu1 %v1992_v60 }
  0xb8   :  { %1464 = vmatpush1.bf16.msra.mxu0 %v1995_v61  ;;  %1379 = vmatprep.subr.bf16.mxu1 %v2000_v62 }
  0xb9   :  { %1465 = vmatprep.subr.bf16.mxu0 %v2003_v63 }
  0xbb   :  { %1380 = vmatpush1.bf16.msra.mxu1 %v1998_v0 }
  0xbc   :  { %1466 = vmatpush1.bf16.msra.mxu0 %v2001_v1  ;;  %1381 = vmatprep.subr.bf16.mxu1 %v2006_v2 }
  0xbd   :  { %1467 = vmatprep.subr.bf16.mxu0 %v2009_v3 }
  0xbf   :  { %1382 = vmatpush1.bf16.msra.mxu1 %v2004_v6 }
  0xc0   :  { %1468 = vmatpush1.bf16.msra.mxu0 %v2007_v7 }
  0xc2   :  { %1384 = vmatmul.mubr.bf16.vlgmr.msra.gmra.mrb[4].mxu1 %v2245_v5 }
  0xc3   :  { %1470 = vmatmul.mubr.bf16.vlgmr.msra.gmra.mrb[4].mxu0 %v2245_v5 }
 0x115   :  { %v1256_v15 = vpop.f32.mrb[0].mxu1 }
 0x116   :  { %v1299_v4 = vpop.f32.mrb[0].mxu0  ;;  %v1257_v16 = vadd.f32 %v1256_v15, %v215_v13  ;;  %v1258_v17 = vpop.f32.mrb[1].mxu1 }
 0x117   :  { %v1301_v18 = vpop.f32.mrb[1].mxu0  ;;  %v1259_v50 = vadd.f32 %v1258_v17, %v219_v14  ;;  %v1260_v19 = vpop.f32.mrb[2].mxu1 }
 0x118   :  { %v1303_v20 = vpop.f32.mrb[2].mxu0  ;;  %v1300_v21 = vadd.f32 %v1299_v4, %v1257_v16  ;;  %v1261_v5 = vadd.f32 %v1260_v19, %v215_v13  ;;  %v1262_v22 = vpop.f32.mrb[3].mxu1 }
 0x119   :  { %v1305_v23 = vpop.f32.mrb[3].mxu0  ;;  %v1302_v24 = vadd.f32 %v1301_v18, %v1259_v50  ;;  %v1263_v25 = vadd.f32 %v1262_v22, %v219_v14 }
 0x11a   :  { %1480 = vst [vmem:[%s2675_s3] sm:$0xff] %v1300_v21  ;;  %v1304_v26 = vadd.f32 %v1303_v20, %v1261_v5 }
 0x11b   :  { %1481 = vst [vmem:[%s2675_s3 + $0x8] sm:$0xff] %v1302_v24  ;;  %v1306_v27 = vadd.f32 %v1305_v23, %v1263_v25 }
 0x11c   :  { %1486 = vst [vmem:[%s2675_s3 + $0x30] sm:$0xff] %v1304_v26 }
 0x11d   :  { %1487 = vst [vmem:[%s2675_s3 + $0x38] sm:$0xff] %v1306_v27 }
 0x195   :  { %v1385_v36 = vpop.f32.mrb[4].mxu1 }
 0x196   :  { %v1471_v37 = vpop.f32.mrb[4].mxu0  ;;  %v1700_v38 = vadd.f32 %v1385_v36, %v223_v32  ;;  %v1387_v40 = vpop.f32.mrb[5].mxu1 }
 0x197   :  { %v1704_v39 = vadd.f32 %v1471_v37, %v231_v33  ;;  %v1473_v41 = vpop.f32.mrb[5].mxu0  ;;  %v1701_v42 = vadd.f32 %v1387_v40, %v227_v34  ;;  %v1389_v44 = vpop.f32.mrb[6].mxu1 }
 0x198   :  { %v1705_v43 = vadd.f32 %v1473_v41, %v235_v35  ;;  %v1475_v45 = vpop.f32.mrb[6].mxu0  ;;  %1482 = vst [vmem:[%s2675_s3 + $0x10] sm:$0xff] %v1700_v38  ;;  %v1702_v46 = vadd.f32 %v1389_v44, %v223_v32  ;;  %v1391_v48 = vpop.f32.mrb[7].mxu1 }
 0x199   :  { %1484 = vst [vmem:[%s2675_s3 + $0x20] sm:$0xff] %v1704_v39  ;;  %v1706_v47 = vadd.f32 %v1475_v45, %v231_v33  ;;  %v1477_v49 = vpop.f32.mrb[7].mxu0  ;;  %1483 = vst [vmem:[%s2675_s3 + $0x18] sm:$0xff] %v1701_v42  ;;  %v1703_v51 = vadd.f32 %v1391_v48, %v227_v34 }
 0x19a   :  { %1485 = vst [vmem:[%s2675_s3 + $0x28] sm:$0xff] %v1705_v43  ;;  %v1707_v52 = vadd.f32 %v1477_v49, %v235_v35  ;;  %1488 = vst [vmem:[%s2675_s3 + $0x40] sm:$0xff] %v1702_v46 }
 0x19b   :  { %1490 = vst [vmem:[%s2675_s3 + $0x50] sm:$0xff] %v1706_v47  ;;  %1489 = vst [vmem:[%s2675_s3 + $0x48] sm:$0xff] %v1703_v51 }
 0x19c   :  { %1491 = vst [vmem:[%s2675_s3 + $0x58] sm:$0xff] %v1707_v52 }

// kernel: seq2seq_forward.10
= control target key start
LH: loop header
LB: loop body
LE: loop exit
PB: predicated region body
PF: predicated region fallthrough
CT: control target
= control target key end

     0   :  { %s6290_s1 = inlined_call_operand.vmem [shape: bf16[512,2048], index: 1, kind: input, shape index: {}]   ;;  %s6291_s0 = inlined_call_operand.vmem [shape: bf16[16,512], index: 0, kind: input, shape index: {}]   ;;  %s6292_s2 = inlined_call_operand.vmem [shape: f32[1,2048], index: 2, kind: input, shape index: {}]   ;;  %s6293_s3 = inlined_call_operand.vmem [shape: f32[16,2048], index: 3, kind: output, shape index: {}]  }
   0x1   :  { %v18_v0 = vld [vmem:[%s6290_s1] sm:$0xff]  ;;  %v19_v2 = vld [vmem:[%s6290_s1 + $0x8] sm:$0xff] }
   0x2   :  { %v26_v1 = vld [vmem:[%s6290_s1 + $0x40] sm:$0xff]  ;;  %v27_v4 = vld [vmem:[%s6290_s1 + $0x48] sm:$0xff] }
   0x3   :  { %v3923_v3 = vcombine.high %v18_v0, %v26_v1  ;;  %v3922_v5 = vcombine.low %v18_v0, %v26_v1  ;;  %v34_v6 = vld [vmem:[%s6290_s1 + $0x80] sm:$0xff]  ;;  %v3925_v8 = vcombine.high %v19_v2, %v27_v4  ;;  %v3924_v9 = vcombine.low %v19_v2, %v27_v4  ;;  %v35_v11 = vld [vmem:[%s6290_s1 + $0x88] sm:$0xff] }
   0x4   :  { %v42_v7 = vld [vmem:[%s6290_s1 + $0xc0] sm:$0xff]  ;;  %v43_v12 = vld [vmem:[%s6290_s1 + $0xc8] sm:$0xff] }
   0x5   :  { %v3939_v10 = vcombine.high %v34_v6, %v42_v7  ;;  %v50_v13 = vld [vmem:[%s6290_s1 + $0x100] sm:$0xff]  ;;  %3194 = vmatprep.subr.bf16.mxu0 %v3923_v3  ;;  %v3941_v14 = vcombine.high %v35_v11, %v43_v12  ;;  %v51_v16 = vld [vmem:[%s6290_s1 + $0x108] sm:$0xff]  ;;  %3280 = vmatprep.subr.bf16.mxu1 %v3925_v8  ;;  %v3938_v18 = vcombine.low %v34_v6, %v42_v7 }
   0x6   :  { %v58_v15 = vld [vmem:[%s6290_s1 + $0x140] sm:$0xff]  ;;  %v59_v17 = vld [vmem:[%s6290_s1 + $0x148] sm:$0xff]  ;;  %3195 = vmatpush1.bf16.msra.mxu0 %v3922_v5  ;;  %3281 = vmatpush1.bf16.msra.mxu1 %v3924_v9  ;;  %v3940_v19 = vcombine.low %v35_v11, %v43_v12 }
   0x7   :  { %3196 = vmatprep.subr.bf16.mxu0 %v3939_v10  ;;  %v3955_v20 = vcombine.high %v50_v13, %v58_v15  ;;  %3282 = vmatprep.subr.bf16.mxu1 %v3941_v14  ;;  %v3957_v21 = vcombine.high %v51_v16, %v59_v17  ;;  %v66_v22 = vld [vmem:[%s6290_s1 + $0x180] sm:$0xff]  ;;  %v67_v24 = vld [vmem:[%s6290_s1 + $0x188] sm:$0xff]  ;;  %v3954_v26 = vcombine.low %v50_v13, %v58_v15 }
   0x8   :  { %v74_v23 = vld [vmem:[%s6290_s1 + $0x1c0] sm:$0xff]  ;;  %v75_v25 = vld [vmem:[%s6290_s1 + $0x1c8] sm:$0xff]  ;;  %v3956_v27 = vcombine.low %v51_v16, %v59_v17 }
   0x9   :  { %v3971_v28 = vcombine.high %v66_v22, %v74_v23  ;;  %v3973_v29 = vcombine.high %v67_v24, %v75_v25  ;;  %v82_v30 = vld [vmem:[%s6290_s1 + $0x200] sm:$0xff]  ;;  %v83_v32 = vld [vmem:[%s6290_s1 + $0x208] sm:$0xff]  ;;  %v3970_v34 = vcombine.low %v66_v22, %v74_v23  ;;  %v3972_v35 = vcombine.low %v67_v24, %v75_v25 }
   0xa   :  { %3197 = vmatpush1.bf16.msra.mxu0 %v3938_v18  ;;  %3283 = vmatpush1.bf16.msra.mxu1 %v3940_v19  ;;  %v90_v31 = vld [vmem:[%s6290_s1 + $0x240] sm:$0xff]  ;;  %v91_v33 = vld [vmem:[%s6290_s1 + $0x248] sm:$0xff] }
   0xb   :  { %3198 = vmatprep.subr.bf16.mxu0 %v3955_v20  ;;  %3284 = vmatprep.subr.bf16.mxu1 %v3957_v21  ;;  %v3987_v36 = vcombine.high %v82_v30, %v90_v31  ;;  %v3989_v37 = vcombine.high %v83_v32, %v91_v33  ;;  %v98_v38 = vld [vmem:[%s6290_s1 + $0x280] sm:$0xff]  ;;  %v99_v40 = vld [vmem:[%s6290_s1 + $0x288] sm:$0xff]  ;;  %v3986_v42 = vcombine.low %v82_v30, %v90_v31 }
   0xc   :  { %v106_v39 = vld [vmem:[%s6290_s1 + $0x2c0] sm:$0xff]  ;;  %v107_v41 = vld [vmem:[%s6290_s1 + $0x2c8] sm:$0xff]  ;;  %v3988_v43 = vcombine.low %v83_v32, %v91_v33 }
   0xd   :  { %v4003_v44 = vcombine.high %v98_v38, %v106_v39  ;;  %v4005_v45 = vcombine.high %v99_v40, %v107_v41  ;;  %v114_v46 = vld [vmem:[%s6290_s1 + $0x300] sm:$0xff]  ;;  %v115_v48 = vld [vmem:[%s6290_s1 + $0x308] sm:$0xff]  ;;  %v4002_v50 = vcombine.low %v98_v38, %v106_v39  ;;  %v4004_v51 = vcombine.low %v99_v40, %v107_v41 }
   0xe   :  { %3199 = vmatpush1.bf16.msra.mxu0 %v3954_v26  ;;  %3285 = vmatpush1.bf16.msra.mxu1 %v3956_v27  ;;  %v122_v47 = vld [vmem:[%s6290_s1 + $0x340] sm:$0xff]  ;;  %v123_v49 = vld [vmem:[%s6290_s1 + $0x348] sm:$0xff] }
   0xf   :  { %3200 = vmatprep.subr.bf16.mxu0 %v3971_v28  ;;  %3286 = vmatprep.subr.bf16.mxu1 %v3973_v29  ;;  %v4019_v52 = vcombine.high %v114_v46, %v122_v47  ;;  %v4021_v53 = vcombine.high %v115_v48, %v123_v49  ;;  %v130_v54 = vld [vmem:[%s6290_s1 + $0x380] sm:$0xff]  ;;  %v131_v57 = vld [vmem:[%s6290_s1 + $0x388] sm:$0xff]  ;;  %v4018_v59 = vcombine.low %v114_v46, %v122_v47 }
  0x10   :  { %v138_v55 = vld [vmem:[%s6290_s1 + $0x3c0] sm:$0xff]  ;;  %v139_v58 = vld [vmem:[%s6290_s1 + $0x3c8] sm:$0xff]  ;;  %v4020_v60 = vcombine.low %v115_v48, %v123_v49 }
  0x11   :  { %v4621_v56 = vld [vmem:[%s6291_s0 + $0x4] ss:$16 sps:$4 sm:$0xff]   ;;  %v4035_v61 = vcombine.high %v130_v54, %v138_v55  ;;  %v4037_v62 = vcombine.high %v131_v57, %v139_v58  ;;  %v147_v1 = vld [vmem:[%s6290_s1 + $0x408] sm:$0xff]  ;;  %v4034_v3 = vcombine.low %v130_v54, %v138_v55  ;;  %v4036_v4 = vcombine.low %v131_v57, %v139_v58 }
  0x12   :  { %3201 = vmatpush1.bf16.msra.mxu0 %v3970_v34  ;;  %3287 = vmatpush1.bf16.msra.mxu1 %v3972_v35  ;;  %v146_v63 = vld [vmem:[%s6290_s1 + $0x400] sm:$0xff]  ;;  %v155_v2 = vld [vmem:[%s6290_s1 + $0x448] sm:$0xff] }
  0x13   :  { %3202 = vmatprep.subr.bf16.mxu0 %v3987_v36  ;;  %3288 = vmatprep.subr.bf16.mxu1 %v3989_v37  ;;  %v154_v0 = vld [vmem:[%s6290_s1 + $0x440] sm:$0xff]  ;;  %v4053_v6 = vcombine.high %v147_v1, %v155_v2  ;;  %v163_v9 = vld [vmem:[%s6290_s1 + $0x488] sm:$0xff]  ;;  %v4052_v12 = vcombine.low %v147_v1, %v155_v2 }
  0x14   :  { %3226 = vmatprep.mubr.bf16.mxu0 %v4621_v56  ;;  %3312 = vmatprep.mubr.bf16.mxu1 %v4621_v56  ;;  %v4051_v5 = vcombine.high %v146_v63, %v154_v0  ;;  %v162_v7 = vld [vmem:[%s6290_s1 + $0x480] sm:$0xff]  ;;  %v171_v10 = vld [vmem:[%s6290_s1 + $0x4c8] sm:$0xff]  ;;  %v4050_v11 = vcombine.low %v146_v63, %v154_v0 }
  0x15   :  { %v170_v8 = vld [vmem:[%s6290_s1 + $0x4c0] sm:$0xff]  ;;  %v4069_v14 = vcombine.high %v163_v9, %v171_v10  ;;  %v179_v17 = vld [vmem:[%s6290_s1 + $0x508] sm:$0xff]  ;;  %v4068_v20 = vcombine.low %v163_v9, %v171_v10 }
  0x16   :  { %3203 = vmatpush1.bf16.msra.mxu0 %v3986_v42  ;;  %3289 = vmatpush1.bf16.msra.mxu1 %v3988_v43  ;;  %v4067_v13 = vcombine.high %v162_v7, %v170_v8  ;;  %v178_v15 = vld [vmem:[%s6290_s1 + $0x500] sm:$0xff]  ;;  %v187_v18 = vld [vmem:[%s6290_s1 + $0x548] sm:$0xff]  ;;  %v4066_v19 = vcombine.low %v162_v7, %v170_v8 }
  0x17   :  { %3204 = vmatprep.subr.bf16.mxu0 %v4003_v44  ;;  %3290 = vmatprep.subr.bf16.mxu1 %v4005_v45  ;;  %v186_v16 = vld [vmem:[%s6290_s1 + $0x540] sm:$0xff]  ;;  %v4085_v22 = vcombine.high %v179_v17, %v187_v18  ;;  %v195_v25 = vld [vmem:[%s6290_s1 + $0x588] sm:$0xff]  ;;  %v4084_v28 = vcombine.low %v179_v17, %v187_v18 }
  0x18   :  { %v4083_v21 = vcombine.high %v178_v15, %v186_v16  ;;  %v194_v23 = vld [vmem:[%s6290_s1 + $0x580] sm:$0xff]  ;;  %v203_v26 = vld [vmem:[%s6290_s1 + $0x5c8] sm:$0xff]  ;;  %v4082_v27 = vcombine.low %v178_v15, %v186_v16 }
  0x19   :  { %v202_v24 = vld [vmem:[%s6290_s1 + $0x5c0] sm:$0xff]  ;;  %v4101_v30 = vcombine.high %v195_v25, %v203_v26  ;;  %v211_v33 = vld [vmem:[%s6290_s1 + $0x608] sm:$0xff]  ;;  %v4100_v36 = vcombine.low %v195_v25, %v203_v26 }
  0x1a   :  { %3205 = vmatpush1.bf16.msra.mxu0 %v4002_v50  ;;  %3291 = vmatpush1.bf16.msra.mxu1 %v4004_v51  ;;  %v4099_v29 = vcombine.high %v194_v23, %v202_v24  ;;  %v210_v31 = vld [vmem:[%s6290_s1 + $0x600] sm:$0xff]  ;;  %v219_v34 = vld [vmem:[%s6290_s1 + $0x648] sm:$0xff]  ;;  %v4098_v35 = vcombine.low %v194_v23, %v202_v24 }
  0x1b   :  { %3206 = vmatprep.subr.bf16.mxu0 %v4019_v52  ;;  %3292 = vmatprep.subr.bf16.mxu1 %v4021_v53  ;;  %v218_v32 = vld [vmem:[%s6290_s1 + $0x640] sm:$0xff]  ;;  %v4117_v38 = vcombine.high %v211_v33, %v219_v34  ;;  %v227_v41 = vld [vmem:[%s6290_s1 + $0x688] sm:$0xff]  ;;  %v4116_v44 = vcombine.low %v211_v33, %v219_v34 }
  0x1c   :  { %v4115_v37 = vcombine.high %v210_v31, %v218_v32  ;;  %v226_v39 = vld [vmem:[%s6290_s1 + $0x680] sm:$0xff]  ;;  %v235_v42 = vld [vmem:[%s6290_s1 + $0x6c8] sm:$0xff]  ;;  %v4114_v43 = vcombine.low %v210_v31, %v218_v32 }
  0x1d   :  { %v234_v40 = vld [vmem:[%s6290_s1 + $0x6c0] sm:$0xff]  ;;  %v4133_v46 = vcombine.high %v227_v41, %v235_v42  ;;  %v243_v49 = vld [vmem:[%s6290_s1 + $0x708] sm:$0xff]  ;;  %v4132_v52 = vcombine.low %v227_v41, %v235_v42 }
  0x1e   :  { %3207 = vmatpush1.bf16.msra.mxu0 %v4018_v59  ;;  %3293 = vmatpush1.bf16.msra.mxu1 %v4020_v60  ;;  %v4131_v45 = vcombine.high %v226_v39, %v234_v40  ;;  %v242_v47 = vld [vmem:[%s6290_s1 + $0x700] sm:$0xff]  ;;  %v251_v50 = vld [vmem:[%s6290_s1 + $0x748] sm:$0xff]  ;;  %v4130_v51 = vcombine.low %v226_v39, %v234_v40 }
  0x1f   :  { %3208 = vmatprep.subr.bf16.mxu0 %v4035_v61  ;;  %3294 = vmatprep.subr.bf16.mxu1 %v4037_v62  ;;  %v250_v48 = vld [vmem:[%s6290_s1 + $0x740] sm:$0xff]  ;;  %v4149_v54 = vcombine.high %v243_v49, %v251_v50  ;;  %v259_v58 = vld [vmem:[%s6290_s1 + $0x788] sm:$0xff]  ;;  %v4148_v61 = vcombine.low %v243_v49, %v251_v50 }
  0x20   :  { %v4147_v53 = vcombine.high %v242_v47, %v250_v48  ;;  %v258_v55 = vld [vmem:[%s6290_s1 + $0x780] sm:$0xff]  ;;  %v267_v59 = vld [vmem:[%s6290_s1 + $0x7c8] sm:$0xff]  ;;  %v4146_v60 = vcombine.low %v242_v47, %v250_v48 }
  0x21   :  { %v266_v57 = vld [vmem:[%s6290_s1 + $0x7c0] sm:$0xff]  ;;  %v4165_v63 = vcombine.high %v259_v58, %v267_v59  ;;  %v275_v2 = vld [vmem:[%s6290_s1 + $0x808] sm:$0xff] }
  0x22   :  { %3209 = vmatpush1.bf16.msra.mxu0 %v4034_v3  ;;  %3295 = vmatpush1.bf16.msra.mxu1 %v4036_v4  ;;  %v4163_v62 = vcombine.high %v258_v55, %v266_v57  ;;  %v274_v0 = vld [vmem:[%s6290_s1 + $0x800] sm:$0xff]  ;;  %v283_v3 = vld [vmem:[%s6290_s1 + $0x848] sm:$0xff]  ;;  %v4162_v4 = vcombine.low %v258_v55, %v266_v57 }
  0x23   :  { %3210 = vmatprep.subr.bf16.mxu0 %v4051_v5  ;;  %3296 = vmatprep.subr.bf16.mxu1 %v4053_v6  ;;  %v282_v1 = vld [vmem:[%s6290_s1 + $0x840] sm:$0xff]  ;;  %v4164_v5 = vcombine.low %v259_v58, %v267_v59  ;;  %v4181_v7 = vcombine.high %v275_v2, %v283_v3 }
  0x24   :  { %v4179_v6 = vcombine.high %v274_v0, %v282_v1  ;;  %v290_v8 = vld [vmem:[%s6290_s1 + $0x880] sm:$0xff] }
  0x25   :  { %v298_v9 = vld [vmem:[%s6290_s1 + $0x8c0] sm:$0xff] }
  0x26   :  { %3211 = vmatpush1.bf16.msra.mxu0 %v4050_v11  ;;  %3297 = vmatpush1.bf16.msra.mxu1 %v4052_v12  ;;  %v4748_v10 = vld [vmem:[%s6291_s0] ss:$16 sps:$4 sm:$0xff]   ;;  %v291_v11 = vld [vmem:[%s6290_s1 + $0x888] sm:$0xff]  ;;  %v4195_v15 = vcombine.high %v290_v8, %v298_v9 }
  0x27   :  { %3212 = vmatprep.subr.bf16.mxu0 %v4067_v13  ;;  %3298 = vmatprep.subr.bf16.mxu1 %v4069_v14  ;;  %v299_v12 = vld [vmem:[%s6290_s1 + $0x8c8] sm:$0xff]  ;;  %v4178_v13 = vcombine.low %v274_v0, %v282_v1  ;;  %v4180_v14 = vcombine.low %v275_v2, %v283_v3  ;;  %v306_v17 = vld [vmem:[%s6290_s1 + $0x900] sm:$0xff] }
  0x28   :  { %v4197_v16 = vcombine.high %v291_v11, %v299_v12  ;;  %v314_v18 = vld [vmem:[%s6290_s1 + $0x940] sm:$0xff]  ;;  %v4196_v23 = vcombine.low %v291_v11, %v299_v12 }
  0x29   :  { %v4211_v24 = vcombine.high %v306_v17, %v314_v18  ;;  %v322_v26 = vld [vmem:[%s6290_s1 + $0x980] sm:$0xff] }
  0x2a   :  { %3213 = vmatpush1.bf16.msra.mxu0 %v4066_v19  ;;  %3299 = vmatpush1.bf16.msra.mxu1 %v4068_v20  ;;  %v4765_v19 = vld [vmem:[%s6291_s0 + $0xc] ss:$16 sps:$4 sm:$0xff]   ;;  %v338_v34 = vld [vmem:[%s6290_s1 + $0xa00] sm:$0xff] }
  0x2b   :  { %3214 = vmatprep.subr.bf16.mxu0 %v4083_v21  ;;  %3300 = vmatprep.subr.bf16.mxu1 %v4085_v22  ;;  %v307_v20 = vld [vmem:[%s6290_s1 + $0x908] sm:$0xff]  ;;  %v4194_v22 = vcombine.low %v290_v8, %v298_v9  ;;  %v354_v42 = vld [vmem:[%s6290_s1 + $0xa80] sm:$0xff] }
  0x2c   :  { %v315_v21 = vld [vmem:[%s6290_s1 + $0x948] sm:$0xff]  ;;  %v370_v50 = vld [vmem:[%s6290_s1 + $0xb00] sm:$0xff] }
  0x2d   :  { %v4213_v25 = vcombine.high %v307_v20, %v315_v21  ;;  %v4212_v31 = vcombine.low %v307_v20, %v315_v21  ;;  %v386_v59 = vld [vmem:[%s6290_s1 + $0xb80] sm:$0xff] }
  0x2e   :  { %3215 = vmatpush1.bf16.msra.mxu0 %v4082_v27  ;;  %3301 = vmatpush1.bf16.msra.mxu1 %v4084_v28  ;;  %v330_v27 = vld [vmem:[%s6290_s1 + $0x9c0] sm:$0xff]  ;;  %v323_v28 = vld [vmem:[%s6290_s1 + $0x988] sm:$0xff] }
  0x2f   :  { %3216 = vmatprep.subr.bf16.mxu0 %v4099_v29  ;;  %3302 = vmatprep.subr.bf16.mxu1 %v4101_v30  ;;  %v331_v29 = vld [vmem:[%s6290_s1 + $0x9c8] sm:$0xff]  ;;  %v4210_v30 = vcombine.low %v306_v17, %v314_v18  ;;  %v4227_v32 = vcombine.high %v322_v26, %v330_v27  ;;  %v402_v3 = vld [vmem:[%s6290_s1 + $0xc00] sm:$0xff] }
  0x30   :  { %v4229_v33 = vcombine.high %v323_v28, %v331_v29  ;;  %v4228_v39 = vcombine.low %v323_v28, %v331_v29  ;;  %v418_v12 = vld [vmem:[%s6290_s1 + $0xc80] sm:$0xff] }
  0x31   :  { %v434_v21 = vld [vmem:[%s6290_s1 + $0xd00] sm:$0xff] }
  0x32   :  { %3217 = vmatpush1.bf16.msra.mxu0 %v4098_v35  ;;  %3303 = vmatpush1.bf16.msra.mxu1 %v4100_v36  ;;  %v346_v35 = vld [vmem:[%s6290_s1 + $0xa40] sm:$0xff]  ;;  %v339_v36 = vld [vmem:[%s6290_s1 + $0xa08] sm:$0xff] }
  0x33   :  { %3218 = vmatprep.subr.bf16.mxu0 %v4115_v37  ;;  %3304 = vmatprep.subr.bf16.mxu1 %v4117_v38  ;;  %v347_v37 = vld [vmem:[%s6290_s1 + $0xa48] sm:$0xff]  ;;  %v4226_v38 = vcombine.low %v322_v26, %v330_v27  ;;  %v4243_v40 = vcombine.high %v338_v34, %v346_v35  ;;  %v450_v29 = vld [vmem:[%s6290_s1 + $0xd80] sm:$0xff] }
  0x34   :  { %v4245_v41 = vcombine.high %v339_v36, %v347_v37  ;;  %v4244_v47 = vcombine.low %v339_v36, %v347_v37  ;;  %v466_v37 = vld [vmem:[%s6290_s1 + $0xe00] sm:$0xff] }
  0x36   :  { %3219 = vmatpush1.bf16.msra.mxu0 %v4114_v43  ;;  %3305 = vmatpush1.bf16.msra.mxu1 %v4116_v44  ;;  %v362_v43 = vld [vmem:[%s6290_s1 + $0xac0] sm:$0xff]  ;;  %v355_v44 = vld [vmem:[%s6290_s1 + $0xa88] sm:$0xff] }
  0x37   :  { %3220 = vmatprep.subr.bf16.mxu0 %v4131_v45  ;;  %3306 = vmatprep.subr.bf16.mxu1 %v4133_v46  ;;  %v363_v45 = vld [vmem:[%s6290_s1 + $0xac8] sm:$0xff]  ;;  %v4242_v46 = vcombine.low %v338_v34, %v346_v35  ;;  %v4259_v48 = vcombine.high %v354_v42, %v362_v43 }
  0x38   :  { %v4261_v49 = vcombine.high %v355_v44, %v363_v45  ;;  %v4260_v55 = vcombine.low %v355_v44, %v363_v45  ;;  %v482_v45 = vld [vmem:[%s6290_s1 + $0xe80] sm:$0xff] }
  0x3a   :  { %3221 = vmatpush1.bf16.msra.mxu0 %v4130_v51  ;;  %3307 = vmatpush1.bf16.msra.mxu1 %v4132_v52  ;;  %v378_v51 = vld [vmem:[%s6290_s1 + $0xb40] sm:$0xff]  ;;  %v371_v52 = vld [vmem:[%s6290_s1 + $0xb08] sm:$0xff] }
  0x3b   :  { %3222 = vmatprep.subr.bf16.mxu0 %v4147_v53  ;;  %3308 = vmatprep.subr.bf16.mxu1 %v4149_v54  ;;  %v379_v53 = vld [vmem:[%s6290_s1 + $0xb48] sm:$0xff]  ;;  %v4258_v54 = vcombine.low %v354_v42, %v362_v43  ;;  %v4275_v57 = vcombine.high %v370_v50, %v378_v51 }
  0x3c   :  { %v4277_v58 = vcombine.high %v371_v52, %v379_v53  ;;  %v4276_v0 = vcombine.low %v371_v52, %v379_v53  ;;  %v498_v53 = vld [vmem:[%s6290_s1 + $0xf00] sm:$0xff] }
  0x3e   :  { %3223 = vmatpush1.bf16.msra.mxu0 %v4146_v60  ;;  %3309 = vmatpush1.bf16.msra.mxu1 %v4148_v61  ;;  %v394_v60 = vld [vmem:[%s6290_s1 + $0xbc0] sm:$0xff]  ;;  %v387_v61 = vld [vmem:[%s6290_s1 + $0xb88] sm:$0xff] }
  0x3f   :  { %3224 = vmatprep.subr.bf16.mxu0 %v4163_v62  ;;  %3310 = vmatprep.subr.bf16.mxu1 %v4165_v63  ;;  %v395_v62 = vld [vmem:[%s6290_s1 + $0xbc8] sm:$0xff]  ;;  %v4274_v63 = vcombine.low %v370_v50, %v378_v51  ;;  %v4291_v1 = vcombine.high %v386_v59, %v394_v60 }
  0x40   :  { %v4293_v2 = vcombine.high %v387_v61, %v395_v62  ;;  %v4292_v8 = vcombine.low %v387_v61, %v395_v62  ;;  %v514_v62 = vld [vmem:[%s6290_s1 + $0xf80] sm:$0xff] }
  0x42   :  { %3225 = vmatpush1.bf16.msra.mxu0 %v4162_v4  ;;  %3311 = vmatpush1.bf16.msra.mxu1 %v4164_v5  ;;  %v410_v4 = vld [vmem:[%s6290_s1 + $0xc40] sm:$0xff]  ;;  %v403_v5 = vld [vmem:[%s6290_s1 + $0xc08] sm:$0xff] }
  0x43   :  { %3237 = vmatprep.subr.bf16.mxu0 %v4179_v6  ;;  %3323 = vmatprep.subr.bf16.mxu1 %v4181_v7  ;;  %v411_v6 = vld [vmem:[%s6290_s1 + $0xc48] sm:$0xff]  ;;  %v4290_v7 = vcombine.low %v386_v59, %v394_v60  ;;  %v4307_v9 = vcombine.high %v402_v3, %v410_v4 }
  0x44   :  { %v4309_v11 = vcombine.high %v403_v5, %v411_v6  ;;  %v4308_v17 = vcombine.low %v403_v5, %v411_v6  ;;  %v20_v6 = vld [vmem:[%s6290_s1 + $0x10] sm:$0xff] }
  0x45   :  { %3227 = vmatmul.mubr.bf16.vlgmr.msra.gmra.mrb[0].mxu0 %v4748_v10  ;;  %3313 = vmatmul.mubr.bf16.vlgmr.msra.gmra.mrb[0].mxu1 %v4748_v10 }
  0x46   :  { %3238 = vmatpush1.bf16.msra.mxu0 %v4178_v13  ;;  %3324 = vmatpush1.bf16.msra.mxu1 %v4180_v14  ;;  %v426_v13 = vld [vmem:[%s6290_s1 + $0xcc0] sm:$0xff]  ;;  %v419_v14 = vld [vmem:[%s6290_s1 + $0xc88] sm:$0xff] }
  0x47   :  { %3239 = vmatprep.subr.bf16.mxu0 %v4195_v15  ;;  %3325 = vmatprep.subr.bf16.mxu1 %v4197_v16  ;;  %v427_v15 = vld [vmem:[%s6290_s1 + $0xcc8] sm:$0xff]  ;;  %v4306_v16 = vcombine.low %v402_v3, %v410_v4  ;;  %v4323_v18 = vcombine.high %v418_v12, %v426_v13 }
  0x48   :  { %3269 = vmatprep.mubr.bf16.mxu0 %v4765_v19  ;;  %3355 = vmatprep.mubr.bf16.mxu1 %v4765_v19  ;;  %v4325_v20 = vcombine.high %v419_v14, %v427_v15  ;;  %v4324_v26 = vcombine.low %v419_v14, %v427_v15  ;;  %v36_v15 = vld [vmem:[%s6290_s1 + $0x90] sm:$0xff] }
  0x4a   :  { %3240 = vmatpush1.bf16.msra.mxu0 %v4194_v22  ;;  %3326 = vmatpush1.bf16.msra.mxu1 %v4196_v23  ;;  %v442_v22 = vld [vmem:[%s6290_s1 + $0xd40] sm:$0xff]  ;;  %v435_v23 = vld [vmem:[%s6290_s1 + $0xd08] sm:$0xff] }
  0x4b   :  { %3241 = vmatprep.subr.bf16.mxu0 %v4211_v24  ;;  %3327 = vmatprep.subr.bf16.mxu1 %v4213_v25  ;;  %v443_v24 = vld [vmem:[%s6290_s1 + $0xd48] sm:$0xff]  ;;  %v4322_v25 = vcombine.low %v418_v12, %v426_v13  ;;  %v4339_v27 = vcombine.high %v434_v21, %v442_v22 }
  0x4c   :  { %v4341_v28 = vcombine.high %v435_v23, %v443_v24  ;;  %v4340_v34 = vcombine.low %v435_v23, %v443_v24 }
  0x4e   :  { %3242 = vmatpush1.bf16.msra.mxu0 %v4210_v30  ;;  %3328 = vmatpush1.bf16.msra.mxu1 %v4212_v31  ;;  %v458_v30 = vld [vmem:[%s6290_s1 + $0xdc0] sm:$0xff]  ;;  %v451_v31 = vld [vmem:[%s6290_s1 + $0xd88] sm:$0xff] }
  0x4f   :  { %3243 = vmatprep.subr.bf16.mxu0 %v4227_v32  ;;  %3329 = vmatprep.subr.bf16.mxu1 %v4229_v33  ;;  %v459_v32 = vld [vmem:[%s6290_s1 + $0xdc8] sm:$0xff]  ;;  %v4338_v33 = vcombine.low %v434_v21, %v442_v22  ;;  %v4355_v35 = vcombine.high %v450_v29, %v458_v30 }
  0x50   :  { %v4357_v36 = vcombine.high %v451_v31, %v459_v32  ;;  %v4356_v42 = vcombine.low %v451_v31, %v459_v32 }
  0x52   :  { %3244 = vmatpush1.bf16.msra.mxu0 %v4226_v38  ;;  %3330 = vmatpush1.bf16.msra.mxu1 %v4228_v39  ;;  %v474_v38 = vld [vmem:[%s6290_s1 + $0xe40] sm:$0xff]  ;;  %v467_v39 = vld [vmem:[%s6290_s1 + $0xe08] sm:$0xff] }
  0x53   :  { %3245 = vmatprep.subr.bf16.mxu0 %v4243_v40  ;;  %3331 = vmatprep.subr.bf16.mxu1 %v4245_v41  ;;  %v475_v40 = vld [vmem:[%s6290_s1 + $0xe48] sm:$0xff]  ;;  %v4354_v41 = vcombine.low %v450_v29, %v458_v30  ;;  %v4371_v43 = vcombine.high %v466_v37, %v474_v38 }
  0x54   :  { %v4373_v44 = vcombine.high %v467_v39, %v475_v40  ;;  %v4372_v50 = vcombine.low %v467_v39, %v475_v40 }
  0x56   :  { %3246 = vmatpush1.bf16.msra.mxu0 %v4242_v46  ;;  %3332 = vmatpush1.bf16.msra.mxu1 %v4244_v47  ;;  %v490_v46 = vld [vmem:[%s6290_s1 + $0xec0] sm:$0xff]  ;;  %v483_v47 = vld [vmem:[%s6290_s1 + $0xe88] sm:$0xff] }
  0x57   :  { %3247 = vmatprep.subr.bf16.mxu0 %v4259_v48  ;;  %3333 = vmatprep.subr.bf16.mxu1 %v4261_v49  ;;  %v491_v48 = vld [vmem:[%s6290_s1 + $0xec8] sm:$0xff]  ;;  %v4370_v49 = vcombine.low %v466_v37, %v474_v38  ;;  %v4387_v51 = vcombine.high %v482_v45, %v490_v46 }
  0x58   :  { %v4389_v52 = vcombine.high %v483_v47, %v491_v48  ;;  %v4388_v59 = vcombine.low %v483_v47, %v491_v48  ;;  %v100_v48 = vld [vmem:[%s6290_s1 + $0x290] sm:$0xff] }
  0x5a   :  { %3248 = vmatpush1.bf16.msra.mxu0 %v4258_v54  ;;  %3334 = vmatpush1.bf16.msra.mxu1 %v4260_v55  ;;  %v506_v54 = vld [vmem:[%s6290_s1 + $0xf40] sm:$0xff]  ;;  %v499_v55 = vld [vmem:[%s6290_s1 + $0xf08] sm:$0xff] }
  0x5b   :  { %3249 = vmatprep.subr.bf16.mxu0 %v4275_v57  ;;  %3335 = vmatprep.subr.bf16.mxu1 %v4277_v58  ;;  %v507_v57 = vld [vmem:[%s6290_s1 + $0xf48] sm:$0xff]  ;;  %v4386_v58 = vcombine.low %v482_v45, %v490_v46  ;;  %v4403_v60 = vcombine.high %v498_v53, %v506_v54 }
  0x5c   :  { %v4405_v61 = vcombine.high %v499_v55, %v507_v57  ;;  %v4404_v3 = vcombine.low %v499_v55, %v507_v57  ;;  %v116_v57 = vld [vmem:[%s6290_s1 + $0x310] sm:$0xff] }
  0x5e   :  { %3250 = vmatpush1.bf16.msra.mxu0 %v4274_v63  ;;  %3336 = vmatpush1.bf16.msra.mxu1 %v4276_v0  ;;  %v522_v63 = vld [vmem:[%s6290_s1 + $0xfc0] sm:$0xff]  ;;  %v515_v0 = vld [vmem:[%s6290_s1 + $0xf88] sm:$0xff] }
  0x5f   :  { %3251 = vmatprep.subr.bf16.mxu0 %v4291_v1  ;;  %3337 = vmatprep.subr.bf16.mxu1 %v4293_v2  ;;  %v523_v1 = vld [vmem:[%s6290_s1 + $0xfc8] sm:$0xff]  ;;  %v4402_v2 = vcombine.low %v498_v53, %v506_v54  ;;  %v4419_v4 = vcombine.high %v514_v62, %v522_v63 }
  0x60   :  { %v4421_v5 = vcombine.high %v515_v0, %v523_v1  ;;  %v4420_v12 = vcombine.low %v515_v0, %v523_v1  ;;  %v132_v1 = vld [vmem:[%s6290_s1 + $0x390] sm:$0xff] }
  0x62   :  { %3252 = vmatpush1.bf16.msra.mxu0 %v4290_v7  ;;  %3338 = vmatpush1.bf16.msra.mxu1 %v4292_v8  ;;  %v28_v7 = vld [vmem:[%s6290_s1 + $0x50] sm:$0xff]  ;;  %v21_v8 = vld [vmem:[%s6290_s1 + $0x18] sm:$0xff] }
  0x63   :  { %3253 = vmatprep.subr.bf16.mxu0 %v4307_v9  ;;  %3339 = vmatprep.subr.bf16.mxu1 %v4309_v11  ;;  %v29_v9 = vld [vmem:[%s6290_s1 + $0x58] sm:$0xff]  ;;  %v4418_v11 = vcombine.low %v514_v62, %v522_v63  ;;  %v3927_v13 = vcombine.high %v20_v6, %v28_v7  ;;  %v3926_v21 = vcombine.low %v20_v6, %v28_v7 }
  0x64   :  { %v3929_v14 = vcombine.high %v21_v8, %v29_v9  ;;  %v3928_v22 = vcombine.low %v21_v8, %v29_v9  ;;  %v148_v9 = vld [vmem:[%s6290_s1 + $0x410] sm:$0xff] }
  0x66   :  { %3254 = vmatpush1.bf16.msra.mxu0 %v4306_v16  ;;  %3340 = vmatpush1.bf16.msra.mxu1 %v4308_v17  ;;  %v44_v16 = vld [vmem:[%s6290_s1 + $0xd0] sm:$0xff]  ;;  %v4954_v17 = vld [vmem:[%s6291_s0 + $0x8] ss:$16 sps:$4 sm:$0xff]  }
  0x67   :  { %3255 = vmatprep.subr.bf16.mxu0 %v4323_v18  ;;  %3341 = vmatprep.subr.bf16.mxu1 %v4325_v20  ;;  %v37_v18 = vld [vmem:[%s6290_s1 + $0x98] sm:$0xff]  ;;  %v3943_v23 = vcombine.high %v36_v15, %v44_v16  ;;  %v3942_v29 = vcombine.low %v36_v15, %v44_v16 }
  0x68   :  { %v45_v20 = vld [vmem:[%s6290_s1 + $0xd8] sm:$0xff] }
  0x69   :  { %v3945_v24 = vcombine.high %v37_v18, %v45_v20  ;;  %v3944_v30 = vcombine.low %v37_v18, %v45_v20  ;;  %v164_v20 = vld [vmem:[%s6290_s1 + $0x490] sm:$0xff] }
  0x6a   :  { %3256 = vmatpush1.bf16.msra.mxu0 %v4322_v25  ;;  %3342 = vmatpush1.bf16.msra.mxu1 %v4324_v26  ;;  %v52_v25 = vld [vmem:[%s6290_s1 + $0x110] sm:$0xff] }
  0x6b   :  { %3257 = vmatprep.subr.bf16.mxu0 %v4339_v27  ;;  %3343 = vmatprep.subr.bf16.mxu1 %v4341_v28  ;;  %v60_v26 = vld [vmem:[%s6290_s1 + $0x150] sm:$0xff]  ;;  %v53_v27 = vld [vmem:[%s6290_s1 + $0x118] sm:$0xff] }
  0x6c   :  { %v61_v28 = vld [vmem:[%s6290_s1 + $0x158] sm:$0xff]  ;;  %v3959_v31 = vcombine.high %v52_v25, %v60_v26  ;;  %v3958_v37 = vcombine.low %v52_v25, %v60_v26 }
  0x6d   :  { %v3961_v32 = vcombine.high %v53_v27, %v61_v28  ;;  %v3960_v38 = vcombine.low %v53_v27, %v61_v28  ;;  %v180_v28 = vld [vmem:[%s6290_s1 + $0x510] sm:$0xff] }
  0x6e   :  { %3258 = vmatpush1.bf16.msra.mxu0 %v4338_v33  ;;  %3344 = vmatpush1.bf16.msra.mxu1 %v4340_v34  ;;  %v68_v33 = vld [vmem:[%s6290_s1 + $0x190] sm:$0xff] }
  0x6f   :  { %3259 = vmatprep.subr.bf16.mxu0 %v4355_v35  ;;  %3345 = vmatprep.subr.bf16.mxu1 %v4357_v36  ;;  %v76_v34 = vld [vmem:[%s6290_s1 + $0x1d0] sm:$0xff]  ;;  %v69_v35 = vld [vmem:[%s6290_s1 + $0x198] sm:$0xff] }
  0x70   :  { %v77_v36 = vld [vmem:[%s6290_s1 + $0x1d8] sm:$0xff]  ;;  %v3975_v39 = vcombine.high %v68_v33, %v76_v34 }
  0x71   :  { %v3977_v40 = vcombine.high %v69_v35, %v77_v36  ;;  %v3976_v45 = vcombine.low %v69_v35, %v77_v36  ;;  %v196_v36 = vld [vmem:[%s6290_s1 + $0x590] sm:$0xff] }
  0x72   :  { %3260 = vmatpush1.bf16.msra.mxu0 %v4354_v41  ;;  %3346 = vmatpush1.bf16.msra.mxu1 %v4356_v42  ;;  %v84_v41 = vld [vmem:[%s6290_s1 + $0x210] sm:$0xff] }
  0x73   :  { %3261 = vmatprep.subr.bf16.mxu0 %v4371_v43  ;;  %3347 = vmatprep.subr.bf16.mxu1 %v4373_v44  ;;  %v92_v42 = vld [vmem:[%s6290_s1 + $0x250] sm:$0xff]  ;;  %v93_v43 = vld [vmem:[%s6290_s1 + $0x258] sm:$0xff]  ;;  %v3974_v44 = vcombine.low %v68_v33, %v76_v34 }
  0x74   :  { %v3991_v46 = vcombine.high %v84_v41, %v92_v42 }
  0x76   :  { %3262 = vmatpush1.bf16.msra.mxu0 %v4370_v49  ;;  %3348 = vmatpush1.bf16.msra.mxu1 %v4372_v50  ;;  %v108_v49 = vld [vmem:[%s6290_s1 + $0x2d0] sm:$0xff]  ;;  %v101_v50 = vld [vmem:[%s6290_s1 + $0x298] sm:$0xff] }
  0x77   :  { %3263 = vmatprep.subr.bf16.mxu0 %v4387_v51  ;;  %3349 = vmatprep.subr.bf16.mxu1 %v4389_v52  ;;  %v109_v51 = vld [vmem:[%s6290_s1 + $0x2d8] sm:$0xff]  ;;  %v3990_v52 = vcombine.low %v84_v41, %v92_v42  ;;  %v4007_v54 = vcombine.high %v100_v48, %v108_v49 }
  0x78   :  { %v4009_v55 = vcombine.high %v101_v50, %v109_v51  ;;  %v4008_v62 = vcombine.low %v101_v50, %v109_v51  ;;  %v228_v51 = vld [vmem:[%s6290_s1 + $0x690] sm:$0xff] }
  0x7a   :  { %3264 = vmatpush1.bf16.msra.mxu0 %v4386_v58  ;;  %3350 = vmatpush1.bf16.msra.mxu1 %v4388_v59  ;;  %v124_v58 = vld [vmem:[%s6290_s1 + $0x350] sm:$0xff]  ;;  %v117_v59 = vld [vmem:[%s6290_s1 + $0x318] sm:$0xff] }
  0x7b   :  { %3265 = vmatprep.subr.bf16.mxu0 %v4403_v60  ;;  %3351 = vmatprep.subr.bf16.mxu1 %v4405_v61  ;;  %v125_v60 = vld [vmem:[%s6290_s1 + $0x358] sm:$0xff]  ;;  %v4006_v61 = vcombine.low %v100_v48, %v108_v49  ;;  %v4023_v63 = vcombine.high %v116_v57, %v124_v58 }
  0x7c   :  { %v4025_v0 = vcombine.high %v117_v59, %v125_v60  ;;  %v4024_v6 = vcombine.low %v117_v59, %v125_v60  ;;  %v244_v60 = vld [vmem:[%s6290_s1 + $0x710] sm:$0xff] }
  0x7e   :  { %3266 = vmatpush1.bf16.msra.mxu0 %v4402_v2  ;;  %3352 = vmatpush1.bf16.msra.mxu1 %v4404_v3  ;;  %v140_v2 = vld [vmem:[%s6290_s1 + $0x3d0] sm:$0xff]  ;;  %v133_v3 = vld [vmem:[%s6290_s1 + $0x398] sm:$0xff] }
  0x7f   :  { %3267 = vmatprep.subr.bf16.mxu0 %v4419_v4  ;;  %3353 = vmatprep.subr.bf16.mxu1 %v4421_v5  ;;  %v141_v4 = vld [vmem:[%s6290_s1 + $0x3d8] sm:$0xff]  ;;  %v4022_v5 = vcombine.low %v116_v57, %v124_v58  ;;  %v4039_v7 = vcombine.high %v132_v1, %v140_v2 }
  0x80   :  { %v4041_v8 = vcombine.high %v133_v3, %v141_v4  ;;  %v4040_v15 = vcombine.low %v133_v3, %v141_v4  ;;  %v260_v4 = vld [vmem:[%s6290_s1 + $0x790] sm:$0xff] }
  0x82   :  { %3268 = vmatpush1.bf16.msra.mxu0 %v4418_v11  ;;  %3354 = vmatpush1.bf16.msra.mxu1 %v4420_v12  ;;  %v156_v11 = vld [vmem:[%s6290_s1 + $0x450] sm:$0xff]  ;;  %v149_v12 = vld [vmem:[%s6290_s1 + $0x418] sm:$0xff] }
  0x83   :  { %3366 = vmatprep.subr.bf16.mxu0 %v3927_v13  ;;  %3452 = vmatprep.subr.bf16.mxu1 %v3929_v14  ;;  %v157_v13 = vld [vmem:[%s6290_s1 + $0x458] sm:$0xff]  ;;  %v4038_v14 = vcombine.low %v132_v1, %v140_v2  ;;  %v4055_v16 = vcombine.high %v148_v9, %v156_v11 }
  0x84   :  { %v4057_v18 = vcombine.high %v149_v12, %v157_v13  ;;  %v4056_v25 = vcombine.low %v149_v12, %v157_v13  ;;  %v276_v13 = vld [vmem:[%s6290_s1 + $0x810] sm:$0xff] }
  0x85   :  { %3270 = vmatmul.mubr.bf16.vlgmr.msra.gmra.mrb[0].mxu0 %v4954_v17  ;;  %3356 = vmatmul.mubr.bf16.vlgmr.msra.gmra.mrb[0].mxu1 %v4954_v17 }
  0x86   :  { %3367 = vmatpush1.bf16.msra.mxu0 %v3926_v21  ;;  %3453 = vmatpush1.bf16.msra.mxu1 %v3928_v22  ;;  %v172_v21 = vld [vmem:[%s6290_s1 + $0x4d0] sm:$0xff]  ;;  %v165_v22 = vld [vmem:[%s6290_s1 + $0x498] sm:$0xff] }
  0x87   :  { %3368 = vmatprep.subr.bf16.mxu0 %v3943_v23  ;;  %3454 = vmatprep.subr.bf16.mxu1 %v3945_v24  ;;  %v173_v23 = vld [vmem:[%s6290_s1 + $0x4d8] sm:$0xff]  ;;  %v4054_v24 = vcombine.low %v148_v9, %v156_v11  ;;  %v4071_v26 = vcombine.high %v164_v20, %v172_v21 }
  0x88   :  { %3398 = vmatprep.mubr.bf16.mxu0 %v4621_v56  ;;  %3484 = vmatprep.mubr.bf16.mxu1 %v4621_v56  ;;  %v85_v56 = vld [vmem:[%s6290_s1 + $0x218] sm:$0xff]  ;;  %v4073_v27 = vcombine.high %v165_v22, %v173_v23  ;;  %v4072_v33 = vcombine.low %v165_v22, %v173_v23  ;;  %v292_v23 = vld [vmem:[%s6290_s1 + $0x890] sm:$0xff] }
  0x89   :  { %v3993_v47 = vcombine.high %v85_v56, %v93_v43  ;;  %v3992_v53 = vcombine.low %v85_v56, %v93_v43  ;;  %v212_v43 = vld [vmem:[%s6290_s1 + $0x610] sm:$0xff] }
  0x8a   :  { %3369 = vmatpush1.bf16.msra.mxu0 %v3942_v29  ;;  %3455 = vmatpush1.bf16.msra.mxu1 %v3944_v30  ;;  %v188_v29 = vld [vmem:[%s6290_s1 + $0x550] sm:$0xff]  ;;  %v181_v30 = vld [vmem:[%s6290_s1 + $0x518] sm:$0xff] }
  0x8b   :  { %3370 = vmatprep.subr.bf16.mxu0 %v3959_v31  ;;  %3456 = vmatprep.subr.bf16.mxu1 %v3961_v32  ;;  %v189_v31 = vld [vmem:[%s6290_s1 + $0x558] sm:$0xff]  ;;  %v4070_v32 = vcombine.low %v164_v20, %v172_v21  ;;  %v4087_v34 = vcombine.high %v180_v28, %v188_v29 }
  0x8c   :  { %v4089_v35 = vcombine.high %v181_v30, %v189_v31  ;;  %v4088_v41 = vcombine.low %v181_v30, %v189_v31  ;;  %v308_v31 = vld [vmem:[%s6290_s1 + $0x910] sm:$0xff] }
  0x8e   :  { %3371 = vmatpush1.bf16.msra.mxu0 %v3958_v37  ;;  %3457 = vmatpush1.bf16.msra.mxu1 %v3960_v38  ;;  %v204_v37 = vld [vmem:[%s6290_s1 + $0x5d0] sm:$0xff]  ;;  %v197_v38 = vld [vmem:[%s6290_s1 + $0x598] sm:$0xff] }
  0x8f   :  { %3372 = vmatprep.subr.bf16.mxu0 %v3975_v39  ;;  %3458 = vmatprep.subr.bf16.mxu1 %v3977_v40  ;;  %v205_v39 = vld [vmem:[%s6290_s1 + $0x5d8] sm:$0xff]  ;;  %v4086_v40 = vcombine.low %v180_v28, %v188_v29  ;;  %v4103_v42 = vcombine.high %v196_v36, %v204_v37 }
  0x90   :  { %v4105_v56 = vcombine.high %v197_v38, %v205_v39  ;;  %v4104_v48 = vcombine.low %v197_v38, %v205_v39  ;;  %v324_v39 = vld [vmem:[%s6290_s1 + $0x990] sm:$0xff] }
  0x92   :  { %3373 = vmatpush1.bf16.msra.mxu0 %v3974_v44  ;;  %3459 = vmatpush1.bf16.msra.mxu1 %v3976_v45  ;;  %v220_v44 = vld [vmem:[%s6290_s1 + $0x650] sm:$0xff]  ;;  %v213_v45 = vld [vmem:[%s6290_s1 + $0x618] sm:$0xff] }
  0x93   :  { %3374 = vmatprep.subr.bf16.mxu0 %v3991_v46  ;;  %3460 = vmatprep.subr.bf16.mxu1 %v3993_v47  ;;  %v221_v46 = vld [vmem:[%s6290_s1 + $0x658] sm:$0xff]  ;;  %v4102_v47 = vcombine.low %v196_v36, %v204_v37  ;;  %v4119_v49 = vcombine.high %v212_v43, %v220_v44 }
  0x94   :  { %v4121_v50 = vcombine.high %v213_v45, %v221_v46  ;;  %v4120_v57 = vcombine.low %v213_v45, %v221_v46  ;;  %v340_v45 = vld [vmem:[%s6290_s1 + $0xa10] sm:$0xff] }
  0x95   :  { %v348_v46 = vld [vmem:[%s6290_s1 + $0xa50] sm:$0xff] }
  0x96   :  { %3375 = vmatpush1.bf16.msra.mxu0 %v3990_v52  ;;  %3461 = vmatpush1.bf16.msra.mxu1 %v3992_v53  ;;  %v236_v52 = vld [vmem:[%s6290_s1 + $0x6d0] sm:$0xff]  ;;  %v229_v53 = vld [vmem:[%s6290_s1 + $0x698] sm:$0xff] }
  0x97   :  { %3376 = vmatprep.subr.bf16.mxu0 %v4007_v54  ;;  %3462 = vmatprep.subr.bf16.mxu1 %v4009_v55  ;;  %v237_v54 = vld [vmem:[%s6290_s1 + $0x6d8] sm:$0xff]  ;;  %v4118_v55 = vcombine.low %v212_v43, %v220_v44  ;;  %v4135_v58 = vcombine.high %v228_v51, %v236_v52 }
  0x98   :  { %v4137_v59 = vcombine.high %v229_v53, %v237_v54  ;;  %v4136_v1 = vcombine.low %v229_v53, %v237_v54  ;;  %v364_v53 = vld [vmem:[%s6290_s1 + $0xad0] sm:$0xff]  ;;  %v357_v54 = vld [vmem:[%s6290_s1 + $0xa98] sm:$0xff] }
  0x9a   :  { %3377 = vmatpush1.bf16.msra.mxu0 %v4006_v61  ;;  %3463 = vmatpush1.bf16.msra.mxu1 %v4008_v62  ;;  %v252_v61 = vld [vmem:[%s6290_s1 + $0x750] sm:$0xff]  ;;  %v245_v62 = vld [vmem:[%s6290_s1 + $0x718] sm:$0xff] }
  0x9b   :  { %3378 = vmatprep.subr.bf16.mxu0 %v4023_v63  ;;  %3464 = vmatprep.subr.bf16.mxu1 %v4025_v0  ;;  %v253_v63 = vld [vmem:[%s6290_s1 + $0x758] sm:$0xff]  ;;  %v4134_v0 = vcombine.low %v228_v51, %v236_v52  ;;  %v4151_v2 = vcombine.high %v244_v60, %v252_v61  ;;  %v356_v52 = vld [vmem:[%s6290_s1 + $0xa90] sm:$0xff] }
  0x9c   :  { %v4153_v3 = vcombine.high %v245_v62, %v253_v63  ;;  %v4152_v9 = vcombine.low %v245_v62, %v253_v63  ;;  %v380_v62 = vld [vmem:[%s6290_s1 + $0xb50] sm:$0xff]  ;;  %v373_v63 = vld [vmem:[%s6290_s1 + $0xb18] sm:$0xff] }
  0x9e   :  { %3379 = vmatpush1.bf16.msra.mxu0 %v4022_v5  ;;  %3465 = vmatpush1.bf16.msra.mxu1 %v4024_v6  ;;  %v268_v5 = vld [vmem:[%s6290_s1 + $0x7d0] sm:$0xff]  ;;  %v261_v6 = vld [vmem:[%s6290_s1 + $0x798] sm:$0xff] }
  0x9f   :  { %3380 = vmatprep.subr.bf16.mxu0 %v4039_v7  ;;  %3466 = vmatprep.subr.bf16.mxu1 %v4041_v8  ;;  %v269_v7 = vld [vmem:[%s6290_s1 + $0x7d8] sm:$0xff]  ;;  %v4150_v8 = vcombine.low %v244_v60, %v252_v61  ;;  %v4167_v11 = vcombine.high %v260_v4, %v268_v5  ;;  %v372_v61 = vld [vmem:[%s6290_s1 + $0xb10] sm:$0xff] }
  0xa0   :  { %v4169_v12 = vcombine.high %v261_v6, %v269_v7  ;;  %v4168_v20 = vcombine.low %v261_v6, %v269_v7  ;;  %v396_v6 = vld [vmem:[%s6290_s1 + $0xbd0] sm:$0xff]  ;;  %v389_v7 = vld [vmem:[%s6290_s1 + $0xb98] sm:$0xff] }
  0xa2   :  { %3381 = vmatpush1.bf16.msra.mxu0 %v4038_v14  ;;  %3467 = vmatpush1.bf16.msra.mxu1 %v4040_v15  ;;  %v284_v14 = vld [vmem:[%s6290_s1 + $0x850] sm:$0xff]  ;;  %v277_v15 = vld [vmem:[%s6290_s1 + $0x818] sm:$0xff] }
  0xa3   :  { %3382 = vmatprep.subr.bf16.mxu0 %v4055_v16  ;;  %3468 = vmatprep.subr.bf16.mxu1 %v4057_v18  ;;  %v285_v16 = vld [vmem:[%s6290_s1 + $0x858] sm:$0xff]  ;;  %v4166_v18 = vcombine.low %v260_v4, %v268_v5  ;;  %v4183_v21 = vcombine.high %v276_v13, %v284_v14  ;;  %v388_v5 = vld [vmem:[%s6290_s1 + $0xb90] sm:$0xff] }
  0xa4   :  { %v4185_v22 = vcombine.high %v277_v15, %v285_v16  ;;  %v4184_v28 = vcombine.low %v277_v15, %v285_v16  ;;  %v412_v15 = vld [vmem:[%s6290_s1 + $0xc50] sm:$0xff]  ;;  %v405_v16 = vld [vmem:[%s6290_s1 + $0xc18] sm:$0xff] }
  0xa6   :  { %3383 = vmatpush1.bf16.msra.mxu0 %v4054_v24  ;;  %3469 = vmatpush1.bf16.msra.mxu1 %v4056_v25  ;;  %v300_v24 = vld [vmem:[%s6290_s1 + $0x8d0] sm:$0xff]  ;;  %v293_v25 = vld [vmem:[%s6290_s1 + $0x898] sm:$0xff] }
  0xa7   :  { %3384 = vmatprep.subr.bf16.mxu0 %v4071_v26  ;;  %3470 = vmatprep.subr.bf16.mxu1 %v4073_v27  ;;  %v301_v26 = vld [vmem:[%s6290_s1 + $0x8d8] sm:$0xff]  ;;  %v4182_v27 = vcombine.low %v276_v13, %v284_v14  ;;  %v4199_v29 = vcombine.high %v292_v23, %v300_v24  ;;  %v404_v14 = vld [vmem:[%s6290_s1 + $0xc10] sm:$0xff] }
  0xa8   :  { %v4201_v30 = vcombine.high %v293_v25, %v301_v26  ;;  %v4200_v36 = vcombine.low %v293_v25, %v301_v26  ;;  %v428_v25 = vld [vmem:[%s6290_s1 + $0xcd0] sm:$0xff]  ;;  %v421_v26 = vld [vmem:[%s6290_s1 + $0xc98] sm:$0xff] }
  0xaa   :  { %3385 = vmatpush1.bf16.msra.mxu0 %v4070_v32  ;;  %3471 = vmatpush1.bf16.msra.mxu1 %v4072_v33  ;;  %v316_v32 = vld [vmem:[%s6290_s1 + $0x950] sm:$0xff]  ;;  %v309_v33 = vld [vmem:[%s6290_s1 + $0x918] sm:$0xff] }
  0xab   :  { %3386 = vmatprep.subr.bf16.mxu0 %v4087_v34  ;;  %3472 = vmatprep.subr.bf16.mxu1 %v4089_v35  ;;  %v317_v34 = vld [vmem:[%s6290_s1 + $0x958] sm:$0xff]  ;;  %v4198_v35 = vcombine.low %v292_v23, %v300_v24  ;;  %v4215_v37 = vcombine.high %v308_v31, %v316_v32  ;;  %v420_v24 = vld [vmem:[%s6290_s1 + $0xc90] sm:$0xff] }
  0xac   :  { %v4217_v38 = vcombine.high %v309_v33, %v317_v34 }
  0xae   :  { %3387 = vmatpush1.bf16.msra.mxu0 %v4086_v40  ;;  %3473 = vmatpush1.bf16.msra.mxu1 %v4088_v41  ;;  %v332_v40 = vld [vmem:[%s6290_s1 + $0x9d0] sm:$0xff]  ;;  %v333_v41 = vld [vmem:[%s6290_s1 + $0x9d8] sm:$0xff] }
  0xaf   :  { %3388 = vmatprep.subr.bf16.mxu0 %v4103_v42  ;;  %3474 = vmatprep.subr.bf16.mxu1 %v4105_v56  ;;  %v4214_v42 = vcombine.low %v308_v31, %v316_v32  ;;  %v4216_v56 = vcombine.low %v309_v33, %v317_v34  ;;  %v4231_v43 = vcombine.high %v324_v39, %v332_v40  ;;  %v436_v32 = vld [vmem:[%s6290_s1 + $0xd10] sm:$0xff]  ;;  %v437_v34 = vld [vmem:[%s6290_s1 + $0xd18] sm:$0xff] }
  0xb0   :  { %v444_v33 = vld [vmem:[%s6290_s1 + $0xd50] sm:$0xff] }
  0xb2   :  { %3389 = vmatpush1.bf16.msra.mxu0 %v4102_v47  ;;  %3475 = vmatpush1.bf16.msra.mxu1 %v4104_v48  ;;  %v349_v47 = vld [vmem:[%s6290_s1 + $0xa58] sm:$0xff]  ;;  %v4230_v48 = vcombine.low %v324_v39, %v332_v40  ;;  %v452_v40 = vld [vmem:[%s6290_s1 + $0xd90] sm:$0xff] }
  0xb3   :  { %3390 = vmatprep.subr.bf16.mxu0 %v4119_v49  ;;  %3476 = vmatprep.subr.bf16.mxu1 %v4121_v50  ;;  %v4247_v50 = vcombine.high %v340_v45, %v348_v46 }
  0xb6   :  { %3391 = vmatpush1.bf16.msra.mxu0 %v4118_v55  ;;  %3477 = vmatpush1.bf16.msra.mxu1 %v4120_v57  ;;  %v365_v55 = vld [vmem:[%s6290_s1 + $0xad8] sm:$0xff]  ;;  %v4246_v57 = vcombine.low %v340_v45, %v348_v46  ;;  %v468_v46 = vld [vmem:[%s6290_s1 + $0xe10] sm:$0xff] }
  0xb7   :  { %3392 = vmatprep.subr.bf16.mxu0 %v4135_v58  ;;  %3478 = vmatprep.subr.bf16.mxu1 %v4137_v59  ;;  %v4263_v59 = vcombine.high %v356_v52, %v364_v53  ;;  %v4265_v60 = vcombine.high %v357_v54, %v365_v55 }
  0xba   :  { %3393 = vmatpush1.bf16.msra.mxu0 %v4134_v0  ;;  %3479 = vmatpush1.bf16.msra.mxu1 %v4136_v1  ;;  %v381_v0 = vld [vmem:[%s6290_s1 + $0xb58] sm:$0xff]  ;;  %v4262_v1 = vcombine.low %v356_v52, %v364_v53  ;;  %v484_v53 = vld [vmem:[%s6290_s1 + $0xe90] sm:$0xff] }
  0xbb   :  { %3394 = vmatprep.subr.bf16.mxu0 %v4151_v2  ;;  %3480 = vmatprep.subr.bf16.mxu1 %v4153_v3  ;;  %v4264_v2 = vcombine.low %v357_v54, %v365_v55  ;;  %v4279_v3 = vcombine.high %v372_v61, %v380_v62  ;;  %v4281_v4 = vcombine.high %v373_v63, %v381_v0  ;;  %v492_v54 = vld [vmem:[%s6290_s1 + $0xed0] sm:$0xff]  ;;  %v485_v55 = vld [vmem:[%s6290_s1 + $0xe98] sm:$0xff] }
  0xbe   :  { %3395 = vmatpush1.bf16.msra.mxu0 %v4150_v8  ;;  %3481 = vmatpush1.bf16.msra.mxu1 %v4152_v9  ;;  %v397_v8 = vld [vmem:[%s6290_s1 + $0xbd8] sm:$0xff]  ;;  %v4278_v9 = vcombine.low %v372_v61, %v380_v62  ;;  %v500_v62 = vld [vmem:[%s6290_s1 + $0xf10] sm:$0xff] }
  0xbf   :  { %3396 = vmatprep.subr.bf16.mxu0 %v4167_v11  ;;  %3482 = vmatprep.subr.bf16.mxu1 %v4169_v12  ;;  %v4280_v11 = vcombine.low %v373_v63, %v381_v0  ;;  %v4295_v12 = vcombine.high %v388_v5, %v396_v6  ;;  %v4297_v13 = vcombine.high %v389_v7, %v397_v8  ;;  %v508_v63 = vld [vmem:[%s6290_s1 + $0xf50] sm:$0xff]  ;;  %v501_v0 = vld [vmem:[%s6290_s1 + $0xf18] sm:$0xff] }
  0xc2   :  { %3397 = vmatpush1.bf16.msra.mxu0 %v4166_v18  ;;  %3483 = vmatpush1.bf16.msra.mxu1 %v4168_v20  ;;  %v413_v18 = vld [vmem:[%s6290_s1 + $0xc58] sm:$0xff]  ;;  %v4294_v20 = vcombine.low %v388_v5, %v396_v6  ;;  %v516_v6 = vld [vmem:[%s6290_s1 + $0xf90] sm:$0xff] }
  0xc3   :  { %3409 = vmatprep.subr.bf16.mxu0 %v4183_v21  ;;  %3495 = vmatprep.subr.bf16.mxu1 %v4185_v22  ;;  %v4296_v21 = vcombine.low %v389_v7, %v397_v8  ;;  %v4311_v22 = vcombine.high %v404_v14, %v412_v15  ;;  %v4313_v23 = vcombine.high %v405_v16, %v413_v18  ;;  %v524_v7 = vld [vmem:[%s6290_s1 + $0xfd0] sm:$0xff]  ;;  %v517_v8 = vld [vmem:[%s6290_s1 + $0xf98] sm:$0xff] }
  0xc5   :  { %3399 = vmatmul.mubr.bf16.vlgmr.msra.gmra.mrb[4].mxu0 %v4748_v10  ;;  %3485 = vmatmul.mubr.bf16.vlgmr.msra.gmra.mrb[4].mxu1 %v4748_v10  ;;  %v325_v10 = vld [vmem:[%s6290_s1 + $0x998] sm:$0xff] }
  0xc6   :  { %3410 = vmatpush1.bf16.msra.mxu0 %v4182_v27  ;;  %3496 = vmatpush1.bf16.msra.mxu1 %v4184_v28  ;;  %v4233_v44 = vcombine.high %v325_v10, %v333_v41  ;;  %v4232_v49 = vcombine.low %v325_v10, %v333_v41  ;;  %v429_v27 = vld [vmem:[%s6290_s1 + $0xcd8] sm:$0xff]  ;;  %v4310_v28 = vcombine.low %v404_v14, %v412_v15  ;;  %v460_v10 = vld [vmem:[%s6290_s1 + $0xdd0] sm:$0xff]  ;;  %v22_v15 = vld [vmem:[%s6290_s1 + $0x20] sm:$0xff] }
  0xc7   :  { %3411 = vmatprep.subr.bf16.mxu0 %v4199_v29  ;;  %3497 = vmatprep.subr.bf16.mxu1 %v4201_v30  ;;  %v4312_v29 = vcombine.low %v405_v16, %v413_v18  ;;  %v4327_v30 = vcombine.high %v420_v24, %v428_v25  ;;  %v4329_v31 = vcombine.high %v421_v26, %v429_v27  ;;  %v453_v41 = vld [vmem:[%s6290_s1 + $0xd98] sm:$0xff]  ;;  %v30_v16 = vld [vmem:[%s6290_s1 + $0x60] sm:$0xff]  ;;  %v23_v18 = vld [vmem:[%s6290_s1 + $0x28] sm:$0xff] }
  0xc8   :  { %3441 = vmatprep.mubr.bf16.mxu0 %v4765_v19  ;;  %3527 = vmatprep.mubr.bf16.mxu1 %v4765_v19  ;;  %v341_v19 = vld [vmem:[%s6290_s1 + $0xa18] sm:$0xff] }
  0xc9   :  { %v4249_v51 = vcombine.high %v341_v19, %v349_v47  ;;  %v4248_v58 = vcombine.low %v341_v19, %v349_v47  ;;  %v476_v19 = vld [vmem:[%s6290_s1 + $0xe50] sm:$0xff]  ;;  %v469_v47 = vld [vmem:[%s6290_s1 + $0xe18] sm:$0xff] }
  0xca   :  { %3412 = vmatpush1.bf16.msra.mxu0 %v4198_v35  ;;  %3498 = vmatpush1.bf16.msra.mxu1 %v4200_v36  ;;  %v445_v35 = vld [vmem:[%s6290_s1 + $0xd58] sm:$0xff]  ;;  %v4326_v36 = vcombine.low %v420_v24, %v428_v25  ;;  %v38_v25 = vld [vmem:[%s6290_s1 + $0xa0] sm:$0xff] }
  0xcb   :  { %3413 = vmatprep.subr.bf16.mxu0 %v4215_v37  ;;  %3499 = vmatprep.subr.bf16.mxu1 %v4217_v38  ;;  %v4328_v37 = vcombine.low %v421_v26, %v429_v27  ;;  %v4343_v38 = vcombine.high %v436_v32, %v444_v33  ;;  %v4345_v39 = vcombine.high %v437_v34, %v445_v35  ;;  %v46_v26 = vld [vmem:[%s6290_s1 + $0xe0] sm:$0xff]  ;;  %v39_v27 = vld [vmem:[%s6290_s1 + $0xa8] sm:$0xff] }
  0xce   :  { %3414 = vmatpush1.bf16.msra.mxu0 %v4214_v42  ;;  %3500 = vmatpush1.bf16.msra.mxu1 %v4216_v56  ;;  %v461_v42 = vld [vmem:[%s6290_s1 + $0xdd8] sm:$0xff]  ;;  %v4342_v56 = vcombine.low %v436_v32, %v444_v33  ;;  %v54_v33 = vld [vmem:[%s6290_s1 + $0x120] sm:$0xff] }
  0xcf   :  { %3415 = vmatprep.subr.bf16.mxu0 %v4231_v43  ;;  %3501 = vmatprep.subr.bf16.mxu1 %v4233_v44  ;;  %v4344_v43 = vcombine.low %v437_v34, %v445_v35  ;;  %v4359_v44 = vcombine.high %v452_v40, %v460_v10  ;;  %v4361_v45 = vcombine.high %v453_v41, %v461_v42  ;;  %v62_v34 = vld [vmem:[%s6290_s1 + $0x160] sm:$0xff]  ;;  %v55_v35 = vld [vmem:[%s6290_s1 + $0x128] sm:$0xff] }
  0xd2   :  { %3416 = vmatpush1.bf16.msra.mxu0 %v4230_v48  ;;  %3502 = vmatpush1.bf16.msra.mxu1 %v4232_v49  ;;  %v477_v48 = vld [vmem:[%s6290_s1 + $0xe58] sm:$0xff]  ;;  %v4358_v49 = vcombine.low %v452_v40, %v460_v10  ;;  %v70_v10 = vld [vmem:[%s6290_s1 + $0x1a0] sm:$0xff] }
  0xd3   :  { %3417 = vmatprep.subr.bf16.mxu0 %v4247_v50  ;;  %3503 = vmatprep.subr.bf16.mxu1 %v4249_v51  ;;  %v4360_v50 = vcombine.low %v453_v41, %v461_v42  ;;  %v4375_v51 = vcombine.high %v468_v46, %v476_v19  ;;  %v4377_v52 = vcombine.high %v469_v47, %v477_v48  ;;  %v78_v41 = vld [vmem:[%s6290_s1 + $0x1e0] sm:$0xff]  ;;  %v71_v42 = vld [vmem:[%s6290_s1 + $0x1a8] sm:$0xff] }
  0xd6   :  { %3418 = vmatpush1.bf16.msra.mxu0 %v4246_v57  ;;  %3504 = vmatpush1.bf16.msra.mxu1 %v4248_v58  ;;  %v493_v57 = vld [vmem:[%s6290_s1 + $0xed8] sm:$0xff]  ;;  %v4374_v58 = vcombine.low %v468_v46, %v476_v19  ;;  %v86_v19 = vld [vmem:[%s6290_s1 + $0x220] sm:$0xff] }
  0xd7   :  { %3419 = vmatprep.subr.bf16.mxu0 %v4263_v59  ;;  %3505 = vmatprep.subr.bf16.mxu1 %v4265_v60  ;;  %v4376_v59 = vcombine.low %v469_v47, %v477_v48  ;;  %v4391_v60 = vcombine.high %v484_v53, %v492_v54  ;;  %v4393_v61 = vcombine.high %v485_v55, %v493_v57  ;;  %v94_v47 = vld [vmem:[%s6290_s1 + $0x260] sm:$0xff]  ;;  %v87_v48 = vld [vmem:[%s6290_s1 + $0x228] sm:$0xff] }
  0xda   :  { %3420 = vmatpush1.bf16.msra.mxu0 %v4262_v1  ;;  %3506 = vmatpush1.bf16.msra.mxu1 %v4264_v2  ;;  %v509_v1 = vld [vmem:[%s6290_s1 + $0xf58] sm:$0xff]  ;;  %v4390_v2 = vcombine.low %v484_v53, %v492_v54  ;;  %v102_v54 = vld [vmem:[%s6290_s1 + $0x2a0] sm:$0xff] }
  0xdb   :  { %3421 = vmatprep.subr.bf16.mxu0 %v4279_v3  ;;  %3507 = vmatprep.subr.bf16.mxu1 %v4281_v4  ;;  %v4392_v3 = vcombine.low %v485_v55, %v493_v57  ;;  %v4407_v4 = vcombine.high %v500_v62, %v508_v63  ;;  %v4409_v5 = vcombine.high %v501_v0, %v509_v1  ;;  %v110_v55 = vld [vmem:[%s6290_s1 + $0x2e0] sm:$0xff]  ;;  %v103_v57 = vld [vmem:[%s6290_s1 + $0x2a8] sm:$0xff] }
  0xde   :  { %3422 = vmatpush1.bf16.msra.mxu0 %v4278_v9  ;;  %3508 = vmatpush1.bf16.msra.mxu1 %v4280_v11  ;;  %v525_v9 = vld [vmem:[%s6290_s1 + $0xfd8] sm:$0xff]  ;;  %v4406_v11 = vcombine.low %v500_v62, %v508_v63  ;;  %v118_v63 = vld [vmem:[%s6290_s1 + $0x320] sm:$0xff] }
  0xdf   :  { %3423 = vmatprep.subr.bf16.mxu0 %v4295_v12  ;;  %3509 = vmatprep.subr.bf16.mxu1 %v4297_v13  ;;  %v4408_v12 = vcombine.low %v501_v0, %v509_v1  ;;  %v4423_v13 = vcombine.high %v516_v6, %v524_v7  ;;  %v4425_v14 = vcombine.high %v517_v8, %v525_v9  ;;  %v126_v0 = vld [vmem:[%s6290_s1 + $0x360] sm:$0xff]  ;;  %v119_v1 = vld [vmem:[%s6290_s1 + $0x328] sm:$0xff] }
  0xe2   :  { %3424 = vmatpush1.bf16.msra.mxu0 %v4294_v20  ;;  %3510 = vmatpush1.bf16.msra.mxu1 %v4296_v21  ;;  %v31_v20 = vld [vmem:[%s6290_s1 + $0x68] sm:$0xff]  ;;  %v4422_v21 = vcombine.low %v516_v6, %v524_v7  ;;  %v134_v7 = vld [vmem:[%s6290_s1 + $0x3a0] sm:$0xff] }
  0xe3   :  { %3425 = vmatprep.subr.bf16.mxu0 %v4311_v22  ;;  %3511 = vmatprep.subr.bf16.mxu1 %v4313_v23  ;;  %v4424_v22 = vcombine.low %v517_v8, %v525_v9  ;;  %v3931_v23 = vcombine.high %v22_v15, %v30_v16  ;;  %v3933_v24 = vcombine.high %v23_v18, %v31_v20  ;;  %v142_v8 = vld [vmem:[%s6290_s1 + $0x3e0] sm:$0xff]  ;;  %v135_v9 = vld [vmem:[%s6290_s1 + $0x3a8] sm:$0xff] }
  0xe6   :  { %3426 = vmatpush1.bf16.msra.mxu0 %v4310_v28  ;;  %3512 = vmatpush1.bf16.msra.mxu1 %v4312_v29  ;;  %v47_v28 = vld [vmem:[%s6290_s1 + $0xe8] sm:$0xff]  ;;  %v3930_v29 = vcombine.low %v22_v15, %v30_v16  ;;  %v150_v16 = vld [vmem:[%s6290_s1 + $0x420] sm:$0xff] }
  0xe7   :  { %3427 = vmatprep.subr.bf16.mxu0 %v4327_v30  ;;  %3513 = vmatprep.subr.bf16.mxu1 %v4329_v31  ;;  %v3932_v30 = vcombine.low %v23_v18, %v31_v20  ;;  %v3947_v31 = vcombine.high %v38_v25, %v46_v26  ;;  %v3949_v32 = vcombine.high %v39_v27, %v47_v28  ;;  %v158_v18 = vld [vmem:[%s6290_s1 + $0x460] sm:$0xff]  ;;  %v151_v20 = vld [vmem:[%s6290_s1 + $0x428] sm:$0xff] }
  0xea   :  { %3428 = vmatpush1.bf16.msra.mxu0 %v4326_v36  ;;  %3514 = vmatpush1.bf16.msra.mxu1 %v4328_v37  ;;  %v63_v36 = vld [vmem:[%s6290_s1 + $0x168] sm:$0xff]  ;;  %v3946_v37 = vcombine.low %v38_v25, %v46_v26  ;;  %v166_v26 = vld [vmem:[%s6290_s1 + $0x4a0] sm:$0xff] }
  0xeb   :  { %3429 = vmatprep.subr.bf16.mxu0 %v4343_v38  ;;  %3515 = vmatprep.subr.bf16.mxu1 %v4345_v39  ;;  %v3948_v38 = vcombine.low %v39_v27, %v47_v28  ;;  %v3963_v39 = vcombine.high %v54_v33, %v62_v34  ;;  %v3965_v40 = vcombine.high %v55_v35, %v63_v36  ;;  %v174_v27 = vld [vmem:[%s6290_s1 + $0x4e0] sm:$0xff]  ;;  %v167_v28 = vld [vmem:[%s6290_s1 + $0x4a8] sm:$0xff] }
  0xee   :  { %3430 = vmatpush1.bf16.msra.mxu0 %v4342_v56  ;;  %3516 = vmatpush1.bf16.msra.mxu1 %v4344_v43  ;;  %v79_v56 = vld [vmem:[%s6290_s1 + $0x1e8] sm:$0xff]  ;;  %v3962_v43 = vcombine.low %v54_v33, %v62_v34  ;;  %v182_v34 = vld [vmem:[%s6290_s1 + $0x520] sm:$0xff] }
  0xef   :  { %3431 = vmatprep.subr.bf16.mxu0 %v4359_v44  ;;  %3517 = vmatprep.subr.bf16.mxu1 %v4361_v45  ;;  %v3964_v44 = vcombine.low %v55_v35, %v63_v36  ;;  %v3979_v45 = vcombine.high %v70_v10, %v78_v41  ;;  %v3981_v46 = vcombine.high %v71_v42, %v79_v56  ;;  %v190_v35 = vld [vmem:[%s6290_s1 + $0x560] sm:$0xff]  ;;  %v183_v36 = vld [vmem:[%s6290_s1 + $0x528] sm:$0xff] }
  0xf2   :  { %3432 = vmatpush1.bf16.msra.mxu0 %v4358_v49  ;;  %3518 = vmatpush1.bf16.msra.mxu1 %v4360_v50  ;;  %v95_v49 = vld [vmem:[%s6290_s1 + $0x268] sm:$0xff]  ;;  %v3978_v50 = vcombine.low %v70_v10, %v78_v41  ;;  %v198_v41 = vld [vmem:[%s6290_s1 + $0x5a0] sm:$0xff] }
  0xf3   :  { %3433 = vmatprep.subr.bf16.mxu0 %v4375_v51  ;;  %3519 = vmatprep.subr.bf16.mxu1 %v4377_v52  ;;  %v3980_v51 = vcombine.low %v71_v42, %v79_v56  ;;  %v3995_v52 = vcombine.high %v86_v19, %v94_v47  ;;  %v3997_v53 = vcombine.high %v87_v48, %v95_v49  ;;  %v206_v42 = vld [vmem:[%s6290_s1 + $0x5e0] sm:$0xff]  ;;  %v199_v56 = vld [vmem:[%s6290_s1 + $0x5a8] sm:$0xff] }
  0xf6   :  { %3434 = vmatpush1.bf16.msra.mxu0 %v4374_v58  ;;  %3520 = vmatpush1.bf16.msra.mxu1 %v4376_v59  ;;  %v111_v58 = vld [vmem:[%s6290_s1 + $0x2e8] sm:$0xff]  ;;  %v3994_v59 = vcombine.low %v86_v19, %v94_v47  ;;  %v214_v47 = vld [vmem:[%s6290_s1 + $0x620] sm:$0xff] }
  0xf7   :  { %3435 = vmatprep.subr.bf16.mxu0 %v4391_v60  ;;  %3521 = vmatprep.subr.bf16.mxu1 %v4393_v61  ;;  %v3996_v60 = vcombine.low %v87_v48, %v95_v49  ;;  %v4011_v61 = vcombine.high %v102_v54, %v110_v55  ;;  %v4013_v62 = vcombine.high %v103_v57, %v111_v58  ;;  %v222_v48 = vld [vmem:[%s6290_s1 + $0x660] sm:$0xff]  ;;  %v215_v49 = vld [vmem:[%s6290_s1 + $0x628] sm:$0xff] }
  0xfa   :  { %3436 = vmatpush1.bf16.msra.mxu0 %v4390_v2  ;;  %3522 = vmatpush1.bf16.msra.mxu1 %v4392_v3  ;;  %v127_v2 = vld [vmem:[%s6290_s1 + $0x368] sm:$0xff]  ;;  %v4010_v3 = vcombine.low %v102_v54, %v110_v55  ;;  %v230_v55 = vld [vmem:[%s6290_s1 + $0x6a0] sm:$0xff] }
  0xfb   :  { %3437 = vmatprep.subr.bf16.mxu0 %v4407_v4  ;;  %3523 = vmatprep.subr.bf16.mxu1 %v4409_v5  ;;  %v4012_v4 = vcombine.low %v103_v57, %v111_v58  ;;  %v4027_v5 = vcombine.high %v118_v63, %v126_v0  ;;  %v4029_v6 = vcombine.high %v119_v1, %v127_v2  ;;  %v238_v57 = vld [vmem:[%s6290_s1 + $0x6e0] sm:$0xff]  ;;  %v231_v58 = vld [vmem:[%s6290_s1 + $0x6a8] sm:$0xff] }
  0xfe   :  { %3438 = vmatpush1.bf16.msra.mxu0 %v4406_v11  ;;  %3524 = vmatpush1.bf16.msra.mxu1 %v4408_v12  ;;  %v143_v11 = vld [vmem:[%s6290_s1 + $0x3e8] sm:$0xff]  ;;  %v4026_v12 = vcombine.low %v118_v63, %v126_v0  ;;  %v246_v0 = vld [vmem:[%s6290_s1 + $0x720] sm:$0xff] }
  0xff   :  { %3439 = vmatprep.subr.bf16.mxu0 %v4423_v13  ;;  %3525 = vmatprep.subr.bf16.mxu1 %v4425_v14  ;;  %v4028_v13 = vcombine.low %v119_v1, %v127_v2  ;;  %v4043_v14 = vcombine.high %v134_v7, %v142_v8  ;;  %v4045_v15 = vcombine.high %v135_v9, %v143_v11  ;;  %v254_v1 = vld [vmem:[%s6290_s1 + $0x760] sm:$0xff]  ;;  %v247_v2 = vld [vmem:[%s6290_s1 + $0x728] sm:$0xff] }
 0x102   :  { %3440 = vmatpush1.bf16.msra.mxu0 %v4422_v21  ;;  %3526 = vmatpush1.bf16.msra.mxu1 %v4424_v22  ;;  %v159_v21 = vld [vmem:[%s6290_s1 + $0x468] sm:$0xff]  ;;  %v4042_v22 = vcombine.low %v134_v7, %v142_v8  ;;  %v262_v8 = vld [vmem:[%s6290_s1 + $0x7a0] sm:$0xff] }
 0x103   :  { %3538 = vmatprep.subr.bf16.mxu0 %v3931_v23  ;;  %3624 = vmatprep.subr.bf16.mxu1 %v3933_v24  ;;  %v4044_v23 = vcombine.low %v135_v9, %v143_v11  ;;  %v4059_v24 = vcombine.high %v150_v16, %v158_v18  ;;  %v4061_v25 = vcombine.high %v151_v20, %v159_v21  ;;  %v270_v9 = vld [vmem:[%s6290_s1 + $0x7e0] sm:$0xff]  ;;  %v263_v11 = vld [vmem:[%s6290_s1 + $0x7a8] sm:$0xff] }
 0x105   :  { %3442 = vmatmul.mubr.bf16.vlgmr.msra.gmra.mrb[4].mxu0 %v4954_v17  ;;  %3528 = vmatmul.mubr.bf16.vlgmr.msra.gmra.mrb[4].mxu1 %v4954_v17  ;;  %v5377_v17 = vld [vmem:[%s6291_s0 + $0x4] ss:$16 sps:$4 sm:$0xff]  }
 0x106   :  { %3539 = vmatpush1.bf16.msra.mxu0 %v3930_v29  ;;  %3625 = vmatpush1.bf16.msra.mxu1 %v3932_v30  ;;  %v175_v29 = vld [vmem:[%s6290_s1 + $0x4e8] sm:$0xff]  ;;  %v4058_v30 = vcombine.low %v150_v16, %v158_v18  ;;  %v278_v18 = vld [vmem:[%s6290_s1 + $0x820] sm:$0xff] }
 0x107   :  { %3540 = vmatprep.subr.bf16.mxu0 %v3947_v31  ;;  %3626 = vmatprep.subr.bf16.mxu1 %v3949_v32  ;;  %v4060_v31 = vcombine.low %v151_v20, %v159_v21  ;;  %v4075_v32 = vcombine.high %v166_v26, %v174_v27  ;;  %v4077_v33 = vcombine.high %v167_v28, %v175_v29  ;;  %v286_v20 = vld [vmem:[%s6290_s1 + $0x860] sm:$0xff]  ;;  %v279_v21 = vld [vmem:[%s6290_s1 + $0x828] sm:$0xff] }
 0x108   :  { %3570 = vmatprep.mubr.bf16.mxu0 %v5377_v17  ;;  %3656 = vmatprep.mubr.bf16.mxu1 %v5377_v17 }
 0x10a   :  { %3541 = vmatpush1.bf16.msra.mxu0 %v3946_v37  ;;  %3627 = vmatpush1.bf16.msra.mxu1 %v3948_v38  ;;  %v191_v37 = vld [vmem:[%s6290_s1 + $0x568] sm:$0xff]  ;;  %v4074_v38 = vcombine.low %v166_v26, %v174_v27  ;;  %v294_v27 = vld [vmem:[%s6290_s1 + $0x8a0] sm:$0xff] }
 0x10b   :  { %3542 = vmatprep.subr.bf16.mxu0 %v3963_v39  ;;  %3628 = vmatprep.subr.bf16.mxu1 %v3965_v40  ;;  %v4076_v39 = vcombine.low %v167_v28, %v175_v29  ;;  %v4091_v40 = vcombine.high %v182_v34, %v190_v35  ;;  %v4093_v10 = vcombine.high %v183_v36, %v191_v37  ;;  %v302_v28 = vld [vmem:[%s6290_s1 + $0x8e0] sm:$0xff]  ;;  %v295_v29 = vld [vmem:[%s6290_s1 + $0x8a8] sm:$0xff] }
 0x10e   :  { %3543 = vmatpush1.bf16.msra.mxu0 %v3962_v43  ;;  %3629 = vmatpush1.bf16.msra.mxu1 %v3964_v44  ;;  %v207_v43 = vld [vmem:[%s6290_s1 + $0x5e8] sm:$0xff]  ;;  %v4090_v44 = vcombine.low %v182_v34, %v190_v35  ;;  %v310_v35 = vld [vmem:[%s6290_s1 + $0x920] sm:$0xff] }
 0x10f   :  { %3544 = vmatprep.subr.bf16.mxu0 %v3979_v45  ;;  %3630 = vmatprep.subr.bf16.mxu1 %v3981_v46  ;;  %v4092_v45 = vcombine.low %v183_v36, %v191_v37  ;;  %v4107_v46 = vcombine.high %v198_v41, %v206_v42  ;;  %v4109_v19 = vcombine.high %v199_v56, %v207_v43  ;;  %v318_v36 = vld [vmem:[%s6290_s1 + $0x960] sm:$0xff] }
 0x110   :  { %v5564_v37 = vld [vmem:[%s6291_s0] ss:$16 sps:$4 sm:$0xff]  }
 0x112   :  { %3545 = vmatpush1.bf16.msra.mxu0 %v3978_v50  ;;  %3631 = vmatpush1.bf16.msra.mxu1 %v3980_v51  ;;  %v223_v50 = vld [vmem:[%s6290_s1 + $0x668] sm:$0xff]  ;;  %v4106_v51 = vcombine.low %v198_v41, %v206_v42  ;;  %v4219_v41 = vcombine.high %v310_v35, %v318_v36 }
 0x113   :  { %3546 = vmatprep.subr.bf16.mxu0 %v3995_v52  ;;  %3632 = vmatprep.subr.bf16.mxu1 %v3997_v53  ;;  %v4108_v52 = vcombine.low %v199_v56, %v207_v43  ;;  %v4123_v53 = vcombine.high %v214_v47, %v222_v48  ;;  %v4125_v54 = vcombine.high %v215_v49, %v223_v50  ;;  %v326_v56 = vld [vmem:[%s6290_s1 + $0x9a0] sm:$0xff] }
 0x114   :  { %v334_v43 = vld [vmem:[%s6290_s1 + $0x9e0] sm:$0xff] }
 0x116   :  { %3547 = vmatpush1.bf16.msra.mxu0 %v3994_v59  ;;  %3633 = vmatpush1.bf16.msra.mxu1 %v3996_v60  ;;  %v239_v59 = vld [vmem:[%s6290_s1 + $0x6e8] sm:$0xff]  ;;  %v4122_v60 = vcombine.low %v214_v47, %v222_v48  ;;  %v4218_v47 = vcombine.low %v310_v35, %v318_v36 }
 0x117   :  { %3548 = vmatprep.subr.bf16.mxu0 %v4011_v61  ;;  %3634 = vmatprep.subr.bf16.mxu1 %v4013_v62  ;;  %v4124_v61 = vcombine.low %v215_v49, %v223_v50  ;;  %v4139_v62 = vcombine.high %v230_v55, %v238_v57  ;;  %v4141_v63 = vcombine.high %v231_v58, %v239_v59 }
 0x118   :  { %v4235_v49 = vcombine.high %v326_v56, %v334_v43 }
 0x11a   :  { %3549 = vmatpush1.bf16.msra.mxu0 %v4010_v3  ;;  %3635 = vmatpush1.bf16.msra.mxu1 %v4012_v4  ;;  %v255_v3 = vld [vmem:[%s6290_s1 + $0x768] sm:$0xff]  ;;  %v4138_v4 = vcombine.low %v230_v55, %v238_v57  ;;  %v4234_v57 = vcombine.low %v326_v56, %v334_v43 }
 0x11b   :  { %3550 = vmatprep.subr.bf16.mxu0 %v4027_v5  ;;  %3636 = vmatprep.subr.bf16.mxu1 %v4029_v6  ;;  %v4140_v5 = vcombine.low %v231_v58, %v239_v59  ;;  %v4155_v6 = vcombine.high %v246_v0, %v254_v1  ;;  %v4157_v7 = vcombine.high %v247_v2, %v255_v3 }
 0x11e   :  { %3551 = vmatpush1.bf16.msra.mxu0 %v4026_v12  ;;  %3637 = vmatpush1.bf16.msra.mxu1 %v4028_v13  ;;  %v271_v12 = vld [vmem:[%s6290_s1 + $0x7e8] sm:$0xff]  ;;  %v4154_v13 = vcombine.low %v246_v0, %v254_v1 }
 0x11f   :  { %3552 = vmatprep.subr.bf16.mxu0 %v4043_v14  ;;  %3638 = vmatprep.subr.bf16.mxu1 %v4045_v15  ;;  %v4156_v14 = vcombine.low %v247_v2, %v255_v3  ;;  %v4171_v15 = vcombine.high %v262_v8, %v270_v9  ;;  %v4173_v16 = vcombine.high %v263_v11, %v271_v12  ;;  %v359_v0 = vld [vmem:[%s6290_s1 + $0xaa8] sm:$0xff]  ;;  %v5623_v3 = vld [vmem:[%s6292_s2] sm:$0xff] }
 0x120   :  { %v367_v1 = vld [vmem:[%s6290_s1 + $0xae8] sm:$0xff] }
 0x122   :  { %3553 = vmatpush1.bf16.msra.mxu0 %v4042_v22  ;;  %3639 = vmatpush1.bf16.msra.mxu1 %v4044_v23  ;;  %v287_v22 = vld [vmem:[%s6290_s1 + $0x868] sm:$0xff]  ;;  %v4170_v23 = vcombine.low %v262_v8, %v270_v9  ;;  %v4269_v9 = vcombine.high %v359_v0, %v367_v1 }
 0x123   :  { %3554 = vmatprep.subr.bf16.mxu0 %v4059_v24  ;;  %3640 = vmatprep.subr.bf16.mxu1 %v4061_v25  ;;  %v4172_v24 = vcombine.low %v263_v11, %v271_v12  ;;  %v4187_v25 = vcombine.high %v278_v18, %v286_v20  ;;  %v4189_v26 = vcombine.high %v279_v21, %v287_v22  ;;  %v374_v11 = vld [vmem:[%s6290_s1 + $0xb20] sm:$0xff] }
 0x124   :  { %v382_v12 = vld [vmem:[%s6290_s1 + $0xb60] sm:$0xff] }
 0x126   :  { %3555 = vmatpush1.bf16.msra.mxu0 %v4058_v30  ;;  %3641 = vmatpush1.bf16.msra.mxu1 %v4060_v31  ;;  %v303_v30 = vld [vmem:[%s6290_s1 + $0x8e8] sm:$0xff]  ;;  %v4186_v31 = vcombine.low %v278_v18, %v286_v20 }
 0x127   :  { %3556 = vmatprep.subr.bf16.mxu0 %v4075_v32  ;;  %3642 = vmatprep.subr.bf16.mxu1 %v4077_v33  ;;  %v4188_v32 = vcombine.low %v279_v21, %v287_v22  ;;  %v4203_v33 = vcombine.high %v294_v27, %v302_v28  ;;  %v4205_v34 = vcombine.high %v295_v29, %v303_v30 }
 0x128   :  { %v4268_v22 = vcombine.low %v359_v0, %v367_v1 }
 0x12a   :  { %3557 = vmatpush1.bf16.msra.mxu0 %v4074_v38  ;;  %3643 = vmatpush1.bf16.msra.mxu1 %v4076_v39  ;;  %v311_v38 = vld [vmem:[%s6290_s1 + $0x928] sm:$0xff] }
 0x12b   :  { %3558 = vmatprep.subr.bf16.mxu0 %v4091_v40  ;;  %3644 = vmatprep.subr.bf16.mxu1 %v4093_v10  ;;  %v319_v39 = vld [vmem:[%s6290_s1 + $0x968] sm:$0xff]  ;;  %v4202_v40 = vcombine.low %v294_v27, %v302_v28  ;;  %v4204_v10 = vcombine.low %v295_v29, %v303_v30  ;;  %v398_v27 = vld [vmem:[%s6290_s1 + $0xbe0] sm:$0xff] }
 0x12c   :  { %v4221_v42 = vcombine.high %v311_v38, %v319_v39  ;;  %v4220_v48 = vcombine.low %v311_v38, %v319_v39  ;;  %v4282_v38 = vcombine.low %v374_v11, %v382_v12 }
 0x12e   :  { %3559 = vmatpush1.bf16.msra.mxu0 %v4090_v44  ;;  %3645 = vmatpush1.bf16.msra.mxu1 %v4092_v45  ;;  %v5583_v44 = vld [vmem:[%s6291_s0 + $0xc] ss:$16 sps:$4 sm:$0xff]  }
 0x12f   :  { %3560 = vmatprep.subr.bf16.mxu0 %v4107_v46  ;;  %3646 = vmatprep.subr.bf16.mxu1 %v4109_v19  ;;  %v327_v45 = vld [vmem:[%s6290_s1 + $0x9a8] sm:$0xff]  ;;  %v534_v19 = vlaneseq }
 0x130   :  { %v335_v46 = vld [vmem:[%s6290_s1 + $0x9e8] sm:$0xff] }
 0x131   :  { %v4237_v50 = vcombine.high %v327_v45, %v335_v46  ;;  %v5605_v55 = vshrl.u32 %v534_v19, 7  ;;  %v4236_v58 = vcombine.low %v327_v45, %v335_v46 }
 0x132   :  { %3561 = vmatpush1.bf16.msra.mxu0 %v4106_v51  ;;  %3647 = vmatpush1.bf16.msra.mxu1 %v4108_v52  ;;  %v342_v51 = vld [vmem:[%s6290_s1 + $0xa20] sm:$0xff] }
 0x133   :  { %3562 = vmatprep.subr.bf16.mxu0 %v4123_v53  ;;  %3648 = vmatprep.subr.bf16.mxu1 %v4125_v54  ;;  %v350_v52 = vld [vmem:[%s6290_s1 + $0xa60] sm:$0xff]  ;;  %v343_v53 = vld [vmem:[%s6290_s1 + $0xa28] sm:$0xff] }
 0x134   :  { %v351_v54 = vld [vmem:[%s6290_s1 + $0xa68] sm:$0xff]  ;;  %v4251_v59 = vcombine.high %v342_v51, %v350_v52  ;;  %v4250_v2 = vcombine.low %v342_v51, %v350_v52 }
 0x135   :  { %v415_v51 = vld [vmem:[%s6290_s1 + $0xc68] sm:$0xff] }
 0x136   :  { %3563 = vmatpush1.bf16.msra.mxu0 %v4122_v60  ;;  %3649 = vmatpush1.bf16.msra.mxu1 %v4124_v61  ;;  %v4253_v60 = vcombine.high %v343_v53, %v351_v54  ;;  %v358_v61 = vld [vmem:[%s6290_s1 + $0xaa0] sm:$0xff] }
 0x137   :  { %3564 = vmatprep.subr.bf16.mxu0 %v4139_v62  ;;  %3650 = vmatprep.subr.bf16.mxu1 %v4141_v63  ;;  %v366_v62 = vld [vmem:[%s6290_s1 + $0xae0] sm:$0xff]  ;;  %v536_v63 = vsub.s32 0, %v5605_v55 }
 0x138   :  { %v4267_v8 = vcombine.high %v358_v61, %v366_v62  ;;  %v4266_v20 = vcombine.low %v358_v61, %v366_v62  ;;  %v431_v61 = vld [vmem:[%s6290_s1 + $0xce8] sm:$0xff] }
 0x13a   :  { %3565 = vmatpush1.bf16.msra.mxu0 %v4138_v4  ;;  %3651 = vmatpush1.bf16.msra.mxu1 %v4140_v5  ;;  %v544_v4 = vsub.s32 2, %v5605_v55  ;;  %v540_v5 = vsub.s32 1, %v5605_v55 }
 0x13b   :  { %3566 = vmatprep.subr.bf16.mxu0 %v4155_v6  ;;  %3652 = vmatprep.subr.bf16.mxu1 %v4157_v7  ;;  %v4252_v6 = vcombine.low %v343_v53, %v351_v54  ;;  %v548_v7 = vsub.s32 3, %v5605_v55 }
 0x13c   :  { %v541_v18 = vrot.slane %v5623_v3, %v540_v5 }
 0x13d   :  { %v549_v21 = vrot.slane %v5623_v3, %v548_v7 }
 0x13e   :  { %3567 = vmatpush1.bf16.msra.mxu0 %v4154_v13  ;;  %3653 = vmatpush1.bf16.msra.mxu1 %v4156_v14  ;;  %v537_v13 = vrot.slane %v5623_v3, %v536_v63  ;;  %v375_v14 = vld [vmem:[%s6290_s1 + $0xb28] sm:$0xff] }
 0x13f   :  { %3568 = vmatprep.subr.bf16.mxu0 %v4171_v15  ;;  %3654 = vmatprep.subr.bf16.mxu1 %v4173_v16  ;;  %v383_v15 = vld [vmem:[%s6290_s1 + $0xb68] sm:$0xff]  ;;  %v545_v16 = vrot.slane %v5623_v3, %v544_v4 }
 0x140   :  { %v4284_v39 = vcombine.low %v375_v14, %v383_v15 }
 0x142   :  { %3569 = vmatpush1.bf16.msra.mxu0 %v4170_v23  ;;  %3655 = vmatpush1.bf16.msra.mxu1 %v4172_v24  ;;  %v4283_v23 = vcombine.high %v374_v11, %v382_v12  ;;  %v447_v11 = vld [vmem:[%s6290_s1 + $0xd68] sm:$0xff] }
 0x143   :  { %3581 = vmatprep.subr.bf16.mxu0 %v4187_v25  ;;  %3667 = vmatprep.subr.bf16.mxu1 %v4189_v26  ;;  %v4285_v25 = vcombine.high %v375_v14, %v383_v15  ;;  %v390_v26 = vld [vmem:[%s6290_s1 + $0xba0] sm:$0xff] }
 0x144   :  { %v4299_v56 = vcombine.high %v390_v26, %v398_v27  ;;  %v4298_v52 = vcombine.low %v390_v26, %v398_v27  ;;  %v470_v26 = vld [vmem:[%s6290_s1 + $0xe20] sm:$0xff] }
 0x145   :  { %3571 = vmatmul.mubr.bf16.vlgmr.msra.gmra.mrb[8].mxu0 %v5564_v37  ;;  %3657 = vmatmul.mubr.bf16.vlgmr.msra.gmra.mrb[8].mxu1 %v5564_v37  ;;  %v478_v27 = vld [vmem:[%s6290_s1 + $0xe60] sm:$0xff] }
 0x146   :  { %3582 = vmatpush1.bf16.msra.mxu0 %v4186_v31  ;;  %3668 = vmatpush1.bf16.msra.mxu1 %v4188_v32  ;;  %v391_v31 = vld [vmem:[%s6290_s1 + $0xba8] sm:$0xff] }
 0x147   :  { %3583 = vmatprep.subr.bf16.mxu0 %v4203_v33  ;;  %3669 = vmatprep.subr.bf16.mxu1 %v4205_v34  ;;  %v399_v32 = vld [vmem:[%s6290_s1 + $0xbe8] sm:$0xff] }
 0x148   :  { %3613 = vmatprep.mubr.bf16.mxu0 %v5583_v44  ;;  %3699 = vmatprep.mubr.bf16.mxu1 %v5583_v44  ;;  %v4301_v19 = vcombine.high %v391_v31, %v399_v32  ;;  %v4300_v53 = vcombine.low %v391_v31, %v399_v32  ;;  %v4379_v32 = vcombine.high %v470_v26, %v478_v27 }
 0x14a   :  { %3584 = vmatpush1.bf16.msra.mxu0 %v4202_v40  ;;  %3670 = vmatpush1.bf16.msra.mxu1 %v4204_v10 }
 0x14b   :  { %3585 = vmatprep.subr.bf16.mxu0 %v4219_v41  ;;  %3671 = vmatprep.subr.bf16.mxu1 %v4221_v42 }
 0x14e   :  { %3586 = vmatpush1.bf16.msra.mxu0 %v4218_v47  ;;  %3672 = vmatpush1.bf16.msra.mxu1 %v4220_v48  ;;  %v406_v47 = vld [vmem:[%s6290_s1 + $0xc20] sm:$0xff] }
 0x14f   :  { %3587 = vmatprep.subr.bf16.mxu0 %v4235_v49  ;;  %3673 = vmatprep.subr.bf16.mxu1 %v4237_v50  ;;  %v414_v48 = vld [vmem:[%s6290_s1 + $0xc60] sm:$0xff]  ;;  %v407_v50 = vld [vmem:[%s6290_s1 + $0xc28] sm:$0xff] }
 0x150   :  { %v4315_v54 = vcombine.high %v406_v47, %v414_v48  ;;  %v4314_v62 = vcombine.low %v406_v47, %v414_v48  ;;  %v4316_v0 = vcombine.low %v407_v50, %v415_v51 }
 0x152   :  { %3588 = vmatpush1.bf16.msra.mxu0 %v4234_v57  ;;  %3674 = vmatpush1.bf16.msra.mxu1 %v4236_v58  ;;  %v4317_v57 = vcombine.high %v407_v50, %v415_v51  ;;  %v422_v58 = vld [vmem:[%s6290_s1 + $0xca0] sm:$0xff]  ;;  %v519_v51 = vld [vmem:[%s6290_s1 + $0xfa8] sm:$0xff] }
 0x153   :  { %3589 = vmatprep.subr.bf16.mxu0 %v4251_v59  ;;  %3675 = vmatprep.subr.bf16.mxu1 %v4253_v60  ;;  %v430_v59 = vld [vmem:[%s6290_s1 + $0xce0] sm:$0xff]  ;;  %v423_v60 = vld [vmem:[%s6290_s1 + $0xca8] sm:$0xff] }
 0x154   :  { %v4331_v1 = vcombine.high %v422_v58, %v430_v59  ;;  %v4330_v12 = vcombine.low %v422_v58, %v430_v59  ;;  %v526_v50 = vld [vmem:[%s6290_s1 + $0xfe0] sm:$0xff]  ;;  %v24_v59 = vld [vmem:[%s6290_s1 + $0x30] sm:$0xff] }
 0x156   :  { %3590 = vmatpush1.bf16.msra.mxu0 %v4250_v2  ;;  %3676 = vmatpush1.bf16.msra.mxu1 %v4252_v6  ;;  %v4333_v2 = vcombine.high %v423_v60, %v431_v61  ;;  %v438_v6 = vld [vmem:[%s6290_s1 + $0xd20] sm:$0xff] }
 0x157   :  { %3591 = vmatprep.subr.bf16.mxu0 %v4267_v8  ;;  %3677 = vmatprep.subr.bf16.mxu1 %v4269_v9  ;;  %v446_v8 = vld [vmem:[%s6290_s1 + $0xd60] sm:$0xff]  ;;  %v439_v9 = vld [vmem:[%s6290_s1 + $0xd28] sm:$0xff] }
 0x158   :  { %v3271_v24 = vpop.f32.mrb[0].mxu0  ;;  %v3357_v29 = vpop.f32.mrb[0].mxu1  ;;  %v4347_v14 = vcombine.high %v438_v6, %v446_v8  ;;  %v4349_v15 = vcombine.high %v439_v9, %v447_v11 }
 0x159   :  { %v4434_v28 = vadd.f32 %v3271_v24, %v537_v13  ;;  %v3273_v30 = vpop.f32.mrb[1].mxu0  ;;  %v4438_v33 = vadd.f32 %v3357_v29, %v545_v16  ;;  %v3359_v35 = vpop.f32.mrb[1].mxu1  ;;  %v479_v29 = vld [vmem:[%s6290_s1 + $0xe68] sm:$0xff] }
 0x15a   :  { %v4435_v34 = vadd.f32 %v3273_v30, %v541_v18  ;;  %v3275_v36 = vpop.f32.mrb[2].mxu0  ;;  %3592 = vmatpush1.bf16.msra.mxu0 %v4266_v20  ;;  %v4439_v40 = vadd.f32 %v3359_v35, %v549_v21  ;;  %v3361_v41 = vpop.f32.mrb[2].mxu1  ;;  %3678 = vmatpush1.bf16.msra.mxu1 %v4268_v22  ;;  %v455_v20 = vld [vmem:[%s6290_s1 + $0xda8] sm:$0xff]  ;;  %v4346_v22 = vcombine.low %v438_v6, %v446_v8  ;;  %v494_v35 = vld [vmem:[%s6290_s1 + $0xee0] sm:$0xff]  ;;  %v40_v8 = vld [vmem:[%s6290_s1 + $0xb0] sm:$0xff] }
 0x15b   :  { %3882 = vst [vmem:[%s6293_s3] sm:$0xff] %v4434_v28  ;;  %v4436_v10 = vadd.f32 %v3275_v36, %v537_v13  ;;  %v3277_v42 = vpop.f32.mrb[3].mxu0  ;;  %3593 = vmatprep.subr.bf16.mxu0 %v4283_v23  ;;  %3884 = vst [vmem:[%s6293_s3 + $0x10] sm:$0xff] %v4438_v33  ;;  %v4440_v43 = vadd.f32 %v3361_v41, %v545_v16  ;;  %v3363_v46 = vpop.f32.mrb[3].mxu1  ;;  %3679 = vmatprep.subr.bf16.mxu1 %v4285_v25  ;;  %v454_v16 = vld [vmem:[%s6290_s1 + $0xda0] sm:$0xff]  ;;  %v471_v28 = vld [vmem:[%s6290_s1 + $0xe28] sm:$0xff] }
 0x15c   :  { %3883 = vst [vmem:[%s6293_s3 + $0x8] sm:$0xff] %v4435_v34  ;;  %v4437_v45 = vadd.f32 %v3277_v42, %v541_v18  ;;  %3885 = vst [vmem:[%s6293_s3 + $0x18] sm:$0xff] %v4439_v40  ;;  %v4441_v49 = vadd.f32 %v3363_v46, %v549_v21  ;;  %v4332_v13 = vcombine.low %v423_v60, %v431_v61  ;;  %v462_v18 = vld [vmem:[%s6290_s1 + $0xde0] sm:$0xff]  ;;  %v463_v21 = vld [vmem:[%s6290_s1 + $0xde8] sm:$0xff] }
 0x15d   :  { %3898 = vst [vmem:[%s6293_s3 + $0x80] sm:$0xff] %v4436_v10  ;;  %3900 = vst [vmem:[%s6293_s3 + $0x90] sm:$0xff] %v4440_v43  ;;  %v4348_v23 = vcombine.low %v439_v9, %v447_v11  ;;  %v4363_v24 = vcombine.high %v454_v16, %v462_v18  ;;  %v4365_v25 = vcombine.high %v455_v20, %v463_v21  ;;  %v486_v34 = vld [vmem:[%s6290_s1 + $0xea0] sm:$0xff]  ;;  %v487_v36 = vld [vmem:[%s6290_s1 + $0xea8] sm:$0xff] }
 0x15e   :  { %3899 = vst [vmem:[%s6293_s3 + $0x88] sm:$0xff] %v4437_v45  ;;  %3594 = vmatpush1.bf16.msra.mxu0 %v4282_v38  ;;  %3901 = vst [vmem:[%s6293_s3 + $0x98] sm:$0xff] %v4441_v49  ;;  %3680 = vmatpush1.bf16.msra.mxu1 %v4284_v39  ;;  %v4362_v30 = vcombine.low %v454_v16, %v462_v18  ;;  %v4364_v31 = vcombine.low %v455_v20, %v463_v21  ;;  %v495_v38 = vld [vmem:[%s6290_s1 + $0xee8] sm:$0xff]  ;;  %v502_v42 = vld [vmem:[%s6290_s1 + $0xf20] sm:$0xff] }
 0x15f   :  { %3595 = vmatprep.subr.bf16.mxu0 %v4299_v56  ;;  %3681 = vmatprep.subr.bf16.mxu1 %v4301_v19  ;;  %v4381_v33 = vcombine.high %v471_v28, %v479_v29  ;;  %v4378_v39 = vcombine.low %v470_v26, %v478_v27  ;;  %v4380_v40 = vcombine.low %v471_v28, %v479_v29  ;;  %v510_v56 = vld [vmem:[%s6290_s1 + $0xf60] sm:$0xff]  ;;  %v503_v43 = vld [vmem:[%s6290_s1 + $0xf28] sm:$0xff]  ;;  %v32_v60 = vld [vmem:[%s6290_s1 + $0x70] sm:$0xff] }
 0x160   :  { %v4395_v10 = vcombine.high %v486_v34, %v494_v35  ;;  %v4397_v41 = vcombine.high %v487_v36, %v495_v38  ;;  %v511_v45 = vld [vmem:[%s6290_s1 + $0xf68] sm:$0xff]  ;;  %v4394_v46 = vcombine.low %v486_v34, %v494_v35  ;;  %v4396_v19 = vcombine.low %v487_v36, %v495_v38  ;;  %v518_v49 = vld [vmem:[%s6290_s1 + $0xfa0] sm:$0xff]  ;;  %v25_v61 = vld [vmem:[%s6290_s1 + $0x38] sm:$0xff] }
 0x161   :  { %v4411_v47 = vcombine.high %v502_v42, %v510_v56  ;;  %v4413_v48 = vcombine.high %v503_v43, %v511_v45  ;;  %v48_v9 = vld [vmem:[%s6290_s1 + $0xf0] sm:$0xff]  ;;  %v41_v11 = vld [vmem:[%s6290_s1 + $0xb8] sm:$0xff] }
 0x162   :  { %3596 = vmatpush1.bf16.msra.mxu0 %v4298_v52  ;;  %3682 = vmatpush1.bf16.msra.mxu1 %v4300_v53  ;;  %v527_v52 = vld [vmem:[%s6290_s1 + $0xfe8] sm:$0xff]  ;;  %v4410_v53 = vcombine.low %v502_v42, %v510_v56  ;;  %v56_v18 = vld [vmem:[%s6290_s1 + $0x130] sm:$0xff] }
 0x163   :  { %3597 = vmatprep.subr.bf16.mxu0 %v4315_v54  ;;  %3683 = vmatprep.subr.bf16.mxu1 %v4317_v57  ;;  %v4412_v54 = vcombine.low %v503_v43, %v511_v45  ;;  %v4427_v57 = vcombine.high %v518_v49, %v526_v50  ;;  %v4429_v58 = vcombine.high %v519_v51, %v527_v52  ;;  %v64_v20 = vld [vmem:[%s6290_s1 + $0x170] sm:$0xff]  ;;  %v5817_v21 = vld [vmem:[%s6291_s0 + $0x8] ss:$16 sps:$4 sm:$0xff]  }
 0x164   :  { %v3967_v26 = vcombine.high %v56_v18, %v64_v20  ;;  %v72_v28 = vld [vmem:[%s6290_s1 + $0x1b0] sm:$0xff]  ;;  %v105_v45 = vld [vmem:[%s6290_s1 + $0x2b8] sm:$0xff] }
 0x165   :  { %v80_v29 = vld [vmem:[%s6290_s1 + $0x1f0] sm:$0xff] }
 0x166   :  { %3598 = vmatpush1.bf16.msra.mxu0 %v4314_v62  ;;  %3684 = vmatpush1.bf16.msra.mxu1 %v4316_v0  ;;  %v33_v62 = vld [vmem:[%s6290_s1 + $0x78] sm:$0xff]  ;;  %v4426_v0 = vcombine.low %v518_v49, %v526_v50  ;;  %v3983_v34 = vcombine.high %v72_v28, %v80_v29  ;;  %v88_v36 = vld [vmem:[%s6290_s1 + $0x230] sm:$0xff] }
 0x167   :  { %3599 = vmatprep.subr.bf16.mxu0 %v4331_v1  ;;  %3685 = vmatprep.subr.bf16.mxu1 %v4333_v2  ;;  %v4428_v1 = vcombine.low %v519_v51, %v527_v52  ;;  %v3935_v2 = vcombine.high %v24_v59, %v32_v60  ;;  %v3937_v6 = vcombine.high %v25_v61, %v33_v62  ;;  %v96_v38 = vld [vmem:[%s6290_s1 + $0x270] sm:$0xff]  ;;  %v121_v52 = vld [vmem:[%s6290_s1 + $0x338] sm:$0xff] }
 0x168   :  { %v104_v56 = vld [vmem:[%s6290_s1 + $0x2b0] sm:$0xff] }
 0x169   :  { %v112_v43 = vld [vmem:[%s6290_s1 + $0x2f0] sm:$0xff] }
 0x16a   :  { %3600 = vmatpush1.bf16.msra.mxu0 %v4330_v12  ;;  %3686 = vmatpush1.bf16.msra.mxu1 %v4332_v13  ;;  %v49_v12 = vld [vmem:[%s6290_s1 + $0xf8] sm:$0xff]  ;;  %v3934_v13 = vcombine.low %v24_v59, %v32_v60  ;;  %v120_v50 = vld [vmem:[%s6290_s1 + $0x330] sm:$0xff] }
 0x16b   :  { %3601 = vmatprep.subr.bf16.mxu0 %v4347_v14  ;;  %3687 = vmatprep.subr.bf16.mxu1 %v4349_v15  ;;  %v3936_v14 = vcombine.low %v25_v61, %v33_v62  ;;  %v3951_v15 = vcombine.high %v40_v8, %v48_v9  ;;  %v3953_v16 = vcombine.high %v41_v11, %v49_v12  ;;  %v128_v51 = vld [vmem:[%s6290_s1 + $0x370] sm:$0xff]  ;;  %v137_v62 = vld [vmem:[%s6290_s1 + $0x3b8] sm:$0xff] }
 0x16c   :  { %v136_v60 = vld [vmem:[%s6290_s1 + $0x3b0] sm:$0xff] }
 0x16d   :  { %v144_v61 = vld [vmem:[%s6290_s1 + $0x3f0] sm:$0xff] }
 0x16e   :  { %3602 = vmatpush1.bf16.msra.mxu0 %v4346_v22  ;;  %3688 = vmatpush1.bf16.msra.mxu1 %v4348_v23  ;;  %v57_v22 = vld [vmem:[%s6290_s1 + $0x138] sm:$0xff] }
 0x16f   :  { %3603 = vmatprep.subr.bf16.mxu0 %v4363_v24  ;;  %3689 = vmatprep.subr.bf16.mxu1 %v4365_v25  ;;  %v65_v23 = vld [vmem:[%s6290_s1 + $0x178] sm:$0xff]  ;;  %v3950_v24 = vcombine.low %v40_v8, %v48_v9  ;;  %v3952_v25 = vcombine.low %v41_v11, %v49_v12  ;;  %v152_v9 = vld [vmem:[%s6290_s1 + $0x430] sm:$0xff] }
 0x170   :  { %v3969_v27 = vcombine.high %v57_v22, %v65_v23  ;;  %v160_v11 = vld [vmem:[%s6290_s1 + $0x470] sm:$0xff]  ;;  %v153_v12 = vld [vmem:[%s6290_s1 + $0x438] sm:$0xff] }
 0x172   :  { %3604 = vmatpush1.bf16.msra.mxu0 %v4362_v30  ;;  %3690 = vmatpush1.bf16.msra.mxu1 %v4364_v31  ;;  %v73_v30 = vld [vmem:[%s6290_s1 + $0x1b8] sm:$0xff] }
 0x173   :  { %3605 = vmatprep.subr.bf16.mxu0 %v4379_v32  ;;  %3691 = vmatprep.subr.bf16.mxu1 %v4381_v33  ;;  %v81_v31 = vld [vmem:[%s6290_s1 + $0x1f8] sm:$0xff]  ;;  %v3966_v32 = vcombine.low %v56_v18, %v64_v20  ;;  %v3968_v33 = vcombine.low %v57_v22, %v65_v23  ;;  %v168_v20 = vld [vmem:[%s6290_s1 + $0x4b0] sm:$0xff] }
 0x174   :  { %v3985_v35 = vcombine.high %v73_v30, %v81_v31  ;;  %v176_v22 = vld [vmem:[%s6290_s1 + $0x4f0] sm:$0xff]  ;;  %v169_v23 = vld [vmem:[%s6290_s1 + $0x4b8] sm:$0xff] }
 0x176   :  { %3606 = vmatpush1.bf16.msra.mxu0 %v4378_v39  ;;  %3692 = vmatpush1.bf16.msra.mxu1 %v4380_v40  ;;  %v97_v39 = vld [vmem:[%s6290_s1 + $0x278] sm:$0xff]  ;;  %v3982_v40 = vcombine.low %v72_v28, %v80_v29  ;;  %v184_v29 = vld [vmem:[%s6290_s1 + $0x530] sm:$0xff] }
 0x177   :  { %3607 = vmatprep.subr.bf16.mxu0 %v4395_v10  ;;  %3693 = vmatprep.subr.bf16.mxu1 %v4397_v41  ;;  %v3984_v10 = vcombine.low %v73_v30, %v81_v31  ;;  %v3999_v41 = vcombine.high %v88_v36, %v96_v38  ;;  %v192_v30 = vld [vmem:[%s6290_s1 + $0x570] sm:$0xff]  ;;  %v185_v31 = vld [vmem:[%s6290_s1 + $0x538] sm:$0xff] }
 0x17a   :  { %3608 = vmatpush1.bf16.msra.mxu0 %v4394_v46  ;;  %3694 = vmatpush1.bf16.msra.mxu1 %v4396_v19  ;;  %v113_v46 = vld [vmem:[%s6290_s1 + $0x2f8] sm:$0xff]  ;;  %v3998_v19 = vcombine.low %v88_v36, %v96_v38  ;;  %v200_v38 = vld [vmem:[%s6290_s1 + $0x5b0] sm:$0xff] }
 0x17b   :  { %3609 = vmatprep.subr.bf16.mxu0 %v4411_v47  ;;  %3695 = vmatprep.subr.bf16.mxu1 %v4413_v48  ;;  %v4015_v48 = vcombine.high %v104_v56, %v112_v43  ;;  %v4017_v49 = vcombine.high %v105_v45, %v113_v46 }
 0x17e   :  { %3610 = vmatpush1.bf16.msra.mxu0 %v4410_v53  ;;  %3696 = vmatpush1.bf16.msra.mxu1 %v4412_v54  ;;  %v129_v53 = vld [vmem:[%s6290_s1 + $0x378] sm:$0xff]  ;;  %v4014_v54 = vcombine.low %v104_v56, %v112_v43  ;;  %v216_v43 = vld [vmem:[%s6290_s1 + $0x630] sm:$0xff] }
 0x17f   :  { %3611 = vmatprep.subr.bf16.mxu0 %v4427_v57  ;;  %3697 = vmatprep.subr.bf16.mxu1 %v4429_v58  ;;  %v4016_v57 = vcombine.low %v105_v45, %v113_v46  ;;  %v4031_v58 = vcombine.high %v120_v50, %v128_v51  ;;  %v4033_v59 = vcombine.high %v121_v52, %v129_v53  ;;  %v224_v45 = vld [vmem:[%s6290_s1 + $0x670] sm:$0xff]  ;;  %v217_v46 = vld [vmem:[%s6290_s1 + $0x638] sm:$0xff] }
 0x182   :  { %3612 = vmatpush1.bf16.msra.mxu0 %v4426_v0  ;;  %3698 = vmatpush1.bf16.msra.mxu1 %v4428_v1  ;;  %v145_v0 = vld [vmem:[%s6290_s1 + $0x3f8] sm:$0xff]  ;;  %v4030_v1 = vcombine.low %v120_v50, %v128_v51  ;;  %v232_v51 = vld [vmem:[%s6290_s1 + $0x6b0] sm:$0xff] }
 0x183   :  { %3710 = vmatprep.subr.bf16.mxu0 %v3935_v2  ;;  %3796 = vmatprep.subr.bf16.mxu1 %v3937_v6  ;;  %v4032_v2 = vcombine.low %v121_v52, %v129_v53  ;;  %v4047_v6 = vcombine.high %v136_v60, %v144_v61  ;;  %v4049_v8 = vcombine.high %v137_v62, %v145_v0  ;;  %v240_v52 = vld [vmem:[%s6290_s1 + $0x6f0] sm:$0xff]  ;;  %v233_v53 = vld [vmem:[%s6290_s1 + $0x6b8] sm:$0xff] }
 0x185   :  { %3614 = vmatmul.mubr.bf16.vlgmr.msra.gmra.mrb[8].mxu0 %v5817_v21  ;;  %3700 = vmatmul.mubr.bf16.vlgmr.msra.gmra.mrb[8].mxu1 %v5817_v21 }
 0x186   :  { %3711 = vmatpush1.bf16.msra.mxu0 %v3934_v13  ;;  %3797 = vmatpush1.bf16.msra.mxu1 %v3936_v14  ;;  %v161_v13 = vld [vmem:[%s6290_s1 + $0x478] sm:$0xff]  ;;  %v4046_v14 = vcombine.low %v136_v60, %v144_v61  ;;  %v248_v61 = vld [vmem:[%s6290_s1 + $0x730] sm:$0xff] }
 0x187   :  { %3712 = vmatprep.subr.bf16.mxu0 %v3951_v15  ;;  %3798 = vmatprep.subr.bf16.mxu1 %v3953_v16  ;;  %v4048_v15 = vcombine.low %v137_v62, %v145_v0  ;;  %v4063_v16 = vcombine.high %v152_v9, %v160_v11  ;;  %v4065_v18 = vcombine.high %v153_v12, %v161_v13  ;;  %v256_v62 = vld [vmem:[%s6290_s1 + $0x770] sm:$0xff]  ;;  %v249_v0 = vld [vmem:[%s6290_s1 + $0x738] sm:$0xff] }
 0x188   :  { %3742 = vmatprep.mubr.bf16.mxu0 %v5377_v17  ;;  %3828 = vmatprep.mubr.bf16.mxu1 %v5377_v17  ;;  %v89_v17 = vld [vmem:[%s6290_s1 + $0x238] sm:$0xff] }
 0x189   :  { %v4001_v42 = vcombine.high %v89_v17, %v97_v39  ;;  %v4000_v47 = vcombine.low %v89_v17, %v97_v39  ;;  %v208_v17 = vld [vmem:[%s6290_s1 + $0x5f0] sm:$0xff]  ;;  %v201_v39 = vld [vmem:[%s6290_s1 + $0x5b8] sm:$0xff] }
 0x18a   :  { %3713 = vmatpush1.bf16.msra.mxu0 %v3950_v24  ;;  %3799 = vmatpush1.bf16.msra.mxu1 %v3952_v25  ;;  %v177_v24 = vld [vmem:[%s6290_s1 + $0x4f8] sm:$0xff]  ;;  %v4062_v25 = vcombine.low %v152_v9, %v160_v11  ;;  %v264_v11 = vld [vmem:[%s6290_s1 + $0x7b0] sm:$0xff] }
 0x18b   :  { %3714 = vmatprep.subr.bf16.mxu0 %v3967_v26  ;;  %3800 = vmatprep.subr.bf16.mxu1 %v3969_v27  ;;  %v4064_v26 = vcombine.low %v153_v12, %v161_v13  ;;  %v4079_v27 = vcombine.high %v168_v20, %v176_v22  ;;  %v4081_v28 = vcombine.high %v169_v23, %v177_v24  ;;  %v272_v12 = vld [vmem:[%s6290_s1 + $0x7f0] sm:$0xff]  ;;  %v265_v13 = vld [vmem:[%s6290_s1 + $0x7b8] sm:$0xff] }
 0x18e   :  { %3715 = vmatpush1.bf16.msra.mxu0 %v3966_v32  ;;  %3801 = vmatpush1.bf16.msra.mxu1 %v3968_v33  ;;  %v193_v32 = vld [vmem:[%s6290_s1 + $0x578] sm:$0xff]  ;;  %v4078_v33 = vcombine.low %v168_v20, %v176_v22  ;;  %v280_v22 = vld [vmem:[%s6290_s1 + $0x830] sm:$0xff] }
 0x18f   :  { %3716 = vmatprep.subr.bf16.mxu0 %v3983_v34  ;;  %3802 = vmatprep.subr.bf16.mxu1 %v3985_v35  ;;  %v4080_v34 = vcombine.low %v169_v23, %v177_v24  ;;  %v4095_v35 = vcombine.high %v184_v29, %v192_v30  ;;  %v4097_v36 = vcombine.high %v185_v31, %v193_v32  ;;  %v288_v23 = vld [vmem:[%s6290_s1 + $0x870] sm:$0xff]  ;;  %v281_v24 = vld [vmem:[%s6290_s1 + $0x838] sm:$0xff] }
 0x192   :  { %3717 = vmatpush1.bf16.msra.mxu0 %v3982_v40  ;;  %3803 = vmatpush1.bf16.msra.mxu1 %v3984_v10  ;;  %v209_v40 = vld [vmem:[%s6290_s1 + $0x5f8] sm:$0xff]  ;;  %v4094_v10 = vcombine.low %v184_v29, %v192_v30  ;;  %v296_v30 = vld [vmem:[%s6290_s1 + $0x8b0] sm:$0xff] }
 0x193   :  { %3718 = vmatprep.subr.bf16.mxu0 %v3999_v41  ;;  %3804 = vmatprep.subr.bf16.mxu1 %v4001_v42  ;;  %v4096_v41 = vcombine.low %v185_v31, %v193_v32  ;;  %v4111_v42 = vcombine.high %v200_v38, %v208_v17  ;;  %v4113_v56 = vcombine.high %v201_v39, %v209_v40  ;;  %v304_v31 = vld [vmem:[%s6290_s1 + $0x8f0] sm:$0xff]  ;;  %v297_v32 = vld [vmem:[%s6290_s1 + $0x8b8] sm:$0xff] }
 0x196   :  { %3719 = vmatpush1.bf16.msra.mxu0 %v3998_v19  ;;  %3805 = vmatpush1.bf16.msra.mxu1 %v4000_v47  ;;  %v225_v19 = vld [vmem:[%s6290_s1 + $0x678] sm:$0xff]  ;;  %v4110_v47 = vcombine.low %v200_v38, %v208_v17  ;;  %v312_v17 = vld [vmem:[%s6290_s1 + $0x930] sm:$0xff] }
 0x197   :  { %3720 = vmatprep.subr.bf16.mxu0 %v4015_v48  ;;  %3806 = vmatprep.subr.bf16.mxu1 %v4017_v49  ;;  %v4112_v48 = vcombine.low %v201_v39, %v209_v40  ;;  %v4127_v49 = vcombine.high %v216_v43, %v224_v45  ;;  %v4129_v50 = vcombine.high %v217_v46, %v225_v19  ;;  %v320_v39 = vld [vmem:[%s6290_s1 + $0x970] sm:$0xff]  ;;  %v313_v40 = vld [vmem:[%s6290_s1 + $0x938] sm:$0xff] }
 0x19a   :  { %3721 = vmatpush1.bf16.msra.mxu0 %v4014_v54  ;;  %3807 = vmatpush1.bf16.msra.mxu1 %v4016_v57  ;;  %v241_v54 = vld [vmem:[%s6290_s1 + $0x6f8] sm:$0xff]  ;;  %v4126_v57 = vcombine.low %v216_v43, %v224_v45  ;;  %v328_v45 = vld [vmem:[%s6290_s1 + $0x9b0] sm:$0xff] }
 0x19b   :  { %3722 = vmatprep.subr.bf16.mxu0 %v4031_v58  ;;  %3808 = vmatprep.subr.bf16.mxu1 %v4033_v59  ;;  %v4128_v58 = vcombine.low %v217_v46, %v225_v19  ;;  %v4143_v59 = vcombine.high %v232_v51, %v240_v52  ;;  %v4145_v60 = vcombine.high %v233_v53, %v241_v54  ;;  %v336_v46 = vld [vmem:[%s6290_s1 + $0x9f0] sm:$0xff]  ;;  %v337_v19 = vld [vmem:[%s6290_s1 + $0x9f8] sm:$0xff] }
 0x19e   :  { %3723 = vmatpush1.bf16.msra.mxu0 %v4030_v1  ;;  %3809 = vmatpush1.bf16.msra.mxu1 %v4032_v2  ;;  %v257_v1 = vld [vmem:[%s6290_s1 + $0x778] sm:$0xff]  ;;  %v4142_v2 = vcombine.low %v232_v51, %v240_v52  ;;  %v344_v51 = vld [vmem:[%s6290_s1 + $0xa30] sm:$0xff] }
 0x19f   :  { %3724 = vmatprep.subr.bf16.mxu0 %v4047_v6  ;;  %3810 = vmatprep.subr.bf16.mxu1 %v4049_v8  ;;  %v4144_v6 = vcombine.low %v233_v53, %v241_v54  ;;  %v4159_v8 = vcombine.high %v248_v61, %v256_v62  ;;  %v4161_v9 = vcombine.high %v249_v0, %v257_v1  ;;  %v352_v52 = vld [vmem:[%s6290_s1 + $0xa70] sm:$0xff]  ;;  %v353_v53 = vld [vmem:[%s6290_s1 + $0xa78] sm:$0xff] }
 0x1a0   :  { %v4238_v54 = vcombine.low %v328_v45, %v336_v46 }
 0x1a2   :  { %3725 = vmatpush1.bf16.msra.mxu0 %v4046_v14  ;;  %3811 = vmatpush1.bf16.msra.mxu1 %v4048_v15  ;;  %v273_v14 = vld [vmem:[%s6290_s1 + $0x7f8] sm:$0xff]  ;;  %v4158_v15 = vcombine.low %v248_v61, %v256_v62  ;;  %v368_v61 = vld [vmem:[%s6290_s1 + $0xaf0] sm:$0xff]  ;;  %v552_v62 = vsub.s32 4, %v5605_v55 }
 0x1a3   :  { %3726 = vmatprep.subr.bf16.mxu0 %v4063_v16  ;;  %3812 = vmatprep.subr.bf16.mxu1 %v4065_v18  ;;  %v4160_v16 = vcombine.low %v249_v0, %v257_v1  ;;  %v4175_v18 = vcombine.high %v264_v11, %v272_v12  ;;  %v4177_v20 = vcombine.high %v265_v13, %v273_v14  ;;  %v361_v0 = vld [vmem:[%s6290_s1 + $0xab8] sm:$0xff] }
 0x1a4   :  { %v369_v1 = vld [vmem:[%s6290_s1 + $0xaf8] sm:$0xff] }
 0x1a6   :  { %3727 = vmatpush1.bf16.msra.mxu0 %v4062_v25  ;;  %3813 = vmatpush1.bf16.msra.mxu1 %v4064_v26  ;;  %v289_v25 = vld [vmem:[%s6290_s1 + $0x878] sm:$0xff]  ;;  %v4174_v26 = vcombine.low %v264_v11, %v272_v12  ;;  %v564_v11 = vsub.s32 7, %v5605_v55 }
 0x1a7   :  { %3728 = vmatprep.subr.bf16.mxu0 %v4079_v27  ;;  %3814 = vmatprep.subr.bf16.mxu1 %v4081_v28  ;;  %v4176_v27 = vcombine.low %v265_v13, %v273_v14  ;;  %v4191_v28 = vcombine.high %v280_v22, %v288_v23  ;;  %v4193_v29 = vcombine.high %v281_v24, %v289_v25  ;;  %v376_v14 = vld [vmem:[%s6290_s1 + $0xb30] sm:$0xff] }
 0x1a8   :  { %v4273_v13 = vcombine.high %v361_v0, %v369_v1 }
 0x1aa   :  { %3729 = vmatpush1.bf16.msra.mxu0 %v4078_v33  ;;  %3815 = vmatpush1.bf16.msra.mxu1 %v4080_v34  ;;  %v305_v33 = vld [vmem:[%s6290_s1 + $0x8f8] sm:$0xff]  ;;  %v4190_v34 = vcombine.low %v280_v22, %v288_v23 }
 0x1ab   :  { %3730 = vmatprep.subr.bf16.mxu0 %v4095_v35  ;;  %3816 = vmatprep.subr.bf16.mxu1 %v4097_v36  ;;  %v4192_v35 = vcombine.low %v281_v24, %v289_v25  ;;  %v4207_v36 = vcombine.high %v296_v30, %v304_v31  ;;  %v4209_v38 = vcombine.high %v297_v32, %v305_v33 }
 0x1ac   :  { %v565_v25 = vrot.slane %v5623_v3, %v564_v11 }
 0x1ae   :  { %3731 = vmatpush1.bf16.msra.mxu0 %v4094_v10  ;;  %3817 = vmatpush1.bf16.msra.mxu1 %v4096_v41  ;;  %v321_v10 = vld [vmem:[%s6290_s1 + $0x978] sm:$0xff]  ;;  %v4206_v41 = vcombine.low %v296_v30, %v304_v31  ;;  %v392_v30 = vld [vmem:[%s6290_s1 + $0xbb0] sm:$0xff] }
 0x1af   :  { %3732 = vmatprep.subr.bf16.mxu0 %v4111_v42  ;;  %3818 = vmatprep.subr.bf16.mxu1 %v4113_v56  ;;  %v4208_v42 = vcombine.low %v297_v32, %v305_v33  ;;  %v4223_v56 = vcombine.high %v312_v17, %v320_v39  ;;  %v4225_v43 = vcombine.high %v313_v40, %v321_v10  ;;  %v400_v31 = vld [vmem:[%s6290_s1 + $0xbf0] sm:$0xff] }
 0x1b2   :  { %3733 = vmatpush1.bf16.msra.mxu0 %v4110_v47  ;;  %3819 = vmatpush1.bf16.msra.mxu1 %v4112_v48  ;;  %v4222_v47 = vcombine.low %v312_v17, %v320_v39  ;;  %v4224_v48 = vcombine.low %v313_v40, %v321_v10 }
 0x1b3   :  { %3734 = vmatprep.subr.bf16.mxu0 %v4127_v49  ;;  %3820 = vmatprep.subr.bf16.mxu1 %v4129_v50  ;;  %v4239_v49 = vcombine.high %v328_v45, %v336_v46  ;;  %v4303_v45 = vcombine.high %v392_v30, %v400_v31 }
 0x1b6   :  { %3735 = vmatpush1.bf16.msra.mxu0 %v4126_v57  ;;  %3821 = vmatpush1.bf16.msra.mxu1 %v4128_v58  ;;  %v4255_v58 = vcombine.high %v344_v51, %v352_v52 }
 0x1b7   :  { %3736 = vmatprep.subr.bf16.mxu0 %v4143_v59  ;;  %3822 = vmatprep.subr.bf16.mxu1 %v4145_v60  ;;  %v360_v60 = vld [vmem:[%s6290_s1 + $0xab0] sm:$0xff] }
 0x1b8   :  { %v4271_v12 = vcombine.high %v360_v60, %v368_v61  ;;  %v4270_v24 = vcombine.low %v360_v60, %v368_v61  ;;  %v425_v60 = vld [vmem:[%s6290_s1 + $0xcb8] sm:$0xff] }
 0x1b9   :  { %v433_v61 = vld [vmem:[%s6290_s1 + $0xcf8] sm:$0xff] }
 0x1ba   :  { %3737 = vmatpush1.bf16.msra.mxu0 %v4142_v2  ;;  %3823 = vmatpush1.bf16.msra.mxu1 %v4144_v6  ;;  %v4254_v2 = vcombine.low %v344_v51, %v352_v52  ;;  %v560_v6 = vsub.s32 6, %v5605_v55  ;;  %v409_v51 = vld [vmem:[%s6290_s1 + $0xc38] sm:$0xff] }
 0x1bb   :  { %3738 = vmatprep.subr.bf16.mxu0 %v4159_v8  ;;  %3824 = vmatprep.subr.bf16.mxu1 %v4161_v9  ;;  %v556_v8 = vsub.s32 5, %v5605_v55  ;;  %v417_v52 = vld [vmem:[%s6290_s1 + $0xc78] sm:$0xff] }
 0x1bc   :  { %v561_v22 = vrot.slane %v5623_v3, %v560_v6 }
 0x1bd   :  { %v557_v23 = vrot.slane %v5623_v3, %v556_v8 }
 0x1be   :  { %3739 = vmatpush1.bf16.msra.mxu0 %v4158_v15  ;;  %3825 = vmatpush1.bf16.msra.mxu1 %v4160_v16  ;;  %v384_v15 = vld [vmem:[%s6290_s1 + $0xb70] sm:$0xff]  ;;  %v553_v16 = vrot.slane %v5623_v3, %v552_v62  ;;  %v393_v3 = vld [vmem:[%s6290_s1 + $0xbb8] sm:$0xff] }
 0x1bf   :  { %3740 = vmatprep.subr.bf16.mxu0 %v4175_v18  ;;  %3826 = vmatprep.subr.bf16.mxu1 %v4177_v20  ;;  %v377_v18 = vld [vmem:[%s6290_s1 + $0xb38] sm:$0xff]  ;;  %v4286_v40 = vcombine.low %v376_v14, %v384_v15 }
 0x1c0   :  { %v385_v20 = vld [vmem:[%s6290_s1 + $0xb78] sm:$0xff] }
 0x1c1   :  { %v4288_v10 = vcombine.low %v377_v18, %v385_v20 }
 0x1c2   :  { %3741 = vmatpush1.bf16.msra.mxu0 %v4174_v26  ;;  %3827 = vmatpush1.bf16.msra.mxu1 %v4176_v27  ;;  %v4272_v26 = vcombine.low %v361_v0, %v369_v1  ;;  %v4287_v27 = vcombine.high %v376_v14, %v384_v15  ;;  %v4320_v1 = vcombine.low %v409_v51, %v417_v52  ;;  %v441_v14 = vld [vmem:[%s6290_s1 + $0xd38] sm:$0xff] }
 0x1c3   :  { %3753 = vmatprep.subr.bf16.mxu0 %v4191_v28  ;;  %3839 = vmatprep.subr.bf16.mxu1 %v4193_v29  ;;  %v4289_v29 = vcombine.high %v377_v18, %v385_v20  ;;  %v449_v15 = vld [vmem:[%s6290_s1 + $0xd78] sm:$0xff]  ;;  %v4336_v18 = vcombine.low %v425_v60, %v433_v61 }
 0x1c5   :  { %3743 = vmatmul.mubr.bf16.vlgmr.msra.gmra.mrb[12].mxu0 %v5564_v37  ;;  %3829 = vmatmul.mubr.bf16.vlgmr.msra.gmra.mrb[12].mxu1 %v5564_v37  ;;  %v329_v37 = vld [vmem:[%s6290_s1 + $0x9b8] sm:$0xff] }
 0x1c6   :  { %3754 = vmatpush1.bf16.msra.mxu0 %v4190_v34  ;;  %3840 = vmatpush1.bf16.msra.mxu1 %v4192_v35  ;;  %v4241_v50 = vcombine.high %v329_v37, %v337_v19  ;;  %v4240_v57 = vcombine.low %v329_v37, %v337_v19  ;;  %v401_v35 = vld [vmem:[%s6290_s1 + $0xbf8] sm:$0xff] }
 0x1c7   :  { %3755 = vmatprep.subr.bf16.mxu0 %v4207_v36  ;;  %3841 = vmatprep.subr.bf16.mxu1 %v4209_v38 }
 0x1c8   :  { %3785 = vmatprep.mubr.bf16.mxu0 %v5583_v44  ;;  %3871 = vmatprep.mubr.bf16.mxu1 %v5583_v44  ;;  %v345_v44 = vld [vmem:[%s6290_s1 + $0xa38] sm:$0xff] }
 0x1c9   :  { %v4257_v59 = vcombine.high %v345_v44, %v353_v53  ;;  %v4256_v9 = vcombine.low %v345_v44, %v353_v53  ;;  %v4302_v44 = vcombine.low %v392_v30, %v400_v31  ;;  %v4304_v53 = vcombine.low %v393_v3, %v401_v35  ;;  %v472_v31 = vld [vmem:[%s6290_s1 + $0xe30] sm:$0xff] }
 0x1ca   :  { %3756 = vmatpush1.bf16.msra.mxu0 %v4206_v41  ;;  %3842 = vmatpush1.bf16.msra.mxu1 %v4208_v42 }
 0x1cb   :  { %3757 = vmatprep.subr.bf16.mxu0 %v4223_v56  ;;  %3843 = vmatprep.subr.bf16.mxu1 %v4225_v43 }
 0x1ce   :  { %3758 = vmatpush1.bf16.msra.mxu0 %v4222_v47  ;;  %3844 = vmatpush1.bf16.msra.mxu1 %v4224_v48  ;;  %v4305_v47 = vcombine.high %v393_v3, %v401_v35  ;;  %v408_v48 = vld [vmem:[%s6290_s1 + $0xc30] sm:$0xff] }
 0x1cf   :  { %3759 = vmatprep.subr.bf16.mxu0 %v4239_v49  ;;  %3845 = vmatprep.subr.bf16.mxu1 %v4241_v50  ;;  %v416_v49 = vld [vmem:[%s6290_s1 + $0xc70] sm:$0xff] }
 0x1d0   :  { %v4318_v0 = vcombine.low %v408_v48, %v416_v49 }
 0x1d2   :  { %3760 = vmatpush1.bf16.msra.mxu0 %v4238_v54  ;;  %3846 = vmatpush1.bf16.msra.mxu1 %v4240_v57  ;;  %v4319_v54 = vcombine.high %v408_v48, %v416_v49  ;;  %v4321_v57 = vcombine.high %v409_v51, %v417_v52  ;;  %v520_v51 = vld [vmem:[%s6290_s1 + $0xfb0] sm:$0xff] }
 0x1d3   :  { %3761 = vmatprep.subr.bf16.mxu0 %v4255_v58  ;;  %3847 = vmatprep.subr.bf16.mxu1 %v4257_v59  ;;  %v424_v58 = vld [vmem:[%s6290_s1 + $0xcb0] sm:$0xff] }
 0x1d4   :  { %v432_v59 = vld [vmem:[%s6290_s1 + $0xcf0] sm:$0xff] }
 0x1d5   :  { %v528_v52 = vld [vmem:[%s6290_s1 + $0xff0] sm:$0xff] }
 0x1d6   :  { %3762 = vmatpush1.bf16.msra.mxu0 %v4254_v2  ;;  %3848 = vmatpush1.bf16.msra.mxu1 %v4256_v9  ;;  %v4335_v2 = vcombine.high %v424_v58, %v432_v59  ;;  %v4337_v9 = vcombine.high %v425_v60, %v433_v61  ;;  %v4430_v60 = vcombine.low %v520_v51, %v528_v52 }
 0x1d7   :  { %3763 = vmatprep.subr.bf16.mxu0 %v4271_v12  ;;  %3849 = vmatprep.subr.bf16.mxu1 %v4273_v13  ;;  %v440_v12 = vld [vmem:[%s6290_s1 + $0xd30] sm:$0xff] }
 0x1d8   :  { %v3443_v28 = vpop.f32.mrb[4].mxu0  ;;  %v3529_v33 = vpop.f32.mrb[4].mxu1  ;;  %v448_v13 = vld [vmem:[%s6290_s1 + $0xd70] sm:$0xff] }
 0x1d9   :  { %v4442_v32 = vadd.f32 %v3443_v28, %v553_v16  ;;  %v3445_v34 = vpop.f32.mrb[5].mxu0  ;;  %v4446_v36 = vadd.f32 %v3529_v33, %v561_v22  ;;  %v3531_v17 = vpop.f32.mrb[5].mxu1  ;;  %v4351_v20 = vcombine.high %v440_v12, %v448_v13  ;;  %v4352_v28 = vcombine.low %v441_v14, %v449_v15  ;;  %v473_v33 = vld [vmem:[%s6290_s1 + $0xe38] sm:$0xff] }
 0x1da   :  { %v4443_v38 = vadd.f32 %v3445_v34, %v557_v23  ;;  %v3447_v39 = vpop.f32.mrb[6].mxu0  ;;  %3764 = vmatpush1.bf16.msra.mxu0 %v4270_v24  ;;  %v4447_v41 = vadd.f32 %v3531_v17, %v565_v25  ;;  %v3533_v56 = vpop.f32.mrb[6].mxu1  ;;  %3850 = vmatpush1.bf16.msra.mxu1 %v4272_v26  ;;  %v464_v24 = vld [vmem:[%s6290_s1 + $0xdf0] sm:$0xff]  ;;  %v465_v26 = vld [vmem:[%s6290_s1 + $0xdf8] sm:$0xff] }
 0x1db   :  { %3886 = vst [vmem:[%s6293_s3 + $0x20] sm:$0xff] %v4442_v32  ;;  %v4444_v42 = vadd.f32 %v3447_v39, %v553_v16  ;;  %v3449_v43 = vpop.f32.mrb[7].mxu0  ;;  %3765 = vmatprep.subr.bf16.mxu0 %v4287_v27  ;;  %3888 = vst [vmem:[%s6293_s3 + $0x30] sm:$0xff] %v4446_v36  ;;  %v4448_v46 = vadd.f32 %v3533_v56, %v561_v22  ;;  %v3535_v19 = vpop.f32.mrb[7].mxu1  ;;  %3851 = vmatprep.subr.bf16.mxu1 %v4289_v29  ;;  %v480_v32 = vld [vmem:[%s6290_s1 + $0xe70] sm:$0xff]  ;;  %v481_v34 = vld [vmem:[%s6290_s1 + $0xe78] sm:$0xff] }
 0x1dc   :  { %3887 = vst [vmem:[%s6293_s3 + $0x28] sm:$0xff] %v4443_v38  ;;  %v4445_v37 = vadd.f32 %v3449_v43, %v557_v23  ;;  %3889 = vst [vmem:[%s6293_s3 + $0x38] sm:$0xff] %v4447_v41  ;;  %v4449_v50 = vadd.f32 %v3535_v19, %v565_v25  ;;  %v4334_v16 = vcombine.low %v424_v58, %v432_v59  ;;  %v456_v23 = vld [vmem:[%s6290_s1 + $0xdb0] sm:$0xff]  ;;  %v457_v25 = vld [vmem:[%s6290_s1 + $0xdb8] sm:$0xff] }
 0x1dd   :  { %3902 = vst [vmem:[%s6293_s3 + $0xa0] sm:$0xff] %v4444_v42  ;;  %3904 = vst [vmem:[%s6293_s3 + $0xb0] sm:$0xff] %v4448_v46  ;;  %v4353_v22 = vcombine.high %v441_v14, %v449_v15  ;;  %v4350_v27 = vcombine.low %v440_v12, %v448_v13  ;;  %v4367_v29 = vcombine.high %v456_v23, %v464_v24  ;;  %v488_v17 = vld [vmem:[%s6290_s1 + $0xeb0] sm:$0xff]  ;;  %v513_v19 = vld [vmem:[%s6290_s1 + $0xf78] sm:$0xff] }
 0x1de   :  { %3903 = vst [vmem:[%s6293_s3 + $0xa8] sm:$0xff] %v4445_v37  ;;  %3766 = vmatpush1.bf16.msra.mxu0 %v4286_v40  ;;  %3905 = vst [vmem:[%s6293_s3 + $0xb8] sm:$0xff] %v4449_v50  ;;  %3852 = vmatpush1.bf16.msra.mxu1 %v4288_v10  ;;  %v4369_v30 = vcombine.high %v457_v25, %v465_v26  ;;  %v4366_v3 = vcombine.low %v456_v23, %v464_v24  ;;  %v496_v39 = vld [vmem:[%s6290_s1 + $0xef0] sm:$0xff]  ;;  %v489_v40 = vld [vmem:[%s6290_s1 + $0xeb8] sm:$0xff] }
 0x1df   :  { %3767 = vmatprep.subr.bf16.mxu0 %v4303_v45  ;;  %3853 = vmatprep.subr.bf16.mxu1 %v4305_v47  ;;  %v4368_v35 = vcombine.low %v457_v25, %v465_v26  ;;  %v4383_v36 = vcombine.high %v472_v31, %v480_v32  ;;  %v4385_v38 = vcombine.high %v473_v33, %v481_v34  ;;  %v497_v10 = vld [vmem:[%s6290_s1 + $0xef8] sm:$0xff]  ;;  %v504_v45 = vld [vmem:[%s6290_s1 + $0xf30] sm:$0xff] }
 0x1e0   :  { %v4382_v41 = vcombine.low %v472_v31, %v480_v32  ;;  %v4384_v42 = vcombine.low %v473_v33, %v481_v34  ;;  %v4399_v56 = vcombine.high %v488_v17, %v496_v39  ;;  %v4401_v43 = vcombine.high %v489_v40, %v497_v10  ;;  %v512_v46 = vld [vmem:[%s6290_s1 + $0xf70] sm:$0xff]  ;;  %v505_v37 = vld [vmem:[%s6290_s1 + $0xf38] sm:$0xff] }
 0x1e1   :  { %v4398_v47 = vcombine.low %v488_v17, %v496_v39  ;;  %v4400_v48 = vcombine.low %v489_v40, %v497_v10  ;;  %v4415_v49 = vcombine.high %v504_v45, %v512_v46  ;;  %v4417_v50 = vcombine.high %v505_v37, %v513_v19 }
 0x1e2   :  { %3768 = vmatpush1.bf16.msra.mxu0 %v4302_v44  ;;  %3854 = vmatpush1.bf16.msra.mxu1 %v4304_v53  ;;  %v521_v44 = vld [vmem:[%s6290_s1 + $0xfb8] sm:$0xff]  ;;  %v4431_v58 = vcombine.high %v520_v51, %v528_v52 }
 0x1e3   :  { %3769 = vmatprep.subr.bf16.mxu0 %v4319_v54  ;;  %3855 = vmatprep.subr.bf16.mxu1 %v4321_v57  ;;  %v529_v53 = vld [vmem:[%s6290_s1 + $0xff8] sm:$0xff]  ;;  %v4414_v54 = vcombine.low %v504_v45, %v512_v46  ;;  %v4416_v57 = vcombine.low %v505_v37, %v513_v19 }
 0x1e4   :  { %v4433_v59 = vcombine.high %v521_v44, %v529_v53  ;;  %v4432_v61 = vcombine.low %v521_v44, %v529_v53 }
 0x1e6   :  { %3770 = vmatpush1.bf16.msra.mxu0 %v4318_v0  ;;  %3856 = vmatpush1.bf16.msra.mxu1 %v4320_v1  ;;  %v531_v0 = vld [vmem:[%s6292_s2 + $0x8] sm:$0xff] }
 0x1e7   :  { %3771 = vmatprep.subr.bf16.mxu0 %v4335_v2  ;;  %3857 = vmatprep.subr.bf16.mxu1 %v4337_v9  ;;  %v569_v1 = vrot.slane %v531_v0, %v536_v63  ;;  %v577_v2 = vrot.slane %v531_v0, %v544_v4  ;;  %v573_v9 = vrot.slane %v531_v0, %v540_v5 }
 0x1e8   :  { %v581_v12 = vrot.slane %v531_v0, %v548_v7 }
 0x1ea   :  { %3772 = vmatpush1.bf16.msra.mxu0 %v4334_v16  ;;  %3858 = vmatpush1.bf16.msra.mxu1 %v4336_v18 }
 0x1eb   :  { %3773 = vmatprep.subr.bf16.mxu0 %v4351_v20  ;;  %3859 = vmatprep.subr.bf16.mxu1 %v4353_v22 }
 0x1ee   :  { %3774 = vmatpush1.bf16.msra.mxu0 %v4350_v27  ;;  %3860 = vmatpush1.bf16.msra.mxu1 %v4352_v28  ;;  %v585_v27 = vrot.slane %v531_v0, %v552_v62  ;;  %v593_v28 = vrot.slane %v531_v0, %v560_v6 }
 0x1ef   :  { %3775 = vmatprep.subr.bf16.mxu0 %v4367_v29  ;;  %3861 = vmatprep.subr.bf16.mxu1 %v4369_v30  ;;  %v589_v29 = vrot.slane %v531_v0, %v556_v8  ;;  %v597_v30 = vrot.slane %v531_v0, %v564_v11 }
 0x1f2   :  { %3776 = vmatpush1.bf16.msra.mxu0 %v4366_v3  ;;  %3862 = vmatpush1.bf16.msra.mxu1 %v4368_v35 }
 0x1f3   :  { %3777 = vmatprep.subr.bf16.mxu0 %v4383_v36  ;;  %3863 = vmatprep.subr.bf16.mxu1 %v4385_v38 }
 0x1f6   :  { %3778 = vmatpush1.bf16.msra.mxu0 %v4382_v41  ;;  %3864 = vmatpush1.bf16.msra.mxu1 %v4384_v42 }
 0x1f7   :  { %3779 = vmatprep.subr.bf16.mxu0 %v4399_v56  ;;  %3865 = vmatprep.subr.bf16.mxu1 %v4401_v43 }
 0x1fa   :  { %3780 = vmatpush1.bf16.msra.mxu0 %v4398_v47  ;;  %3866 = vmatpush1.bf16.msra.mxu1 %v4400_v48 }
 0x1fb   :  { %3781 = vmatprep.subr.bf16.mxu0 %v4415_v49  ;;  %3867 = vmatprep.subr.bf16.mxu1 %v4417_v50 }
 0x1fe   :  { %3782 = vmatpush1.bf16.msra.mxu0 %v4414_v54  ;;  %3868 = vmatpush1.bf16.msra.mxu1 %v4416_v57 }
 0x1ff   :  { %3783 = vmatprep.subr.bf16.mxu0 %v4431_v58  ;;  %3869 = vmatprep.subr.bf16.mxu1 %v4433_v59 }
 0x202   :  { %3784 = vmatpush1.bf16.msra.mxu0 %v4430_v60  ;;  %3870 = vmatpush1.bf16.msra.mxu1 %v4432_v61 }
 0x205   :  { %3786 = vmatmul.mubr.bf16.vlgmr.msra.gmra.mrb[12].mxu0 %v5817_v21  ;;  %3872 = vmatmul.mubr.bf16.vlgmr.msra.gmra.mrb[12].mxu1 %v5817_v21 }
 0x258   :  { %v3615_v13 = vpop.f32.mrb[8].mxu0  ;;  %v3701_v15 = vpop.f32.mrb[8].mxu1 }
 0x259   :  { %v4450_v14 = vadd.f32 %v3615_v13, %v569_v1  ;;  %v3617_v21 = vpop.f32.mrb[9].mxu0  ;;  %v4454_v16 = vadd.f32 %v3701_v15, %v577_v2  ;;  %v3703_v20 = vpop.f32.mrb[9].mxu1 }
 0x25a   :  { %v4451_v18 = vadd.f32 %v3617_v21, %v573_v9  ;;  %v3619_v22 = vpop.f32.mrb[10].mxu0  ;;  %v4455_v63 = vadd.f32 %v3703_v20, %v581_v12  ;;  %v3705_v23 = vpop.f32.mrb[10].mxu1 }
 0x25b   :  { %3890 = vst [vmem:[%s6293_s3 + $0x40] sm:$0xff] %v4450_v14  ;;  %v4452_v4 = vadd.f32 %v3619_v22, %v569_v1  ;;  %v3621_v24 = vpop.f32.mrb[11].mxu0  ;;  %3892 = vst [vmem:[%s6293_s3 + $0x50] sm:$0xff] %v4454_v16  ;;  %v4456_v5 = vadd.f32 %v3705_v23, %v577_v2  ;;  %v3707_v25 = vpop.f32.mrb[11].mxu1 }
 0x25c   :  { %3891 = vst [vmem:[%s6293_s3 + $0x48] sm:$0xff] %v4451_v18  ;;  %v4453_v7 = vadd.f32 %v3621_v24, %v573_v9  ;;  %3893 = vst [vmem:[%s6293_s3 + $0x58] sm:$0xff] %v4455_v63  ;;  %v4457_v26 = vadd.f32 %v3707_v25, %v581_v12 }
 0x25d   :  { %3906 = vst [vmem:[%s6293_s3 + $0xc0] sm:$0xff] %v4452_v4  ;;  %3908 = vst [vmem:[%s6293_s3 + $0xd0] sm:$0xff] %v4456_v5 }
 0x25e   :  { %3907 = vst [vmem:[%s6293_s3 + $0xc8] sm:$0xff] %v4453_v7  ;;  %3909 = vst [vmem:[%s6293_s3 + $0xd8] sm:$0xff] %v4457_v26 }
 0x2d8   :  { %v3787_v31 = vpop.f32.mrb[12].mxu0  ;;  %v3873_v33 = vpop.f32.mrb[12].mxu1 }
 0x2d9   :  { %v4458_v32 = vadd.f32 %v3787_v31, %v585_v27  ;;  %v3789_v34 = vpop.f32.mrb[13].mxu0  ;;  %v4462_v3 = vadd.f32 %v3873_v33, %v593_v28  ;;  %v3875_v36 = vpop.f32.mrb[13].mxu1 }
 0x2da   :  { %v4459_v35 = vadd.f32 %v3789_v34, %v589_v29  ;;  %v3791_v38 = vpop.f32.mrb[14].mxu0  ;;  %v4463_v62 = vadd.f32 %v3875_v36, %v597_v30  ;;  %v3877_v17 = vpop.f32.mrb[14].mxu1 }
 0x2db   :  { %3894 = vst [vmem:[%s6293_s3 + $0x60] sm:$0xff] %v4458_v32  ;;  %v4460_v6 = vadd.f32 %v3791_v38, %v585_v27  ;;  %v3793_v39 = vpop.f32.mrb[15].mxu0  ;;  %3896 = vst [vmem:[%s6293_s3 + $0x70] sm:$0xff] %v4462_v3  ;;  %v4464_v55 = vadd.f32 %v3877_v17, %v593_v28  ;;  %v3879_v11 = vpop.f32.mrb[15].mxu1 }
 0x2dc   :  { %3895 = vst [vmem:[%s6293_s3 + $0x68] sm:$0xff] %v4459_v35  ;;  %v4461_v8 = vadd.f32 %v3793_v39, %v589_v29  ;;  %3897 = vst [vmem:[%s6293_s3 + $0x78] sm:$0xff] %v4463_v62  ;;  %v4465_v40 = vadd.f32 %v3879_v11, %v597_v30 }
 0x2dd   :  { %3910 = vst [vmem:[%s6293_s3 + $0xe0] sm:$0xff] %v4460_v6  ;;  %3912 = vst [vmem:[%s6293_s3 + $0xf0] sm:$0xff] %v4464_v55 }
 0x2de   :  { %3911 = vst [vmem:[%s6293_s3 + $0xe8] sm:$0xff] %v4461_v8  ;;  %3913 = vst [vmem:[%s6293_s3 + $0xf8] sm:$0xff] %v4465_v40 }

// kernel: seq2seq_forward.14
= control target key start
LH: loop header
LB: loop body
LE: loop exit
PB: predicated region body
PF: predicated region fallthrough
CT: control target
= control target key end

     0   :  { %v683_v3 = vmov 0   ;;  %s936_s1 = inlined_call_operand.vmem [shape: bf16[128,1024], index: 1, kind: input, shape index: {}]   ;;  %s937_s0 = inlined_call_operand.vmem [shape: bf16[8,128], index: 0, kind: input, shape index: {}]   ;;  %s938_s2 = inlined_call_operand.vmem [shape: f32[1,1024], index: 2, kind: input, shape index: {}]   ;;  %s939_s3 = inlined_call_operand.vmem [shape: f32[8,1024], index: 3, kind: output, shape index: {}]  }
   0x1   :  { %v16_v0 = vld [vmem:[%s936_s1] sm:$0xff]  ;;  %v17_v2 = vld [vmem:[%s936_s1 + $0x8] sm:$0xff]  ;;  %474 = vmatprep.mubr.bf16.mxu0 %v683_v3  ;;  %515 = vmatprep.mubr.bf16.mxu1 %v683_v3  ;;  %v18_v63 = vld [vmem:[%s936_s1 + $0x10] sm:$0xff] }
   0x2   :  { %v20_v1 = vld [vmem:[%s936_s1 + $0x20] sm:$0xff]  ;;  %v21_v5 = vld [vmem:[%s936_s1 + $0x28] sm:$0xff] }
   0x3   :  { %v619_v4 = vcombine.high %v16_v0, %v20_v1  ;;  %v618_v6 = vcombine.low %v16_v0, %v20_v1  ;;  %v24_v7 = vld [vmem:[%s936_s1 + $0x40] sm:$0xff]  ;;  %v621_v9 = vcombine.high %v17_v2, %v21_v5  ;;  %v620_v10 = vcombine.low %v17_v2, %v21_v5  ;;  %v25_v12 = vld [vmem:[%s936_s1 + $0x48] sm:$0xff]  ;;  %v22_v0 = vld [vmem:[%s936_s1 + $0x30] sm:$0xff] }
   0x4   :  { %v28_v8 = vld [vmem:[%s936_s1 + $0x60] sm:$0xff]  ;;  %v29_v13 = vld [vmem:[%s936_s1 + $0x68] sm:$0xff]  ;;  %v19_v1 = vld [vmem:[%s936_s1 + $0x18] sm:$0xff] }
   0x5   :  { %v627_v11 = vcombine.high %v24_v7, %v28_v8  ;;  %v32_v14 = vld [vmem:[%s936_s1 + $0x80] sm:$0xff]  ;;  %442 = vmatprep.subr.bf16.mxu0 %v619_v4  ;;  %v629_v15 = vcombine.high %v25_v12, %v29_v13  ;;  %v33_v17 = vld [vmem:[%s936_s1 + $0x88] sm:$0xff]  ;;  %483 = vmatprep.subr.bf16.mxu1 %v621_v9  ;;  %v626_v19 = vcombine.low %v24_v7, %v28_v8  ;;  %v23_v2 = vld [vmem:[%s936_s1 + $0x38] sm:$0xff] }
   0x6   :  { %v36_v16 = vld [vmem:[%s936_s1 + $0xa0] sm:$0xff]  ;;  %v37_v18 = vld [vmem:[%s936_s1 + $0xa8] sm:$0xff]  ;;  %443 = vmatpush1.bf16.msra.mxu0 %v618_v6  ;;  %484 = vmatpush1.bf16.msra.mxu1 %v620_v10  ;;  %v628_v20 = vcombine.low %v25_v12, %v29_v13  ;;  %v623_v6 = vcombine.high %v18_v63, %v22_v0  ;;  %v625_v7 = vcombine.high %v19_v1, %v23_v2  ;;  %v26_v8 = vld [vmem:[%s936_s1 + $0x50] sm:$0xff] }
   0x7   :  { %444 = vmatprep.subr.bf16.mxu0 %v627_v11  ;;  %v635_v21 = vcombine.high %v32_v14, %v36_v16  ;;  %485 = vmatprep.subr.bf16.mxu1 %v629_v15  ;;  %v637_v22 = vcombine.high %v33_v17, %v37_v18  ;;  %v40_v23 = vld [vmem:[%s936_s1 + $0xc0] sm:$0xff]  ;;  %v41_v25 = vld [vmem:[%s936_s1 + $0xc8] sm:$0xff]  ;;  %v634_v27 = vcombine.low %v32_v14, %v36_v16  ;;  %v30_v9 = vld [vmem:[%s936_s1 + $0x70] sm:$0xff] }
   0x8   :  { %v44_v24 = vld [vmem:[%s936_s1 + $0xe0] sm:$0xff]  ;;  %v45_v26 = vld [vmem:[%s936_s1 + $0xe8] sm:$0xff]  ;;  %v636_v28 = vcombine.low %v33_v17, %v37_v18  ;;  %v27_v10 = vld [vmem:[%s936_s1 + $0x58] sm:$0xff]  ;;  %v622_v13 = vcombine.low %v18_v63, %v22_v0  ;;  %v624_v14 = vcombine.low %v19_v1, %v23_v2  ;;  %v631_v15 = vcombine.high %v26_v8, %v30_v9 }
   0x9   :  { %v643_v29 = vcombine.high %v40_v23, %v44_v24  ;;  %v645_v30 = vcombine.high %v41_v25, %v45_v26  ;;  %v48_v31 = vld [vmem:[%s936_s1 + $0x100] sm:$0xff]  ;;  %v49_v33 = vld [vmem:[%s936_s1 + $0x108] sm:$0xff]  ;;  %v642_v35 = vcombine.low %v40_v23, %v44_v24  ;;  %v644_v36 = vcombine.low %v41_v25, %v45_v26  ;;  %v31_v11 = vld [vmem:[%s936_s1 + $0x78] sm:$0xff] }
   0xa   :  { %445 = vmatpush1.bf16.msra.mxu0 %v626_v19  ;;  %486 = vmatpush1.bf16.msra.mxu1 %v628_v20  ;;  %v52_v32 = vld [vmem:[%s936_s1 + $0x120] sm:$0xff]  ;;  %v53_v34 = vld [vmem:[%s936_s1 + $0x128] sm:$0xff]  ;;  %v633_v16 = vcombine.high %v27_v10, %v31_v11  ;;  %v34_v17 = vld [vmem:[%s936_s1 + $0x90] sm:$0xff]  ;;  %v82_v2 = vlaneseq }
   0xb   :  { %446 = vmatprep.subr.bf16.mxu0 %v635_v21  ;;  %487 = vmatprep.subr.bf16.mxu1 %v637_v22  ;;  %v651_v37 = vcombine.high %v48_v31, %v52_v32  ;;  %v653_v38 = vcombine.high %v49_v33, %v53_v34  ;;  %v56_v39 = vld [vmem:[%s936_s1 + $0x140] sm:$0xff]  ;;  %v57_v41 = vld [vmem:[%s936_s1 + $0x148] sm:$0xff]  ;;  %v650_v43 = vcombine.low %v48_v31, %v52_v32  ;;  %v38_v18 = vld [vmem:[%s936_s1 + $0xb0] sm:$0xff] }
   0xc   :  { %v60_v40 = vld [vmem:[%s936_s1 + $0x160] sm:$0xff]  ;;  %v61_v42 = vld [vmem:[%s936_s1 + $0x168] sm:$0xff]  ;;  %v652_v44 = vcombine.low %v49_v33, %v53_v34  ;;  %v35_v19 = vld [vmem:[%s936_s1 + $0x98] sm:$0xff]  ;;  %v630_v21 = vcombine.low %v26_v8, %v30_v9  ;;  %v632_v22 = vcombine.low %v27_v10, %v31_v11  ;;  %v639_v23 = vcombine.high %v34_v17, %v38_v18 }
   0xd   :  { %v659_v45 = vcombine.high %v56_v39, %v60_v40  ;;  %v661_v46 = vcombine.high %v57_v41, %v61_v42  ;;  %v64_v47 = vld [vmem:[%s936_s1 + $0x180] sm:$0xff]  ;;  %v65_v49 = vld [vmem:[%s936_s1 + $0x188] sm:$0xff]  ;;  %v658_v51 = vcombine.low %v56_v39, %v60_v40  ;;  %v660_v52 = vcombine.low %v57_v41, %v61_v42  ;;  %v39_v20 = vld [vmem:[%s936_s1 + $0xb8] sm:$0xff] }
   0xe   :  { %447 = vmatpush1.bf16.msra.mxu0 %v634_v27  ;;  %488 = vmatpush1.bf16.msra.mxu1 %v636_v28  ;;  %v68_v48 = vld [vmem:[%s936_s1 + $0x1a0] sm:$0xff]  ;;  %v69_v50 = vld [vmem:[%s936_s1 + $0x1a8] sm:$0xff]  ;;  %v641_v24 = vcombine.high %v35_v19, %v39_v20  ;;  %v42_v25 = vld [vmem:[%s936_s1 + $0xd0] sm:$0xff] }
   0xf   :  { %448 = vmatprep.subr.bf16.mxu0 %v643_v29  ;;  %489 = vmatprep.subr.bf16.mxu1 %v645_v30  ;;  %v667_v53 = vcombine.high %v64_v47, %v68_v48  ;;  %v669_v54 = vcombine.high %v65_v49, %v69_v50  ;;  %v72_v55 = vld [vmem:[%s936_s1 + $0x1c0] sm:$0xff]  ;;  %v73_v57 = vld [vmem:[%s936_s1 + $0x1c8] sm:$0xff]  ;;  %v666_v59 = vcombine.low %v64_v47, %v68_v48  ;;  %v46_v26 = vld [vmem:[%s936_s1 + $0xf0] sm:$0xff] }
  0x10   :  { %v76_v56 = vld [vmem:[%s936_s1 + $0x1e0] sm:$0xff]  ;;  %v77_v58 = vld [vmem:[%s936_s1 + $0x1e8] sm:$0xff]  ;;  %v668_v60 = vcombine.low %v65_v49, %v69_v50  ;;  %v43_v27 = vld [vmem:[%s936_s1 + $0xd8] sm:$0xff]  ;;  %v638_v29 = vcombine.low %v34_v17, %v38_v18  ;;  %v640_v30 = vcombine.low %v35_v19, %v39_v20  ;;  %v647_v31 = vcombine.high %v42_v25, %v46_v26 }
  0x11   :  { %v675_v61 = vcombine.high %v72_v55, %v76_v56  ;;  %v677_v62 = vcombine.high %v73_v57, %v77_v58  ;;  %v674_v4 = vcombine.low %v72_v55, %v76_v56  ;;  %v676_v5 = vcombine.low %v73_v57, %v77_v58  ;;  %v829_v12 = vld [vmem:[%s937_s0] sm:$0xf]  ;;  %v47_v28 = vld [vmem:[%s936_s1 + $0xf8] sm:$0xff]  ;;  %v50_v33 = vld [vmem:[%s936_s1 + $0x110] sm:$0xff] }
  0x12   :  { %449 = vmatpush1.bf16.msra.mxu0 %v642_v35  ;;  %490 = vmatpush1.bf16.msra.mxu1 %v644_v36  ;;  %v649_v32 = vcombine.high %v43_v27, %v47_v28  ;;  %v54_v34 = vld [vmem:[%s936_s1 + $0x130] sm:$0xff]  ;;  %v55_v35 = vld [vmem:[%s936_s1 + $0x138] sm:$0xff]  ;;  %v646_v36 = vcombine.low %v42_v25, %v46_v26 }
  0x13   :  { %450 = vmatprep.subr.bf16.mxu0 %v651_v37  ;;  %491 = vmatprep.subr.bf16.mxu1 %v653_v38  ;;  %v648_v37 = vcombine.low %v43_v27, %v47_v28  ;;  %v655_v38 = vcombine.high %v50_v33, %v54_v34  ;;  %v58_v40 = vld [vmem:[%s936_s1 + $0x150] sm:$0xff]  ;;  %v59_v42 = vld [vmem:[%s936_s1 + $0x158] sm:$0xff] }
  0x14   :  { %v62_v41 = vld [vmem:[%s936_s1 + $0x170] sm:$0xff]  ;;  %v67_v50 = vld [vmem:[%s936_s1 + $0x198] sm:$0xff] }
  0x15   :  { %v66_v48 = vld [vmem:[%s936_s1 + $0x190] sm:$0xff]  ;;  %v75_v58 = vld [vmem:[%s936_s1 + $0x1d8] sm:$0xff] }
  0x16   :  { %451 = vmatpush1.bf16.msra.mxu0 %v650_v43  ;;  %492 = vmatpush1.bf16.msra.mxu1 %v652_v44  ;;  %v63_v43 = vld [vmem:[%s936_s1 + $0x178] sm:$0xff]  ;;  %v654_v44 = vcombine.low %v50_v33, %v54_v34  ;;  %v70_v49 = vld [vmem:[%s936_s1 + $0x1b0] sm:$0xff] }
  0x17   :  { %452 = vmatprep.subr.bf16.mxu0 %v659_v45  ;;  %493 = vmatprep.subr.bf16.mxu1 %v661_v46  ;;  %v663_v46 = vcombine.high %v58_v40, %v62_v41  ;;  %v665_v47 = vcombine.high %v59_v42, %v63_v43  ;;  %v74_v56 = vld [vmem:[%s936_s1 + $0x1d0] sm:$0xff] }
  0x18   :  { %v78_v57 = vld [vmem:[%s936_s1 + $0x1f0] sm:$0xff] }
  0x19   :  { %v678_v0 = vcombine.low %v74_v56, %v78_v57 }
  0x1a   :  { %453 = vmatpush1.bf16.msra.mxu0 %v658_v51  ;;  %494 = vmatpush1.bf16.msra.mxu1 %v660_v52  ;;  %v71_v51 = vld [vmem:[%s936_s1 + $0x1b8] sm:$0xff]  ;;  %v662_v52 = vcombine.low %v58_v40, %v62_v41 }
  0x1b   :  { %454 = vmatprep.subr.bf16.mxu0 %v667_v53  ;;  %495 = vmatprep.subr.bf16.mxu1 %v669_v54  ;;  %v664_v53 = vcombine.low %v59_v42, %v63_v43  ;;  %v671_v54 = vcombine.high %v66_v48, %v70_v49  ;;  %v673_v55 = vcombine.high %v67_v50, %v71_v51 }
  0x1e   :  { %455 = vmatpush1.bf16.msra.mxu0 %v666_v59  ;;  %496 = vmatpush1.bf16.msra.mxu1 %v668_v60  ;;  %v79_v59 = vld [vmem:[%s936_s1 + $0x1f8] sm:$0xff]  ;;  %v670_v60 = vcombine.low %v66_v48, %v70_v49 }
  0x1f   :  { %456 = vmatprep.subr.bf16.mxu0 %v675_v61  ;;  %497 = vmatprep.subr.bf16.mxu1 %v677_v62  ;;  %v672_v61 = vcombine.low %v67_v50, %v71_v51  ;;  %v679_v62 = vcombine.high %v74_v56, %v78_v57  ;;  %v681_v63 = vcombine.high %v75_v58, %v79_v59 }
  0x20   :  { %v680_v1 = vcombine.low %v75_v58, %v79_v59 }
  0x22   :  { %457 = vmatpush1.bf16.msra.mxu0 %v674_v4  ;;  %498 = vmatpush1.bf16.msra.mxu1 %v676_v5  ;;  %v83_v4 = vshrl.u32 %v82_v2, 7 }
  0x23   :  { %524 = vmatprep.subr.bf16.mxu0 %v623_v6  ;;  %565 = vmatprep.subr.bf16.mxu1 %v625_v7  ;;  %v80_v6 = vld [vmem:[%s938_s2] sm:$0xff] }
  0x24   :  { %v84_v5 = vsub.s32 0, %v83_v4  ;;  %v92_v7 = vsub.s32 2, %v83_v4  ;;  %v88_v8 = vsub.s32 1, %v83_v4  ;;  %v96_v9 = vsub.s32 3, %v83_v4 }
  0x25   :  { %475 = vmatmul.mubr.bf16.vlgmr.msra.gmra.mrb[0].mxu0 %v829_v12  ;;  %516 = vmatmul.mubr.bf16.vlgmr.msra.gmra.mrb[0].mxu1 %v829_v12  ;;  %v100_v26 = vsub.s32 4, %v83_v4  ;;  %v108_v27 = vsub.s32 6, %v83_v4  ;;  %v104_v28 = vsub.s32 5, %v83_v4 }
  0x26   :  { %525 = vmatpush1.bf16.msra.mxu0 %v622_v13  ;;  %566 = vmatpush1.bf16.msra.mxu1 %v624_v14  ;;  %v85_v10 = vrot.slane %v80_v6, %v84_v5  ;;  %v93_v11 = vrot.slane %v80_v6, %v92_v7  ;;  %v89_v13 = vrot.slane %v80_v6, %v88_v8 }
  0x27   :  { %526 = vmatprep.subr.bf16.mxu0 %v631_v15  ;;  %567 = vmatprep.subr.bf16.mxu1 %v633_v16  ;;  %v97_v14 = vrot.slane %v80_v6, %v96_v9 }
  0x28   :  { %556 = vmatprep.mubr.bf16.mxu0 %v683_v3  ;;  %597 = vmatprep.mubr.bf16.mxu1 %v683_v3  ;;  %v51_v3 = vld [vmem:[%s936_s1 + $0x118] sm:$0xff] }
  0x29   :  { %v657_v39 = vcombine.high %v51_v3, %v55_v35  ;;  %v656_v45 = vcombine.low %v51_v3, %v55_v35 }
  0x2a   :  { %527 = vmatpush1.bf16.msra.mxu0 %v630_v21  ;;  %568 = vmatpush1.bf16.msra.mxu1 %v632_v22 }
  0x2b   :  { %528 = vmatprep.subr.bf16.mxu0 %v639_v23  ;;  %569 = vmatprep.subr.bf16.mxu1 %v641_v24 }
  0x2e   :  { %529 = vmatpush1.bf16.msra.mxu0 %v638_v29  ;;  %570 = vmatpush1.bf16.msra.mxu1 %v640_v30  ;;  %v112_v29 = vsub.s32 7, %v83_v4  ;;  %v101_v30 = vrot.slane %v80_v6, %v100_v26 }
  0x2f   :  { %530 = vmatprep.subr.bf16.mxu0 %v647_v31  ;;  %571 = vmatprep.subr.bf16.mxu1 %v649_v32  ;;  %v109_v31 = vrot.slane %v80_v6, %v108_v27  ;;  %v105_v32 = vrot.slane %v80_v6, %v104_v28 }
  0x30   :  { %v113_v33 = vrot.slane %v80_v6, %v112_v29 }
  0x32   :  { %531 = vmatpush1.bf16.msra.mxu0 %v646_v36  ;;  %572 = vmatpush1.bf16.msra.mxu1 %v648_v37 }
  0x33   :  { %532 = vmatprep.subr.bf16.mxu0 %v655_v38  ;;  %573 = vmatprep.subr.bf16.mxu1 %v657_v39 }
  0x36   :  { %533 = vmatpush1.bf16.msra.mxu0 %v654_v44  ;;  %574 = vmatpush1.bf16.msra.mxu1 %v656_v45 }
  0x37   :  { %534 = vmatprep.subr.bf16.mxu0 %v663_v46  ;;  %575 = vmatprep.subr.bf16.mxu1 %v665_v47 }
  0x3a   :  { %535 = vmatpush1.bf16.msra.mxu0 %v662_v52  ;;  %576 = vmatpush1.bf16.msra.mxu1 %v664_v53 }
  0x3b   :  { %536 = vmatprep.subr.bf16.mxu0 %v671_v54  ;;  %577 = vmatprep.subr.bf16.mxu1 %v673_v55 }
  0x3e   :  { %537 = vmatpush1.bf16.msra.mxu0 %v670_v60  ;;  %578 = vmatpush1.bf16.msra.mxu1 %v672_v61 }
  0x3f   :  { %538 = vmatprep.subr.bf16.mxu0 %v679_v62  ;;  %579 = vmatprep.subr.bf16.mxu1 %v681_v63 }
  0x42   :  { %539 = vmatpush1.bf16.msra.mxu0 %v678_v0  ;;  %580 = vmatpush1.bf16.msra.mxu1 %v680_v1 }
  0x45   :  { %557 = vmatmul.mubr.bf16.vlgmr.msra.gmra.mrb[4].mxu0 %v829_v12  ;;  %598 = vmatmul.mubr.bf16.vlgmr.msra.gmra.mrb[4].mxu1 %v829_v12 }
  0xf8   :  { %v476_v15 = vpop.f32.mrb[0].mxu0  ;;  %v517_v17 = vpop.f32.mrb[0].mxu1 }
  0xf9   :  { %v477_v16 = vadd.f32 %v476_v15, %v85_v10  ;;  %v478_v18 = vpop.f32.mrb[1].mxu0  ;;  %v518_v19 = vadd.f32 %v517_v17, %v93_v11  ;;  %v519_v20 = vpop.f32.mrb[1].mxu1 }
  0xfa   :  { %v479_v12 = vadd.f32 %v478_v18, %v89_v13  ;;  %v480_v21 = vpop.f32.mrb[2].mxu0  ;;  %v520_v22 = vadd.f32 %v519_v20, %v97_v14  ;;  %v521_v23 = vpop.f32.mrb[2].mxu1 }
  0xfb   :  { %606 = vst [vmem:[%s939_s3] sm:$0xff] %v477_v16  ;;  %v481_v24 = vpop.f32.mrb[3].mxu0  ;;  %608 = vst [vmem:[%s939_s3 + $0x10] sm:$0xff] %v518_v19  ;;  %v522_v25 = vpop.f32.mrb[3].mxu1 }
  0xfc   :  { %607 = vst [vmem:[%s939_s3 + $0x8] sm:$0xff] %v479_v12  ;;  %609 = vst [vmem:[%s939_s3 + $0x18] sm:$0xff] %v520_v22 }
 0x118   :  { %v558_v34 = vpop.f32.mrb[4].mxu0  ;;  %v599_v35 = vpop.f32.mrb[4].mxu1 }
 0x119   :  { %v559_v3 = vadd.f32 %v558_v34, %v101_v30  ;;  %v560_v36 = vpop.f32.mrb[5].mxu0  ;;  %v600_v37 = vadd.f32 %v599_v35, %v109_v31  ;;  %v601_v39 = vpop.f32.mrb[5].mxu1 }
 0x11a   :  { %v561_v38 = vadd.f32 %v560_v36, %v105_v32  ;;  %v562_v40 = vpop.f32.mrb[6].mxu0  ;;  %v602_v41 = vadd.f32 %v601_v39, %v113_v33  ;;  %v603_v42 = vpop.f32.mrb[6].mxu1 }
 0x11b   :  { %610 = vst [vmem:[%s939_s3 + $0x20] sm:$0xff] %v559_v3  ;;  %v563_v43 = vpop.f32.mrb[7].mxu0  ;;  %612 = vst [vmem:[%s939_s3 + $0x30] sm:$0xff] %v600_v37  ;;  %v604_v44 = vpop.f32.mrb[7].mxu1 }
 0x11c   :  { %611 = vst [vmem:[%s939_s3 + $0x28] sm:$0xff] %v561_v38  ;;  %613 = vst [vmem:[%s939_s3 + $0x38] sm:$0xff] %v602_v41 }

// kernel: seq2seq_forward.13
= control target key start
LH: loop header
LB: loop body
LE: loop exit
PB: predicated region body
PF: predicated region fallthrough
CT: control target
= control target key end

     0   :  { %vm128_vm0 = vcmask 1043456   ;;  %v514_v21 = vmov 0   ;;  %vm124_vm1 = vcmask 64512   ;;  %vm306_vm2 = vcmask 1041409   ;;  %s629_s0 = inlined_call_operand.vmem [shape: f32[2,8,768], index: 0, kind: input, shape index: {}]   ;;  %s630_s1 = inlined_call_operand.vmem [shape: bf16[256,128], index: 1, kind: input, shape index: {}]   ;;  %s631_s2 = inlined_call_operand.vmem [shape: f32[1,128], index: 2, kind: input, shape index: {}]   ;;  %s632_s3 = inlined_call_operand.vmem [shape: f32[2,128], index: 3, kind: output, shape index: {}]  }
   0x1   :  { %v18_v0 = vld [vmem:[%s629_s0 + $0x18] sm:$0xff]  ;;  %v17_v1 = vld [vmem:[%s629_s0 + $0x10] sm:$0xff]  ;;  %v16_v2 = vld [vmem:[%s629_s0 + $0x8] sm:$0xff] }
   0x2   :  { %v32_v3 = vpack.c.bf16 %v18_v0, %v18_v0  ;;  %v31_v4 = vpack.c.bf16 %v17_v1, %v17_v1  ;;  %v28_v5 = vpack.c.bf16 %v16_v2, %v16_v2  ;;  %v24_v6 = vld [vmem:[%s629_s0 + $0x48] sm:$0xff]  ;;  %v15_v8 = vld [vmem:[%s629_s0] sm:$0xff]  ;;  %v22_v10 = vld [vmem:[%s629_s0 + $0x38] sm:$0xff] }
   0x3   :  { %v34_v7 = vpack.c.bf16 %v24_v6, %v24_v6  ;;  %v23_v9 = vld [vmem:[%s629_s0 + $0x40] sm:$0xff]  ;;  %v20_v11 = vld [vmem:[%s629_s0 + $0x28] sm:$0xff]  ;;  %v27_v12 = vpack.c.bf16 %v15_v8, %v15_v8  ;;  %v30_v14 = vpack.c.bf16 %v22_v10, %v22_v10  ;;  %v21_v17 = vld [vmem:[%s629_s0 + $0x30] sm:$0xff] }
   0x4   :  { %39 = vmatprep.subr.bf16.mxu1 %v32_v3  ;;  %71 = vmatprep.mubr.bf16.mxu1 %v28_v5  ;;  %v33_v13 = vpack.c.bf16 %v23_v9, %v23_v9  ;;  %v36_v15 = vpack.c.bf16 %v20_v11, %v20_v11  ;;  %v19_v16 = vld [vmem:[%s629_s0 + $0x20] sm:$0xff]  ;;  %v29_v19 = vpack.c.bf16 %v21_v17, %v21_v17  ;;  %v26_v22 = vld [vmem:[%s629_s0 + $0x58] sm:$0xff]  ;;  %v25_v24 = vld [vmem:[%s629_s0 + $0x50] sm:$0xff] }
   0x5   :  { %40 = vmatpush1.bf16.xpose.msra.mxu1 %v31_v4  ;;  %v35_v18 = vpack.c.bf16 %v19_v16, %v19_v16  ;;  %v38_v23 = vpack.c.bf16 %v26_v22, %v26_v22  ;;  %v37_v25 = vpack.c.bf16 %v25_v24, %v25_v24  ;;  %v498_v39 = vld [vmem:[%s630_s1 + $0x40] sm:$0xff]   ;;  %v500_v41 = vld [vmem:[%s630_s1 + $0x48] sm:$0xff]   ;;  %v502_v43 = vld [vmem:[%s630_s1 + $0x50] sm:$0xff]  }
   0x6   :  { %79 = vmatprep.subr.bf16.mxu1 %v34_v7  ;;  %v499_v40 = vld [vmem:[%s630_s1] sm:$0xff]   ;;  %475 = vmatprep.subr.bf16.mxu0 %v498_v39  ;;  %v501_v42 = vld [vmem:[%s630_s1 + $0x8] sm:$0xff]   ;;  %v503_v44 = vld [vmem:[%s630_s1 + $0x10] sm:$0xff]  }
   0x7   :  { %v130_v20 = vsel %vm128_vm0, %v35_v18, 0  ;;  %v180_v32 = vsel %vm128_vm0, %v37_v25, 0  ;;  %476 = vmatpush3.bf16.msra.mxu0 %v499_v40  ;;  %v504_v45 = vld [vmem:[%s630_s1 + $0x58] sm:$0xff]   ;;  %v506_v47 = vld [vmem:[%s630_s1 + $0x60] sm:$0xff]   ;;  %v508_v49 = vld [vmem:[%s630_s1 + $0x68] sm:$0xff]  }
   0x8   :  { %477 = vmatprep.subr.bf16.mxu0 %v500_v41  ;;  %v505_v46 = vld [vmem:[%s630_s1 + $0x18] sm:$0xff]   ;;  %v507_v48 = vld [vmem:[%s630_s1 + $0x20] sm:$0xff]   ;;  %v509_v50 = vld [vmem:[%s630_s1 + $0x28] sm:$0xff]  }
   0x9   :  { %v510_v51 = vld [vmem:[%s630_s1 + $0x70] sm:$0xff]   ;;  %v512_v53 = vld [vmem:[%s630_s1 + $0x78] sm:$0xff]   ;;  %v458_v40 = vld [vmem:[%s631_s2] ss:$0 sm:$0xff] }
   0xa   :  { %v511_v52 = vld [vmem:[%s630_s1 + $0x30] sm:$0xff]   ;;  %v513_v54 = vld [vmem:[%s630_s1 + $0x38] sm:$0xff]  }
   0xb   :  { %478 = vmatpush3.bf16.msra.mxu0 %v501_v42 }
   0xc   :  { %72 = vmatmul.mubr.bf16.vlgmr.msra.gmra.mrb[0].mxu1 %v27_v12  ;;  %479 = vmatprep.subr.bf16.mxu0 %v502_v43 }
   0xd   :  { %80 = vmatpush1.bf16.xpose.msra.mxu1 %v33_v13  ;;  %111 = vmatprep.mubr.bf16.mxu1 %v30_v14 }
   0xe   :  { %454 = vmatprep.subr.msk.bf16.mxu1 %vm128_vm0, %v36_v15 }
   0xf   :  { %480 = vmatpush3.bf16.msra.mxu0 %v503_v44 }
  0x10   :  { %481 = vmatprep.subr.bf16.mxu0 %v504_v45 }
  0x13   :  { %482 = vmatpush3.bf16.msra.mxu0 %v505_v46 }
  0x14   :  { %112 = vmatmul.mubr.bf16.vlgmr.msra.gmra.mrb[4].mxu1 %v29_v19  ;;  %483 = vmatprep.subr.bf16.mxu0 %v506_v47 }
  0x15   :  { %136 = vmatpush1.bf16.msra.mxu1 %v130_v20  ;;  %167 = vmatprep.mubr.bf16.mxu1 %v514_v21 }
  0x16   :  { %456 = vmatprep.subr.msk.bf16.mxu1 %vm128_vm0, %v38_v23 }
  0x17   :  { %484 = vmatpush3.bf16.msra.mxu0 %v507_v48 }
  0x18   :  { %485 = vmatprep.subr.bf16.mxu0 %v508_v49 }
  0x1b   :  { %486 = vmatpush3.bf16.msra.mxu0 %v509_v50 }
  0x1c   :  { %487 = vmatprep.subr.bf16.mxu0 %v510_v51 }
  0x1f   :  { %488 = vmatpush3.bf16.msra.mxu0 %v511_v52 }
  0x20   :  { %489 = vmatprep.subr.bf16.mxu0 %v512_v53 }
  0x23   :  { %490 = vmatpush3.bf16.msra.mxu0 %v513_v54 }
  0xdf   :  { %v73_v26 = vpop.f32.mrb[0].mxu1 }
  0xe0   :  { %v120_v27 = vmul.f32 0.0625, %v73_v26  ;;  %v75_v28 = vpop.f32.mrb[1].mxu1 }
  0xe1   :  { %v76_v29 = vpop.f32.mrb[2].mxu1 }
  0xe2   :  { %v122_v30 = vpack.c.bf16 %v120_v27, %v120_v27  ;;  %v77_v31 = vpop.f32.mrb[3].mxu1 }
  0xe4   :  { %455 = vmatmul.mubr.msk.bf16.vlgmr.msra.gmra.mrb[8].mxu1 %vm124_vm1, %v122_v30 }
  0xe5   :  { %186 = vmatpush1.bf16.msra.mxu1 %v180_v32  ;;  %217 = vmatprep.mubr.bf16.mxu1 %v514_v21 }
  0xe7   :  { %v113_v33 = vpop.f32.mrb[4].mxu1 }
  0xe8   :  { %v121_v34 = vmul.f32 0.0625, %v113_v33  ;;  %v115_v35 = vpop.f32.mrb[5].mxu1 }
  0xe9   :  { %v116_v36 = vpop.f32.mrb[6].mxu1 }
  0xea   :  { %v123_v37 = vpack.c.bf16 %v121_v34, %v121_v34  ;;  %v117_v38 = vpop.f32.mrb[7].mxu1 }
  0xec   :  { %457 = vmatmul.mubr.msk.bf16.vlgmr.msra.gmra.mrb[12].mxu1 %vm124_vm1, %v123_v37 }
 0x1b7   :  { %v169_v55 = vpop.f32.mrb[8].mxu1 }
 0x1b8   :  { %v226_v56 = vrot.slane %v169_v55, 4  ;;  %v171_v57 = vpop.f32.mrb[9].mxu1 }
 0x1b9   :  { %v232_v58 = vrot.slane %v171_v57, 4  ;;  %v173_v59 = vpop.f32.mrb[10].mxu1 }
 0x1ba   :  { %v227_v60 = vadd.f32 %v226_v56, %v169_v55  ;;  %v174_v61 = vpop.f32.mrb[11].mxu1 }
 0x1bb   :  { %v233_v62 = vadd.f32 %v232_v58, %v171_v57 }
 0x1bc   :  { %v228_v63 = vrot.slane %v227_v60, 2 }
 0x1bd   :  { %v234_v0 = vrot.slane %v233_v62, 2 }
 0x1be   :  { %v229_v1 = vadd.f32 %v228_v63, %v227_v60 }
 0x1bf   :  { %v235_v2 = vadd.f32 %v234_v0, %v233_v62  ;;  %v219_v3 = vpop.f32.mrb[12].mxu1 }
 0x1c0   :  { %v230_v4 = vrot.slane %v229_v1, 1  ;;  %v238_v5 = vrot.slane %v219_v3, 4  ;;  %v221_v6 = vpop.f32.mrb[13].mxu1 }
 0x1c1   :  { %v236_v7 = vrot.slane %v235_v2, 1  ;;  %v244_v8 = vrot.slane %v221_v6, 4  ;;  %v223_v9 = vpop.f32.mrb[14].mxu1 }
 0x1c2   :  { %v239_v10 = vadd.f32 %v238_v5, %v219_v3  ;;  %v224_v11 = vpop.f32.mrb[15].mxu1  ;;  %v231_v13 = vadd.f32 %v230_v4, %v229_v1 }
 0x1c3   :  { %v245_v12 = vadd.f32 %v244_v8, %v221_v6  ;;  %v237_v15 = vadd.f32 %v236_v7, %v235_v2 }
 0x1c4   :  { %v240_v14 = vrot.slane %v239_v10, 2  ;;  %v251_v19 = vmul.f32 0.125, %v231_v13 }
 0x1c5   :  { %v246_v16 = vrot.slane %v245_v12, 2  ;;  %v252_v22 = vmul.f32 0.125, %v237_v15 }
 0x1c6   :  { %v241_v17 = vadd.f32 %v240_v14, %v239_v10  ;;  %v255_v25 = vpack.c.bf16 %v251_v19, %v251_v19 }
 0x1c7   :  { %v247_v18 = vadd.f32 %v246_v16, %v245_v12  ;;  %v256_v28 = vpack.c.bf16 %v252_v22, %v252_v22 }
 0x1c8   :  { %v242_v20 = vrot.slane %v241_v17, 1  ;;  %v302_v31 = vunpack.c.l.b16 %v255_v25 }
 0x1c9   :  { %v248_v21 = vrot.slane %v247_v18, 1  ;;  %v303_v33 = vunpack.c.l.b16 %v256_v28 }
 0x1ca   :  { %v243_v23 = vadd.f32 %v242_v20, %v241_v17 }
 0x1cb   :  { %v249_v24 = vadd.f32 %v248_v21, %v247_v18 }
 0x1cc   :  { %v253_v26 = vmul.f32 0.125, %v243_v23 }
 0x1cd   :  { %v254_v27 = vmul.f32 0.125, %v249_v24 }
 0x1ce   :  { %v257_v29 = vpack.c.bf16 %v253_v26, %v253_v26 }
 0x1cf   :  { %v258_v30 = vpack.c.bf16 %v254_v27, %v254_v27 }
 0x1d0   :  { %v304_v32 = vunpack.c.l.b16 %v257_v29 }
 0x1d1   :  { %v305_v34 = vunpack.c.l.b16 %v258_v30 }
 0x1d2   :  { %v307_v35 = vsel %vm306_vm2, %v304_v32, %v302_v31 }
 0x1d3   :  { %v308_v36 = vsel %vm306_vm2, %v305_v34, %v303_v33  ;;  %v309_v38 = vpack.c.b16 %v307_v35, %v307_v35 }
 0x1d4   :  { %v310_v37 = vpack.c.b16 %v308_v36, %v308_v36 }
 0x1d6   :  { %441 = vmatprep.mubr.bf16.mxu0 %v310_v37 }
 0x1d7   :  { %442 = vmatmul.mubr.bf16.vlgmr.msra.gmra.mrb[0].mxu0 %v309_v38 }
 0x2aa   :  { %v491_v39 = vpop.f32.mrb[0].mxu0 }
 0x2ab   :  { %v492_v41 = vpop.f32.mrb[1].mxu0 }
 0x2ac   :  { %v493_v42 = vadd.f32 %v492_v41, %v491_v39  ;;  %v494_v43 = vpop.f32.mrb[2].mxu0 }
 0x2ad   :  { %v495_v44 = vpop.f32.mrb[3].mxu0 }
 0x2ae   :  { %v444_v45 = vadd.f32 %v493_v42, %v458_v40 }
 0x2b0   :  { %449 = vst [vmem:[%s632_s3] sm:$0x3] %v444_v45 }

// kernel: seq2seq_forward.15
= control target key start
LH: loop header
LB: loop body
LE: loop exit
PB: predicated region body
PF: predicated region fallthrough
CT: control target
= control target key end

     0   :  { %s1789_s21 = smov 0   ;;  %s2272_s0 = inlined_call_operand.vmem [shape: f32[4,2,1024], index: 0, kind: input, shape index: {}]   ;;  %s2273_s1 = inlined_call_operand.vmem [shape: f32[2,256], index: 1, kind: input, shape index: {}]   ;;  %s2274_s2 = inlined_call_operand.vmem [shape: f32[2,256], index: 2, kind: input, shape index: {}]   ;;  %s2275_s3 = inlined_call_operand.vmem [shape: bf16[256,1024], index: 3, kind: input, shape index: {}]   ;;  %s2276_s4 = inlined_call_operand.vmem [shape: bf16[256,128], index: 4, kind: input, shape index: {}]   ;;  %s2277_s5 = inlined_call_operand.vmem [shape: f32[2,128], index: 5, kind: input, shape index: {}]   ;;  %s2278_s6 = inlined_call_operand.vmem [shape: f32[4,2,128], index: 6, kind: output, shape index: {}]  }
   0x1 LB: > { %s1522_s22 = sadd.s32 4294967295, %s1751_s21   ;;  %p1526_p0 = scmp.ge.s32.totalorder %s1751_s21, 1  ;;  %s1751_s21 = sphi %s1789_s21, %s16_s21  }
   0x2   : > { %p212_p1 = scmp.lt.s32.totalorder %s1751_s21, 5 }
   0x4   : > { %p213_p2 = pnand %p1526_p0, %p212_p1 }
   0x5   : > { %p241_p3 = scmp.lt.s32.totalorder (!%p213_p2), %s1522_s22, 3  ;;  %p1530_p4 = scmp.ne.s32.totalorder (!%p213_p2), %s1522_s22, 0 }
   0x6   : > { %216 = sbr.rel (%p213_p2) target bundleno = 629 (0x275), region = 44 }
   0xd   : > { %s242_s23 = scalar_select %p241_p3, %s1522_s22, 3 }
   0xe   : > { %254 = sbr.rel (%p1530_p4) target bundleno = 21 (0x15), region = 48  ;;  %v255_v0 = vld [vmem:[%s2273_s1] sm:$0xf] (!%p1530_p4) }
   0xf   : > { %s1681_s24 = sshll.u32 %s242_s23, 4  ;;  %s1529_s25 = sshll.u32 %s242_s23, 1  ;;  %v257_v1 = vld [vmem:[%s2274_s2] sm:$0xf] (!%p1530_p4)  ;;  %256 = vst [vmem:[#allocation2] sm:$0xf] (!%p1530_p4), %v255_v0 }
  0x10   : > { %s1800_s28 = scalar_lea.vmem %s2272_s0, %s1681_s24  ;;  %s1805_s7 = scalar_lea.vmem %s2278_s6, %s1529_s25  ;;  %258 = vst [vmem:[#allocation3] sm:$0xf] (!%p1530_p4), %v257_v1 }
  0x15 PF: > { %v275_v2 = vld [vmem:[%s2275_s3] sm:$0xff]  ;;  %v276_v4 = vld [vmem:[%s2275_s3 + $0x8] sm:$0xff] }
  0x16   : > { %v279_v3 = vld [vmem:[%s2275_s3 + $0x20] sm:$0xff]  ;;  %v280_v6 = vld [vmem:[%s2275_s3 + $0x28] sm:$0xff] }
  0x17   : > { %v1533_v5 = vcombine.high %v275_v2, %v279_v3  ;;  %v1532_v7 = vcombine.low %v275_v2, %v279_v3  ;;  %v283_v8 = vld [vmem:[%s2275_s3 + $0x40] sm:$0xff]  ;;  %v1535_v10 = vcombine.high %v276_v4, %v280_v6  ;;  %v1534_v11 = vcombine.low %v276_v4, %v280_v6  ;;  %v284_v13 = vld [vmem:[%s2275_s3 + $0x48] sm:$0xff] }
  0x18   : > { %v287_v9 = vld [vmem:[%s2275_s3 + $0x60] sm:$0xff]  ;;  %v288_v14 = vld [vmem:[%s2275_s3 + $0x68] sm:$0xff] }
  0x19   : > { %v1541_v12 = vcombine.high %v283_v8, %v287_v9  ;;  %v291_v15 = vld [vmem:[%s2275_s3 + $0x80] sm:$0xff]  ;;  %1043 = vmatprep.subr.bf16.mxu0 %v1533_v5  ;;  %v1543_v16 = vcombine.high %v284_v13, %v288_v14  ;;  %v292_v18 = vld [vmem:[%s2275_s3 + $0x88] sm:$0xff]  ;;  %1084 = vmatprep.subr.bf16.mxu1 %v1535_v10  ;;  %v1540_v20 = vcombine.low %v283_v8, %v287_v9 }
  0x1a   : > { %v295_v17 = vld [vmem:[%s2275_s3 + $0xa0] sm:$0xff]  ;;  %v296_v19 = vld [vmem:[%s2275_s3 + $0xa8] sm:$0xff]  ;;  %1044 = vmatpush1.bf16.msra.mxu0 %v1532_v7  ;;  %1085 = vmatpush1.bf16.msra.mxu1 %v1534_v11  ;;  %v1542_v21 = vcombine.low %v284_v13, %v288_v14 }
  0x1b   : > { %1045 = vmatprep.subr.bf16.mxu0 %v1541_v12  ;;  %v1549_v22 = vcombine.high %v291_v15, %v295_v17  ;;  %1086 = vmatprep.subr.bf16.mxu1 %v1543_v16  ;;  %v1551_v23 = vcombine.high %v292_v18, %v296_v19  ;;  %v299_v24 = vld [vmem:[%s2275_s3 + $0xc0] sm:$0xff]  ;;  %v300_v26 = vld [vmem:[%s2275_s3 + $0xc8] sm:$0xff]  ;;  %v1548_v28 = vcombine.low %v291_v15, %v295_v17 }
  0x1c   : > { %v303_v25 = vld [vmem:[%s2275_s3 + $0xe0] sm:$0xff]  ;;  %v304_v27 = vld [vmem:[%s2275_s3 + $0xe8] sm:$0xff]  ;;  %v1550_v29 = vcombine.low %v292_v18, %v296_v19 }
  0x1d   : > { %v1557_v30 = vcombine.high %v299_v24, %v303_v25  ;;  %v1559_v31 = vcombine.high %v300_v26, %v304_v27  ;;  %v307_v32 = vld [vmem:[%s2275_s3 + $0x100] sm:$0xff]  ;;  %v308_v34 = vld [vmem:[%s2275_s3 + $0x108] sm:$0xff]  ;;  %v1556_v36 = vcombine.low %v299_v24, %v303_v25  ;;  %v1558_v37 = vcombine.low %v300_v26, %v304_v27 }
  0x1e   : > { %1046 = vmatpush1.bf16.msra.mxu0 %v1540_v20  ;;  %1087 = vmatpush1.bf16.msra.mxu1 %v1542_v21  ;;  %v311_v33 = vld [vmem:[%s2275_s3 + $0x120] sm:$0xff]  ;;  %v312_v35 = vld [vmem:[%s2275_s3 + $0x128] sm:$0xff] }
  0x1f   : > { %1047 = vmatprep.subr.bf16.mxu0 %v1549_v22  ;;  %1088 = vmatprep.subr.bf16.mxu1 %v1551_v23  ;;  %v1565_v38 = vcombine.high %v307_v32, %v311_v33  ;;  %v1567_v39 = vcombine.high %v308_v34, %v312_v35  ;;  %v315_v40 = vld [vmem:[%s2275_s3 + $0x140] sm:$0xff]  ;;  %v316_v42 = vld [vmem:[%s2275_s3 + $0x148] sm:$0xff]  ;;  %v1564_v44 = vcombine.low %v307_v32, %v311_v33 }
  0x20   : > { %v319_v41 = vld [vmem:[%s2275_s3 + $0x160] sm:$0xff]  ;;  %v320_v43 = vld [vmem:[%s2275_s3 + $0x168] sm:$0xff]  ;;  %v1566_v45 = vcombine.low %v308_v34, %v312_v35 }
  0x21   : > { %v1573_v46 = vcombine.high %v315_v40, %v319_v41  ;;  %v1575_v47 = vcombine.high %v316_v42, %v320_v43  ;;  %v323_v48 = vld [vmem:[%s2275_s3 + $0x180] sm:$0xff]  ;;  %v324_v50 = vld [vmem:[%s2275_s3 + $0x188] sm:$0xff]  ;;  %v1572_v52 = vcombine.low %v315_v40, %v319_v41  ;;  %v1574_v53 = vcombine.low %v316_v42, %v320_v43 }
  0x22   : > { %1048 = vmatpush1.bf16.msra.mxu0 %v1548_v28  ;;  %1089 = vmatpush1.bf16.msra.mxu1 %v1550_v29  ;;  %v327_v49 = vld [vmem:[%s2275_s3 + $0x1a0] sm:$0xff]  ;;  %v328_v51 = vld [vmem:[%s2275_s3 + $0x1a8] sm:$0xff] }
  0x23   : > { %1049 = vmatprep.subr.bf16.mxu0 %v1557_v30  ;;  %1090 = vmatprep.subr.bf16.mxu1 %v1559_v31  ;;  %v1581_v54 = vcombine.high %v323_v48, %v327_v49  ;;  %v1897_v55 = vld.sshfl [vmem:[#allocation2] sm:$0x33 pattern:$0x76325410]  ;;  %v1583_v56 = vcombine.high %v324_v50, %v328_v51  ;;  %v332_v60 = vld [vmem:[%s2275_s3 + $0x1c8] sm:$0xff]  ;;  %v1580_v62 = vcombine.low %v323_v48, %v327_v49 }
  0x24   : > { %v331_v57 = vld [vmem:[%s2275_s3 + $0x1c0] sm:$0xff]  ;;  %v270_v59 = vcombine.high %v1897_v55, %v1897_v55  ;;  %v336_v61 = vld [vmem:[%s2275_s3 + $0x1e8] sm:$0xff]  ;;  %v1582_v0 = vcombine.low %v324_v50, %v328_v51 }
  0x25   : > { %v335_v58 = vld [vmem:[%s2275_s3 + $0x1e0] sm:$0xff]  ;;  %v1591_v2 = vcombine.high %v332_v60, %v336_v61  ;;  %v340_v5 = vld [vmem:[%s2275_s3 + $0x208] sm:$0xff]  ;;  %v1590_v8 = vcombine.low %v332_v60, %v336_v61 }
  0x26   : > { %1050 = vmatpush1.bf16.msra.mxu0 %v1556_v36  ;;  %1091 = vmatpush1.bf16.msra.mxu1 %v1558_v37  ;;  %v1913_v63 = vpack.c.bf16 %v270_v59, %v270_v59  ;;  %v1589_v1 = vcombine.high %v331_v57, %v335_v58  ;;  %v339_v3 = vld [vmem:[%s2275_s3 + $0x200] sm:$0xff]  ;;  %v344_v6 = vld [vmem:[%s2275_s3 + $0x228] sm:$0xff]  ;;  %v1588_v7 = vcombine.low %v331_v57, %v335_v58 }
  0x27   : > { %1051 = vmatprep.subr.bf16.mxu0 %v1565_v38  ;;  %1092 = vmatprep.subr.bf16.mxu1 %v1567_v39  ;;  %v343_v4 = vld [vmem:[%s2275_s3 + $0x220] sm:$0xff]  ;;  %v1599_v10 = vcombine.high %v340_v5, %v344_v6  ;;  %v348_v13 = vld [vmem:[%s2275_s3 + $0x248] sm:$0xff]  ;;  %v1598_v16 = vcombine.low %v340_v5, %v344_v6  ;;  %v277_v5 = vld [vmem:[%s2275_s3 + $0x10] sm:$0xff] }
  0x28   : > { %1075 = vmatprep.mubr.bf16.mxu0 %v1913_v63  ;;  %1116 = vmatprep.mubr.bf16.mxu1 %v1913_v63  ;;  %v1597_v9 = vcombine.high %v339_v3, %v343_v4  ;;  %v347_v11 = vld [vmem:[%s2275_s3 + $0x240] sm:$0xff]  ;;  %v352_v14 = vld [vmem:[%s2275_s3 + $0x268] sm:$0xff]  ;;  %v1596_v15 = vcombine.low %v339_v3, %v343_v4  ;;  %v281_v6 = vld [vmem:[%s2275_s3 + $0x30] sm:$0xff] }
  0x29   : > { %v351_v12 = vld [vmem:[%s2275_s3 + $0x260] sm:$0xff]  ;;  %v1607_v18 = vcombine.high %v348_v13, %v352_v14  ;;  %v356_v21 = vld [vmem:[%s2275_s3 + $0x288] sm:$0xff]  ;;  %v1606_v24 = vcombine.low %v348_v13, %v352_v14  ;;  %v285_v13 = vld [vmem:[%s2275_s3 + $0x50] sm:$0xff] }
  0x2a   : > { %1052 = vmatpush1.bf16.msra.mxu0 %v1564_v44  ;;  %1093 = vmatpush1.bf16.msra.mxu1 %v1566_v45  ;;  %v1605_v17 = vcombine.high %v347_v11, %v351_v12  ;;  %v355_v19 = vld [vmem:[%s2275_s3 + $0x280] sm:$0xff]  ;;  %v360_v22 = vld [vmem:[%s2275_s3 + $0x2a8] sm:$0xff]  ;;  %v1604_v23 = vcombine.low %v347_v11, %v351_v12  ;;  %v1537_v11 = vcombine.high %v277_v5, %v281_v6  ;;  %v289_v14 = vld [vmem:[%s2275_s3 + $0x70] sm:$0xff] }
  0x2b   : > { %1053 = vmatprep.subr.bf16.mxu0 %v1573_v46  ;;  %1094 = vmatprep.subr.bf16.mxu1 %v1575_v47  ;;  %v359_v20 = vld [vmem:[%s2275_s3 + $0x2a0] sm:$0xff]  ;;  %v1615_v26 = vcombine.high %v356_v21, %v360_v22  ;;  %v364_v29 = vld [vmem:[%s2275_s3 + $0x2c8] sm:$0xff]  ;;  %v1614_v32 = vcombine.low %v356_v21, %v360_v22  ;;  %v297_v22 = vld [vmem:[%s2275_s3 + $0xb0] sm:$0xff] }
  0x2c   : > { %v1613_v25 = vcombine.high %v355_v19, %v359_v20  ;;  %v363_v27 = vld [vmem:[%s2275_s3 + $0x2c0] sm:$0xff]  ;;  %v368_v30 = vld [vmem:[%s2275_s3 + $0x2e8] sm:$0xff]  ;;  %v1612_v31 = vcombine.low %v355_v19, %v359_v20  ;;  %v1545_v20 = vcombine.high %v285_v13, %v289_v14 }
  0x2d   : > { %v367_v28 = vld [vmem:[%s2275_s3 + $0x2e0] sm:$0xff]  ;;  %v1623_v35 = vcombine.high %v364_v29, %v368_v30  ;;  %v372_v37 = vld [vmem:[%s2275_s3 + $0x308] sm:$0xff]  ;;  %v1622_v42 = vcombine.low %v364_v29, %v368_v30  ;;  %v301_v29 = vld [vmem:[%s2275_s3 + $0xd0] sm:$0xff] }
  0x2e   : > { %1054 = vmatpush1.bf16.msra.mxu0 %v1572_v52  ;;  %1095 = vmatpush1.bf16.msra.mxu1 %v1574_v53  ;;  %v1621_v33 = vcombine.high %v363_v27, %v367_v28  ;;  %v371_v34 = vld [vmem:[%s2275_s3 + $0x300] sm:$0xff]  ;;  %v376_v38 = vld [vmem:[%s2275_s3 + $0x328] sm:$0xff]  ;;  %v1620_v39 = vcombine.low %v363_v27, %v367_v28  ;;  %v305_v30 = vld [vmem:[%s2275_s3 + $0xf0] sm:$0xff] }
  0x2f   : > { %1055 = vmatprep.subr.bf16.mxu0 %v1581_v54  ;;  %1096 = vmatprep.subr.bf16.mxu1 %v1583_v56  ;;  %v375_v36 = vld [vmem:[%s2275_s3 + $0x320] sm:$0xff]  ;;  %v380_v44 = vld [vmem:[%s2275_s3 + $0x348] sm:$0xff]  ;;  %v1631_v46 = vcombine.high %v372_v37, %v376_v38  ;;  %v1630_v50 = vcombine.low %v372_v37, %v376_v38  ;;  %v309_v37 = vld [vmem:[%s2275_s3 + $0x110] sm:$0xff] }
  0x30   : > { %v379_v40 = vld [vmem:[%s2275_s3 + $0x340] sm:$0xff]  ;;  %v1629_v43 = vcombine.high %v371_v34, %v375_v36  ;;  %v384_v45 = vld [vmem:[%s2275_s3 + $0x368] sm:$0xff]  ;;  %v1628_v47 = vcombine.low %v371_v34, %v375_v36  ;;  %v313_v38 = vld [vmem:[%s2275_s3 + $0x130] sm:$0xff] }
  0x31   : > { %v383_v41 = vld [vmem:[%s2275_s3 + $0x360] sm:$0xff]  ;;  %v388_v52 = vld [vmem:[%s2275_s3 + $0x388] sm:$0xff]  ;;  %v1639_v54 = vcombine.high %v380_v44, %v384_v45  ;;  %v1638_v57 = vcombine.low %v380_v44, %v384_v45  ;;  %v317_v44 = vld [vmem:[%s2275_s3 + $0x150] sm:$0xff] }
  0x32   : > { %1056 = vmatpush1.bf16.msra.mxu0 %v1580_v62  ;;  %1097 = vmatpush1.bf16.msra.mxu1 %v1582_v0  ;;  %v387_v48 = vld [vmem:[%s2275_s3 + $0x380] sm:$0xff]  ;;  %v1637_v51 = vcombine.high %v379_v40, %v383_v41  ;;  %v392_v53 = vld [vmem:[%s2275_s3 + $0x3a8] sm:$0xff]  ;;  %v1636_v56 = vcombine.low %v379_v40, %v383_v41  ;;  %v1560_v40 = vcombine.low %v301_v29, %v305_v30  ;;  %v321_v45 = vld [vmem:[%s2275_s3 + $0x170] sm:$0xff] }
  0x33   : > { %1057 = vmatprep.subr.bf16.mxu0 %v1589_v1  ;;  %1098 = vmatprep.subr.bf16.mxu1 %v1591_v2  ;;  %v391_v49 = vld [vmem:[%s2275_s3 + $0x3a0] sm:$0xff]  ;;  %v1647_v59 = vcombine.high %v388_v52, %v392_v53  ;;  %v396_v62 = vld [vmem:[%s2275_s3 + $0x3c8] sm:$0xff]  ;;  %v1646_v2 = vcombine.low %v388_v52, %v392_v53  ;;  %v325_v52 = vld [vmem:[%s2275_s3 + $0x190] sm:$0xff] }
  0x34   : > { %v1645_v58 = vcombine.high %v387_v48, %v391_v49  ;;  %v395_v60 = vld [vmem:[%s2275_s3 + $0x3c0] sm:$0xff]  ;;  %v400_v0 = vld [vmem:[%s2275_s3 + $0x3e8] sm:$0xff]  ;;  %v1644_v1 = vcombine.low %v387_v48, %v391_v49  ;;  %v1568_v48 = vcombine.low %v309_v37, %v313_v38  ;;  %v329_v53 = vld [vmem:[%s2275_s3 + $0x1b0] sm:$0xff] }
  0x35   : > { %v399_v61 = vld [vmem:[%s2275_s3 + $0x3e0] sm:$0xff]  ;;  %v1655_v4 = vcombine.high %v396_v62, %v400_v0 }
  0x36   : > { %1058 = vmatpush1.bf16.msra.mxu0 %v1588_v7  ;;  %1099 = vmatpush1.bf16.msra.mxu1 %v1590_v8  ;;  %v1653_v3 = vcombine.high %v395_v60, %v399_v61  ;;  %v278_v7 = vld [vmem:[%s2275_s3 + $0x18] sm:$0xff] }
  0x37   : > { %1059 = vmatprep.subr.bf16.mxu0 %v1597_v9  ;;  %1100 = vmatprep.subr.bf16.mxu1 %v1599_v10  ;;  %v282_v8 = vld [vmem:[%s2275_s3 + $0x38] sm:$0xff]  ;;  %v1652_v9 = vcombine.low %v395_v60, %v399_v61  ;;  %v1654_v10 = vcombine.low %v396_v62, %v400_v0  ;;  %v333_v61 = vld [vmem:[%s2275_s3 + $0x1d0] sm:$0xff] }
  0x38   : > { %v1539_v12 = vcombine.high %v278_v7, %v282_v8  ;;  %v1538_v19 = vcombine.low %v278_v7, %v282_v8  ;;  %v337_v62 = vld [vmem:[%s2275_s3 + $0x1f0] sm:$0xff]  ;;  %v334_v0 = vld [vmem:[%s2275_s3 + $0x1d8] sm:$0xff] }
  0x39   : > { %v345_v7 = vld [vmem:[%s2275_s3 + $0x230] sm:$0xff]  ;;  %v342_v8 = vld [vmem:[%s2275_s3 + $0x218] sm:$0xff] }
  0x3a   : > { %1060 = vmatpush1.bf16.msra.mxu0 %v1596_v15  ;;  %1101 = vmatpush1.bf16.msra.mxu1 %v1598_v16  ;;  %v2033_v15 = vpack.c.bf16 %v1897_v55, %v1897_v55  ;;  %v286_v16 = vld [vmem:[%s2275_s3 + $0x58] sm:$0xff]  ;;  %v293_v55 = vld [vmem:[%s2275_s3 + $0x90] sm:$0xff] }
  0x3b   : > { %1061 = vmatprep.subr.bf16.mxu0 %v1605_v17  ;;  %1102 = vmatprep.subr.bf16.mxu1 %v1607_v18  ;;  %v290_v17 = vld [vmem:[%s2275_s3 + $0x78] sm:$0xff]  ;;  %v1536_v18 = vcombine.low %v277_v5, %v281_v6  ;;  %v1553_v27 = vcombine.high %v293_v55, %v297_v22  ;;  %v341_v6 = vld [vmem:[%s2275_s3 + $0x210] sm:$0xff] }
  0x3c   : > { %v1547_v21 = vcombine.high %v286_v16, %v290_v17 }
  0x3e   : > { %1062 = vmatpush1.bf16.msra.mxu0 %v1604_v23  ;;  %1103 = vmatpush1.bf16.msra.mxu1 %v1606_v24  ;;  %v294_v23 = vld [vmem:[%s2275_s3 + $0x98] sm:$0xff] }
  0x3f   : > { %1063 = vmatprep.subr.bf16.mxu0 %v1613_v25  ;;  %1104 = vmatprep.subr.bf16.mxu1 %v1615_v26  ;;  %v298_v24 = vld [vmem:[%s2275_s3 + $0xb8] sm:$0xff]  ;;  %v1544_v25 = vcombine.low %v285_v13, %v289_v14  ;;  %v1546_v26 = vcombine.low %v286_v16, %v290_v17  ;;  %v349_v14 = vld [vmem:[%s2275_s3 + $0x250] sm:$0xff] }
  0x40   : > { %v1555_v28 = vcombine.high %v294_v23, %v298_v24  ;;  %v1554_v34 = vcombine.low %v294_v23, %v298_v24  ;;  %v353_v16 = vld [vmem:[%s2275_s3 + $0x270] sm:$0xff]  ;;  %v350_v17 = vld [vmem:[%s2275_s3 + $0x258] sm:$0xff] }
  0x41   : > { %v361_v23 = vld [vmem:[%s2275_s3 + $0x2b0] sm:$0xff]  ;;  %v358_v24 = vld [vmem:[%s2275_s3 + $0x298] sm:$0xff] }
  0x42   : > { %1064 = vmatpush1.bf16.msra.mxu0 %v1612_v31  ;;  %1105 = vmatpush1.bf16.msra.mxu1 %v1614_v32  ;;  %v302_v31 = vld [vmem:[%s2275_s3 + $0xd8] sm:$0xff] }
  0x43   : > { %1065 = vmatprep.subr.bf16.mxu0 %v1621_v33  ;;  %1106 = vmatprep.subr.bf16.mxu1 %v1623_v35  ;;  %v306_v32 = vld [vmem:[%s2275_s3 + $0xf8] sm:$0xff]  ;;  %v1552_v33 = vcombine.low %v293_v55, %v297_v22  ;;  %v1561_v35 = vcombine.high %v301_v29, %v305_v30  ;;  %v357_v22 = vld [vmem:[%s2275_s3 + $0x290] sm:$0xff] }
  0x44   : > { %v1563_v36 = vcombine.high %v302_v31, %v306_v32  ;;  %v1562_v41 = vcombine.low %v302_v31, %v306_v32  ;;  %v365_v30 = vld [vmem:[%s2275_s3 + $0x2d0] sm:$0xff]  ;;  %v366_v32 = vld [vmem:[%s2275_s3 + $0x2d8] sm:$0xff] }
  0x45   : > { %v369_v31 = vld [vmem:[%s2275_s3 + $0x2f0] sm:$0xff] }
  0x46   : > { %1066 = vmatpush1.bf16.msra.mxu0 %v1620_v39  ;;  %1107 = vmatpush1.bf16.msra.mxu1 %v1622_v42  ;;  %v314_v39 = vld [vmem:[%s2275_s3 + $0x138] sm:$0xff]  ;;  %v1569_v42 = vcombine.high %v309_v37, %v313_v38  ;;  %v373_v38 = vld [vmem:[%s2275_s3 + $0x310] sm:$0xff] }
  0x47   : > { %1067 = vmatprep.subr.bf16.mxu0 %v1629_v43  ;;  %1108 = vmatprep.subr.bf16.mxu1 %v1631_v46  ;;  %v318_v46 = vld [vmem:[%s2275_s3 + $0x158] sm:$0xff] }
  0x4a   : > { %1068 = vmatpush1.bf16.msra.mxu0 %v1628_v47  ;;  %1109 = vmatpush1.bf16.msra.mxu1 %v1630_v50  ;;  %v322_v47 = vld [vmem:[%s2275_s3 + $0x178] sm:$0xff]  ;;  %v1577_v50 = vcombine.high %v317_v44, %v321_v45 }
  0x4b   : > { %1069 = vmatprep.subr.bf16.mxu0 %v1637_v51  ;;  %1110 = vmatprep.subr.bf16.mxu1 %v1639_v54  ;;  %v1579_v51 = vcombine.high %v318_v46, %v322_v47  ;;  %v326_v54 = vld [vmem:[%s2275_s3 + $0x198] sm:$0xff] }
  0x4e   : > { %1070 = vmatpush1.bf16.msra.mxu0 %v1636_v56  ;;  %1111 = vmatpush1.bf16.msra.mxu1 %v1638_v57  ;;  %v330_v56 = vld [vmem:[%s2275_s3 + $0x1b8] sm:$0xff]  ;;  %v1576_v57 = vcombine.low %v317_v44, %v321_v45  ;;  %v381_v45 = vld [vmem:[%s2275_s3 + $0x350] sm:$0xff] }
  0x4f   : > { %1071 = vmatprep.subr.bf16.mxu0 %v1645_v58  ;;  %1112 = vmatprep.subr.bf16.mxu1 %v1647_v59  ;;  %v1578_v58 = vcombine.low %v318_v46, %v322_v47  ;;  %v1585_v59 = vcombine.high %v325_v52, %v329_v53  ;;  %v1587_v60 = vcombine.high %v326_v54, %v330_v56  ;;  %v385_v46 = vld [vmem:[%s2275_s3 + $0x370] sm:$0xff]  ;;  %v382_v47 = vld [vmem:[%s2275_s3 + $0x358] sm:$0xff] }
  0x52   : > { %1072 = vmatpush1.bf16.msra.mxu0 %v1644_v1  ;;  %1113 = vmatpush1.bf16.msra.mxu1 %v1646_v2  ;;  %v338_v1 = vld [vmem:[%s2275_s3 + $0x1f8] sm:$0xff]  ;;  %v1584_v2 = vcombine.low %v325_v52, %v329_v53  ;;  %v389_v53 = vld [vmem:[%s2275_s3 + $0x390] sm:$0xff] }
  0x53   : > { %1073 = vmatprep.subr.bf16.mxu0 %v1653_v3  ;;  %1114 = vmatprep.subr.bf16.mxu1 %v1655_v4  ;;  %v1586_v3 = vcombine.low %v326_v54, %v330_v56  ;;  %v1593_v4 = vcombine.high %v333_v61, %v337_v62  ;;  %v1595_v5 = vcombine.high %v334_v0, %v338_v1  ;;  %v393_v54 = vld [vmem:[%s2275_s3 + $0x3b0] sm:$0xff]  ;;  %v390_v56 = vld [vmem:[%s2275_s3 + $0x398] sm:$0xff] }
  0x56   : > { %1074 = vmatpush1.bf16.msra.mxu0 %v1652_v9  ;;  %1115 = vmatpush1.bf16.msra.mxu1 %v1654_v10  ;;  %v346_v9 = vld [vmem:[%s2275_s3 + $0x238] sm:$0xff]  ;;  %v1592_v10 = vcombine.low %v333_v61, %v337_v62  ;;  %v397_v62 = vld [vmem:[%s2275_s3 + $0x3d0] sm:$0xff] }
  0x57   : > { %1125 = vmatprep.subr.bf16.mxu0 %v1537_v11  ;;  %1166 = vmatprep.subr.bf16.mxu1 %v1539_v12  ;;  %v1594_v11 = vcombine.low %v334_v0, %v338_v1  ;;  %v1601_v12 = vcombine.high %v341_v6, %v345_v7  ;;  %v1603_v13 = vcombine.high %v342_v8, %v346_v9  ;;  %v401_v0 = vld [vmem:[%s2275_s3 + $0x3f0] sm:$0xff]  ;;  %v398_v1 = vld [vmem:[%s2275_s3 + $0x3d8] sm:$0xff] }
  0x59   : > { %1076 = vmatmul.mubr.bf16.vlgmr.msra.gmra.mrb[0].mxu0 %v2033_v15  ;;  %1117 = vmatmul.mubr.bf16.vlgmr.msra.gmra.mrb[0].mxu1 %v2033_v15 }
  0x5a   : > { %1126 = vmatpush1.bf16.msra.mxu0 %v1536_v18  ;;  %1167 = vmatpush1.bf16.msra.mxu1 %v1538_v19  ;;  %v354_v18 = vld [vmem:[%s2275_s3 + $0x278] sm:$0xff]  ;;  %v1600_v19 = vcombine.low %v341_v6, %v345_v7  ;;  %v1656_v7 = vcombine.low %v397_v62, %v401_v0 }
  0x5b   : > { %1127 = vmatprep.subr.bf16.mxu0 %v1545_v20  ;;  %1168 = vmatprep.subr.bf16.mxu1 %v1547_v21  ;;  %v1602_v20 = vcombine.low %v342_v8, %v346_v9  ;;  %v1609_v21 = vcombine.high %v349_v14, %v353_v16  ;;  %v1611_v55 = vcombine.high %v350_v17, %v354_v18  ;;  %v1713_v9 = vld [vmem:[%s2276_s4 + $0x40] sm:$0xff]  }
  0x5c   : > { %1157 = vmatprep.mubr.bf16.mxu0 %v1913_v63  ;;  %1198 = vmatprep.mubr.bf16.mxu1 %v1913_v63  ;;  %v310_v63 = vld [vmem:[%s2275_s3 + $0x118] sm:$0xff] }
  0x5d   : > { %v1571_v43 = vcombine.high %v310_v63, %v314_v39  ;;  %v1570_v49 = vcombine.low %v310_v63, %v314_v39  ;;  %v377_v63 = vld [vmem:[%s2275_s3 + $0x330] sm:$0xff]  ;;  %v374_v39 = vld [vmem:[%s2275_s3 + $0x318] sm:$0xff] }
  0x5e   : > { %1128 = vmatpush1.bf16.msra.mxu0 %v1544_v25  ;;  %1169 = vmatpush1.bf16.msra.mxu1 %v1546_v26  ;;  %v362_v25 = vld [vmem:[%s2275_s3 + $0x2b8] sm:$0xff]  ;;  %v1608_v26 = vcombine.low %v349_v14, %v353_v16 }
  0x5f   : > { %1129 = vmatprep.subr.bf16.mxu0 %v1553_v27  ;;  %1170 = vmatprep.subr.bf16.mxu1 %v1555_v28  ;;  %v1610_v27 = vcombine.low %v350_v17, %v354_v18  ;;  %v1617_v28 = vcombine.high %v357_v22, %v361_v23  ;;  %v1619_v29 = vcombine.high %v358_v24, %v362_v25  ;;  %v1719_v14 = vld [vmem:[%s2276_s4 + $0x58] sm:$0xff]   ;;  %v1721_v17 = vld [vmem:[%s2276_s4 + $0x60] sm:$0xff]  }
  0x60   : > { %v1720_v16 = vld [vmem:[%s2276_s4 + $0x18] sm:$0xff]   ;;  %v1722_v18 = vld [vmem:[%s2276_s4 + $0x20] sm:$0xff]  }
  0x62   : > { %1130 = vmatpush1.bf16.msra.mxu0 %v1552_v33  ;;  %1171 = vmatpush1.bf16.msra.mxu1 %v1554_v34  ;;  %v370_v33 = vld [vmem:[%s2275_s3 + $0x2f8] sm:$0xff]  ;;  %v1616_v34 = vcombine.low %v357_v22, %v361_v23 }
  0x63   : > { %1131 = vmatprep.subr.bf16.mxu0 %v1561_v35  ;;  %1172 = vmatprep.subr.bf16.mxu1 %v1563_v36  ;;  %v1618_v35 = vcombine.low %v358_v24, %v362_v25  ;;  %v1625_v36 = vcombine.high %v365_v30, %v369_v31  ;;  %v1627_v37 = vcombine.high %v366_v32, %v370_v33  ;;  %v1727_v22 = vld [vmem:[%s2276_s4 + $0x78] sm:$0xff]   ;;  %v1753_v24 = vmov 1983009808  }
  0x64   : > { %v1728_v23 = vld [vmem:[%s2276_s4 + $0x38] sm:$0xff]   ;;  %v1218_v25 = vunpack.c.l.s4 %v1753_v24 }
  0x66   : > { %1132 = vmatpush1.bf16.msra.mxu0 %v1560_v40  ;;  %1173 = vmatpush1.bf16.msra.mxu1 %v1562_v41  ;;  %v378_v40 = vld [vmem:[%s2275_s3 + $0x338] sm:$0xff]  ;;  %v1624_v41 = vcombine.low %v365_v30, %v369_v31 }
  0x67   : > { %1133 = vmatprep.subr.bf16.mxu0 %v1569_v42  ;;  %1174 = vmatprep.subr.bf16.mxu1 %v1571_v43  ;;  %v1626_v42 = vcombine.low %v366_v32, %v370_v33  ;;  %v1633_v43 = vcombine.high %v373_v38, %v377_v63  ;;  %v1635_v44 = vcombine.high %v374_v39, %v378_v40 }
  0x6a   : > { %1134 = vmatpush1.bf16.msra.mxu0 %v1568_v48  ;;  %1175 = vmatpush1.bf16.msra.mxu1 %v1570_v49  ;;  %v386_v48 = vld [vmem:[%s2275_s3 + $0x378] sm:$0xff]  ;;  %v1632_v49 = vcombine.low %v373_v38, %v377_v63 }
  0x6b   : > { %1135 = vmatprep.subr.bf16.mxu0 %v1577_v50  ;;  %1176 = vmatprep.subr.bf16.mxu1 %v1579_v51  ;;  %v1634_v50 = vcombine.low %v374_v39, %v378_v40  ;;  %v1641_v51 = vcombine.high %v381_v45, %v385_v46  ;;  %v1643_v52 = vcombine.high %v382_v47, %v386_v48 }
  0x6e   : > { %1136 = vmatpush1.bf16.msra.mxu0 %v1576_v57  ;;  %1177 = vmatpush1.bf16.msra.mxu1 %v1578_v58  ;;  %v394_v57 = vld [vmem:[%s2275_s3 + $0x3b8] sm:$0xff]  ;;  %v1640_v58 = vcombine.low %v381_v45, %v385_v46 }
  0x6f   : > { %1137 = vmatprep.subr.bf16.mxu0 %v1585_v59  ;;  %1178 = vmatprep.subr.bf16.mxu1 %v1587_v60  ;;  %v1642_v59 = vcombine.low %v382_v47, %v386_v48  ;;  %v1649_v60 = vcombine.high %v389_v53, %v393_v54  ;;  %v1651_v61 = vcombine.high %v390_v56, %v394_v57 }
  0x72   : > { %1138 = vmatpush1.bf16.msra.mxu0 %v1584_v2  ;;  %1179 = vmatpush1.bf16.msra.mxu1 %v1586_v3  ;;  %v402_v2 = vld [vmem:[%s2275_s3 + $0x3f8] sm:$0xff]  ;;  %v1648_v3 = vcombine.low %v389_v53, %v393_v54 }
  0x73   : > { %1139 = vmatprep.subr.bf16.mxu0 %v1593_v4  ;;  %1180 = vmatprep.subr.bf16.mxu1 %v1595_v5  ;;  %v1650_v4 = vcombine.low %v390_v56, %v394_v57  ;;  %v1657_v5 = vcombine.high %v397_v62, %v401_v0  ;;  %v1659_v6 = vcombine.high %v398_v1, %v402_v2 }
  0x74   : > { %v1658_v8 = vcombine.low %v398_v1, %v402_v2  ;;  %v260_v1 = vld [vmem:[%s1800_s28 + $0x8] sm:$0xff] }
  0x76   : > { %1140 = vmatpush1.bf16.msra.mxu0 %v1592_v10  ;;  %1181 = vmatpush1.bf16.msra.mxu1 %v1594_v11  ;;  %v1714_v10 = vld [vmem:[%s2276_s4] sm:$0xff]   ;;  %v1715_v11 = vld [vmem:[%s2276_s4 + $0x48] sm:$0xff]  }
  0x77   : > { %1141 = vmatprep.subr.bf16.mxu0 %v1601_v12  ;;  %1182 = vmatprep.subr.bf16.mxu1 %v1603_v13  ;;  %v1716_v12 = vld [vmem:[%s2276_s4 + $0x8] sm:$0xff]   ;;  %v1718_v13 = vld [vmem:[%s2276_s4 + $0x10] sm:$0xff]  }
  0x7a   : > { %1142 = vmatpush1.bf16.msra.mxu0 %v1600_v19  ;;  %1183 = vmatpush1.bf16.msra.mxu1 %v1602_v20  ;;  %v1723_v19 = vld [vmem:[%s2276_s4 + $0x68] sm:$0xff]  }
  0x7b   : > { %1143 = vmatprep.subr.bf16.mxu0 %v1609_v21  ;;  %1184 = vmatprep.subr.bf16.mxu1 %v1611_v55  ;;  %v1724_v20 = vld [vmem:[%s2276_s4 + $0x28] sm:$0xff]   ;;  %v1725_v21 = vld [vmem:[%s2276_s4 + $0x70] sm:$0xff]  }
  0x7c   : > { %v1726_v55 = vld [vmem:[%s2276_s4 + $0x30] sm:$0xff]  }
  0x7e   : > { %1144 = vmatpush1.bf16.msra.mxu0 %v1608_v26  ;;  %1185 = vmatpush1.bf16.msra.mxu1 %v1610_v27  ;;  %v1220_v26 = vlaneseq  ;;  %v1219_v27 = vunpack.c.0.s8 %v1218_v25 }
  0x7f   : > { %1145 = vmatprep.subr.bf16.mxu0 %v1617_v28  ;;  %1186 = vmatprep.subr.bf16.mxu1 %v1619_v29 }
  0x80   : > { %v1221_v28 = vshrl.u32 %v1220_v26, 7 }
  0x82   : > { %1146 = vmatpush1.bf16.msra.mxu0 %v1616_v34  ;;  %1187 = vmatpush1.bf16.msra.mxu1 %v1618_v35  ;;  %v1222_v30 = vsub.s32 %v1219_v27, %v1221_v28 }
  0x83   : > { %1147 = vmatprep.subr.bf16.mxu0 %v1625_v36  ;;  %1188 = vmatprep.subr.bf16.mxu1 %v1627_v37 }
  0x86   : > { %1148 = vmatpush1.bf16.msra.mxu0 %v1624_v41  ;;  %1189 = vmatpush1.bf16.msra.mxu1 %v1626_v42  ;;  %v259_v42 = vld [vmem:[%s1800_s28] sm:$0xff] }
  0x87   : > { %1149 = vmatprep.subr.bf16.mxu0 %v1633_v43  ;;  %1190 = vmatprep.subr.bf16.mxu1 %v1635_v44 }
  0x8a   : > { %1150 = vmatpush1.bf16.msra.mxu0 %v1632_v49  ;;  %1191 = vmatpush1.bf16.msra.mxu1 %v1634_v50 }
  0x8b   : > { %1151 = vmatprep.subr.bf16.mxu0 %v1641_v51  ;;  %1192 = vmatprep.subr.bf16.mxu1 %v1643_v52 }
  0x8e   : > { %1152 = vmatpush1.bf16.msra.mxu0 %v1640_v58  ;;  %1193 = vmatpush1.bf16.msra.mxu1 %v1642_v59 }
  0x8f   : > { %1153 = vmatprep.subr.bf16.mxu0 %v1649_v60  ;;  %1194 = vmatprep.subr.bf16.mxu1 %v1651_v61 }
  0x92   : > { %1154 = vmatpush1.bf16.msra.mxu0 %v1648_v3  ;;  %1195 = vmatpush1.bf16.msra.mxu1 %v1650_v4 }
  0x93   : > { %1155 = vmatprep.subr.bf16.mxu0 %v1657_v5  ;;  %1196 = vmatprep.subr.bf16.mxu1 %v1659_v6 }
  0x96   : > { %1156 = vmatpush1.bf16.msra.mxu0 %v1656_v7  ;;  %1197 = vmatpush1.bf16.msra.mxu1 %v1658_v8  ;;  %v1278_v7 = vld [vmem:[#allocation3] sm:$0xf] }
  0x97   : > { %1682 = vmatprep.subr.bf16.mxu0 %v1713_v9 }
  0x99   : > { %1158 = vmatmul.mubr.bf16.vlgmr.msra.gmra.mrb[4].mxu0 %v2033_v15  ;;  %1199 = vmatmul.mubr.bf16.vlgmr.msra.gmra.mrb[4].mxu1 %v2033_v15  ;;  %v1717_v15 = vld [vmem:[%s2276_s4 + $0x50] sm:$0xff]  }
  0x9a   : > { %1683 = vmatpush3.bf16.msra.mxu0 %v1714_v10 }
  0x9b   : > { %1684 = vmatprep.subr.bf16.mxu0 %v1715_v11 }
  0x9e   : > { %1685 = vmatpush3.bf16.msra.mxu0 %v1716_v12 }
  0x9f   : > { %1686 = vmatprep.subr.bf16.mxu0 %v1717_v15 }
  0xa2   : > { %1687 = vmatpush3.bf16.msra.mxu0 %v1718_v13 }
  0xa3   : > { %1688 = vmatprep.subr.bf16.mxu0 %v1719_v14 }
  0xa6   : > { %1689 = vmatpush3.bf16.msra.mxu0 %v1720_v16 }
  0xa7   : > { %1690 = vmatprep.subr.bf16.mxu0 %v1721_v17 }
  0xaa   : > { %1691 = vmatpush3.bf16.msra.mxu0 %v1722_v18 }
  0xab   : > { %1692 = vmatprep.subr.bf16.mxu0 %v1723_v19 }
  0xae   : > { %1693 = vmatpush3.bf16.msra.mxu0 %v1724_v20 }
  0xaf   : > { %1694 = vmatprep.subr.bf16.mxu0 %v1725_v21 }
  0xb2   : > { %1695 = vmatpush3.bf16.msra.mxu0 %v1726_v55 }
  0xb3   : > { %1696 = vmatprep.subr.bf16.mxu0 %v1727_v22  ;;  %v1331_v22 = vld [vmem:[%s2277_s5] sm:$0x3] }
  0xb6   : > { %1697 = vmatpush3.bf16.msra.mxu0 %v1728_v23 }
 0x12c   : > { %v1077_v29 = vpop.f32.mrb[0].mxu0  ;;  %v1118_v31 = vpop.f32.mrb[0].mxu1 }
 0x12d   : > { %v1079_v32 = vpop.f32.mrb[1].mxu0  ;;  %v1120_v34 = vpop.f32.mrb[1].mxu1 }
 0x12e   : > { %v1215_v33 = vcombine.low %v1077_v29, %v1079_v32  ;;  %v1081_v35 = vpop.f32.mrb[2].mxu0  ;;  %v1216_v36 = vcombine.low %v1118_v31, %v1120_v34  ;;  %v1122_v37 = vpop.f32.mrb[2].mxu1 }
 0x12f   : > { %v1082_v38 = vpop.f32.mrb[3].mxu0  ;;  %v1123_v39 = vpop.f32.mrb[3].mxu1 }
 0x130   : > { %v1223_v63 = vrot.slane %v1215_v33, %v1222_v30  ;;  %v1230_v40 = vrot.slane %v1216_v36, %v1222_v30 }
 0x132   : > { %v1231_v41 = vcombine.low %v1223_v63, %v1230_v40 }
 0x134   : > { %v1251_v43 = vadd.f32 %v1231_v41, %v259_v42 }
 0x136   : > { %v1260_v44 = vrot.slane %v1251_v43, 4  ;;  %v1660_v46 = vmul.f32 -1.442695, %v1251_v43 }
 0x138   : > { %v1661_v45 = vmul.f32 -1.442695, %v1260_v44 }
 0x13a   : > { %1729 = vpow2.f32 %v1661_v45 }
 0x13b   : > { %1731 = vpow2.f32 %v1660_v46 }
 0x144   : > { %v1730_v50 = vpop.eup %1729 }
 0x145   : > { %v1732_v54 = vpop.eup %1731  ;;  %v1265_v61 = vadd.f32 1.0, %v1730_v50 }
 0x146   : > { %v1256_v0 = vadd.f32 1.0, %v1732_v54 }
 0x147   : > { %1733 = vrcp.f32 %v1265_v61 }
 0x148   : > { %1735 = vrcp.f32 %v1256_v0 }
 0x151   : > { %v1734_v6 = vpop.eup %1733 }
 0x152   : > { %v1736_v8 = vpop.eup %1735  ;;  %v1279_v11 = vmul.f32 %v1734_v6, %v1278_v7 }
 0x16c   : > { %v1159_v47 = vpop.f32.mrb[4].mxu0  ;;  %v1200_v48 = vpop.f32.mrb[4].mxu1 }
 0x16d   : > { %v1161_v49 = vpop.f32.mrb[5].mxu0  ;;  %v1202_v52 = vpop.f32.mrb[5].mxu1 }
 0x16e   : > { %v1232_v51 = vcombine.low %v1159_v47, %v1161_v49  ;;  %v1163_v53 = vpop.f32.mrb[6].mxu0  ;;  %v1233_v56 = vcombine.low %v1200_v48, %v1202_v52  ;;  %v1204_v57 = vpop.f32.mrb[6].mxu1 }
 0x16f   : > { %v1164_v58 = vpop.f32.mrb[7].mxu0  ;;  %v1205_v60 = vpop.f32.mrb[7].mxu1 }
 0x170   : > { %v1240_v59 = vrot.slane %v1232_v51, %v1222_v30  ;;  %v1247_v62 = vrot.slane %v1233_v56, %v1222_v30 }
 0x172   : > { %v1248_v2 = vcombine.low %v1240_v59, %v1247_v62 }
 0x174   : > { %v1252_v3 = vadd.f32 %v1248_v2, %v260_v1 }
 0x176   : > { %1737 = vtanh.f32 %v1252_v3  ;;  %v1270_v4 = vrot.slane %v1252_v3, 4 }
 0x178   : > { %v1662_v5 = vmul.f32 -1.442695, %v1270_v4 }
 0x17a   : > { %1739 = vpow2.f32 %v1662_v5 }
 0x180   : > { %v1738_v9 = vpop.eup %1737 }
 0x181   : > { %v1280_v10 = vmul.f32 %v1738_v9, %v1736_v8 }
 0x183   : > { %v1281_v12 = vadd.f32 %v1280_v10, %v1279_v11 }
 0x184   : > { %v1740_v15 = vpop.eup %1739 }
 0x185   : > { %v1275_v13 = vadd.f32 1.0, %v1740_v15  ;;  %1285 = vst [vmem:[#allocation3] sm:$0xf] %v1281_v12  ;;  %1741 = vtanh.f32 %v1281_v12 }
 0x187   : > { %1743 = vrcp.f32 %v1275_v13 }
 0x18f   : > { %v1742_v14 = vpop.eup %1741 }
 0x191   : > { %v1744_v16 = vpop.eup %1743 }
 0x192   : > { %v1283_v17 = vmul.f32 %v1744_v16, %v1742_v14 }
 0x194   : > { %1284 = vst [vmem:[#allocation2] sm:$0xf] %v1283_v17  ;;  %v1293_v18 = vrot.slane %v1283_v17, %v1222_v30 }
 0x196   : > { %v1294_v19 = vcombine.high %v1293_v18, %v1293_v18  ;;  %v1297_v21 = vpack.c.bf16 %v1293_v18, %v1293_v18 }
 0x198   : > { %v1298_v20 = vpack.c.bf16 %v1294_v19, %v1294_v19 }
 0x19a   : > { %1460 = vmatprep.mubr.bf16.mxu0 %v1298_v20 }
 0x19b   : > { %1461 = vmatmul.mubr.bf16.vlgmr.msra.gmra.mrb[8].mxu0 %v1297_v21 }
 0x26e   : > { %v1698_v55 = vpop.f32.mrb[8].mxu0 }
 0x26f   : > { %v1699_v23 = vpop.f32.mrb[9].mxu0 }
 0x270   : > { %v1700_v24 = vadd.f32 %v1699_v23, %v1698_v55  ;;  %v1701_v25 = vpop.f32.mrb[10].mxu0 }
 0x271   : > { %v1702_v26 = vpop.f32.mrb[11].mxu0 }
 0x272   : > { %v1463_v27 = vadd.f32 %v1700_v24, %v1331_v22 }
 0x274   : > { %1468 = vst [vmem:[%s1805_s7] sm:$0x3] %v1463_v27 }
 0x275 PF: > { %s16_s21 = sadd.s32 1, %s1751_s21  }
 0x276   : > { %p13_p5 = scmp.ge.s32.totalorder %s16_s21, 6  }
 0x278   :  { %15 = sbr.rel (!%p13_p5) target bundleno = 1 (0x1), region = 78 }

</bundles_post_ra>
